<compile_context>
chip_gen: v7x
topology: tpu7x:2x2x1
jax: 0.10.0
libtpu: 0.0.40
codegen_flags: <defaults>
</compile_context>

<pallas_src>
import numpy as np
import jax
import jax.numpy as jnp
from jax.experimental import pallas as pl
from jax.experimental.pallas import tpu as pltpu


# ---------------------------------------------------------------------------
# Helpers
# ---------------------------------------------------------------------------
def _round_up(n, m):
    return ((n + m - 1) // m) * m


def conv_to_dense_matrix(w, cin, hin, win, stride, pad, hout, wout,
                         din_padded, dout_padded):
    """Dense matrix M (din_padded, dout_padded) with x_flat @ M == conv2d(x, w)
    flattened channel-major (co, oh, ow).  Rows beyond cin*hin*win stay zero so the
    matrix composes with the zero-padded output columns of the previous layer.
    w: (cout, cin, 3, 3) numpy float32."""
    cout = w.shape[0]
    assert din_padded >= cin * hin * win
    m = np.zeros((din_padded, dout_padded), dtype=np.float32)
    oh = np.arange(hout)
    ow = np.arange(wout)
    for co in range(cout):
        for ci in range(cin):
            for dh in range(3):
                ih = oh * stride + dh - pad
                vh = (ih >= 0) & (ih < hin)
                if not vh.any():
                    continue
                for dw in range(3):
                    iw = ow * stride + dw - pad
                    vw = (iw >= 0) & (iw < win)
                    if not vw.any():
                        continue
                    rows = (ci * hin + ih[vh])[:, None] * win + iw[vw][None, :]
                    cols = (co * hout + oh[vh])[:, None] * wout + ow[vw][None, :]
                    m[rows.ravel(), cols.ravel()] = w[co, ci, dh, dw]
    return m


def fold_bias_bn(m, conv_b, gamma, beta, mean, var, cout, hout, wout, eps=1e-5):
    """Fold eval-mode BN (scale/shift) + conv bias into the dense matrix / bias row."""
    dout = cout * hout * wout
    s = gamma / np.sqrt(var + eps)                       # (cout,)
    col_scale = np.ones((m.shape[1],), np.float32)
    col_scale[:dout] = np.repeat(s, hout * wout)
    m = m * col_scale[None, :]
    bias = np.zeros((1, m.shape[1]), np.float32)         # padded cols keep bias 0
    bias[0, :dout] = np.repeat(s * (conv_b - mean) + beta, hout * wout)
    return m, bias


# ---------------------------------------------------------------------------
# Pallas kernel: fused 3-layer (matmul + bias + ReLU) encoder
# ---------------------------------------------------------------------------
def encoder_kernel(x_ref, m1_ref, b1_ref, m2_ref, b2_ref, m3_ref, b3_ref, o_ref):
    # Layer 1 (conv1 + BN1 folded): (TB, 784) @ (784, 1664) + bias, ReLU
    # bf16 cast happens here (in-kernel) so the wrapper never materializes a cast.
    h = jnp.dot(x_ref[...].astype(m1_ref.dtype), m1_ref[...],
                preferred_element_type=jnp.float32)
    h = jnp.maximum(h + b1_ref[...], 0.0)
    # Layer 2 (conv2 + BN2 folded): (TB, 1664) @ (1664, 896) + bias, ReLU
    h = jnp.dot(h.astype(m2_ref.dtype), m2_ref[...],
                preferred_element_type=jnp.float32)
    h = jnp.maximum(h + b2_ref[...], 0.0)
    # Layer 3 (conv3 + BN3 folded): (TB, 896) @ (896, 288) + bias, ReLU
    h = jnp.dot(h.astype(m3_ref.dtype), m3_ref[...],
                preferred_element_type=jnp.float32)
    h = jnp.maximum(h + b3_ref[...], 0.0)
    o_ref[...] = h.astype(o_ref.dtype)


def _pick_batch_tile(B, batch_tile):
    """Batch tile: full batch for tiny B; split into >=2 tiles (v7x megacore) when it
    fits in <=2 tiles; otherwise the cap.  Result is either == B or a multiple of 8."""
    batch_tile = _round_up(batch_tile, 8)
    if B <= 16:
        return B
    if B <= 2 * batch_tile:
        return min(batch_tile, _round_up((B + 1) // 2, 8))
    return batch_tile


def encoder28x28_forward(x, mats, biases, *, batch_tile=512, out_chw=(32, 3, 3)):
    """x: (B, 1, 28, 28) float32 NCHW.  Returns (B, 32, 3, 3) float32."""
    B = x.shape[0]
    m1, m2, m3 = mats
    b1, b2, b3 = biases
    d0, d1 = m1.shape
    d2 = m2.shape[1]
    d3 = m3.shape[1]
    assert x.shape[1] * x.shape[2] * x.shape[3] == d0
    assert m2.shape[0] == d1 and m3.shape[0] == d2, "dense matrices must chain"

    # Keep x in f32 (reshape is free); cast to bf16 happens inside the kernel.
    x2d = x.reshape(B, d0)

    tile_b = _pick_batch_tile(B, batch_tile)
    grid = (pl.cdiv(B, tile_b),)          # partial last block handled by Pallas

    const = lambda i: (0, 0)              # weights/biases: one block, VMEM-resident
    batch = lambda i: (i, 0)              # activations/out: new batch tile each step

    out = pl.pallas_call(
        encoder_kernel,
        out_shape=jax.ShapeDtypeStruct((B, d3), jnp.float32),
        grid=grid,
        in_specs=[
            pl.BlockSpec((tile_b, d0), batch),
            pl.BlockSpec((d0, d1), const), pl.BlockSpec((1, d1), const),
            pl.BlockSpec((d1, d2), const), pl.BlockSpec((1, d2), const),
            pl.BlockSpec((d2, d3), const), pl.BlockSpec((1, d3), const),
        ],
        out_specs=pl.BlockSpec((tile_b, d3), batch),
        compiler_params=pltpu.CompilerParams(
            dimension_semantics=("parallel",),      # megacore on v7x
            vmem_limit_bytes=48 * 1024 * 1024,      # fits v7x 64 MiB; lifts v5e default
        ),
    )(x2d, m1, b1, m2, b2, m3, b3)

    co, ho, wo = out_chw
    # d3 == co*ho*wo exactly -> no slice, reshape only (no extra HBM pass).
    return out.reshape(B, co, ho, wo)


# ---------------------------------------------------------------------------
# Parameter construction (PyTorch-default-style init) and host-side folding
# ---------------------------------------------------------------------------
_LAYERS = [  # (cin, cout, stride, pad, hin, hout)
    (1, 8, 2, 1, 28, 14),
    (8, 16, 2, 1, 14, 7),
    (16, 32, 2, 0, 7, 3),
]


def init_encoder_params(key):
    params = []
    keys = jax.random.split(key, 6 * len(_LAYERS))
    for i, (cin, cout, stride, pad, hin, hout) in enumerate(_LAYERS):
        k = keys[6 * i:6 * i + 6]
        bound = 1.0 / np.sqrt(cin * 9)   # PyTorch Conv2d default init
        params.append(dict(
            w=jax.random.uniform(k[0], (cout, cin, 3, 3), minval=-bound, maxval=bound),
            b=jax.random.uniform(k[1], (cout,), minval=-bound, maxval=bound),
            gamma=jax.random.uniform(k[2], (cout,), minval=0.9, maxval=1.1),
            beta=jax.random.uniform(k[3], (cout,), minval=-0.1, maxval=0.1),
            mean=jax.random.uniform(k[4], (cout,), minval=-0.1, maxval=0.1),
            var=jax.random.uniform(k[5], (cout,), minval=0.9, maxval=1.1),
            cin=cin, cout=cout, stride=stride, pad=pad,
            hin=hin, win=hin, hout=hout, wout=hout,
        ))
    return params


def build_dense_params(params, weight_dtype=jnp.bfloat16):
    """Build chained, lane-dense folded matrices:
       m1: (784, 1664)  m2: (1664, 896)  m3: (896, 288)."""
    mats, biases = [], []
    din_padded = params[0]["cin"] * params[0]["hin"] * params[0]["win"]   # 784
    for li, lp in enumerate(params):
        dout = lp["cout"] * lp["hout"] * lp["wout"]
        last = (li == len(params) - 1)
        # Hidden layers: pad output width to a lane-dense multiple of 128.
        # Last layer: keep the exact 288 width so the kernel writes the real output.
        dout_padded = dout if last else _round_up(dout, 128)
        m = conv_to_dense_matrix(np.asarray(lp["w"], np.float32),
                                 lp["cin"], lp["hin"], lp["win"],
                                 lp["stride"], lp["pad"], lp["hout"], lp["wout"],
                                 din_padded, dout_padded)
        m, bias = fold_bias_bn(m, np.asarray(lp["b"], np.float32),
                               np.asarray(lp["gamma"], np.float32),
                               np.asarray(lp["beta"], np.float32),
                               np.asarray(lp["mean"], np.float32),
                               np.asarray(lp["var"], np.float32),
                               lp["cout"], lp["hout"], lp["wout"])
        mats.append(jnp.asarray(m, dtype=weight_dtype))
        biases.append(jnp.asarray(bias, dtype=jnp.float32))
        din_padded = dout_padded           # next layer's row count matches this width
    return mats, biases


# ---------------------------------------------------------------------------
# References
# ---------------------------------------------------------------------------
def encoder28x28_ref_conv_f32(x, params, eps=1e-5):
    """Direct f32 conv + eval-mode BN + ReLU reference (PyTorch semantics)."""
    h = x
    for lp in params:
        y = jax.lax.conv_general_dilated(
            h, lp["w"], window_strides=(lp["stride"],) * 2,
            padding=[(lp["pad"], lp["pad"])] * 2,
            dimension_numbers=("NCHW", "OIHW", "NCHW"))
        y = y + lp["b"][None, :, None, None]
        s = lp["gamma"] / jnp.sqrt(lp["var"] + eps)
        y = s[None, :, None, None] * (y - lp["mean"][None, :, None, None]) \
            + lp["beta"][None, :, None, None]
        h = jnp.maximum(y, 0.0)
    return h


def encoder28x28_ref_dense(x, mats, biases, out_chw=(32, 3, 3)):
    """Plain-JAX version of the exact math the kernel does (same bf16 casts)."""
    h = x.reshape(x.shape[0], -1)
    for m, b in zip(mats, biases):
        h = jnp.dot(h.astype(m.dtype), m, preferred_element_type=jnp.float32) + b
        h = jnp.maximum(h, 0.0)
    co, ho, wo = out_chw
    return h[:, : co * ho * wo].reshape(x.shape[0], co, ho, wo)


# ---------------------------------------------------------------------------
if __name__ == "__main__":
    key = jax.random.PRNGKey(0)
    k_x, k_p = jax.random.split(key)

    B, C, H, W = 2, 1, 28, 28                      # shape implied by Encoder28x28
    x = jax.random.normal(k_x, (B, C, H, W), dtype=jnp.float32)

    params = init_encoder_params(k_p)
    mats, biases = build_dense_params(params)      # bf16 folded conv+BN matrices

    out = jax.block_until_ready(encoder28x28_forward(x, mats, biases))
    assert out.shape == (B, 32, 3, 3), out.shape

    # 1) Exact-math check vs the same bf16 dense formulation in plain JAX.
    ref_dense = encoder28x28_ref_dense(x, mats, biases)
    assert jnp.allclose(out, ref_dense, atol=1e-3, rtol=1e-3), \
        "mismatch vs bf16 dense reference"

    # 2) End-to-end semantics check vs the f32 conv+BN+ReLU reference
    #    (tolerance accounts for bf16 weight/activation storage).
    ref_conv = encoder28x28_ref_conv_f32(x, params)
    assert jnp.allclose(out, ref_conv, atol=3e-2, rtol=3e-2), \
        "mismatch vs f32 conv reference"

    print("KERNEL_OK")
</pallas_src>

<mosaic_0001>
module attributes {stable_mosaic.version = 11 : i64} {
  func.func @encoder_kernel(%arg0: i32, %arg1: memref<2x784xf32, #tpu.memory_space<vmem>>, %arg2: memref<784x1664xbf16, #tpu.memory_space<vmem>>, %arg3: memref<1x1664xf32, #tpu.memory_space<vmem>>, %arg4: memref<1664x896xbf16, #tpu.memory_space<vmem>>, %arg5: memref<1x896xf32, #tpu.memory_space<vmem>>, %arg6: memref<896x288xbf16, #tpu.memory_space<vmem>>, %arg7: memref<1x288xf32, #tpu.memory_space<vmem>>, %arg8: memref<2x288xf32, #tpu.memory_space<vmem>>) attributes {dimension_semantics = [#tpu.dimension_semantics<parallel>], iteration_bounds = array<i64: 1>, scalar_prefetch = 0 : i64, scratch_operands = 0 : i64, tpu.core_type = #tpu.core_type<tc>, window_params = [{transform_indices = @transform_0, window_bounds = array<i64: 2, 784>}, {pipeline_mode = #tpu.pipeline_mode<synchronous>, transform_indices = @transform_1, window_bounds = array<i64: 784, 1664>}, {pipeline_mode = #tpu.pipeline_mode<synchronous>, transform_indices = @transform_2, window_bounds = array<i64: 1, 1664>}, {pipeline_mode = #tpu.pipeline_mode<synchronous>, transform_indices = @transform_3, window_bounds = array<i64: 1664, 896>}, {pipeline_mode = #tpu.pipeline_mode<synchronous>, transform_indices = @transform_4, window_bounds = array<i64: 1, 896>}, {pipeline_mode = #tpu.pipeline_mode<synchronous>, transform_indices = @transform_5, window_bounds = array<i64: 896, 288>}, {pipeline_mode = #tpu.pipeline_mode<synchronous>, transform_indices = @transform_6, window_bounds = array<i64: 1, 288>}, {transform_indices = @transform_7, window_bounds = array<i64: 2, 288>}]} {
    %c0 = arith.constant 0 : index
    %c0_0 = arith.constant 0 : index
    %0 = vector.load %arg1[%c0, %c0_0] : memref<2x784xf32, #tpu.memory_space<vmem>>, vector<2x784xf32>
    %1 = arith.truncf %0 : vector<2x784xf32> to vector<2x784xbf16>
    %c0_1 = arith.constant 0 : index
    %c0_2 = arith.constant 0 : index
    %2 = vector.load %arg2[%c0_1, %c0_2] : memref<784x1664xbf16, #tpu.memory_space<vmem>>, vector<784x1664xbf16>
    %cst = arith.constant dense<0.000000e+00> : vector<2x1664xf32>
    %3 = tpu.matmul %1, %2, %cst {dimension_numbers = #tpu.dot_dimension_numbers<[1], [0], [0], [1], [0, 0, 1, 1], [], []>} : vector<2x784xbf16>, vector<784x1664xbf16>, vector<2x1664xf32> -> vector<2x1664xf32>
    %c0_3 = arith.constant 0 : index
    %c0_4 = arith.constant 0 : index
    %4 = vector.load %arg3[%c0_3, %c0_4] : memref<1x1664xf32, #tpu.memory_space<vmem>>, vector<1x1664xf32>
    %5 = vector.broadcast %4 : vector<1x1664xf32> to vector<2x1664xf32>
    %6 = arith.addf %3, %5 : vector<2x1664xf32>
    %cst_5 = arith.constant 0.000000e+00 : f32
    %7 = vector.broadcast %cst_5 : f32 to vector<2x1664xf32>
    %8 = arith.maximumf %6, %7 : vector<2x1664xf32>
    %9 = arith.truncf %8 : vector<2x1664xf32> to vector<2x1664xbf16>
    %c0_6 = arith.constant 0 : index
    %c0_7 = arith.constant 0 : index
    %10 = vector.load %arg4[%c0_6, %c0_7] : memref<1664x896xbf16, #tpu.memory_space<vmem>>, vector<1664x896xbf16>
    %cst_8 = arith.constant dense<0.000000e+00> : vector<2x896xf32>
    %11 = tpu.matmul %9, %10, %cst_8 {dimension_numbers = #tpu.dot_dimension_numbers<[1], [0], [0], [1], [0, 0, 1, 1], [], []>} : vector<2x1664xbf16>, vector<1664x896xbf16>, vector<2x896xf32> -> vector<2x896xf32>
    %c0_9 = arith.constant 0 : index
    %c0_10 = arith.constant 0 : index
    %12 = vector.load %arg5[%c0_9, %c0_10] : memref<1x896xf32, #tpu.memory_space<vmem>>, vector<1x896xf32>
    %13 = vector.broadcast %12 : vector<1x896xf32> to vector<2x896xf32>
    %14 = arith.addf %11, %13 : vector<2x896xf32>
    %cst_11 = arith.constant 0.000000e+00 : f32
    %15 = vector.broadcast %cst_11 : f32 to vector<2x896xf32>
    %16 = arith.maximumf %14, %15 : vector<2x896xf32>
    %17 = arith.truncf %16 : vector<2x896xf32> to vector<2x896xbf16>
    %c0_12 = arith.constant 0 : index
    %c0_13 = arith.constant 0 : index
    %18 = vector.load %arg6[%c0_12, %c0_13] : memref<896x288xbf16, #tpu.memory_space<vmem>>, vector<896x288xbf16>
    %cst_14 = arith.constant dense<0.000000e+00> : vector<2x288xf32>
    %19 = tpu.matmul %17, %18, %cst_14 {dimension_numbers = #tpu.dot_dimension_numbers<[1], [0], [0], [1], [0, 0, 1, 1], [], []>} : vector<2x896xbf16>, vector<896x288xbf16>, vector<2x288xf32> -> vector<2x288xf32>
    %c0_15 = arith.constant 0 : index
    %c0_16 = arith.constant 0 : index
    %20 = vector.load %arg7[%c0_15, %c0_16] : memref<1x288xf32, #tpu.memory_space<vmem>>, vector<1x288xf32>
    %21 = vector.broadcast %20 : vector<1x288xf32> to vector<2x288xf32>
    %22 = arith.addf %19, %21 : vector<2x288xf32>
    %cst_17 = arith.constant 0.000000e+00 : f32
    %23 = vector.broadcast %cst_17 : f32 to vector<2x288xf32>
    %24 = arith.maximumf %22, %23 : vector<2x288xf32>
    %c0_18 = arith.constant 0 : index
    %c0_19 = arith.constant 0 : index
    %25 = vector.load %arg8[%c0_18, %c0_19] : memref<2x288xf32, #tpu.memory_space<vmem>>, vector<2x288xf32>
    tpu.vector_store %arg8[%c0_18, %c0_19], %24 {strides = array<i32>} : memref<2x288xf32, #tpu.memory_space<vmem>>, vector<2x288xf32>,
    return
  }
  func.func @transform_0(%arg0: i32) -> (i32, i32) {
    %c0_i32 = arith.constant 0 : i32
    %c0_i32_0 = arith.constant 0 : i32
    return %arg0, %c0_i32 : i32, i32
  }
  func.func @transform_1(%arg0: i32) -> (i32, i32) {
    %c0_i32 = arith.constant 0 : i32
    %c0_i32_0 = arith.constant 0 : i32
    %c0_i32_1 = arith.constant 0 : i32
    return %c0_i32, %c0_i32_0 : i32, i32
  }
  func.func @transform_2(%arg0: i32) -> (i32, i32) {
    %c0_i32 = arith.constant 0 : i32
    %c0_i32_0 = arith.constant 0 : i32
    %c0_i32_1 = arith.constant 0 : i32
    return %c0_i32, %c0_i32_0 : i32, i32
  }
  func.func @transform_3(%arg0: i32) -> (i32, i32) {
    %c0_i32 = arith.constant 0 : i32
    %c0_i32_0 = arith.constant 0 : i32
    %c0_i32_1 = arith.constant 0 : i32
    return %c0_i32, %c0_i32_0 : i32, i32
  }
  func.func @transform_4(%arg0: i32) -> (i32, i32) {
    %c0_i32 = arith.constant 0 : i32
    %c0_i32_0 = arith.constant 0 : i32
    %c0_i32_1 = arith.constant 0 : i32
    return %c0_i32, %c0_i32_0 : i32, i32
  }
  func.func @transform_5(%arg0: i32) -> (i32, i32) {
    %c0_i32 = arith.constant 0 : i32
    %c0_i32_0 = arith.constant 0 : i32
    %c0_i32_1 = arith.constant 0 : i32
    return %c0_i32, %c0_i32_0 : i32, i32
  }
  func.func @transform_6(%arg0: i32) -> (i32, i32) {
    %c0_i32 = arith.constant 0 : i32
    %c0_i32_0 = arith.constant 0 : i32
    %c0_i32_1 = arith.constant 0 : i32
    return %c0_i32, %c0_i32_0 : i32, i32
  }
  func.func @transform_7(%arg0: i32) -> (i32, i32) {
    %c0_i32 = arith.constant 0 : i32
    %c0_i32_0 = arith.constant 0 : i32
    return %arg0, %c0_i32 : i32, i32
  }
}

</mosaic_0001>

<bundles_post_ra>
// kernel: tpu_custom_call.1
= control target key start
LH: loop header
LB: loop body
LE: loop exit
PB: predicated region body
PF: predicated region fallthrough
CT: control target
= control target key end

     0   :  { %12 = vsyncpa [#allocation3], 0  ;;  %s18027_s0 = inlined_call_operand.hbm [shape: f32[2,784], index: 0, kind: input, shape index: {}]   ;;  %s18028_s1 = inlined_call_operand.hbm [shape: bf16[784,1664], index: 1, kind: input, shape index: {}]   ;;  %s18029_s2 = inlined_call_operand.hbm [shape: f32[1,1664], index: 2, kind: input, shape index: {}]   ;;  %s18030_s3 = inlined_call_operand.hbm [shape: bf16[1664,896], index: 3, kind: input, shape index: {}]   ;;  %s18031_s4 = inlined_call_operand.hbm [shape: f32[1,896], index: 4, kind: input, shape index: {}]   ;;  %s18032_s5 = inlined_call_operand.vmem [shape: bf16[896,288], index: 5, kind: input, shape index: {}]   ;;  %s18033_s6 = inlined_call_operand.hbm [shape: f32[1,288], index: 6, kind: input, shape index: {}]   ;;  %s18034_s7 = inlined_call_operand.hbm [shape: f32[2,288], index: 7, kind: output, shape index: {}]  }
   0x1   :  { %13 = vsyncpa [#allocation6], 0 }
   0x2   :  { %14 = vsyncpa [#allocation9], 0 }
   0x3   :  { %15 = vsyncpa [#allocation12], 0 }
   0x4   :  { %16 = vsyncpa [#allocation4], 0  ;;  %s17018_s24 = smov [#allocation5]   ;;  %s16854_s28 = scalar_lea.hbm %s18028_s1, 81536 }
   0x5   :  { %s32_s25 = sshll.u32 %s17018_s24, 4  ;;  %p16855_p0 = scmp.ne.s32.totalorder %s18028_s1, %s16854_s28  ;;  %s33_s25 = int_to_ptr.vmem [resolvable:$true] %s32_s25 }
   0x6   :  { %p16858_p1 = scmp.lt.u32.totalorder %s16854_s28, %s18028_s1 }
   0x8   :  { %p16860_p2 = pnand %p16858_p1, %p16855_p0 }
   0xa   :  { %16863 = shalt.err (!%p16860_p2)
}
   0xb   :  { %s16864_s10 = scalar_lea.vmem %s33_s25, 81536  ;;  %p16869_p4 = scmp.lt.s32.totalorder %s33_s25, %s33_s25 }
   0xc   :  { %p16865_p3 = scmp.ne.s32.totalorder %s33_s25, %s16864_s10  ;;  %p16870_p5 = scmp.lt.s32.totalorder %s16864_s10, %s16864_s10 }
   0xe   :  { %p16871_p6 = por %p16870_p5, %p16869_p4 }
  0x10   :  { %p16872_p7 = pnand %p16871_p6, %p16865_p3 }
  0x12   :  { %16875 = shalt.err (!%p16872_p7)
}
  0x13   :  { %s17019_s11 = smov 832   ;;  %s17020_s12 = smov 52  }
  0x14   :  { %38 = dma.hbm_to_vmem [thread:$0]  %s18028_s1, 81536, %s33_s25, [#allocation6], %s17019_s11, %s17019_s11, %s17020_s12  }
  0x15   :  { %s17021_s15 = smov [#allocation8]   ;;  %s16876_s19 = scalar_lea.hbm %s18030_s3, 93184 }
  0x16   :  { %s54_s16 = sshll.u32 %s17021_s15, 4  ;;  %p16877_p8 = scmp.ne.s32.totalorder %s18030_s3, %s16876_s19  ;;  %s55_s16 = int_to_ptr.vmem [resolvable:$true] %s54_s16 }
  0x17   :  { %p16880_p9 = scmp.lt.u32.totalorder %s16876_s19, %s18030_s3 }
  0x19   :  { %p16882_p10 = pnand %p16880_p9, %p16877_p8 }
  0x1b   :  { %16885 = shalt.err (!%p16882_p10)
}
  0x1c   :  { %s16886_s24 = scalar_lea.vmem %s55_s16, 93184  ;;  %p16891_p12 = scmp.lt.s32.totalorder %s55_s16, %s55_s16 }
  0x1d   :  { %p16887_p11 = scmp.ne.s32.totalorder %s55_s16, %s16886_s24  ;;  %p16892_p13 = scmp.lt.s32.totalorder %s16886_s24, %s16886_s24 }
  0x1f   :  { %p16893_p0 = por %p16892_p13, %p16891_p12 }
  0x21   :  { %p16894_p1 = pnand %p16893_p0, %p16887_p11 }
  0x23   :  { %16897 = shalt.err (!%p16894_p1)
}
  0x24   :  { %s17022_s1 = smov 448   ;;  %s17023_s25 = smov 28  }
  0x25   :  { %60 = dma.hbm_to_vmem [thread:$0]  %s18030_s3, 93184, %s55_s16, [#allocation9], %s17022_s1, %s17022_s1, %s17023_s25  }
  0x26   :  { %s17024_s28 = smov [#allocation2]   ;;  %s17025_s30 = smov [#allocation7]  }
  0x27   :  { %s23_s29 = sshll.u32 %s17024_s28, 4  ;;  %s45_s8 = sshll.u32 %s17025_s30, 4  ;;  %s24_s29 = int_to_ptr.vmem [resolvable:$true] %s23_s29  ;;  %s46_s8 = int_to_ptr.vmem [resolvable:$true] %s45_s8 }
  0x28   :  { %s16898_s11 = scalar_lea.hbm %s18027_s0, 224 }
  0x29   :  { %p16899_p2 = scmp.ne.s32.totalorder %s18027_s0, %s16898_s11  ;;  %p16902_p3 = scmp.lt.u32.totalorder %s16898_s11, %s18027_s0 }
  0x2b   :  { %p16904_p4 = pnand %p16902_p3, %p16899_p2 }
  0x2d   :  { %16907 = shalt.err (!%p16904_p4)
}
  0x2e   :  { %s16908_s3 = scalar_lea.vmem %s24_s29, 224  ;;  %p16913_p6 = scmp.lt.s32.totalorder %s24_s29, %s24_s29 }
  0x2f   :  { %p16909_p5 = scmp.ne.s32.totalorder %s24_s29, %s16908_s3  ;;  %p16914_p7 = scmp.lt.s32.totalorder %s16908_s3, %s16908_s3 }
  0x31   :  { %p16915_p8 = por %p16914_p7, %p16913_p6 }
  0x33   :  { %p16916_p9 = pnand %p16915_p8, %p16909_p5 }
  0x35   :  { %16919 = shalt.err (!%p16916_p9)
}
  0x36   :  { %26 = dma.hbm_to_vmem [thread:$0]  %s18027_s0, 224, %s24_s29, [#allocation3]  }
  0x37   :  { %s16920_s20 = scalar_lea.hbm %s18029_s2, 208 }
  0x38   :  { %p16921_p10 = scmp.ne.s32.totalorder %s18029_s2, %s16920_s20  ;;  %p16924_p11 = scmp.lt.u32.totalorder %s16920_s20, %s18029_s2 }
  0x3a   :  { %p16926_p12 = pnand %p16924_p11, %p16921_p10 }
  0x3c   :  { %16929 = shalt.err (!%p16926_p12)
}
  0x3d   :  { %s16930_s1 = scalar_lea.vmem %s46_s8, 208  ;;  %s16934_s25 = scalar_lea.vmem %s46_s8, 224 }
  0x3e   :  { %p16931_p13 = scmp.ne.s32.totalorder %s46_s8, %s16930_s1  ;;  %p16935_p0 = scmp.lt.s32.totalorder %s46_s8, %s46_s8 }
  0x3f   :  { %p16936_p1 = scmp.lt.s32.totalorder %s16934_s25, %s16930_s1 }
  0x41   :  { %p16937_p2 = por %p16936_p1, %p16935_p0 }
  0x43   :  { %p16938_p3 = pnand %p16937_p2, %p16931_p13 }
  0x45   :  { %16941 = shalt.err (!%p16938_p3)
}
  0x46   :  { %48 = dma.hbm_to_vmem [thread:$0]  %s18029_s2, 208, %s46_s8, [#allocation6]  }
  0x47   :  { %s17026_s27 = smov [#allocation10]   ;;  %s17027_s29 = smov [#allocation11]  }
  0x48   :  { %s67_s28 = sshll.u32 %s17026_s27, 4  ;;  %s79_s30 = sshll.u32 %s17027_s29, 4  ;;  %s68_s28 = int_to_ptr.vmem [resolvable:$true] %s67_s28  ;;  %s80_s30 = int_to_ptr.vmem [resolvable:$true] %s79_s30 }
  0x49   :  { %s16942_s11 = scalar_lea.hbm %s18031_s4, 112 }
  0x4a   :  { %p16943_p4 = scmp.ne.s32.totalorder %s18031_s4, %s16942_s11  ;;  %p16946_p5 = scmp.lt.u32.totalorder %s16942_s11, %s18031_s4 }
  0x4c   :  { %p16948_p6 = pnand %p16946_p5, %p16943_p4 }
  0x4e   :  { %16951 = shalt.err (!%p16948_p6)
}
  0x4f   :  { %s16952_s2 = scalar_lea.vmem %s68_s28, 112  ;;  %s16956_s8 = scalar_lea.vmem %s68_s28, 128 }
  0x50   :  { %p16953_p7 = scmp.ne.s32.totalorder %s68_s28, %s16952_s2  ;;  %p16957_p8 = scmp.lt.s32.totalorder %s68_s28, %s68_s28 }
  0x51   :  { %p16958_p9 = scmp.lt.s32.totalorder %s16956_s8, %s16952_s2 }
  0x53   :  { %p16959_p10 = por %p16958_p9, %p16957_p8 }
  0x55   :  { %p16960_p11 = pnand %p16959_p10, %p16953_p7 }
  0x57   :  { %16963 = shalt.err (!%p16960_p11)
}
  0x58   :  { %70 = dma.hbm_to_vmem [thread:$0]  %s18031_s4, 112, %s68_s28, [#allocation9]  }
  0x59   :  { %s16964_s19 = scalar_lea.hbm %s18033_s6, 48 }
  0x5a   :  { %p16965_p12 = scmp.ne.s32.totalorder %s18033_s6, %s16964_s19  ;;  %p16968_p13 = scmp.lt.u32.totalorder %s16964_s19, %s18033_s6 }
  0x5c   :  { %p16970_p0 = pnand %p16968_p13, %p16965_p12 }
  0x5e   :  { %16973 = shalt.err (!%p16970_p0)
}
  0x5f   :  { %s16974_s24 = scalar_lea.vmem %s80_s30, 48  ;;  %s16978_s1 = scalar_lea.vmem %s80_s30, 64 }
  0x60   :  { %p16975_p1 = scmp.ne.s32.totalorder %s80_s30, %s16974_s24  ;;  %p16979_p2 = scmp.lt.s32.totalorder %s80_s30, %s80_s30 }
  0x61   :  { %p16980_p3 = scmp.lt.s32.totalorder %s16978_s1, %s16974_s24 }
  0x63   :  { %p16981_p4 = por %p16980_p3, %p16979_p2 }
  0x65   :  { %p16982_p5 = pnand %p16981_p4, %p16975_p1 }
  0x67   :  { %16985 = shalt.err (!%p16982_p5)
}
  0x68   :  { %82 = dma.hbm_to_vmem [thread:$0]  %s18033_s6, 48, %s80_s30, [#allocation12]  }
  0x69   :  { %17008 = dma.done.wait [#allocation3], 224  }
  0x6a   :  { %17009 = vsyncadd [#allocation3], 4294967072 }
  0x6b   :  { %17010 = dma.done.wait [#allocation6], 81744  }
  0x6c   :  { %17011 = vsyncadd [#allocation6], 4294885552 }
  0x6d   :  { %17012 = dma.done.wait [#allocation9], 93296  }
  0x6e   :  { %17013 = vsyncadd [#allocation9], 4294874000 }
  0x6f   :  { %17014 = dma.done.wait [#allocation12], 48  }
  0x70   :  { %17015 = vsyncadd [#allocation12], 4294967248  ;;  %v14653_v0 = vld [vmem:[#allocation5 + $0x4] ss:$52 sps:$4 sm:$0xff]   ;;  %v14655_v1 = vld [vmem:[#allocation5 + $0xc] ss:$52 sps:$4 sm:$0xff]   ;;  %v110_v38 = vlaneseq }
  0x71   :  { %4146 = vmatprep.subr.bf16.mxu0 %v14653_v0  ;;  %v14657_v2 = vld [vmem:[#allocation5] ss:$52 sps:$4 sm:$0xff]   ;;  %v14658_v3 = vld [vmem:[#allocation5 + $0x8] ss:$52 sps:$4 sm:$0xff]   ;;  %4310 = vmatprep.subr.bf16.mxu1 %v14655_v1  ;;  %v14664_v7 = vld [vmem:[#allocation5 + $0x70] ss:$52 sps:$4 sm:$0xff]  }
  0x72   :  { %v14659_v4 = vld [vmem:[#allocation5 + $0x6c] ss:$52 sps:$4 sm:$0xff]   ;;  %4147 = vmatpush1.bf16.msra.mxu0 %v14657_v2  ;;  %4311 = vmatpush1.bf16.msra.mxu1 %v14658_v3  ;;  %v14661_v5 = vld [vmem:[#allocation5 + $0x74] ss:$52 sps:$4 sm:$0xff]   ;;  %v14667_v9 = vld [vmem:[#allocation5 + $0xdc] ss:$52 sps:$4 sm:$0xff]  }
  0x73   :  { %v14663_v6 = vld [vmem:[#allocation5 + $0x68] ss:$52 sps:$4 sm:$0xff]   ;;  %4148 = vmatprep.subr.bf16.mxu0 %v14659_v4  ;;  %4312 = vmatprep.subr.bf16.mxu1 %v14661_v5  ;;  %v14669_v10 = vld [vmem:[#allocation5 + $0xd0] ss:$52 sps:$4 sm:$0xff]   ;;  %v14670_v11 = vld [vmem:[#allocation5 + $0xd8] ss:$52 sps:$4 sm:$0xff]  }
  0x74   :  { %v14665_v8 = vld [vmem:[#allocation5 + $0xd4] ss:$52 sps:$4 sm:$0xff]   ;;  %v14671_v12 = vld [vmem:[#allocation5 + $0x13c] ss:$52 sps:$4 sm:$0xff]   ;;  %v14673_v13 = vld [vmem:[#allocation5 + $0x144] ss:$52 sps:$4 sm:$0xff]  }
  0x75   :  { %v14675_v14 = vld [vmem:[#allocation5 + $0x138] ss:$52 sps:$4 sm:$0xff]   ;;  %v14676_v15 = vld [vmem:[#allocation5 + $0x140] ss:$52 sps:$4 sm:$0xff]   ;;  %v14682_v19 = vld [vmem:[#allocation5 + $0x1a8] ss:$52 sps:$4 sm:$0xff]  }
  0x76   :  { %4149 = vmatpush1.bf16.msra.mxu0 %v14663_v6  ;;  %4313 = vmatpush1.bf16.msra.mxu1 %v14664_v7  ;;  %v14677_v16 = vld [vmem:[#allocation5 + $0x1a4] ss:$52 sps:$4 sm:$0xff]   ;;  %v14679_v17 = vld [vmem:[#allocation5 + $0x1ac] ss:$52 sps:$4 sm:$0xff]   ;;  %v14685_v21 = vld [vmem:[#allocation5 + $0x214] ss:$52 sps:$4 sm:$0xff]  }
  0x77   :  { %4150 = vmatprep.subr.bf16.mxu0 %v14665_v8  ;;  %4314 = vmatprep.subr.bf16.mxu1 %v14667_v9  ;;  %v14681_v18 = vld [vmem:[#allocation5 + $0x1a0] ss:$52 sps:$4 sm:$0xff]   ;;  %v14687_v22 = vld [vmem:[#allocation5 + $0x208] ss:$52 sps:$4 sm:$0xff]   ;;  %v14688_v23 = vld [vmem:[#allocation5 + $0x210] ss:$52 sps:$4 sm:$0xff]  }
  0x78   :  { %v14683_v20 = vld [vmem:[#allocation5 + $0x20c] ss:$52 sps:$4 sm:$0xff]   ;;  %v14689_v24 = vld [vmem:[#allocation5 + $0x274] ss:$52 sps:$4 sm:$0xff]   ;;  %v14691_v25 = vld [vmem:[#allocation5 + $0x27c] ss:$52 sps:$4 sm:$0xff]  }
  0x79   :  { %v14693_v26 = vld [vmem:[#allocation5 + $0x270] ss:$52 sps:$4 sm:$0xff]   ;;  %v14694_v27 = vld [vmem:[#allocation5 + $0x278] ss:$52 sps:$4 sm:$0xff]   ;;  %v14700_v31 = vld [vmem:[#allocation5 + $0x2e0] ss:$52 sps:$4 sm:$0xff]  }
  0x7a   :  { %4151 = vmatpush1.bf16.msra.mxu0 %v14669_v10  ;;  %4315 = vmatpush1.bf16.msra.mxu1 %v14670_v11  ;;  %v14695_v28 = vld [vmem:[#allocation5 + $0x2dc] ss:$52 sps:$4 sm:$0xff]   ;;  %v14697_v29 = vld [vmem:[#allocation5 + $0x2e4] ss:$52 sps:$4 sm:$0xff]   ;;  %v14703_v33 = vld [vmem:[#allocation5 + $0x34c] ss:$52 sps:$4 sm:$0xff]  }
  0x7b   :  { %4152 = vmatprep.subr.bf16.mxu0 %v14671_v12  ;;  %4316 = vmatprep.subr.bf16.mxu1 %v14673_v13  ;;  %v14699_v30 = vld [vmem:[#allocation5 + $0x2d8] ss:$52 sps:$4 sm:$0xff]   ;;  %v14705_v34 = vld [vmem:[#allocation5 + $0x340] ss:$52 sps:$4 sm:$0xff]   ;;  %v14706_v35 = vld [vmem:[#allocation5 + $0x348] ss:$52 sps:$4 sm:$0xff]  }
  0x7c   :  { %v14701_v32 = vld [vmem:[#allocation5 + $0x344] ss:$52 sps:$4 sm:$0xff]   ;;  %v17028_v36 = vmov 1983009808   ;;  %v14707_v39 = vld [vmem:[#allocation5 + $0x3ac] ss:$52 sps:$4 sm:$0xff]  }
  0x7d   :  { %v108_v37 = vunpack.c.l.s4 %v17028_v36  ;;  %v14709_v40 = vld [vmem:[#allocation5 + $0x3b4] ss:$52 sps:$4 sm:$0xff]   ;;  %v17145_v43 = vshrl.u32 %v110_v38, 7  ;;  %v14712_v44 = vld [vmem:[#allocation5 + $0x3b0] ss:$52 sps:$4 sm:$0xff]   ;;  %vm4142_vm0 = vcmask 130048  }
  0x7e   :  { %4153 = vmatpush1.bf16.msra.mxu0 %v14675_v14  ;;  %4317 = vmatpush1.bf16.msra.mxu1 %v14676_v15  ;;  %v14711_v41 = vld [vmem:[#allocation5 + $0x3a8] ss:$52 sps:$4 sm:$0xff]   ;;  %v14717_v47 = vld [vmem:[#allocation5 + $0x410] ss:$52 sps:$4 sm:$0xff]   ;;  %v14718_v48 = vld [vmem:[#allocation5 + $0x418] ss:$52 sps:$4 sm:$0xff]  }
  0x7f   :  { %4154 = vmatprep.subr.bf16.mxu0 %v14677_v16  ;;  %4318 = vmatprep.subr.bf16.mxu1 %v14679_v17  ;;  %v109_v42 = vunpack.c.0.s8 %v108_v37  ;;  %v14713_v45 = vld [vmem:[#allocation5 + $0x414] ss:$52 sps:$4 sm:$0xff]   ;;  %v14715_v46 = vld [vmem:[#allocation5 + $0x41c] ss:$52 sps:$4 sm:$0xff]   ;;  %v14721_v51 = vld [vmem:[#allocation5 + $0x484] ss:$52 sps:$4 sm:$0xff]  }
  0x80   :  { %v14719_v50 = vld [vmem:[#allocation5 + $0x47c] ss:$52 sps:$4 sm:$0xff]   ;;  %v14723_v53 = vld [vmem:[#allocation5 + $0x478] ss:$52 sps:$4 sm:$0xff]   ;;  %v14724_v55 = vld [vmem:[#allocation5 + $0x480] ss:$52 sps:$4 sm:$0xff]  }
  0x81   :  { %v17148_v49 = vsub.s32 %v109_v42, %v17145_v43  ;;  %v102_v52 = vld [vmem:[#allocation2] sm:$0xff]  ;;  %v14727_v57 = vld [vmem:[#allocation5 + $0x4ec] ss:$52 sps:$4 sm:$0xff]   ;;  %v14730_v61 = vld [vmem:[#allocation5 + $0x4e8] ss:$52 sps:$4 sm:$0xff]   ;;  %vm17031_vm1 = vmmov 0  }
  0x82   :  { %4155 = vmatpush1.bf16.msra.mxu0 %v14681_v18  ;;  %4319 = vmatpush1.bf16.msra.mxu1 %v14682_v19  ;;  %v14725_v56 = vld [vmem:[#allocation5 + $0x4e4] ss:$52 sps:$4 sm:$0xff]   ;;  %v14729_v59 = vld [vmem:[#allocation5 + $0x4e0] ss:$52 sps:$4 sm:$0xff]   ;;  %v14735_v0 = vld [vmem:[#allocation5 + $0x548] ss:$52 sps:$4 sm:$0xff]   ;;  %v106_v4 = vcombine.high %v102_v52, %v102_v52 }
  0x83   :  { %4156 = vmatprep.subr.bf16.mxu0 %v14683_v20  ;;  %4320 = vmatprep.subr.bf16.mxu1 %v14685_v21  ;;  %v113_v54 = vrot.slane %v102_v52, %v17148_v49  ;;  %v14731_v62 = vld [vmem:[#allocation5 + $0x54c] ss:$52 sps:$4 sm:$0xff]   ;;  %v14733_v63 = vld [vmem:[#allocation5 + $0x554] ss:$52 sps:$4 sm:$0xff]   ;;  %v14736_v1 = vld [vmem:[#allocation5 + $0x550] ss:$52 sps:$4 sm:$0xff]  }
  0x84   :  { %v14737_v2 = vld [vmem:[#allocation5 + $0x5b4] ss:$52 sps:$4 sm:$0xff]   ;;  %v14739_v3 = vld [vmem:[#allocation5 + $0x5bc] ss:$52 sps:$4 sm:$0xff]   ;;  %v14742_v6 = vld [vmem:[#allocation5 + $0x5b8] ss:$52 sps:$4 sm:$0xff]   ;;  %v17156_v9 = vrot.slane %v106_v4, %v17148_v49 }
  0x85   :  { %v121_v58 = vcombine.high %v113_v54, %v113_v54  ;;  %v14741_v5 = vld [vmem:[#allocation5 + $0x5b0] ss:$52 sps:$4 sm:$0xff]   ;;  %v14747_v10 = vld [vmem:[#allocation5 + $0x618] ss:$52 sps:$4 sm:$0xff]   ;;  %v14748_v11 = vld [vmem:[#allocation5 + $0x620] ss:$52 sps:$4 sm:$0xff]   ;;  %v17160_v16 = vpack.c.bf16 %v113_v54, %v113_v54 }
  0x86   :  { %4157 = vmatpush1.bf16.msra.mxu0 %v14687_v22  ;;  %4321 = vmatpush1.bf16.msra.mxu1 %v14688_v23  ;;  %v14743_v7 = vld [vmem:[#allocation5 + $0x61c] ss:$52 sps:$4 sm:$0xff]   ;;  %v14745_v8 = vld [vmem:[#allocation5 + $0x624] ss:$52 sps:$4 sm:$0xff]   ;;  %v14754_v13 = vld [vmem:[#allocation5 + $0x68c] ss:$52 sps:$4 sm:$0xff]   ;;  %v122_v14 = vcombine.high %v17156_v9, %v17156_v9 }
  0x87   :  { %4158 = vmatprep.subr.bf16.mxu0 %v14689_v24  ;;  %4322 = vmatprep.subr.bf16.mxu1 %v14691_v25  ;;  %v17151_v60 = vpack.c.bf16 %v121_v58, %v121_v58  ;;  %v14751_v12 = vld [vmem:[#allocation5 + $0x684] ss:$52 sps:$4 sm:$0xff]   ;;  %v14749_v15 = vld [vmem:[#allocation5 + $0x680] ss:$52 sps:$4 sm:$0xff]   ;;  %v14752_v17 = vld [vmem:[#allocation5 + $0x688] ss:$52 sps:$4 sm:$0xff]  }
  0x88   :  { %v14757_v18 = vld [vmem:[#allocation5 + $0x6ec] ss:$52 sps:$4 sm:$0xff]   ;;  %v14760_v19 = vld [vmem:[#allocation5 + $0x6f4] ss:$52 sps:$4 sm:$0xff]   ;;  %v17162_v20 = vpack.c.bf16 %v122_v14, %v122_v14  ;;  %v14758_v22 = vld [vmem:[#allocation5 + $0x6f0] ss:$52 sps:$4 sm:$0xff]  }
  0x89   :  { %4178 = vmatprep.mubr.bf16.mxu0 %v17151_v60  ;;  %4342 = vmatprep.mubr.bf16.mxu1 %v17151_v60  ;;  %v14755_v21 = vld [vmem:[#allocation5 + $0x6e8] ss:$52 sps:$4 sm:$0xff]   ;;  %v14761_v25 = vld [vmem:[#allocation5 + $0x750] ss:$52 sps:$4 sm:$0xff]   ;;  %v14788_v42 = vld [vmem:[#allocation5 + $0x8f8] ss:$52 sps:$4 sm:$0xff]  }
  0x8a   :  { %4159 = vmatpush1.bf16.msra.mxu0 %v14693_v26  ;;  %4323 = vmatpush1.bf16.msra.mxu1 %v14694_v27  ;;  %v14763_v23 = vld [vmem:[#allocation5 + $0x754] ss:$52 sps:$4 sm:$0xff]   ;;  %v14766_v24 = vld [vmem:[#allocation5 + $0x75c] ss:$52 sps:$4 sm:$0xff]   ;;  %v14764_v26 = vld [vmem:[#allocation5 + $0x758] ss:$52 sps:$4 sm:$0xff]  }
  0x8b   :  { %4160 = vmatprep.subr.bf16.mxu0 %v14695_v28  ;;  %4324 = vmatprep.subr.bf16.mxu1 %v14697_v29  ;;  %v14769_v27 = vld [vmem:[#allocation5 + $0x7bc] ss:$52 sps:$4 sm:$0xff]   ;;  %v14772_v28 = vld [vmem:[#allocation5 + $0x7c4] ss:$52 sps:$4 sm:$0xff]   ;;  %v14784_v36 = vld [vmem:[#allocation5 + $0x894] ss:$52 sps:$4 sm:$0xff]  }
  0x8c   :  { %v14767_v29 = vld [vmem:[#allocation5 + $0x7b8] ss:$52 sps:$4 sm:$0xff]   ;;  %v14779_v37 = vld [vmem:[#allocation5 + $0x888] ss:$52 sps:$4 sm:$0xff]   ;;  %v14782_v38 = vld [vmem:[#allocation5 + $0x890] ss:$52 sps:$4 sm:$0xff]  }
  0x8d   :  { %v14800_v52 = vld [vmem:[#allocation5 + $0x9c8] ss:$52 sps:$4 sm:$0xff]   ;;  %v14821_v4 = vld [vmem:[#allocation5 + $0xb60] ss:$52 sps:$4 sm:$0xff]   ;;  %v14836_v14 = vld [vmem:[#allocation5 + $0xc38] ss:$52 sps:$4 sm:$0xff]  }
  0x8e   :  { %4161 = vmatpush1.bf16.msra.mxu0 %v14699_v30  ;;  %4325 = vmatpush1.bf16.msra.mxu1 %v14700_v31  ;;  %v14770_v30 = vld [vmem:[#allocation5 + $0x7c0] ss:$52 sps:$4 sm:$0xff]   ;;  %v14775_v31 = vld [vmem:[#allocation5 + $0x824] ss:$52 sps:$4 sm:$0xff]   ;;  %v14814_v58 = vld [vmem:[#allocation5 + $0xa9c] ss:$52 sps:$4 sm:$0xff]  }
  0x8f   :  { %4162 = vmatprep.subr.bf16.mxu0 %v14701_v32  ;;  %4326 = vmatprep.subr.bf16.mxu1 %v14703_v33  ;;  %v14778_v32 = vld [vmem:[#allocation5 + $0x82c] ss:$52 sps:$4 sm:$0xff]   ;;  %v14808_v54 = vld [vmem:[#allocation5 + $0xa34] ss:$52 sps:$4 sm:$0xff]   ;;  %vm12568_vm2 = vcmask 1041408   ;;  %vm12569_vm3 = vcmask 1043458  }
  0x90   :  { %v14773_v33 = vld [vmem:[#allocation5 + $0x820] ss:$52 sps:$4 sm:$0xff]   ;;  %vm12570_vm4 = vmor %vm12569_vm3, %vm12568_vm2  ;;  %vm12571_vm5 = vcmask 259076  }
  0x91   :  { %vm12572_vm6 = vmor %vm12571_vm5, %vm12570_vm4 }
  0x92   :  { %4163 = vmatpush1.bf16.msra.mxu0 %v14705_v34  ;;  %4327 = vmatpush1.bf16.msra.mxu1 %v14706_v35  ;;  %v14776_v34 = vld [vmem:[#allocation5 + $0x828] ss:$52 sps:$4 sm:$0xff]   ;;  %v14781_v35 = vld [vmem:[#allocation5 + $0x88c] ss:$52 sps:$4 sm:$0xff]  }
  0x93   :  { %4164 = vmatprep.subr.bf16.mxu0 %v14707_v39  ;;  %4328 = vmatprep.subr.bf16.mxu1 %v14709_v40  ;;  %v14787_v39 = vld [vmem:[#allocation5 + $0x8f4] ss:$52 sps:$4 sm:$0xff]   ;;  %v14790_v40 = vld [vmem:[#allocation5 + $0x8fc] ss:$52 sps:$4 sm:$0xff]  }
  0x96   :  { %4165 = vmatpush1.bf16.msra.mxu0 %v14711_v41  ;;  %4329 = vmatpush1.bf16.msra.mxu1 %v14712_v44  ;;  %v14785_v41 = vld [vmem:[#allocation5 + $0x8f0] ss:$52 sps:$4 sm:$0xff]  }
  0x97   :  { %4166 = vmatprep.subr.bf16.mxu0 %v14713_v45  ;;  %4330 = vmatprep.subr.bf16.mxu1 %v14715_v46  ;;  %v14793_v44 = vld [vmem:[#allocation5 + $0x95c] ss:$52 sps:$4 sm:$0xff]   ;;  %v14796_v45 = vld [vmem:[#allocation5 + $0x964] ss:$52 sps:$4 sm:$0xff]  }
  0x98   :  { %v14791_v46 = vld [vmem:[#allocation5 + $0x958] ss:$52 sps:$4 sm:$0xff]  }
  0x9a   :  { %4167 = vmatpush1.bf16.msra.mxu0 %v14717_v47  ;;  %4331 = vmatpush1.bf16.msra.mxu1 %v14718_v48  ;;  %v14794_v47 = vld [vmem:[#allocation5 + $0x960] ss:$52 sps:$4 sm:$0xff]   ;;  %v14799_v48 = vld [vmem:[#allocation5 + $0x9c4] ss:$52 sps:$4 sm:$0xff]  }
  0x9b   :  { %4168 = vmatprep.subr.bf16.mxu0 %v14719_v50  ;;  %4332 = vmatprep.subr.bf16.mxu1 %v14721_v51  ;;  %v14802_v50 = vld [vmem:[#allocation5 + $0x9cc] ss:$52 sps:$4 sm:$0xff]  }
  0x9c   :  { %v14797_v51 = vld [vmem:[#allocation5 + $0x9c0] ss:$52 sps:$4 sm:$0xff]  }
  0x9e   :  { %4169 = vmatpush1.bf16.msra.mxu0 %v14723_v53  ;;  %4333 = vmatpush1.bf16.msra.mxu1 %v14724_v55  ;;  %v14805_v53 = vld [vmem:[#allocation5 + $0xa2c] ss:$52 sps:$4 sm:$0xff]   ;;  %v14803_v55 = vld [vmem:[#allocation5 + $0xa28] ss:$52 sps:$4 sm:$0xff]  }
  0x9f   :  { %4170 = vmatprep.subr.bf16.mxu0 %v14725_v56  ;;  %4334 = vmatprep.subr.bf16.mxu1 %v14727_v57  ;;  %v14806_v56 = vld [vmem:[#allocation5 + $0xa30] ss:$52 sps:$4 sm:$0xff]   ;;  %v14811_v57 = vld [vmem:[#allocation5 + $0xa94] ss:$52 sps:$4 sm:$0xff]  }
  0xa2   :  { %4171 = vmatpush1.bf16.msra.mxu0 %v14729_v59  ;;  %4335 = vmatpush1.bf16.msra.mxu1 %v14730_v61  ;;  %v14809_v59 = vld [vmem:[#allocation5 + $0xa90] ss:$52 sps:$4 sm:$0xff]   ;;  %v14812_v61 = vld [vmem:[#allocation5 + $0xa98] ss:$52 sps:$4 sm:$0xff]  }
  0xa3   :  { %4172 = vmatprep.subr.bf16.mxu0 %v14731_v62  ;;  %4336 = vmatprep.subr.bf16.mxu1 %v14733_v63  ;;  %v14817_v62 = vld [vmem:[#allocation5 + $0xafc] ss:$52 sps:$4 sm:$0xff]   ;;  %v14820_v63 = vld [vmem:[#allocation5 + $0xb04] ss:$52 sps:$4 sm:$0xff]  }
  0xa6   :  { %4173 = vmatpush1.bf16.msra.mxu0 %v14735_v0  ;;  %4337 = vmatpush1.bf16.msra.mxu1 %v14736_v1  ;;  %v14815_v0 = vld [vmem:[#allocation5 + $0xaf8] ss:$52 sps:$4 sm:$0xff]   ;;  %v14818_v1 = vld [vmem:[#allocation5 + $0xb00] ss:$52 sps:$4 sm:$0xff]  }
  0xa7   :  { %4174 = vmatprep.subr.bf16.mxu0 %v14737_v2  ;;  %4338 = vmatprep.subr.bf16.mxu1 %v14739_v3  ;;  %v14823_v2 = vld [vmem:[#allocation5 + $0xb64] ss:$52 sps:$4 sm:$0xff]   ;;  %v14826_v3 = vld [vmem:[#allocation5 + $0xb6c] ss:$52 sps:$4 sm:$0xff]  }
  0xaa   :  { %4175 = vmatpush1.bf16.msra.mxu0 %v14741_v5  ;;  %4339 = vmatpush1.bf16.msra.mxu1 %v14742_v6  ;;  %v14824_v5 = vld [vmem:[#allocation5 + $0xb68] ss:$52 sps:$4 sm:$0xff]   ;;  %v14829_v6 = vld [vmem:[#allocation5 + $0xbcc] ss:$52 sps:$4 sm:$0xff]  }
  0xab   :  { %4176 = vmatprep.subr.bf16.mxu0 %v14743_v7  ;;  %4340 = vmatprep.subr.bf16.mxu1 %v14745_v8  ;;  %v14832_v7 = vld [vmem:[#allocation5 + $0xbd4] ss:$52 sps:$4 sm:$0xff]  }
  0xac   :  { %v14827_v8 = vld [vmem:[#allocation5 + $0xbc8] ss:$52 sps:$4 sm:$0xff]  }
  0xae   :  { %4177 = vmatpush1.bf16.msra.mxu0 %v14747_v10  ;;  %4341 = vmatpush1.bf16.msra.mxu1 %v14748_v11  ;;  %v14830_v10 = vld [vmem:[#allocation5 + $0xbd0] ss:$52 sps:$4 sm:$0xff]   ;;  %v14835_v11 = vld [vmem:[#allocation5 + $0xc34] ss:$52 sps:$4 sm:$0xff]  }
  0xaf   :  { %4187 = vmatprep.subr.bf16.mxu0 %v14751_v12  ;;  %4351 = vmatprep.subr.bf16.mxu1 %v14754_v13  ;;  %v14838_v12 = vld [vmem:[#allocation5 + $0xc3c] ss:$52 sps:$4 sm:$0xff]  }
  0xb0   :  { %v14833_v13 = vld [vmem:[#allocation5 + $0xc30] ss:$52 sps:$4 sm:$0xff]  }
  0xb1   :  { %4179 = vmatmul.mubr.bf16.vlgmr.msra.gmra.mrb[0].mxu0 %v17160_v16  ;;  %4343 = vmatmul.mubr.bf16.vlgmr.msra.gmra.mrb[0].mxu1 %v17160_v16 }
  0xb2   :  { %4188 = vmatpush1.bf16.msra.mxu0 %v14749_v15  ;;  %4352 = vmatpush1.bf16.msra.mxu1 %v14752_v17  ;;  %v14841_v15 = vld [vmem:[#allocation5 + $0xc9c] ss:$52 sps:$4 sm:$0xff]   ;;  %v14844_v17 = vld [vmem:[#allocation5 + $0xca4] ss:$52 sps:$4 sm:$0xff]  }
  0xb3   :  { %4189 = vmatprep.subr.bf16.mxu0 %v14757_v18  ;;  %4353 = vmatprep.subr.bf16.mxu1 %v14760_v19  ;;  %v14839_v18 = vld [vmem:[#allocation5 + $0xc98] ss:$52 sps:$4 sm:$0xff]   ;;  %v14842_v19 = vld [vmem:[#allocation5 + $0xca0] ss:$52 sps:$4 sm:$0xff]  }
  0xb4   :  { %4219 = vmatprep.mubr.bf16.mxu0 %v17162_v20  ;;  %4383 = vmatprep.mubr.bf16.mxu1 %v17162_v20 }
  0xb6   :  { %4190 = vmatpush1.bf16.msra.mxu0 %v14755_v21  ;;  %4354 = vmatpush1.bf16.msra.mxu1 %v14758_v22  ;;  %v14848_v21 = vld [vmem:[#allocation5 + $0xd04] ss:$52 sps:$4 sm:$0xff]   ;;  %v14851_v22 = vld [vmem:[#allocation5 + $0xd0c] ss:$52 sps:$4 sm:$0xff]  }
  0xb7   :  { %4191 = vmatprep.subr.bf16.mxu0 %v14763_v23  ;;  %4355 = vmatprep.subr.bf16.mxu1 %v14766_v24  ;;  %v14846_v23 = vld [vmem:[#allocation5 + $0xd00] ss:$52 sps:$4 sm:$0xff]   ;;  %v17170_v24 = vpack.c.bf16 %v17156_v9, %v17156_v9 }
  0xba   :  { %4192 = vmatpush1.bf16.msra.mxu0 %v14761_v25  ;;  %4356 = vmatpush1.bf16.msra.mxu1 %v14764_v26  ;;  %v14849_v25 = vld [vmem:[#allocation5 + $0xd08] ss:$52 sps:$4 sm:$0xff]  }
  0xbb   :  { %4193 = vmatprep.subr.bf16.mxu0 %v14769_v27  ;;  %4357 = vmatprep.subr.bf16.mxu1 %v14772_v28  ;;  %v17172_v26 = vld [vmem:[#allocation2 + $0x8] sm:$0x3f]  ;;  %v14854_v27 = vld [vmem:[#allocation5 + $0xd6c] ss:$52 sps:$4 sm:$0xff]   ;;  %v14857_v28 = vld [vmem:[#allocation5 + $0xd74] ss:$52 sps:$4 sm:$0xff]  }
  0xbe   :  { %4194 = vmatpush1.bf16.msra.mxu0 %v14767_v29  ;;  %4358 = vmatpush1.bf16.msra.mxu1 %v14770_v30  ;;  %v17176_v29 = vrot.slane %v17172_v26, %v17148_v49  ;;  %v14852_v30 = vld [vmem:[#allocation5 + $0xd68] ss:$52 sps:$4 sm:$0xff]  }
  0xbf   :  { %4195 = vmatprep.subr.bf16.mxu0 %v14775_v31  ;;  %4359 = vmatprep.subr.bf16.mxu1 %v14778_v32  ;;  %v14855_v31 = vld [vmem:[#allocation5 + $0xd70] ss:$52 sps:$4 sm:$0xff]   ;;  %v14860_v32 = vld [vmem:[#allocation5 + $0xdd4] ss:$52 sps:$4 sm:$0xff]  }
  0xc0   :  { %v138_v9 = vcombine.high %v17176_v29, %v17176_v29 }
  0xc2   :  { %4196 = vmatpush1.bf16.msra.mxu0 %v14773_v33  ;;  %4360 = vmatpush1.bf16.msra.mxu1 %v14776_v34  ;;  %v14863_v33 = vld [vmem:[#allocation5 + $0xddc] ss:$52 sps:$4 sm:$0xff]   ;;  %v17182_v34 = vpack.c.bf16 %v138_v9, %v138_v9 }
  0xc3   :  { %4197 = vmatprep.subr.bf16.mxu0 %v14781_v35  ;;  %4361 = vmatprep.subr.bf16.mxu1 %v14784_v36  ;;  %v14858_v35 = vld [vmem:[#allocation5 + $0xdd0] ss:$52 sps:$4 sm:$0xff]   ;;  %v14861_v36 = vld [vmem:[#allocation5 + $0xdd8] ss:$52 sps:$4 sm:$0xff]  }
  0xc4   :  { %v14938_v9 = vld [vmem:[#allocation5 + $0x131c] ss:$52 sps:$4 sm:$0xff]  }
  0xc6   :  { %4198 = vmatpush1.bf16.msra.mxu0 %v14779_v37  ;;  %4362 = vmatpush1.bf16.msra.mxu1 %v14782_v38  ;;  %v14866_v37 = vld [vmem:[#allocation5 + $0xe3c] ss:$52 sps:$4 sm:$0xff]   ;;  %v14869_v38 = vld [vmem:[#allocation5 + $0xe44] ss:$52 sps:$4 sm:$0xff]  }
  0xc7   :  { %4199 = vmatprep.subr.bf16.mxu0 %v14787_v39  ;;  %4363 = vmatprep.subr.bf16.mxu1 %v14790_v40  ;;  %v14864_v39 = vld [vmem:[#allocation5 + $0xe38] ss:$52 sps:$4 sm:$0xff]   ;;  %v14867_v40 = vld [vmem:[#allocation5 + $0xe40] ss:$52 sps:$4 sm:$0xff]  }
  0xca   :  { %4200 = vmatpush1.bf16.msra.mxu0 %v14785_v41  ;;  %4364 = vmatpush1.bf16.msra.mxu1 %v14788_v42  ;;  %v14872_v41 = vld [vmem:[#allocation5 + $0xea4] ss:$52 sps:$4 sm:$0xff]   ;;  %v14875_v42 = vld [vmem:[#allocation5 + $0xeac] ss:$52 sps:$4 sm:$0xff]  }
  0xcb   :  { %4201 = vmatprep.subr.bf16.mxu0 %v14793_v44  ;;  %4365 = vmatprep.subr.bf16.mxu1 %v14796_v45  ;;  %v14870_v44 = vld [vmem:[#allocation5 + $0xea0] ss:$52 sps:$4 sm:$0xff]   ;;  %v14873_v45 = vld [vmem:[#allocation5 + $0xea8] ss:$52 sps:$4 sm:$0xff]  }
  0xce   :  { %4202 = vmatpush1.bf16.msra.mxu0 %v14791_v46  ;;  %4366 = vmatpush1.bf16.msra.mxu1 %v14794_v47  ;;  %v14878_v46 = vld [vmem:[#allocation5 + $0xf0c] ss:$52 sps:$4 sm:$0xff]   ;;  %v14881_v47 = vld [vmem:[#allocation5 + $0xf14] ss:$52 sps:$4 sm:$0xff]  }
  0xcf   :  { %4203 = vmatprep.subr.bf16.mxu0 %v14799_v48  ;;  %4367 = vmatprep.subr.bf16.mxu1 %v14802_v50  ;;  %v14876_v48 = vld [vmem:[#allocation5 + $0xf08] ss:$52 sps:$4 sm:$0xff]   ;;  %v14879_v50 = vld [vmem:[#allocation5 + $0xf10] ss:$52 sps:$4 sm:$0xff]  }
  0xd2   :  { %4204 = vmatpush1.bf16.msra.mxu0 %v14797_v51  ;;  %4368 = vmatpush1.bf16.msra.mxu1 %v14800_v52  ;;  %v14884_v51 = vld [vmem:[#allocation5 + $0xf74] ss:$52 sps:$4 sm:$0xff]   ;;  %v14887_v52 = vld [vmem:[#allocation5 + $0xf7c] ss:$52 sps:$4 sm:$0xff]  }
  0xd3   :  { %4205 = vmatprep.subr.bf16.mxu0 %v14805_v53  ;;  %4369 = vmatprep.subr.bf16.mxu1 %v14808_v54  ;;  %v14882_v53 = vld [vmem:[#allocation5 + $0xf70] ss:$52 sps:$4 sm:$0xff]   ;;  %v14885_v54 = vld [vmem:[#allocation5 + $0xf78] ss:$52 sps:$4 sm:$0xff]  }
  0xd6   :  { %4206 = vmatpush1.bf16.msra.mxu0 %v14803_v55  ;;  %4370 = vmatpush1.bf16.msra.mxu1 %v14806_v56  ;;  %v14890_v55 = vld [vmem:[#allocation5 + $0xfdc] ss:$52 sps:$4 sm:$0xff]   ;;  %v14893_v56 = vld [vmem:[#allocation5 + $0xfe4] ss:$52 sps:$4 sm:$0xff]  }
  0xd7   :  { %4207 = vmatprep.subr.bf16.mxu0 %v14811_v57  ;;  %4371 = vmatprep.subr.bf16.mxu1 %v14814_v58  ;;  %v14888_v57 = vld [vmem:[#allocation5 + $0xfd8] ss:$52 sps:$4 sm:$0xff]   ;;  %v14891_v58 = vld [vmem:[#allocation5 + $0xfe0] ss:$52 sps:$4 sm:$0xff]  }
  0xda   :  { %4208 = vmatpush1.bf16.msra.mxu0 %v14809_v59  ;;  %4372 = vmatpush1.bf16.msra.mxu1 %v14812_v61  ;;  %v14896_v59 = vld [vmem:[#allocation5 + $0x1044] ss:$52 sps:$4 sm:$0xff]   ;;  %v14899_v61 = vld [vmem:[#allocation5 + $0x104c] ss:$52 sps:$4 sm:$0xff]  }
  0xdb   :  { %4209 = vmatprep.subr.bf16.mxu0 %v14817_v62  ;;  %4373 = vmatprep.subr.bf16.mxu1 %v14820_v63  ;;  %v14894_v62 = vld [vmem:[#allocation5 + $0x1040] ss:$52 sps:$4 sm:$0xff]   ;;  %v14897_v63 = vld [vmem:[#allocation5 + $0x1048] ss:$52 sps:$4 sm:$0xff]  }
  0xde   :  { %4210 = vmatpush1.bf16.msra.mxu0 %v14815_v0  ;;  %4374 = vmatpush1.bf16.msra.mxu1 %v14818_v1  ;;  %v14902_v0 = vld [vmem:[#allocation5 + $0x10ac] ss:$52 sps:$4 sm:$0xff]   ;;  %v14905_v1 = vld [vmem:[#allocation5 + $0x10b4] ss:$52 sps:$4 sm:$0xff]  }
  0xdf   :  { %4211 = vmatprep.subr.bf16.mxu0 %v14823_v2  ;;  %4375 = vmatprep.subr.bf16.mxu1 %v14826_v3  ;;  %v14900_v2 = vld [vmem:[#allocation5 + $0x10a8] ss:$52 sps:$4 sm:$0xff]   ;;  %v14903_v3 = vld [vmem:[#allocation5 + $0x10b0] ss:$52 sps:$4 sm:$0xff]  }
  0xe2   :  { %4212 = vmatpush1.bf16.msra.mxu0 %v14821_v4  ;;  %4376 = vmatpush1.bf16.msra.mxu1 %v14824_v5  ;;  %v14908_v4 = vld [vmem:[#allocation5 + $0x1114] ss:$52 sps:$4 sm:$0xff]   ;;  %v14911_v5 = vld [vmem:[#allocation5 + $0x111c] ss:$52 sps:$4 sm:$0xff]  }
  0xe3   :  { %4213 = vmatprep.subr.bf16.mxu0 %v14829_v6  ;;  %4377 = vmatprep.subr.bf16.mxu1 %v14832_v7  ;;  %v14906_v6 = vld [vmem:[#allocation5 + $0x1110] ss:$52 sps:$4 sm:$0xff]   ;;  %v14909_v7 = vld [vmem:[#allocation5 + $0x1118] ss:$52 sps:$4 sm:$0xff]  }
  0xe6   :  { %4214 = vmatpush1.bf16.msra.mxu0 %v14827_v8  ;;  %4378 = vmatpush1.bf16.msra.mxu1 %v14830_v10  ;;  %v14914_v8 = vld [vmem:[#allocation5 + $0x117c] ss:$52 sps:$4 sm:$0xff]   ;;  %v14917_v10 = vld [vmem:[#allocation5 + $0x1184] ss:$52 sps:$4 sm:$0xff]  }
  0xe7   :  { %4215 = vmatprep.subr.bf16.mxu0 %v14835_v11  ;;  %4379 = vmatprep.subr.bf16.mxu1 %v14838_v12  ;;  %v14912_v11 = vld [vmem:[#allocation5 + $0x1178] ss:$52 sps:$4 sm:$0xff]   ;;  %v14915_v12 = vld [vmem:[#allocation5 + $0x1180] ss:$52 sps:$4 sm:$0xff]  }
  0xea   :  { %4216 = vmatpush1.bf16.msra.mxu0 %v14833_v13  ;;  %4380 = vmatpush1.bf16.msra.mxu1 %v14836_v14  ;;  %v14920_v13 = vld [vmem:[#allocation5 + $0x11e4] ss:$52 sps:$4 sm:$0xff]   ;;  %v14923_v14 = vld [vmem:[#allocation5 + $0x11ec] ss:$52 sps:$4 sm:$0xff]  }
  0xeb   :  { %4217 = vmatprep.subr.bf16.mxu0 %v14841_v15  ;;  %4381 = vmatprep.subr.bf16.mxu1 %v14844_v17  ;;  %v14918_v15 = vld [vmem:[#allocation5 + $0x11e0] ss:$52 sps:$4 sm:$0xff]   ;;  %v14921_v17 = vld [vmem:[#allocation5 + $0x11e8] ss:$52 sps:$4 sm:$0xff]  }
  0xee   :  { %4218 = vmatpush1.bf16.msra.mxu0 %v14839_v18  ;;  %4382 = vmatpush1.bf16.msra.mxu1 %v14842_v19  ;;  %v14926_v18 = vld [vmem:[#allocation5 + $0x124c] ss:$52 sps:$4 sm:$0xff]   ;;  %v14929_v19 = vld [vmem:[#allocation5 + $0x1254] ss:$52 sps:$4 sm:$0xff]  }
  0xef   :  { %4228 = vmatprep.subr.bf16.mxu0 %v14848_v21  ;;  %4392 = vmatprep.subr.bf16.mxu1 %v14851_v22  ;;  %v14924_v21 = vld [vmem:[#allocation5 + $0x1248] ss:$52 sps:$4 sm:$0xff]   ;;  %v14927_v22 = vld [vmem:[#allocation5 + $0x1250] ss:$52 sps:$4 sm:$0xff]  }
  0xf1   :  { %4220 = vmatmul.mubr.bf16.vlgmr.msra.gmra.mrb[0].mxu0 %v17170_v24  ;;  %4384 = vmatmul.mubr.bf16.vlgmr.msra.gmra.mrb[0].mxu1 %v17170_v24 }
  0xf2   :  { %4229 = vmatpush1.bf16.msra.mxu0 %v14846_v23  ;;  %4393 = vmatpush1.bf16.msra.mxu1 %v14849_v25  ;;  %v14932_v23 = vld [vmem:[#allocation5 + $0x12b4] ss:$52 sps:$4 sm:$0xff]   ;;  %v14935_v25 = vld [vmem:[#allocation5 + $0x12bc] ss:$52 sps:$4 sm:$0xff]  }
  0xf3   :  { %4230 = vmatprep.subr.bf16.mxu0 %v14854_v27  ;;  %4394 = vmatprep.subr.bf16.mxu1 %v14857_v28  ;;  %v14930_v27 = vld [vmem:[#allocation5 + $0x12b0] ss:$52 sps:$4 sm:$0xff]   ;;  %v14933_v28 = vld [vmem:[#allocation5 + $0x12b8] ss:$52 sps:$4 sm:$0xff]  }
  0xf4   :  { %4260 = vmatprep.mubr.bf16.mxu0 %v17182_v34  ;;  %4424 = vmatprep.mubr.bf16.mxu1 %v17182_v34 }
  0xf6   :  { %4231 = vmatpush1.bf16.msra.mxu0 %v14852_v30  ;;  %4395 = vmatpush1.bf16.msra.mxu1 %v14855_v31  ;;  %v14941_v30 = vld [vmem:[#allocation5 + $0x1324] ss:$52 sps:$4 sm:$0xff]  }
  0xf7   :  { %4232 = vmatprep.subr.bf16.mxu0 %v14860_v32  ;;  %4396 = vmatprep.subr.bf16.mxu1 %v14863_v33  ;;  %v14936_v31 = vld [vmem:[#allocation5 + $0x1318] ss:$52 sps:$4 sm:$0xff]   ;;  %v14939_v32 = vld [vmem:[#allocation5 + $0x1320] ss:$52 sps:$4 sm:$0xff]  }
  0xf8   :  { %v14944_v33 = vld [vmem:[#allocation5 + $0x138c] ss:$52 sps:$4 sm:$0xff]  }
  0xfa   :  { %4233 = vmatpush1.bf16.msra.mxu0 %v14858_v35  ;;  %4397 = vmatpush1.bf16.msra.mxu1 %v14861_v36  ;;  %v14947_v35 = vld [vmem:[#allocation5 + $0x1384] ss:$52 sps:$4 sm:$0xff]   ;;  %v17188_v36 = vpack.c.bf16 %v17176_v29, %v17176_v29 }
  0xfb   :  { %4234 = vmatprep.subr.bf16.mxu0 %v14866_v37  ;;  %4398 = vmatprep.subr.bf16.mxu1 %v14869_v38  ;;  %v14942_v37 = vld [vmem:[#allocation5 + $0x1388] ss:$52 sps:$4 sm:$0xff]   ;;  %v14945_v38 = vld [vmem:[#allocation5 + $0x1380] ss:$52 sps:$4 sm:$0xff]  }
  0xfe   :  { %4235 = vmatpush1.bf16.msra.mxu0 %v14864_v39  ;;  %4399 = vmatpush1.bf16.msra.mxu1 %v14867_v40  ;;  %v14950_v39 = vld [vmem:[#allocation5 + $0x14] ss:$52 sps:$4 sm:$0xff]   ;;  %v14953_v40 = vld [vmem:[#allocation5 + $0x1c] ss:$52 sps:$4 sm:$0xff]  }
  0xff   :  { %4236 = vmatprep.subr.bf16.mxu0 %v14872_v41  ;;  %4400 = vmatprep.subr.bf16.mxu1 %v14875_v42  ;;  %v123_v41 = vcombine.high %v17172_v26, %v17172_v26  ;;  %v17029_v42 = vmov 0   ;;  %v14955_v26 = vld [vmem:[#allocation5 + $0x78] ss:$52 sps:$4 sm:$0xff]  }
 0x101   :  { %v137_v29 = vrot.slane %v123_v41, %v17148_v49  ;;  %v15027_v41 = vld [vmem:[#allocation5 + $0x558] ss:$52 sps:$4 sm:$0xff]  }
 0x102   :  { %4237 = vmatpush1.bf16.msra.mxu0 %v14870_v44  ;;  %4401 = vmatpush1.bf16.msra.mxu1 %v14873_v45  ;;  %v14948_v45 = vld [vmem:[#allocation5 + $0x10] ss:$52 sps:$4 sm:$0xff]  }
 0x103   :  { %4238 = vmatprep.subr.bf16.mxu0 %v14878_v46  ;;  %4402 = vmatprep.subr.bf16.mxu1 %v14881_v47  ;;  %v17197_v44 = vpack.c.bf16 %v137_v29, %v137_v29  ;;  %v14951_v46 = vld [vmem:[#allocation5 + $0x18] ss:$52 sps:$4 sm:$0xff]   ;;  %v14957_v47 = vld [vmem:[#allocation5 + $0x7c] ss:$52 sps:$4 sm:$0xff]   ;;  %v15030_v29 = vld [vmem:[#allocation5 + $0x560] ss:$52 sps:$4 sm:$0xff]  }
 0x106   :  { %4239 = vmatpush1.bf16.msra.mxu0 %v14876_v48  ;;  %4403 = vmatpush1.bf16.msra.mxu1 %v14879_v50  ;;  %v14960_v48 = vld [vmem:[#allocation5 + $0x84] ss:$52 sps:$4 sm:$0xff]   ;;  %v14958_v50 = vld [vmem:[#allocation5 + $0x80] ss:$52 sps:$4 sm:$0xff]  }
 0x107   :  { %4240 = vmatprep.subr.bf16.mxu0 %v14884_v51  ;;  %4404 = vmatprep.subr.bf16.mxu1 %v14887_v52  ;;  %v14963_v51 = vld [vmem:[#allocation5 + $0xe4] ss:$52 sps:$4 sm:$0xff]   ;;  %v14966_v52 = vld [vmem:[#allocation5 + $0xec] ss:$52 sps:$4 sm:$0xff]  }
 0x10a   :  { %4241 = vmatpush1.bf16.msra.mxu0 %v14882_v53  ;;  %4405 = vmatpush1.bf16.msra.mxu1 %v14885_v54  ;;  %v14961_v53 = vld [vmem:[#allocation5 + $0xe0] ss:$52 sps:$4 sm:$0xff]   ;;  %v14964_v54 = vld [vmem:[#allocation5 + $0xe8] ss:$52 sps:$4 sm:$0xff]  }
 0x10b   :  { %4242 = vmatprep.subr.bf16.mxu0 %v14890_v55  ;;  %4406 = vmatprep.subr.bf16.mxu1 %v14893_v56  ;;  %v14969_v55 = vld [vmem:[#allocation5 + $0x14c] ss:$52 sps:$4 sm:$0xff]   ;;  %v14972_v56 = vld [vmem:[#allocation5 + $0x154] ss:$52 sps:$4 sm:$0xff]  }
 0x10e   :  { %4243 = vmatpush1.bf16.msra.mxu0 %v14888_v57  ;;  %4407 = vmatpush1.bf16.msra.mxu1 %v14891_v58  ;;  %v14967_v57 = vld [vmem:[#allocation5 + $0x148] ss:$52 sps:$4 sm:$0xff]   ;;  %v14970_v58 = vld [vmem:[#allocation5 + $0x150] ss:$52 sps:$4 sm:$0xff]  }
 0x10f   :  { %4244 = vmatprep.subr.bf16.mxu0 %v14896_v59  ;;  %4408 = vmatprep.subr.bf16.mxu1 %v14899_v61  ;;  %v14975_v59 = vld [vmem:[#allocation5 + $0x1b4] ss:$52 sps:$4 sm:$0xff]   ;;  %v14978_v61 = vld [vmem:[#allocation5 + $0x1bc] ss:$52 sps:$4 sm:$0xff]  }
 0x112   :  { %4245 = vmatpush1.bf16.msra.mxu0 %v14894_v62  ;;  %4409 = vmatpush1.bf16.msra.mxu1 %v14897_v63  ;;  %v14973_v62 = vld [vmem:[#allocation5 + $0x1b0] ss:$52 sps:$4 sm:$0xff]   ;;  %v14976_v63 = vld [vmem:[#allocation5 + $0x1b8] ss:$52 sps:$4 sm:$0xff]  }
 0x113   :  { %4246 = vmatprep.subr.bf16.mxu0 %v14902_v0  ;;  %4410 = vmatprep.subr.bf16.mxu1 %v14905_v1  ;;  %v14981_v0 = vld [vmem:[#allocation5 + $0x21c] ss:$52 sps:$4 sm:$0xff]   ;;  %v14984_v1 = vld [vmem:[#allocation5 + $0x224] ss:$52 sps:$4 sm:$0xff]  }
 0x116   :  { %4247 = vmatpush1.bf16.msra.mxu0 %v14900_v2  ;;  %4411 = vmatpush1.bf16.msra.mxu1 %v14903_v3  ;;  %v14979_v2 = vld [vmem:[#allocation5 + $0x218] ss:$52 sps:$4 sm:$0xff]   ;;  %v14982_v3 = vld [vmem:[#allocation5 + $0x220] ss:$52 sps:$4 sm:$0xff]  }
 0x117   :  { %4248 = vmatprep.subr.bf16.mxu0 %v14908_v4  ;;  %4412 = vmatprep.subr.bf16.mxu1 %v14911_v5  ;;  %v14987_v4 = vld [vmem:[#allocation5 + $0x284] ss:$52 sps:$4 sm:$0xff]   ;;  %v14990_v5 = vld [vmem:[#allocation5 + $0x28c] ss:$52 sps:$4 sm:$0xff]  }
 0x11a   :  { %4249 = vmatpush1.bf16.msra.mxu0 %v14906_v6  ;;  %4413 = vmatpush1.bf16.msra.mxu1 %v14909_v7  ;;  %v14985_v6 = vld [vmem:[#allocation5 + $0x280] ss:$52 sps:$4 sm:$0xff]   ;;  %v14988_v7 = vld [vmem:[#allocation5 + $0x288] ss:$52 sps:$4 sm:$0xff]  }
 0x11b   :  { %4250 = vmatprep.subr.bf16.mxu0 %v14914_v8  ;;  %4414 = vmatprep.subr.bf16.mxu1 %v14917_v10  ;;  %v14993_v8 = vld [vmem:[#allocation5 + $0x2ec] ss:$52 sps:$4 sm:$0xff]   ;;  %v14996_v10 = vld [vmem:[#allocation5 + $0x2f4] ss:$52 sps:$4 sm:$0xff]  }
 0x11e   :  { %4251 = vmatpush1.bf16.msra.mxu0 %v14912_v11  ;;  %4415 = vmatpush1.bf16.msra.mxu1 %v14915_v12  ;;  %v14991_v11 = vld [vmem:[#allocation5 + $0x2e8] ss:$52 sps:$4 sm:$0xff]   ;;  %v14994_v12 = vld [vmem:[#allocation5 + $0x2f0] ss:$52 sps:$4 sm:$0xff]  }
 0x11f   :  { %4252 = vmatprep.subr.bf16.mxu0 %v14920_v13  ;;  %4416 = vmatprep.subr.bf16.mxu1 %v14923_v14  ;;  %v14999_v13 = vld [vmem:[#allocation5 + $0x354] ss:$52 sps:$4 sm:$0xff]   ;;  %v15002_v14 = vld [vmem:[#allocation5 + $0x35c] ss:$52 sps:$4 sm:$0xff]  }
 0x122   :  { %4253 = vmatpush1.bf16.msra.mxu0 %v14918_v15  ;;  %4417 = vmatpush1.bf16.msra.mxu1 %v14921_v17  ;;  %v14997_v15 = vld [vmem:[#allocation5 + $0x350] ss:$52 sps:$4 sm:$0xff]   ;;  %v15000_v17 = vld [vmem:[#allocation5 + $0x358] ss:$52 sps:$4 sm:$0xff]  }
 0x123   :  { %4254 = vmatprep.subr.bf16.mxu0 %v14926_v18  ;;  %4418 = vmatprep.subr.bf16.mxu1 %v14929_v19  ;;  %v15005_v18 = vld [vmem:[#allocation5 + $0x3bc] ss:$52 sps:$4 sm:$0xff]   ;;  %v15008_v19 = vld [vmem:[#allocation5 + $0x3c4] ss:$52 sps:$4 sm:$0xff]  }
 0x126   :  { %4255 = vmatpush1.bf16.msra.mxu0 %v14924_v21  ;;  %4419 = vmatpush1.bf16.msra.mxu1 %v14927_v22  ;;  %v15003_v21 = vld [vmem:[#allocation5 + $0x3b8] ss:$52 sps:$4 sm:$0xff]   ;;  %v15006_v22 = vld [vmem:[#allocation5 + $0x3c0] ss:$52 sps:$4 sm:$0xff]  }
 0x127   :  { %4256 = vmatprep.subr.bf16.mxu0 %v14932_v23  ;;  %4420 = vmatprep.subr.bf16.mxu1 %v14935_v25  ;;  %v15011_v23 = vld [vmem:[#allocation5 + $0x424] ss:$52 sps:$4 sm:$0xff]   ;;  %v15014_v25 = vld [vmem:[#allocation5 + $0x42c] ss:$52 sps:$4 sm:$0xff]  }
 0x12a   :  { %4257 = vmatpush1.bf16.msra.mxu0 %v14930_v27  ;;  %4421 = vmatpush1.bf16.msra.mxu1 %v14933_v28  ;;  %v15009_v27 = vld [vmem:[#allocation5 + $0x420] ss:$52 sps:$4 sm:$0xff]   ;;  %v15012_v28 = vld [vmem:[#allocation5 + $0x428] ss:$52 sps:$4 sm:$0xff]  }
 0x12b   :  { %4258 = vmatprep.subr.bf16.mxu0 %v14938_v9  ;;  %4422 = vmatprep.subr.bf16.mxu1 %v14941_v30  ;;  %v15017_v9 = vld [vmem:[#allocation5 + $0x48c] ss:$52 sps:$4 sm:$0xff]   ;;  %v15020_v30 = vld [vmem:[#allocation5 + $0x494] ss:$52 sps:$4 sm:$0xff]  }
 0x12e   :  { %4259 = vmatpush1.bf16.msra.mxu0 %v14936_v31  ;;  %4423 = vmatpush1.bf16.msra.mxu1 %v14939_v32  ;;  %v15015_v31 = vld [vmem:[#allocation5 + $0x488] ss:$52 sps:$4 sm:$0xff]   ;;  %v15018_v32 = vld [vmem:[#allocation5 + $0x490] ss:$52 sps:$4 sm:$0xff]  }
 0x12f   :  { %4433 = vmatprep.subr.bf16.mxu1 %v14944_v33  ;;  %4269 = vmatprep.subr.bf16.mxu0 %v14947_v35  ;;  %v15023_v33 = vld [vmem:[#allocation5 + $0x4f4] ss:$52 sps:$4 sm:$0xff]   ;;  %v15026_v35 = vld [vmem:[#allocation5 + $0x4fc] ss:$52 sps:$4 sm:$0xff]  }
 0x131   :  { %4261 = vmatmul.mubr.bf16.vlgmr.msra.gmra.mrb[0].mxu0 %v17188_v36  ;;  %4425 = vmatmul.mubr.bf16.vlgmr.msra.gmra.mrb[0].mxu1 %v17188_v36 }
 0x132   :  { %4434 = vmatpush1.bf16.msra.mxu1 %v14942_v37  ;;  %4270 = vmatpush1.bf16.msra.mxu0 %v14945_v38  ;;  %v15021_v37 = vld [vmem:[#allocation5 + $0x4f0] ss:$52 sps:$4 sm:$0xff]   ;;  %v15024_v38 = vld [vmem:[#allocation5 + $0x4f8] ss:$52 sps:$4 sm:$0xff]  }
 0x133   :  { %4301 = vmatprep.mubr.bf16.mxu0 %v17029_v42  ;;  %4465 = vmatprep.mubr.bf16.mxu1 %v17029_v42 }
 0x134   :  { %4474 = vmatprep.subr.bf16.mxu0 %v14950_v39  ;;  %4638 = vmatprep.subr.bf16.mxu1 %v14953_v40  ;;  %v15029_v39 = vld [vmem:[#allocation5 + $0x55c] ss:$52 sps:$4 sm:$0xff]   ;;  %v15032_v40 = vld [vmem:[#allocation5 + $0x564] ss:$52 sps:$4 sm:$0xff]  }
 0x13d   :  { %13229 = vmatmul.mubr.msk.bf16.vlgmr.msra.gmra.mrb[0].mxu0 %vm4142_vm0, %v17197_v44  ;;  %13230 = vmatmul.mubr.msk.bf16.vlgmr.msra.gmra.mrb[0].mxu1 %vm4142_vm0, %v17197_v44 }
 0x13e   :  { %4475 = vmatpush1.bf16.msra.mxu0 %v14948_v45  ;;  %4639 = vmatpush1.bf16.msra.mxu1 %v14951_v46  ;;  %v15035_v45 = vld [vmem:[#allocation5 + $0x5c4] ss:$52 sps:$4 sm:$0xff]   ;;  %v15038_v46 = vld [vmem:[#allocation5 + $0x5cc] ss:$52 sps:$4 sm:$0xff]  }
 0x13f   :  { %4476 = vmatprep.subr.bf16.mxu0 %v14957_v47  ;;  %4640 = vmatprep.subr.bf16.mxu1 %v14960_v48  ;;  %v15033_v47 = vld [vmem:[#allocation5 + $0x5c0] ss:$52 sps:$4 sm:$0xff]   ;;  %v15036_v48 = vld [vmem:[#allocation5 + $0x5c8] ss:$52 sps:$4 sm:$0xff]  }
 0x140   :  { %4506 = vmatprep.mubr.bf16.mxu0 %v17151_v60  ;;  %4670 = vmatprep.mubr.bf16.mxu1 %v17151_v60 }
 0x142   :  { %4477 = vmatpush1.bf16.msra.mxu0 %v14955_v26  ;;  %4641 = vmatpush1.bf16.msra.mxu1 %v14958_v50  ;;  %v15041_v26 = vld [vmem:[#allocation5 + $0x62c] ss:$52 sps:$4 sm:$0xff]   ;;  %v15044_v50 = vld [vmem:[#allocation5 + $0x634] ss:$52 sps:$4 sm:$0xff]  }
 0x143   :  { %4478 = vmatprep.subr.bf16.mxu0 %v14963_v51  ;;  %4642 = vmatprep.subr.bf16.mxu1 %v14966_v52  ;;  %v15039_v51 = vld [vmem:[#allocation5 + $0x628] ss:$52 sps:$4 sm:$0xff]   ;;  %v15042_v52 = vld [vmem:[#allocation5 + $0x630] ss:$52 sps:$4 sm:$0xff]  }
 0x146   :  { %4479 = vmatpush1.bf16.msra.mxu0 %v14961_v53  ;;  %4643 = vmatpush1.bf16.msra.mxu1 %v14964_v54  ;;  %v15047_v53 = vld [vmem:[#allocation5 + $0x694] ss:$52 sps:$4 sm:$0xff]   ;;  %v15050_v54 = vld [vmem:[#allocation5 + $0x69c] ss:$52 sps:$4 sm:$0xff]  }
 0x147   :  { %4480 = vmatprep.subr.bf16.mxu0 %v14969_v55  ;;  %4644 = vmatprep.subr.bf16.mxu1 %v14972_v56  ;;  %v15045_v55 = vld [vmem:[#allocation5 + $0x690] ss:$52 sps:$4 sm:$0xff]   ;;  %v15048_v56 = vld [vmem:[#allocation5 + $0x698] ss:$52 sps:$4 sm:$0xff]  }
 0x14a   :  { %4481 = vmatpush1.bf16.msra.mxu0 %v14967_v57  ;;  %4645 = vmatpush1.bf16.msra.mxu1 %v14970_v58  ;;  %v15053_v57 = vld [vmem:[#allocation5 + $0x6fc] ss:$52 sps:$4 sm:$0xff]   ;;  %v15056_v58 = vld [vmem:[#allocation5 + $0x704] ss:$52 sps:$4 sm:$0xff]  }
 0x14b   :  { %4482 = vmatprep.subr.bf16.mxu0 %v14975_v59  ;;  %4646 = vmatprep.subr.bf16.mxu1 %v14978_v61  ;;  %v15051_v59 = vld [vmem:[#allocation5 + $0x6f8] ss:$52 sps:$4 sm:$0xff]   ;;  %v15054_v61 = vld [vmem:[#allocation5 + $0x700] ss:$52 sps:$4 sm:$0xff]  }
 0x14e   :  { %4483 = vmatpush1.bf16.msra.mxu0 %v14973_v62  ;;  %4647 = vmatpush1.bf16.msra.mxu1 %v14976_v63  ;;  %v15059_v62 = vld [vmem:[#allocation5 + $0x764] ss:$52 sps:$4 sm:$0xff]   ;;  %v15062_v63 = vld [vmem:[#allocation5 + $0x76c] ss:$52 sps:$4 sm:$0xff]  }
 0x14f   :  { %4484 = vmatprep.subr.bf16.mxu0 %v14981_v0  ;;  %4648 = vmatprep.subr.bf16.mxu1 %v14984_v1  ;;  %v15057_v0 = vld [vmem:[#allocation5 + $0x760] ss:$52 sps:$4 sm:$0xff]   ;;  %v15060_v1 = vld [vmem:[#allocation5 + $0x768] ss:$52 sps:$4 sm:$0xff]  }
 0x152   :  { %4485 = vmatpush1.bf16.msra.mxu0 %v14979_v2  ;;  %4649 = vmatpush1.bf16.msra.mxu1 %v14982_v3  ;;  %v15065_v2 = vld [vmem:[#allocation5 + $0x7cc] ss:$52 sps:$4 sm:$0xff]   ;;  %v15068_v3 = vld [vmem:[#allocation5 + $0x7d4] ss:$52 sps:$4 sm:$0xff]  }
 0x153   :  { %4486 = vmatprep.subr.bf16.mxu0 %v14987_v4  ;;  %4650 = vmatprep.subr.bf16.mxu1 %v14990_v5  ;;  %v15063_v4 = vld [vmem:[#allocation5 + $0x7c8] ss:$52 sps:$4 sm:$0xff]   ;;  %v15066_v5 = vld [vmem:[#allocation5 + $0x7d0] ss:$52 sps:$4 sm:$0xff]  }
 0x156   :  { %4487 = vmatpush1.bf16.msra.mxu0 %v14985_v6  ;;  %4651 = vmatpush1.bf16.msra.mxu1 %v14988_v7  ;;  %v15071_v6 = vld [vmem:[#allocation5 + $0x834] ss:$52 sps:$4 sm:$0xff]   ;;  %v15074_v7 = vld [vmem:[#allocation5 + $0x83c] ss:$52 sps:$4 sm:$0xff]  }
 0x157   :  { %4488 = vmatprep.subr.bf16.mxu0 %v14993_v8  ;;  %4652 = vmatprep.subr.bf16.mxu1 %v14996_v10  ;;  %v15069_v8 = vld [vmem:[#allocation5 + $0x830] ss:$52 sps:$4 sm:$0xff]   ;;  %v15072_v10 = vld [vmem:[#allocation5 + $0x838] ss:$52 sps:$4 sm:$0xff]  }
 0x15a   :  { %4489 = vmatpush1.bf16.msra.mxu0 %v14991_v11  ;;  %4653 = vmatpush1.bf16.msra.mxu1 %v14994_v12  ;;  %v15077_v11 = vld [vmem:[#allocation5 + $0x89c] ss:$52 sps:$4 sm:$0xff]   ;;  %v15080_v12 = vld [vmem:[#allocation5 + $0x8a4] ss:$52 sps:$4 sm:$0xff]  }
 0x15b   :  { %4490 = vmatprep.subr.bf16.mxu0 %v14999_v13  ;;  %4654 = vmatprep.subr.bf16.mxu1 %v15002_v14  ;;  %v15075_v13 = vld [vmem:[#allocation5 + $0x898] ss:$52 sps:$4 sm:$0xff]   ;;  %v15078_v14 = vld [vmem:[#allocation5 + $0x8a0] ss:$52 sps:$4 sm:$0xff]  }
 0x15e   :  { %4491 = vmatpush1.bf16.msra.mxu0 %v14997_v15  ;;  %4655 = vmatpush1.bf16.msra.mxu1 %v15000_v17  ;;  %v15083_v15 = vld [vmem:[#allocation5 + $0x904] ss:$52 sps:$4 sm:$0xff]   ;;  %v15086_v17 = vld [vmem:[#allocation5 + $0x90c] ss:$52 sps:$4 sm:$0xff]  }
 0x15f   :  { %4492 = vmatprep.subr.bf16.mxu0 %v15005_v18  ;;  %4656 = vmatprep.subr.bf16.mxu1 %v15008_v19  ;;  %v15081_v18 = vld [vmem:[#allocation5 + $0x900] ss:$52 sps:$4 sm:$0xff]   ;;  %v15084_v19 = vld [vmem:[#allocation5 + $0x908] ss:$52 sps:$4 sm:$0xff]  }
 0x162   :  { %4493 = vmatpush1.bf16.msra.mxu0 %v15003_v21  ;;  %4657 = vmatpush1.bf16.msra.mxu1 %v15006_v22  ;;  %v15089_v21 = vld [vmem:[#allocation5 + $0x96c] ss:$52 sps:$4 sm:$0xff]   ;;  %v15092_v22 = vld [vmem:[#allocation5 + $0x974] ss:$52 sps:$4 sm:$0xff]  }
 0x163   :  { %4494 = vmatprep.subr.bf16.mxu0 %v15011_v23  ;;  %4658 = vmatprep.subr.bf16.mxu1 %v15014_v25  ;;  %v15087_v23 = vld [vmem:[#allocation5 + $0x968] ss:$52 sps:$4 sm:$0xff]   ;;  %v15090_v25 = vld [vmem:[#allocation5 + $0x970] ss:$52 sps:$4 sm:$0xff]  }
 0x166   :  { %4495 = vmatpush1.bf16.msra.mxu0 %v15009_v27  ;;  %4659 = vmatpush1.bf16.msra.mxu1 %v15012_v28  ;;  %v15095_v27 = vld [vmem:[#allocation5 + $0x9d4] ss:$52 sps:$4 sm:$0xff]   ;;  %v15098_v28 = vld [vmem:[#allocation5 + $0x9dc] ss:$52 sps:$4 sm:$0xff]  }
 0x167   :  { %4496 = vmatprep.subr.bf16.mxu0 %v15017_v9  ;;  %4660 = vmatprep.subr.bf16.mxu1 %v15020_v30  ;;  %v15093_v9 = vld [vmem:[#allocation5 + $0x9d0] ss:$52 sps:$4 sm:$0xff]   ;;  %v15096_v30 = vld [vmem:[#allocation5 + $0x9d8] ss:$52 sps:$4 sm:$0xff]  }
 0x16a   :  { %4497 = vmatpush1.bf16.msra.mxu0 %v15015_v31  ;;  %4661 = vmatpush1.bf16.msra.mxu1 %v15018_v32  ;;  %v15101_v31 = vld [vmem:[#allocation5 + $0xa3c] ss:$52 sps:$4 sm:$0xff]   ;;  %v15104_v32 = vld [vmem:[#allocation5 + $0xa44] ss:$52 sps:$4 sm:$0xff]  }
 0x16b   :  { %4498 = vmatprep.subr.bf16.mxu0 %v15023_v33  ;;  %4662 = vmatprep.subr.bf16.mxu1 %v15026_v35  ;;  %v15099_v33 = vld [vmem:[#allocation5 + $0xa38] ss:$52 sps:$4 sm:$0xff]   ;;  %v15102_v35 = vld [vmem:[#allocation5 + $0xa40] ss:$52 sps:$4 sm:$0xff]  }
 0x16e   :  { %4499 = vmatpush1.bf16.msra.mxu0 %v15021_v37  ;;  %4663 = vmatpush1.bf16.msra.mxu1 %v15024_v38  ;;  %v15107_v37 = vld [vmem:[#allocation5 + $0xaa4] ss:$52 sps:$4 sm:$0xff]   ;;  %v15110_v38 = vld [vmem:[#allocation5 + $0xaac] ss:$52 sps:$4 sm:$0xff]  }
 0x16f   :  { %4500 = vmatprep.subr.bf16.mxu0 %v15029_v39  ;;  %4664 = vmatprep.subr.bf16.mxu1 %v15032_v40  ;;  %v15105_v39 = vld [vmem:[#allocation5 + $0xaa0] ss:$52 sps:$4 sm:$0xff]   ;;  %v15108_v40 = vld [vmem:[#allocation5 + $0xaa8] ss:$52 sps:$4 sm:$0xff]  }
 0x172   :  { %4501 = vmatpush1.bf16.msra.mxu0 %v15027_v41  ;;  %4665 = vmatpush1.bf16.msra.mxu1 %v15030_v29  ;;  %v15113_v41 = vld [vmem:[#allocation5 + $0xb0c] ss:$52 sps:$4 sm:$0xff]   ;;  %v15116_v29 = vld [vmem:[#allocation5 + $0xb14] ss:$52 sps:$4 sm:$0xff]  }
 0x173   :  { %4502 = vmatprep.subr.bf16.mxu0 %v15035_v45  ;;  %4666 = vmatprep.subr.bf16.mxu1 %v15038_v46  ;;  %v15111_v45 = vld [vmem:[#allocation5 + $0xb08] ss:$52 sps:$4 sm:$0xff]   ;;  %v15114_v46 = vld [vmem:[#allocation5 + $0xb10] ss:$52 sps:$4 sm:$0xff]  }
 0x176   :  { %4503 = vmatpush1.bf16.msra.mxu0 %v15033_v47  ;;  %4667 = vmatpush1.bf16.msra.mxu1 %v15036_v48  ;;  %v15119_v47 = vld [vmem:[#allocation5 + $0xb74] ss:$52 sps:$4 sm:$0xff]   ;;  %v15122_v48 = vld [vmem:[#allocation5 + $0xb7c] ss:$52 sps:$4 sm:$0xff]  }
 0x177   :  { %4504 = vmatprep.subr.bf16.mxu0 %v15041_v26  ;;  %4668 = vmatprep.subr.bf16.mxu1 %v15044_v50  ;;  %v15117_v26 = vld [vmem:[#allocation5 + $0xb70] ss:$52 sps:$4 sm:$0xff]   ;;  %v15120_v50 = vld [vmem:[#allocation5 + $0xb78] ss:$52 sps:$4 sm:$0xff]  }
 0x17a   :  { %4505 = vmatpush1.bf16.msra.mxu0 %v15039_v51  ;;  %4669 = vmatpush1.bf16.msra.mxu1 %v15042_v52  ;;  %v15125_v51 = vld [vmem:[#allocation5 + $0xbdc] ss:$52 sps:$4 sm:$0xff]   ;;  %v15128_v52 = vld [vmem:[#allocation5 + $0xbe4] ss:$52 sps:$4 sm:$0xff]  }
 0x17b   :  { %4515 = vmatprep.subr.bf16.mxu0 %v15047_v53  ;;  %4679 = vmatprep.subr.bf16.mxu1 %v15050_v54  ;;  %v15123_v53 = vld [vmem:[#allocation5 + $0xbd8] ss:$52 sps:$4 sm:$0xff]   ;;  %v15126_v54 = vld [vmem:[#allocation5 + $0xbe0] ss:$52 sps:$4 sm:$0xff]  }
 0x17d   :  { %4507 = vmatmul.mubr.bf16.vlgmr.msra.gmra.mrb[4].mxu0 %v17160_v16  ;;  %4671 = vmatmul.mubr.bf16.vlgmr.msra.gmra.mrb[4].mxu1 %v17160_v16 }
 0x17e   :  { %4516 = vmatpush1.bf16.msra.mxu0 %v15045_v55  ;;  %4680 = vmatpush1.bf16.msra.mxu1 %v15048_v56  ;;  %v15131_v55 = vld [vmem:[#allocation5 + $0xc44] ss:$52 sps:$4 sm:$0xff]   ;;  %v15134_v56 = vld [vmem:[#allocation5 + $0xc4c] ss:$52 sps:$4 sm:$0xff]  }
 0x17f   :  { %4517 = vmatprep.subr.bf16.mxu0 %v15053_v57  ;;  %4681 = vmatprep.subr.bf16.mxu1 %v15056_v58  ;;  %v15129_v57 = vld [vmem:[#allocation5 + $0xc40] ss:$52 sps:$4 sm:$0xff]   ;;  %v15132_v58 = vld [vmem:[#allocation5 + $0xc48] ss:$52 sps:$4 sm:$0xff]  }
 0x180   :  { %4547 = vmatprep.mubr.bf16.mxu0 %v17162_v20  ;;  %4711 = vmatprep.mubr.bf16.mxu1 %v17162_v20 }
 0x182   :  { %4518 = vmatpush1.bf16.msra.mxu0 %v15051_v59  ;;  %4682 = vmatpush1.bf16.msra.mxu1 %v15054_v61  ;;  %v15137_v59 = vld [vmem:[#allocation5 + $0xcac] ss:$52 sps:$4 sm:$0xff]   ;;  %v15140_v61 = vld [vmem:[#allocation5 + $0xcb4] ss:$52 sps:$4 sm:$0xff]  }
 0x183   :  { %4519 = vmatprep.subr.bf16.mxu0 %v15059_v62  ;;  %4683 = vmatprep.subr.bf16.mxu1 %v15062_v63  ;;  %v15135_v62 = vld [vmem:[#allocation5 + $0xca8] ss:$52 sps:$4 sm:$0xff]   ;;  %v15138_v63 = vld [vmem:[#allocation5 + $0xcb0] ss:$52 sps:$4 sm:$0xff]  }
 0x186   :  { %4520 = vmatpush1.bf16.msra.mxu0 %v15057_v0  ;;  %4684 = vmatpush1.bf16.msra.mxu1 %v15060_v1  ;;  %v15143_v0 = vld [vmem:[#allocation5 + $0xd14] ss:$52 sps:$4 sm:$0xff]   ;;  %v15146_v1 = vld [vmem:[#allocation5 + $0xd1c] ss:$52 sps:$4 sm:$0xff]  }
 0x187   :  { %4521 = vmatprep.subr.bf16.mxu0 %v15065_v2  ;;  %4685 = vmatprep.subr.bf16.mxu1 %v15068_v3  ;;  %v15141_v2 = vld [vmem:[#allocation5 + $0xd10] ss:$52 sps:$4 sm:$0xff]   ;;  %v15144_v3 = vld [vmem:[#allocation5 + $0xd18] ss:$52 sps:$4 sm:$0xff]  }
 0x18a   :  { %4522 = vmatpush1.bf16.msra.mxu0 %v15063_v4  ;;  %4686 = vmatpush1.bf16.msra.mxu1 %v15066_v5  ;;  %v15149_v4 = vld [vmem:[#allocation5 + $0xd7c] ss:$52 sps:$4 sm:$0xff]   ;;  %v15152_v5 = vld [vmem:[#allocation5 + $0xd84] ss:$52 sps:$4 sm:$0xff]  }
 0x18b   :  { %4523 = vmatprep.subr.bf16.mxu0 %v15071_v6  ;;  %4687 = vmatprep.subr.bf16.mxu1 %v15074_v7  ;;  %v15147_v6 = vld [vmem:[#allocation5 + $0xd78] ss:$52 sps:$4 sm:$0xff]   ;;  %v15150_v7 = vld [vmem:[#allocation5 + $0xd80] ss:$52 sps:$4 sm:$0xff]  }
 0x18e   :  { %4524 = vmatpush1.bf16.msra.mxu0 %v15069_v8  ;;  %4688 = vmatpush1.bf16.msra.mxu1 %v15072_v10  ;;  %v15155_v8 = vld [vmem:[#allocation5 + $0xde4] ss:$52 sps:$4 sm:$0xff]   ;;  %v15158_v10 = vld [vmem:[#allocation5 + $0xdec] ss:$52 sps:$4 sm:$0xff]  }
 0x18f   :  { %4525 = vmatprep.subr.bf16.mxu0 %v15077_v11  ;;  %4689 = vmatprep.subr.bf16.mxu1 %v15080_v12  ;;  %v15153_v11 = vld [vmem:[#allocation5 + $0xde0] ss:$52 sps:$4 sm:$0xff]   ;;  %v15156_v12 = vld [vmem:[#allocation5 + $0xde8] ss:$52 sps:$4 sm:$0xff]  }
 0x192   :  { %4526 = vmatpush1.bf16.msra.mxu0 %v15075_v13  ;;  %4690 = vmatpush1.bf16.msra.mxu1 %v15078_v14  ;;  %v15161_v13 = vld [vmem:[#allocation5 + $0xe4c] ss:$52 sps:$4 sm:$0xff]   ;;  %v15164_v14 = vld [vmem:[#allocation5 + $0xe54] ss:$52 sps:$4 sm:$0xff]  }
 0x193   :  { %4527 = vmatprep.subr.bf16.mxu0 %v15083_v15  ;;  %4691 = vmatprep.subr.bf16.mxu1 %v15086_v17  ;;  %v15159_v15 = vld [vmem:[#allocation5 + $0xe48] ss:$52 sps:$4 sm:$0xff]   ;;  %v15162_v17 = vld [vmem:[#allocation5 + $0xe50] ss:$52 sps:$4 sm:$0xff]  }
 0x196   :  { %4528 = vmatpush1.bf16.msra.mxu0 %v15081_v18  ;;  %4692 = vmatpush1.bf16.msra.mxu1 %v15084_v19  ;;  %v15167_v18 = vld [vmem:[#allocation5 + $0xeb4] ss:$52 sps:$4 sm:$0xff]   ;;  %v15170_v19 = vld [vmem:[#allocation5 + $0xebc] ss:$52 sps:$4 sm:$0xff]  }
 0x197   :  { %4529 = vmatprep.subr.bf16.mxu0 %v15089_v21  ;;  %4693 = vmatprep.subr.bf16.mxu1 %v15092_v22  ;;  %v15165_v21 = vld [vmem:[#allocation5 + $0xeb0] ss:$52 sps:$4 sm:$0xff]   ;;  %v15168_v22 = vld [vmem:[#allocation5 + $0xeb8] ss:$52 sps:$4 sm:$0xff]  }
 0x19a   :  { %4530 = vmatpush1.bf16.msra.mxu0 %v15087_v23  ;;  %4694 = vmatpush1.bf16.msra.mxu1 %v15090_v25  ;;  %v15173_v23 = vld [vmem:[#allocation5 + $0xf1c] ss:$52 sps:$4 sm:$0xff]   ;;  %v15176_v25 = vld [vmem:[#allocation5 + $0xf24] ss:$52 sps:$4 sm:$0xff]  }
 0x19b   :  { %4531 = vmatprep.subr.bf16.mxu0 %v15095_v27  ;;  %4695 = vmatprep.subr.bf16.mxu1 %v15098_v28  ;;  %v15171_v27 = vld [vmem:[#allocation5 + $0xf18] ss:$52 sps:$4 sm:$0xff]   ;;  %v15174_v28 = vld [vmem:[#allocation5 + $0xf20] ss:$52 sps:$4 sm:$0xff]  }
 0x19e   :  { %4532 = vmatpush1.bf16.msra.mxu0 %v15093_v9  ;;  %4696 = vmatpush1.bf16.msra.mxu1 %v15096_v30  ;;  %v15179_v9 = vld [vmem:[#allocation5 + $0xf84] ss:$52 sps:$4 sm:$0xff]   ;;  %v15182_v30 = vld [vmem:[#allocation5 + $0xf8c] ss:$52 sps:$4 sm:$0xff]  }
 0x19f   :  { %4533 = vmatprep.subr.bf16.mxu0 %v15101_v31  ;;  %4697 = vmatprep.subr.bf16.mxu1 %v15104_v32  ;;  %v15177_v31 = vld [vmem:[#allocation5 + $0xf80] ss:$52 sps:$4 sm:$0xff]   ;;  %v15180_v32 = vld [vmem:[#allocation5 + $0xf88] ss:$52 sps:$4 sm:$0xff]  }
 0x1a2   :  { %4534 = vmatpush1.bf16.msra.mxu0 %v15099_v33  ;;  %4698 = vmatpush1.bf16.msra.mxu1 %v15102_v35  ;;  %v15185_v33 = vld [vmem:[#allocation5 + $0xfec] ss:$52 sps:$4 sm:$0xff]   ;;  %v15188_v35 = vld [vmem:[#allocation5 + $0xff4] ss:$52 sps:$4 sm:$0xff]  }
 0x1a3   :  { %4535 = vmatprep.subr.bf16.mxu0 %v15107_v37  ;;  %4699 = vmatprep.subr.bf16.mxu1 %v15110_v38  ;;  %v15183_v37 = vld [vmem:[#allocation5 + $0xfe8] ss:$52 sps:$4 sm:$0xff]   ;;  %v15186_v38 = vld [vmem:[#allocation5 + $0xff0] ss:$52 sps:$4 sm:$0xff]  }
 0x1a6   :  { %4536 = vmatpush1.bf16.msra.mxu0 %v15105_v39  ;;  %4700 = vmatpush1.bf16.msra.mxu1 %v15108_v40  ;;  %v15191_v39 = vld [vmem:[#allocation5 + $0x1054] ss:$52 sps:$4 sm:$0xff]   ;;  %v15194_v40 = vld [vmem:[#allocation5 + $0x105c] ss:$52 sps:$4 sm:$0xff]  }
 0x1a7   :  { %4537 = vmatprep.subr.bf16.mxu0 %v15113_v41  ;;  %4701 = vmatprep.subr.bf16.mxu1 %v15116_v29  ;;  %v15189_v41 = vld [vmem:[#allocation5 + $0x1050] ss:$52 sps:$4 sm:$0xff]   ;;  %v15192_v29 = vld [vmem:[#allocation5 + $0x1058] ss:$52 sps:$4 sm:$0xff]  }
 0x1aa   :  { %4538 = vmatpush1.bf16.msra.mxu0 %v15111_v45  ;;  %4702 = vmatpush1.bf16.msra.mxu1 %v15114_v46  ;;  %v15197_v45 = vld [vmem:[#allocation5 + $0x10bc] ss:$52 sps:$4 sm:$0xff]   ;;  %v15200_v46 = vld [vmem:[#allocation5 + $0x10c4] ss:$52 sps:$4 sm:$0xff]  }
 0x1ab   :  { %4539 = vmatprep.subr.bf16.mxu0 %v15119_v47  ;;  %4703 = vmatprep.subr.bf16.mxu1 %v15122_v48  ;;  %v15195_v47 = vld [vmem:[#allocation5 + $0x10b8] ss:$52 sps:$4 sm:$0xff]   ;;  %v15198_v48 = vld [vmem:[#allocation5 + $0x10c0] ss:$52 sps:$4 sm:$0xff]  }
 0x1ae   :  { %4540 = vmatpush1.bf16.msra.mxu0 %v15117_v26  ;;  %4704 = vmatpush1.bf16.msra.mxu1 %v15120_v50  ;;  %v15203_v26 = vld [vmem:[#allocation5 + $0x1124] ss:$52 sps:$4 sm:$0xff]   ;;  %v15206_v50 = vld [vmem:[#allocation5 + $0x112c] ss:$52 sps:$4 sm:$0xff]  }
 0x1af   :  { %4541 = vmatprep.subr.bf16.mxu0 %v15125_v51  ;;  %4705 = vmatprep.subr.bf16.mxu1 %v15128_v52  ;;  %v15201_v51 = vld [vmem:[#allocation5 + $0x1120] ss:$52 sps:$4 sm:$0xff]   ;;  %v15204_v52 = vld [vmem:[#allocation5 + $0x1128] ss:$52 sps:$4 sm:$0xff]  }
 0x1b2   :  { %4542 = vmatpush1.bf16.msra.mxu0 %v15123_v53  ;;  %4706 = vmatpush1.bf16.msra.mxu1 %v15126_v54  ;;  %v15209_v53 = vld [vmem:[#allocation5 + $0x118c] ss:$52 sps:$4 sm:$0xff]   ;;  %v15212_v54 = vld [vmem:[#allocation5 + $0x1194] ss:$52 sps:$4 sm:$0xff]  }
 0x1b3   :  { %4543 = vmatprep.subr.bf16.mxu0 %v15131_v55  ;;  %4707 = vmatprep.subr.bf16.mxu1 %v15134_v56  ;;  %v15207_v55 = vld [vmem:[#allocation5 + $0x1188] ss:$52 sps:$4 sm:$0xff]   ;;  %v15210_v56 = vld [vmem:[#allocation5 + $0x1190] ss:$52 sps:$4 sm:$0xff]  }
 0x1b6   :  { %4544 = vmatpush1.bf16.msra.mxu0 %v15129_v57  ;;  %4708 = vmatpush1.bf16.msra.mxu1 %v15132_v58  ;;  %v15215_v57 = vld [vmem:[#allocation5 + $0x11f4] ss:$52 sps:$4 sm:$0xff]   ;;  %v15218_v58 = vld [vmem:[#allocation5 + $0x11fc] ss:$52 sps:$4 sm:$0xff]  }
 0x1b7   :  { %4545 = vmatprep.subr.bf16.mxu0 %v15137_v59  ;;  %4709 = vmatprep.subr.bf16.mxu1 %v15140_v61  ;;  %v15213_v59 = vld [vmem:[#allocation5 + $0x11f0] ss:$52 sps:$4 sm:$0xff]   ;;  %v15216_v61 = vld [vmem:[#allocation5 + $0x11f8] ss:$52 sps:$4 sm:$0xff]  }
 0x1ba   :  { %4546 = vmatpush1.bf16.msra.mxu0 %v15135_v62  ;;  %4710 = vmatpush1.bf16.msra.mxu1 %v15138_v63  ;;  %v15221_v62 = vld [vmem:[#allocation5 + $0x125c] ss:$52 sps:$4 sm:$0xff]   ;;  %v15224_v63 = vld [vmem:[#allocation5 + $0x1264] ss:$52 sps:$4 sm:$0xff]  }
 0x1bb   :  { %4556 = vmatprep.subr.bf16.mxu0 %v15143_v0  ;;  %4720 = vmatprep.subr.bf16.mxu1 %v15146_v1  ;;  %v15219_v0 = vld [vmem:[#allocation5 + $0x1258] ss:$52 sps:$4 sm:$0xff]   ;;  %v15222_v1 = vld [vmem:[#allocation5 + $0x1260] ss:$52 sps:$4 sm:$0xff]  }
 0x1bd   :  { %4548 = vmatmul.mubr.bf16.vlgmr.msra.gmra.mrb[4].mxu0 %v17170_v24  ;;  %4712 = vmatmul.mubr.bf16.vlgmr.msra.gmra.mrb[4].mxu1 %v17170_v24 }
 0x1be   :  { %4557 = vmatpush1.bf16.msra.mxu0 %v15141_v2  ;;  %4721 = vmatpush1.bf16.msra.mxu1 %v15144_v3  ;;  %v15227_v2 = vld [vmem:[#allocation5 + $0x12c4] ss:$52 sps:$4 sm:$0xff]   ;;  %v15230_v3 = vld [vmem:[#allocation5 + $0x12cc] ss:$52 sps:$4 sm:$0xff]  }
 0x1bf   :  { %4558 = vmatprep.subr.bf16.mxu0 %v15149_v4  ;;  %4722 = vmatprep.subr.bf16.mxu1 %v15152_v5  ;;  %v15225_v4 = vld [vmem:[#allocation5 + $0x12c0] ss:$52 sps:$4 sm:$0xff]   ;;  %v15228_v5 = vld [vmem:[#allocation5 + $0x12c8] ss:$52 sps:$4 sm:$0xff]  }
 0x1c0   :  { %4588 = vmatprep.mubr.bf16.mxu0 %v17182_v34  ;;  %4752 = vmatprep.mubr.bf16.mxu1 %v17182_v34 }
 0x1c2   :  { %4559 = vmatpush1.bf16.msra.mxu0 %v15147_v6  ;;  %4723 = vmatpush1.bf16.msra.mxu1 %v15150_v7  ;;  %v15233_v6 = vld [vmem:[#allocation5 + $0x132c] ss:$52 sps:$4 sm:$0xff]   ;;  %v15236_v7 = vld [vmem:[#allocation5 + $0x1334] ss:$52 sps:$4 sm:$0xff]  }
 0x1c3   :  { %4560 = vmatprep.subr.bf16.mxu0 %v15155_v8  ;;  %4724 = vmatprep.subr.bf16.mxu1 %v15158_v10  ;;  %v15231_v8 = vld [vmem:[#allocation5 + $0x1328] ss:$52 sps:$4 sm:$0xff]   ;;  %v15234_v10 = vld [vmem:[#allocation5 + $0x1330] ss:$52 sps:$4 sm:$0xff]  }
 0x1c6   :  { %4561 = vmatpush1.bf16.msra.mxu0 %v15153_v11  ;;  %4725 = vmatpush1.bf16.msra.mxu1 %v15156_v12  ;;  %v15239_v11 = vld [vmem:[#allocation5 + $0x139c] ss:$52 sps:$4 sm:$0xff]   ;;  %v15242_v12 = vld [vmem:[#allocation5 + $0x1394] ss:$52 sps:$4 sm:$0xff]  }
 0x1c7   :  { %4562 = vmatprep.subr.bf16.mxu0 %v15161_v13  ;;  %4726 = vmatprep.subr.bf16.mxu1 %v15164_v14  ;;  %v15237_v13 = vld [vmem:[#allocation5 + $0x1398] ss:$52 sps:$4 sm:$0xff]   ;;  %v15240_v14 = vld [vmem:[#allocation5 + $0x1390] ss:$52 sps:$4 sm:$0xff]  }
 0x1ca   :  { %4563 = vmatpush1.bf16.msra.mxu0 %v15159_v15  ;;  %4727 = vmatpush1.bf16.msra.mxu1 %v15162_v17  ;;  %v15245_v15 = vld [vmem:[#allocation5 + $0x24] ss:$52 sps:$4 sm:$0xff]   ;;  %v15248_v17 = vld [vmem:[#allocation5 + $0x2c] ss:$52 sps:$4 sm:$0xff]  }
 0x1cb   :  { %4564 = vmatprep.subr.bf16.mxu0 %v15167_v18  ;;  %4728 = vmatprep.subr.bf16.mxu1 %v15170_v19  ;;  %v15243_v18 = vld [vmem:[#allocation5 + $0x20] ss:$52 sps:$4 sm:$0xff]   ;;  %v15246_v19 = vld [vmem:[#allocation5 + $0x28] ss:$52 sps:$4 sm:$0xff]  }
 0x1ce   :  { %4565 = vmatpush1.bf16.msra.mxu0 %v15165_v21  ;;  %4729 = vmatpush1.bf16.msra.mxu1 %v15168_v22  ;;  %v15251_v21 = vld [vmem:[#allocation5 + $0x8c] ss:$52 sps:$4 sm:$0xff]   ;;  %v15254_v22 = vld [vmem:[#allocation5 + $0x94] ss:$52 sps:$4 sm:$0xff]  }
 0x1cf   :  { %4566 = vmatprep.subr.bf16.mxu0 %v15173_v23  ;;  %4730 = vmatprep.subr.bf16.mxu1 %v15176_v25  ;;  %v15249_v23 = vld [vmem:[#allocation5 + $0x88] ss:$52 sps:$4 sm:$0xff]   ;;  %v15252_v25 = vld [vmem:[#allocation5 + $0x90] ss:$52 sps:$4 sm:$0xff]  }
 0x1d2   :  { %4567 = vmatpush1.bf16.msra.mxu0 %v15171_v27  ;;  %4731 = vmatpush1.bf16.msra.mxu1 %v15174_v28  ;;  %v15257_v27 = vld [vmem:[#allocation5 + $0xf4] ss:$52 sps:$4 sm:$0xff]   ;;  %v15260_v28 = vld [vmem:[#allocation5 + $0xfc] ss:$52 sps:$4 sm:$0xff]  }
 0x1d3   :  { %4568 = vmatprep.subr.bf16.mxu0 %v15179_v9  ;;  %4732 = vmatprep.subr.bf16.mxu1 %v15182_v30  ;;  %v15255_v9 = vld [vmem:[#allocation5 + $0xf0] ss:$52 sps:$4 sm:$0xff]   ;;  %v15258_v30 = vld [vmem:[#allocation5 + $0xf8] ss:$52 sps:$4 sm:$0xff]  }
 0x1d6   :  { %4569 = vmatpush1.bf16.msra.mxu0 %v15177_v31  ;;  %4733 = vmatpush1.bf16.msra.mxu1 %v15180_v32  ;;  %v15263_v31 = vld [vmem:[#allocation5 + $0x15c] ss:$52 sps:$4 sm:$0xff]   ;;  %v15266_v32 = vld [vmem:[#allocation5 + $0x164] ss:$52 sps:$4 sm:$0xff]  }
 0x1d7   :  { %4570 = vmatprep.subr.bf16.mxu0 %v15185_v33  ;;  %4734 = vmatprep.subr.bf16.mxu1 %v15188_v35 }
 0x1da   :  { %4571 = vmatpush1.bf16.msra.mxu0 %v15183_v37  ;;  %4735 = vmatpush1.bf16.msra.mxu1 %v15186_v38 }
 0x1db   :  { %4572 = vmatprep.subr.bf16.mxu0 %v15191_v39  ;;  %4736 = vmatprep.subr.bf16.mxu1 %v15194_v40 }
 0x1de   :  { %4573 = vmatpush1.bf16.msra.mxu0 %v15189_v41  ;;  %4737 = vmatpush1.bf16.msra.mxu1 %v15192_v29  ;;  %v15261_v41 = vld [vmem:[#allocation5 + $0x158] ss:$52 sps:$4 sm:$0xff]   ;;  %v15264_v29 = vld [vmem:[#allocation5 + $0x160] ss:$52 sps:$4 sm:$0xff]  }
 0x1df   :  { %4574 = vmatprep.subr.bf16.mxu0 %v15197_v45  ;;  %4738 = vmatprep.subr.bf16.mxu1 %v15200_v46 }
 0x1e2   :  { %4575 = vmatpush1.bf16.msra.mxu0 %v15195_v47  ;;  %4739 = vmatpush1.bf16.msra.mxu1 %v15198_v48  ;;  %v15269_v47 = vld [vmem:[#allocation5 + $0x1c4] ss:$52 sps:$4 sm:$0xff]   ;;  %v15272_v48 = vld [vmem:[#allocation5 + $0x1cc] ss:$52 sps:$4 sm:$0xff]  }
 0x1e3   :  { %4576 = vmatprep.subr.bf16.mxu0 %v15203_v26  ;;  %4740 = vmatprep.subr.bf16.mxu1 %v15206_v50  ;;  %v15267_v26 = vld [vmem:[#allocation5 + $0x1c0] ss:$52 sps:$4 sm:$0xff]   ;;  %v15270_v50 = vld [vmem:[#allocation5 + $0x1c8] ss:$52 sps:$4 sm:$0xff]  }
 0x1e6   :  { %4577 = vmatpush1.bf16.msra.mxu0 %v15201_v51  ;;  %4741 = vmatpush1.bf16.msra.mxu1 %v15204_v52  ;;  %v15275_v51 = vld [vmem:[#allocation5 + $0x22c] ss:$52 sps:$4 sm:$0xff]   ;;  %v15278_v52 = vld [vmem:[#allocation5 + $0x234] ss:$52 sps:$4 sm:$0xff]  }
 0x1e7   :  { %4578 = vmatprep.subr.bf16.mxu0 %v15209_v53  ;;  %4742 = vmatprep.subr.bf16.mxu1 %v15212_v54  ;;  %v15273_v53 = vld [vmem:[#allocation5 + $0x228] ss:$52 sps:$4 sm:$0xff]   ;;  %v15276_v54 = vld [vmem:[#allocation5 + $0x230] ss:$52 sps:$4 sm:$0xff]  }
 0x1ea   :  { %4579 = vmatpush1.bf16.msra.mxu0 %v15207_v55  ;;  %4743 = vmatpush1.bf16.msra.mxu1 %v15210_v56  ;;  %v15281_v55 = vld [vmem:[#allocation5 + $0x294] ss:$52 sps:$4 sm:$0xff]   ;;  %v15284_v56 = vld [vmem:[#allocation5 + $0x29c] ss:$52 sps:$4 sm:$0xff]  }
 0x1eb   :  { %4580 = vmatprep.subr.bf16.mxu0 %v15215_v57  ;;  %4744 = vmatprep.subr.bf16.mxu1 %v15218_v58  ;;  %v15279_v57 = vld [vmem:[#allocation5 + $0x290] ss:$52 sps:$4 sm:$0xff]   ;;  %v15282_v58 = vld [vmem:[#allocation5 + $0x298] ss:$52 sps:$4 sm:$0xff]  }
 0x1ee   :  { %4581 = vmatpush1.bf16.msra.mxu0 %v15213_v59  ;;  %4745 = vmatpush1.bf16.msra.mxu1 %v15216_v61  ;;  %v15287_v59 = vld [vmem:[#allocation5 + $0x2fc] ss:$52 sps:$4 sm:$0xff]   ;;  %v15290_v61 = vld [vmem:[#allocation5 + $0x304] ss:$52 sps:$4 sm:$0xff]  }
 0x1ef   :  { %4582 = vmatprep.subr.bf16.mxu0 %v15221_v62  ;;  %4746 = vmatprep.subr.bf16.mxu1 %v15224_v63  ;;  %v15285_v62 = vld [vmem:[#allocation5 + $0x2f8] ss:$52 sps:$4 sm:$0xff]   ;;  %v15288_v63 = vld [vmem:[#allocation5 + $0x300] ss:$52 sps:$4 sm:$0xff]  }
 0x1f2   :  { %4583 = vmatpush1.bf16.msra.mxu0 %v15219_v0  ;;  %4747 = vmatpush1.bf16.msra.mxu1 %v15222_v1  ;;  %v15293_v0 = vld [vmem:[#allocation5 + $0x364] ss:$52 sps:$4 sm:$0xff]   ;;  %v15296_v1 = vld [vmem:[#allocation5 + $0x36c] ss:$52 sps:$4 sm:$0xff]  }
 0x1f3   :  { %4584 = vmatprep.subr.bf16.mxu0 %v15227_v2  ;;  %4748 = vmatprep.subr.bf16.mxu1 %v15230_v3  ;;  %v15291_v2 = vld [vmem:[#allocation5 + $0x360] ss:$52 sps:$4 sm:$0xff]   ;;  %v15294_v3 = vld [vmem:[#allocation5 + $0x368] ss:$52 sps:$4 sm:$0xff]  }
 0x1f6   :  { %4585 = vmatpush1.bf16.msra.mxu0 %v15225_v4  ;;  %4749 = vmatpush1.bf16.msra.mxu1 %v15228_v5  ;;  %v15299_v4 = vld [vmem:[#allocation5 + $0x3cc] ss:$52 sps:$4 sm:$0xff]   ;;  %v15302_v5 = vld [vmem:[#allocation5 + $0x3d4] ss:$52 sps:$4 sm:$0xff]  }
 0x1f7   :  { %4586 = vmatprep.subr.bf16.mxu0 %v15233_v6  ;;  %4750 = vmatprep.subr.bf16.mxu1 %v15236_v7  ;;  %v15297_v6 = vld [vmem:[#allocation5 + $0x3c8] ss:$52 sps:$4 sm:$0xff]   ;;  %v15300_v7 = vld [vmem:[#allocation5 + $0x3d0] ss:$52 sps:$4 sm:$0xff]  }
 0x1fa   :  { %4587 = vmatpush1.bf16.msra.mxu0 %v15231_v8  ;;  %4751 = vmatpush1.bf16.msra.mxu1 %v15234_v10  ;;  %v15305_v8 = vld [vmem:[#allocation5 + $0x434] ss:$52 sps:$4 sm:$0xff]   ;;  %v15308_v10 = vld [vmem:[#allocation5 + $0x43c] ss:$52 sps:$4 sm:$0xff]  }
 0x1fb   :  { %4761 = vmatprep.subr.bf16.mxu1 %v15239_v11  ;;  %4597 = vmatprep.subr.bf16.mxu0 %v15242_v12  ;;  %v15303_v11 = vld [vmem:[#allocation5 + $0x430] ss:$52 sps:$4 sm:$0xff]   ;;  %v15306_v12 = vld [vmem:[#allocation5 + $0x438] ss:$52 sps:$4 sm:$0xff]  }
 0x1fd   :  { %4589 = vmatmul.mubr.bf16.vlgmr.msra.gmra.mrb[4].mxu0 %v17188_v36  ;;  %4753 = vmatmul.mubr.bf16.vlgmr.msra.gmra.mrb[4].mxu1 %v17188_v36 }
 0x1fe   :  { %4762 = vmatpush1.bf16.msra.mxu1 %v15237_v13  ;;  %4598 = vmatpush1.bf16.msra.mxu0 %v15240_v14  ;;  %v15311_v13 = vld [vmem:[#allocation5 + $0x49c] ss:$52 sps:$4 sm:$0xff]   ;;  %v15314_v14 = vld [vmem:[#allocation5 + $0x4a4] ss:$52 sps:$4 sm:$0xff]  }
 0x1ff   :  { %4629 = vmatprep.mubr.bf16.mxu0 %v17029_v42  ;;  %4793 = vmatprep.mubr.bf16.mxu1 %v17029_v42 }
 0x200   :  { %4802 = vmatprep.subr.bf16.mxu0 %v15245_v15  ;;  %4966 = vmatprep.subr.bf16.mxu1 %v15248_v17  ;;  %v15309_v15 = vld [vmem:[#allocation5 + $0x498] ss:$52 sps:$4 sm:$0xff]   ;;  %v15312_v17 = vld [vmem:[#allocation5 + $0x4a0] ss:$52 sps:$4 sm:$0xff]  }
 0x209   :  { %13231 = vmatmul.mubr.msk.bf16.vlgmr.msra.gmra.mrb[4].mxu0 %vm4142_vm0, %v17197_v44  ;;  %13232 = vmatmul.mubr.msk.bf16.vlgmr.msra.gmra.mrb[4].mxu1 %vm4142_vm0, %v17197_v44 }
 0x20a   :  { %4803 = vmatpush1.bf16.msra.mxu0 %v15243_v18  ;;  %4967 = vmatpush1.bf16.msra.mxu1 %v15246_v19  ;;  %v15317_v18 = vld [vmem:[#allocation5 + $0x504] ss:$52 sps:$4 sm:$0xff]   ;;  %v15320_v19 = vld [vmem:[#allocation5 + $0x50c] ss:$52 sps:$4 sm:$0xff]  }
 0x20b   :  { %4804 = vmatprep.subr.bf16.mxu0 %v15251_v21  ;;  %4968 = vmatprep.subr.bf16.mxu1 %v15254_v22  ;;  %v15315_v21 = vld [vmem:[#allocation5 + $0x500] ss:$52 sps:$4 sm:$0xff]   ;;  %v15318_v22 = vld [vmem:[#allocation5 + $0x508] ss:$52 sps:$4 sm:$0xff]  }
 0x20c   :  { %4834 = vmatprep.mubr.bf16.mxu0 %v17151_v60  ;;  %4998 = vmatprep.mubr.bf16.mxu1 %v17151_v60 }
 0x20e   :  { %4805 = vmatpush1.bf16.msra.mxu0 %v15249_v23  ;;  %4969 = vmatpush1.bf16.msra.mxu1 %v15252_v25  ;;  %v15323_v23 = vld [vmem:[#allocation5 + $0x56c] ss:$52 sps:$4 sm:$0xff]   ;;  %v15326_v25 = vld [vmem:[#allocation5 + $0x574] ss:$52 sps:$4 sm:$0xff]  }
 0x20f   :  { %4806 = vmatprep.subr.bf16.mxu0 %v15257_v27  ;;  %4970 = vmatprep.subr.bf16.mxu1 %v15260_v28  ;;  %v15321_v27 = vld [vmem:[#allocation5 + $0x568] ss:$52 sps:$4 sm:$0xff]   ;;  %v15324_v28 = vld [vmem:[#allocation5 + $0x570] ss:$52 sps:$4 sm:$0xff]  }
 0x210   :  { %v17223_v33 = vpop.f32.mrb[0].mxu0  ;;  %v17225_v35 = vpop.f32.mrb[0].mxu1 }
 0x211   :  { %v17227_v37 = vpop.f32.mrb[1].mxu0  ;;  %v17229_v38 = vpop.f32.mrb[1].mxu1 }
 0x212   :  { %4807 = vmatpush1.bf16.msra.mxu0 %v15255_v9  ;;  %4971 = vmatpush1.bf16.msra.mxu1 %v15258_v30  ;;  %v4307_v39 = vpop.f32.mrb[2].mxu0  ;;  %v4471_v40 = vpop.f32.mrb[2].mxu1  ;;  %v15329_v9 = vld [vmem:[#allocation5 + $0x5d4] ss:$52 sps:$4 sm:$0xff]   ;;  %v15332_v30 = vld [vmem:[#allocation5 + $0x5dc] ss:$52 sps:$4 sm:$0xff]  }
 0x213   :  { %v4308_v45 = vpop.f32.mrb[3].mxu0  ;;  %v4472_v46 = vpop.f32.mrb[3].mxu1  ;;  %4808 = vmatprep.subr.bf16.mxu0 %v15263_v31  ;;  %4972 = vmatprep.subr.bf16.mxu1 %v15266_v32  ;;  %v15327_v31 = vld [vmem:[#allocation5 + $0x5d0] ss:$52 sps:$4 sm:$0xff]   ;;  %v15330_v32 = vld [vmem:[#allocation5 + $0x5d8] ss:$52 sps:$4 sm:$0xff]  }
 0x214   :  { %v15335_v39 = vld [vmem:[#allocation5 + $0x63c] ss:$52 sps:$4 sm:$0xff]   ;;  %v15338_v40 = vld [vmem:[#allocation5 + $0x644] ss:$52 sps:$4 sm:$0xff]   ;;  %v15344_v46 = vld [vmem:[#allocation5 + $0x6ac] ss:$52 sps:$4 sm:$0xff]  }
 0x215   :  { %v15341_v45 = vld [vmem:[#allocation5 + $0x6a4] ss:$52 sps:$4 sm:$0xff]  }
 0x216   :  { %4809 = vmatpush1.bf16.msra.mxu0 %v15261_v41  ;;  %4973 = vmatpush1.bf16.msra.mxu1 %v15264_v29  ;;  %v15333_v41 = vld [vmem:[#allocation5 + $0x638] ss:$52 sps:$4 sm:$0xff]   ;;  %v15336_v29 = vld [vmem:[#allocation5 + $0x640] ss:$52 sps:$4 sm:$0xff]  }
 0x217   :  { %4810 = vmatprep.subr.bf16.mxu0 %v15269_v47  ;;  %4974 = vmatprep.subr.bf16.mxu1 %v15272_v48  ;;  %v15339_v47 = vld [vmem:[#allocation5 + $0x6a0] ss:$52 sps:$4 sm:$0xff]   ;;  %v15342_v48 = vld [vmem:[#allocation5 + $0x6a8] ss:$52 sps:$4 sm:$0xff]  }
 0x21a   :  { %4811 = vmatpush1.bf16.msra.mxu0 %v15267_v26  ;;  %4975 = vmatpush1.bf16.msra.mxu1 %v15270_v50  ;;  %v15347_v26 = vld [vmem:[#allocation5 + $0x70c] ss:$52 sps:$4 sm:$0xff]   ;;  %v15350_v50 = vld [vmem:[#allocation5 + $0x714] ss:$52 sps:$4 sm:$0xff]  }
 0x21b   :  { %4812 = vmatprep.subr.bf16.mxu0 %v15275_v51  ;;  %4976 = vmatprep.subr.bf16.mxu1 %v15278_v52  ;;  %v15345_v51 = vld [vmem:[#allocation5 + $0x708] ss:$52 sps:$4 sm:$0xff]   ;;  %v15348_v52 = vld [vmem:[#allocation5 + $0x710] ss:$52 sps:$4 sm:$0xff]  }
 0x21e   :  { %4813 = vmatpush1.bf16.msra.mxu0 %v15273_v53  ;;  %4977 = vmatpush1.bf16.msra.mxu1 %v15276_v54  ;;  %v15353_v53 = vld [vmem:[#allocation5 + $0x774] ss:$52 sps:$4 sm:$0xff]   ;;  %v15356_v54 = vld [vmem:[#allocation5 + $0x77c] ss:$52 sps:$4 sm:$0xff]  }
 0x21f   :  { %4814 = vmatprep.subr.bf16.mxu0 %v15281_v55  ;;  %4978 = vmatprep.subr.bf16.mxu1 %v15284_v56  ;;  %v15351_v55 = vld [vmem:[#allocation5 + $0x770] ss:$52 sps:$4 sm:$0xff]   ;;  %v15354_v56 = vld [vmem:[#allocation5 + $0x778] ss:$52 sps:$4 sm:$0xff]  }
 0x222   :  { %4815 = vmatpush1.bf16.msra.mxu0 %v15279_v57  ;;  %4979 = vmatpush1.bf16.msra.mxu1 %v15282_v58  ;;  %v15359_v57 = vld [vmem:[#allocation5 + $0x7dc] ss:$52 sps:$4 sm:$0xff]   ;;  %v15362_v58 = vld [vmem:[#allocation5 + $0x7e4] ss:$52 sps:$4 sm:$0xff]  }
 0x223   :  { %4816 = vmatprep.subr.bf16.mxu0 %v15287_v59  ;;  %4980 = vmatprep.subr.bf16.mxu1 %v15290_v61  ;;  %v15357_v59 = vld [vmem:[#allocation5 + $0x7d8] ss:$52 sps:$4 sm:$0xff]   ;;  %v15360_v61 = vld [vmem:[#allocation5 + $0x7e0] ss:$52 sps:$4 sm:$0xff]  }
 0x226   :  { %4817 = vmatpush1.bf16.msra.mxu0 %v15285_v62  ;;  %4981 = vmatpush1.bf16.msra.mxu1 %v15288_v63  ;;  %v15365_v62 = vld [vmem:[#allocation5 + $0x844] ss:$52 sps:$4 sm:$0xff]   ;;  %v15368_v63 = vld [vmem:[#allocation5 + $0x84c] ss:$52 sps:$4 sm:$0xff]  }
 0x227   :  { %4818 = vmatprep.subr.bf16.mxu0 %v15293_v0  ;;  %4982 = vmatprep.subr.bf16.mxu1 %v15296_v1  ;;  %v15363_v0 = vld [vmem:[#allocation5 + $0x840] ss:$52 sps:$4 sm:$0xff]   ;;  %v15366_v1 = vld [vmem:[#allocation5 + $0x848] ss:$52 sps:$4 sm:$0xff]  }
 0x22a   :  { %4819 = vmatpush1.bf16.msra.mxu0 %v15291_v2  ;;  %4983 = vmatpush1.bf16.msra.mxu1 %v15294_v3  ;;  %v15371_v2 = vld [vmem:[#allocation5 + $0x8ac] ss:$52 sps:$4 sm:$0xff]   ;;  %v15374_v3 = vld [vmem:[#allocation5 + $0x8b4] ss:$52 sps:$4 sm:$0xff]  }
 0x22b   :  { %4820 = vmatprep.subr.bf16.mxu0 %v15299_v4  ;;  %4984 = vmatprep.subr.bf16.mxu1 %v15302_v5  ;;  %v15369_v4 = vld [vmem:[#allocation5 + $0x8a8] ss:$52 sps:$4 sm:$0xff]   ;;  %v15372_v5 = vld [vmem:[#allocation5 + $0x8b0] ss:$52 sps:$4 sm:$0xff]  }
 0x22e   :  { %4821 = vmatpush1.bf16.msra.mxu0 %v15297_v6  ;;  %4985 = vmatpush1.bf16.msra.mxu1 %v15300_v7  ;;  %v15377_v6 = vld [vmem:[#allocation5 + $0x914] ss:$52 sps:$4 sm:$0xff]   ;;  %v15380_v7 = vld [vmem:[#allocation5 + $0x91c] ss:$52 sps:$4 sm:$0xff]  }
 0x22f   :  { %4822 = vmatprep.subr.bf16.mxu0 %v15305_v8  ;;  %4986 = vmatprep.subr.bf16.mxu1 %v15308_v10  ;;  %v15375_v8 = vld [vmem:[#allocation5 + $0x910] ss:$52 sps:$4 sm:$0xff]   ;;  %v15378_v10 = vld [vmem:[#allocation5 + $0x918] ss:$52 sps:$4 sm:$0xff]  }
 0x232   :  { %4823 = vmatpush1.bf16.msra.mxu0 %v15303_v11  ;;  %4987 = vmatpush1.bf16.msra.mxu1 %v15306_v12  ;;  %v15383_v11 = vld [vmem:[#allocation5 + $0x97c] ss:$52 sps:$4 sm:$0xff]   ;;  %v15386_v12 = vld [vmem:[#allocation5 + $0x984] ss:$52 sps:$4 sm:$0xff]  }
 0x233   :  { %4824 = vmatprep.subr.bf16.mxu0 %v15311_v13  ;;  %4988 = vmatprep.subr.bf16.mxu1 %v15314_v14  ;;  %v15381_v13 = vld [vmem:[#allocation5 + $0x978] ss:$52 sps:$4 sm:$0xff]   ;;  %v15384_v14 = vld [vmem:[#allocation5 + $0x980] ss:$52 sps:$4 sm:$0xff]  }
 0x236   :  { %4825 = vmatpush1.bf16.msra.mxu0 %v15309_v15  ;;  %4989 = vmatpush1.bf16.msra.mxu1 %v15312_v17  ;;  %v15389_v15 = vld [vmem:[#allocation5 + $0x9e4] ss:$52 sps:$4 sm:$0xff]   ;;  %v15392_v17 = vld [vmem:[#allocation5 + $0x9ec] ss:$52 sps:$4 sm:$0xff]  }
 0x237   :  { %4826 = vmatprep.subr.bf16.mxu0 %v15317_v18  ;;  %4990 = vmatprep.subr.bf16.mxu1 %v15320_v19  ;;  %v15387_v18 = vld [vmem:[#allocation5 + $0x9e0] ss:$52 sps:$4 sm:$0xff]   ;;  %v15390_v19 = vld [vmem:[#allocation5 + $0x9e8] ss:$52 sps:$4 sm:$0xff]  }
 0x23a   :  { %4827 = vmatpush1.bf16.msra.mxu0 %v15315_v21  ;;  %4991 = vmatpush1.bf16.msra.mxu1 %v15318_v22  ;;  %v15395_v21 = vld [vmem:[#allocation5 + $0xa4c] ss:$52 sps:$4 sm:$0xff]   ;;  %v15398_v22 = vld [vmem:[#allocation5 + $0xa54] ss:$52 sps:$4 sm:$0xff]  }
 0x23b   :  { %4828 = vmatprep.subr.bf16.mxu0 %v15323_v23  ;;  %4992 = vmatprep.subr.bf16.mxu1 %v15326_v25  ;;  %v15393_v23 = vld [vmem:[#allocation5 + $0xa48] ss:$52 sps:$4 sm:$0xff]   ;;  %v15396_v25 = vld [vmem:[#allocation5 + $0xa50] ss:$52 sps:$4 sm:$0xff]  }
 0x23e   :  { %4829 = vmatpush1.bf16.msra.mxu0 %v15321_v27  ;;  %4993 = vmatpush1.bf16.msra.mxu1 %v15324_v28  ;;  %v15401_v27 = vld [vmem:[#allocation5 + $0xab4] ss:$52 sps:$4 sm:$0xff]   ;;  %v15404_v28 = vld [vmem:[#allocation5 + $0xabc] ss:$52 sps:$4 sm:$0xff]  }
 0x23f   :  { %4830 = vmatprep.subr.bf16.mxu0 %v15329_v9  ;;  %4994 = vmatprep.subr.bf16.mxu1 %v15332_v30  ;;  %v15399_v9 = vld [vmem:[#allocation5 + $0xab0] ss:$52 sps:$4 sm:$0xff]   ;;  %v15402_v30 = vld [vmem:[#allocation5 + $0xab8] ss:$52 sps:$4 sm:$0xff]  }
 0x242   :  { %4831 = vmatpush1.bf16.msra.mxu0 %v15327_v31  ;;  %4995 = vmatpush1.bf16.msra.mxu1 %v15330_v32  ;;  %v15407_v31 = vld [vmem:[#allocation5 + $0xb1c] ss:$52 sps:$4 sm:$0xff]   ;;  %v15410_v32 = vld [vmem:[#allocation5 + $0xb24] ss:$52 sps:$4 sm:$0xff]  }
 0x243   :  { %4832 = vmatprep.subr.bf16.mxu0 %v15335_v39  ;;  %4996 = vmatprep.subr.bf16.mxu1 %v15338_v40  ;;  %v15405_v39 = vld [vmem:[#allocation5 + $0xb18] ss:$52 sps:$4 sm:$0xff]   ;;  %v15408_v40 = vld [vmem:[#allocation5 + $0xb20] ss:$52 sps:$4 sm:$0xff]  }
 0x246   :  { %4833 = vmatpush1.bf16.msra.mxu0 %v15333_v41  ;;  %4997 = vmatpush1.bf16.msra.mxu1 %v15336_v29  ;;  %v15413_v41 = vld [vmem:[#allocation5 + $0xb84] ss:$52 sps:$4 sm:$0xff]   ;;  %v15416_v29 = vld [vmem:[#allocation5 + $0xb8c] ss:$52 sps:$4 sm:$0xff]  }
 0x247   :  { %4843 = vmatprep.subr.bf16.mxu0 %v15341_v45  ;;  %5007 = vmatprep.subr.bf16.mxu1 %v15344_v46  ;;  %v15411_v45 = vld [vmem:[#allocation5 + $0xb80] ss:$52 sps:$4 sm:$0xff]   ;;  %v15414_v46 = vld [vmem:[#allocation5 + $0xb88] ss:$52 sps:$4 sm:$0xff]  }
 0x249   :  { %4835 = vmatmul.mubr.bf16.vlgmr.msra.gmra.mrb[8].mxu0 %v17160_v16  ;;  %4999 = vmatmul.mubr.bf16.vlgmr.msra.gmra.mrb[8].mxu1 %v17160_v16 }
 0x24a   :  { %4844 = vmatpush1.bf16.msra.mxu0 %v15339_v47  ;;  %5008 = vmatpush1.bf16.msra.mxu1 %v15342_v48  ;;  %v15419_v47 = vld [vmem:[#allocation5 + $0xbec] ss:$52 sps:$4 sm:$0xff]   ;;  %v15422_v48 = vld [vmem:[#allocation5 + $0xbf4] ss:$52 sps:$4 sm:$0xff]  }
 0x24b   :  { %4845 = vmatprep.subr.bf16.mxu0 %v15347_v26  ;;  %5009 = vmatprep.subr.bf16.mxu1 %v15350_v50  ;;  %v15417_v26 = vld [vmem:[#allocation5 + $0xbe8] ss:$52 sps:$4 sm:$0xff]   ;;  %v15420_v50 = vld [vmem:[#allocation5 + $0xbf0] ss:$52 sps:$4 sm:$0xff]  }
 0x24c   :  { %4875 = vmatprep.mubr.bf16.mxu0 %v17162_v20  ;;  %5039 = vmatprep.mubr.bf16.mxu1 %v17162_v20 }
 0x24e   :  { %4846 = vmatpush1.bf16.msra.mxu0 %v15345_v51  ;;  %5010 = vmatpush1.bf16.msra.mxu1 %v15348_v52  ;;  %v15425_v51 = vld [vmem:[#allocation5 + $0xc54] ss:$52 sps:$4 sm:$0xff]   ;;  %v15428_v52 = vld [vmem:[#allocation5 + $0xc5c] ss:$52 sps:$4 sm:$0xff]  }
 0x24f   :  { %4847 = vmatprep.subr.bf16.mxu0 %v15353_v53  ;;  %5011 = vmatprep.subr.bf16.mxu1 %v15356_v54  ;;  %v15423_v53 = vld [vmem:[#allocation5 + $0xc50] ss:$52 sps:$4 sm:$0xff]   ;;  %v15426_v54 = vld [vmem:[#allocation5 + $0xc58] ss:$52 sps:$4 sm:$0xff]  }
 0x252   :  { %4848 = vmatpush1.bf16.msra.mxu0 %v15351_v55  ;;  %5012 = vmatpush1.bf16.msra.mxu1 %v15354_v56  ;;  %v15431_v55 = vld [vmem:[#allocation5 + $0xcbc] ss:$52 sps:$4 sm:$0xff]   ;;  %v15434_v56 = vld [vmem:[#allocation5 + $0xcc4] ss:$52 sps:$4 sm:$0xff]  }
 0x253   :  { %4849 = vmatprep.subr.bf16.mxu0 %v15359_v57  ;;  %5013 = vmatprep.subr.bf16.mxu1 %v15362_v58  ;;  %v15429_v57 = vld [vmem:[#allocation5 + $0xcb8] ss:$52 sps:$4 sm:$0xff]   ;;  %v15432_v58 = vld [vmem:[#allocation5 + $0xcc0] ss:$52 sps:$4 sm:$0xff]  }
 0x256   :  { %4850 = vmatpush1.bf16.msra.mxu0 %v15357_v59  ;;  %5014 = vmatpush1.bf16.msra.mxu1 %v15360_v61  ;;  %v15437_v59 = vld [vmem:[#allocation5 + $0xd24] ss:$52 sps:$4 sm:$0xff]   ;;  %v15440_v61 = vld [vmem:[#allocation5 + $0xd2c] ss:$52 sps:$4 sm:$0xff]  }
 0x257   :  { %4851 = vmatprep.subr.bf16.mxu0 %v15365_v62  ;;  %5015 = vmatprep.subr.bf16.mxu1 %v15368_v63  ;;  %v15435_v62 = vld [vmem:[#allocation5 + $0xd20] ss:$52 sps:$4 sm:$0xff]   ;;  %v15438_v63 = vld [vmem:[#allocation5 + $0xd28] ss:$52 sps:$4 sm:$0xff]  }
 0x25a   :  { %4852 = vmatpush1.bf16.msra.mxu0 %v15363_v0  ;;  %5016 = vmatpush1.bf16.msra.mxu1 %v15366_v1  ;;  %v15443_v0 = vld [vmem:[#allocation5 + $0xd8c] ss:$52 sps:$4 sm:$0xff]   ;;  %v15446_v1 = vld [vmem:[#allocation5 + $0xd94] ss:$52 sps:$4 sm:$0xff]  }
 0x25b   :  { %4853 = vmatprep.subr.bf16.mxu0 %v15371_v2  ;;  %5017 = vmatprep.subr.bf16.mxu1 %v15374_v3  ;;  %v15441_v2 = vld [vmem:[#allocation5 + $0xd88] ss:$52 sps:$4 sm:$0xff]   ;;  %v15444_v3 = vld [vmem:[#allocation5 + $0xd90] ss:$52 sps:$4 sm:$0xff]  }
 0x25e   :  { %4854 = vmatpush1.bf16.msra.mxu0 %v15369_v4  ;;  %5018 = vmatpush1.bf16.msra.mxu1 %v15372_v5  ;;  %v15449_v4 = vld [vmem:[#allocation5 + $0xdf4] ss:$52 sps:$4 sm:$0xff]   ;;  %v15452_v5 = vld [vmem:[#allocation5 + $0xdfc] ss:$52 sps:$4 sm:$0xff]  }
 0x25f   :  { %4855 = vmatprep.subr.bf16.mxu0 %v15377_v6  ;;  %5019 = vmatprep.subr.bf16.mxu1 %v15380_v7  ;;  %v15447_v6 = vld [vmem:[#allocation5 + $0xdf0] ss:$52 sps:$4 sm:$0xff]   ;;  %v15450_v7 = vld [vmem:[#allocation5 + $0xdf8] ss:$52 sps:$4 sm:$0xff]  }
 0x262   :  { %4856 = vmatpush1.bf16.msra.mxu0 %v15375_v8  ;;  %5020 = vmatpush1.bf16.msra.mxu1 %v15378_v10  ;;  %v15455_v8 = vld [vmem:[#allocation5 + $0xe5c] ss:$52 sps:$4 sm:$0xff]   ;;  %v15458_v10 = vld [vmem:[#allocation5 + $0xe64] ss:$52 sps:$4 sm:$0xff]  }
 0x263   :  { %4857 = vmatprep.subr.bf16.mxu0 %v15383_v11  ;;  %5021 = vmatprep.subr.bf16.mxu1 %v15386_v12  ;;  %v15453_v11 = vld [vmem:[#allocation5 + $0xe58] ss:$52 sps:$4 sm:$0xff]   ;;  %v15456_v12 = vld [vmem:[#allocation5 + $0xe60] ss:$52 sps:$4 sm:$0xff]  }
 0x266   :  { %4858 = vmatpush1.bf16.msra.mxu0 %v15381_v13  ;;  %5022 = vmatpush1.bf16.msra.mxu1 %v15384_v14  ;;  %v15461_v13 = vld [vmem:[#allocation5 + $0xec4] ss:$52 sps:$4 sm:$0xff]   ;;  %v15464_v14 = vld [vmem:[#allocation5 + $0xecc] ss:$52 sps:$4 sm:$0xff]  }
 0x267   :  { %4859 = vmatprep.subr.bf16.mxu0 %v15389_v15  ;;  %5023 = vmatprep.subr.bf16.mxu1 %v15392_v17  ;;  %v15459_v15 = vld [vmem:[#allocation5 + $0xec0] ss:$52 sps:$4 sm:$0xff]   ;;  %v15462_v17 = vld [vmem:[#allocation5 + $0xec8] ss:$52 sps:$4 sm:$0xff]  }
 0x26a   :  { %4860 = vmatpush1.bf16.msra.mxu0 %v15387_v18  ;;  %5024 = vmatpush1.bf16.msra.mxu1 %v15390_v19  ;;  %v15467_v18 = vld [vmem:[#allocation5 + $0xf2c] ss:$52 sps:$4 sm:$0xff]   ;;  %v15470_v19 = vld [vmem:[#allocation5 + $0xf34] ss:$52 sps:$4 sm:$0xff]  }
 0x26b   :  { %4861 = vmatprep.subr.bf16.mxu0 %v15395_v21  ;;  %5025 = vmatprep.subr.bf16.mxu1 %v15398_v22  ;;  %v15465_v21 = vld [vmem:[#allocation5 + $0xf28] ss:$52 sps:$4 sm:$0xff]   ;;  %v15468_v22 = vld [vmem:[#allocation5 + $0xf30] ss:$52 sps:$4 sm:$0xff]  }
 0x26e   :  { %4862 = vmatpush1.bf16.msra.mxu0 %v15393_v23  ;;  %5026 = vmatpush1.bf16.msra.mxu1 %v15396_v25  ;;  %v15473_v23 = vld [vmem:[#allocation5 + $0xf94] ss:$52 sps:$4 sm:$0xff]   ;;  %v15476_v25 = vld [vmem:[#allocation5 + $0xf9c] ss:$52 sps:$4 sm:$0xff]  }
 0x26f   :  { %4863 = vmatprep.subr.bf16.mxu0 %v15401_v27  ;;  %5027 = vmatprep.subr.bf16.mxu1 %v15404_v28  ;;  %v15471_v27 = vld [vmem:[#allocation5 + $0xf90] ss:$52 sps:$4 sm:$0xff]   ;;  %v15474_v28 = vld [vmem:[#allocation5 + $0xf98] ss:$52 sps:$4 sm:$0xff]  }
 0x272   :  { %4864 = vmatpush1.bf16.msra.mxu0 %v15399_v9  ;;  %5028 = vmatpush1.bf16.msra.mxu1 %v15402_v30  ;;  %v15479_v9 = vld [vmem:[#allocation5 + $0xffc] ss:$52 sps:$4 sm:$0xff]   ;;  %v15482_v30 = vld [vmem:[#allocation5 + $0x1004] ss:$52 sps:$4 sm:$0xff]  }
 0x273   :  { %4865 = vmatprep.subr.bf16.mxu0 %v15407_v31  ;;  %5029 = vmatprep.subr.bf16.mxu1 %v15410_v32  ;;  %v15477_v31 = vld [vmem:[#allocation5 + $0xff8] ss:$52 sps:$4 sm:$0xff]   ;;  %v15480_v32 = vld [vmem:[#allocation5 + $0x1000] ss:$52 sps:$4 sm:$0xff]  }
 0x276   :  { %4866 = vmatpush1.bf16.msra.mxu0 %v15405_v39  ;;  %5030 = vmatpush1.bf16.msra.mxu1 %v15408_v40  ;;  %v15485_v39 = vld [vmem:[#allocation5 + $0x1064] ss:$52 sps:$4 sm:$0xff]   ;;  %v15488_v40 = vld [vmem:[#allocation5 + $0x106c] ss:$52 sps:$4 sm:$0xff]  }
 0x277   :  { %4867 = vmatprep.subr.bf16.mxu0 %v15413_v41  ;;  %5031 = vmatprep.subr.bf16.mxu1 %v15416_v29  ;;  %v15483_v41 = vld [vmem:[#allocation5 + $0x1060] ss:$52 sps:$4 sm:$0xff]   ;;  %v15486_v29 = vld [vmem:[#allocation5 + $0x1068] ss:$52 sps:$4 sm:$0xff]  }
 0x27a   :  { %4868 = vmatpush1.bf16.msra.mxu0 %v15411_v45  ;;  %5032 = vmatpush1.bf16.msra.mxu1 %v15414_v46  ;;  %v15491_v45 = vld [vmem:[#allocation5 + $0x10cc] ss:$52 sps:$4 sm:$0xff]   ;;  %v15494_v46 = vld [vmem:[#allocation5 + $0x10d4] ss:$52 sps:$4 sm:$0xff]  }
 0x27b   :  { %4869 = vmatprep.subr.bf16.mxu0 %v15419_v47  ;;  %5033 = vmatprep.subr.bf16.mxu1 %v15422_v48  ;;  %v15489_v47 = vld [vmem:[#allocation5 + $0x10c8] ss:$52 sps:$4 sm:$0xff]   ;;  %v15492_v48 = vld [vmem:[#allocation5 + $0x10d0] ss:$52 sps:$4 sm:$0xff]  }
 0x27e   :  { %4870 = vmatpush1.bf16.msra.mxu0 %v15417_v26  ;;  %5034 = vmatpush1.bf16.msra.mxu1 %v15420_v50  ;;  %v15497_v26 = vld [vmem:[#allocation5 + $0x1134] ss:$52 sps:$4 sm:$0xff]   ;;  %v15500_v50 = vld [vmem:[#allocation5 + $0x113c] ss:$52 sps:$4 sm:$0xff]  }
 0x27f   :  { %4871 = vmatprep.subr.bf16.mxu0 %v15425_v51  ;;  %5035 = vmatprep.subr.bf16.mxu1 %v15428_v52  ;;  %v15495_v51 = vld [vmem:[#allocation5 + $0x1130] ss:$52 sps:$4 sm:$0xff]   ;;  %v15498_v52 = vld [vmem:[#allocation5 + $0x1138] ss:$52 sps:$4 sm:$0xff]  }
 0x282   :  { %4872 = vmatpush1.bf16.msra.mxu0 %v15423_v53  ;;  %5036 = vmatpush1.bf16.msra.mxu1 %v15426_v54  ;;  %v15503_v53 = vld [vmem:[#allocation5 + $0x119c] ss:$52 sps:$4 sm:$0xff]   ;;  %v15506_v54 = vld [vmem:[#allocation5 + $0x11a4] ss:$52 sps:$4 sm:$0xff]  }
 0x283   :  { %4873 = vmatprep.subr.bf16.mxu0 %v15431_v55  ;;  %5037 = vmatprep.subr.bf16.mxu1 %v15434_v56  ;;  %v15501_v55 = vld [vmem:[#allocation5 + $0x1198] ss:$52 sps:$4 sm:$0xff]   ;;  %v15504_v56 = vld [vmem:[#allocation5 + $0x11a0] ss:$52 sps:$4 sm:$0xff]  }
 0x286   :  { %4874 = vmatpush1.bf16.msra.mxu0 %v15429_v57  ;;  %5038 = vmatpush1.bf16.msra.mxu1 %v15432_v58  ;;  %v15509_v57 = vld [vmem:[#allocation5 + $0x1204] ss:$52 sps:$4 sm:$0xff]   ;;  %v15512_v58 = vld [vmem:[#allocation5 + $0x120c] ss:$52 sps:$4 sm:$0xff]  }
 0x287   :  { %4884 = vmatprep.subr.bf16.mxu0 %v15437_v59  ;;  %5048 = vmatprep.subr.bf16.mxu1 %v15440_v61  ;;  %v15507_v59 = vld [vmem:[#allocation5 + $0x1200] ss:$52 sps:$4 sm:$0xff]   ;;  %v15510_v61 = vld [vmem:[#allocation5 + $0x1208] ss:$52 sps:$4 sm:$0xff]  }
 0x289   :  { %4876 = vmatmul.mubr.bf16.vlgmr.msra.gmra.mrb[8].mxu0 %v17170_v24  ;;  %5040 = vmatmul.mubr.bf16.vlgmr.msra.gmra.mrb[8].mxu1 %v17170_v24 }
 0x28a   :  { %4885 = vmatpush1.bf16.msra.mxu0 %v15435_v62  ;;  %5049 = vmatpush1.bf16.msra.mxu1 %v15438_v63  ;;  %v15515_v62 = vld [vmem:[#allocation5 + $0x126c] ss:$52 sps:$4 sm:$0xff]   ;;  %v15518_v63 = vld [vmem:[#allocation5 + $0x1274] ss:$52 sps:$4 sm:$0xff]  }
 0x28b   :  { %4886 = vmatprep.subr.bf16.mxu0 %v15443_v0  ;;  %5050 = vmatprep.subr.bf16.mxu1 %v15446_v1  ;;  %v15513_v0 = vld [vmem:[#allocation5 + $0x1268] ss:$52 sps:$4 sm:$0xff]   ;;  %v15516_v1 = vld [vmem:[#allocation5 + $0x1270] ss:$52 sps:$4 sm:$0xff]  }
 0x28c   :  { %4916 = vmatprep.mubr.bf16.mxu0 %v17182_v34  ;;  %5080 = vmatprep.mubr.bf16.mxu1 %v17182_v34 }
 0x28e   :  { %4887 = vmatpush1.bf16.msra.mxu0 %v15441_v2  ;;  %5051 = vmatpush1.bf16.msra.mxu1 %v15444_v3  ;;  %v15521_v2 = vld [vmem:[#allocation5 + $0x12d4] ss:$52 sps:$4 sm:$0xff]   ;;  %v15524_v3 = vld [vmem:[#allocation5 + $0x12dc] ss:$52 sps:$4 sm:$0xff]  }
 0x28f   :  { %4888 = vmatprep.subr.bf16.mxu0 %v15449_v4  ;;  %5052 = vmatprep.subr.bf16.mxu1 %v15452_v5  ;;  %v15519_v4 = vld [vmem:[#allocation5 + $0x12d0] ss:$52 sps:$4 sm:$0xff]   ;;  %v15522_v5 = vld [vmem:[#allocation5 + $0x12d8] ss:$52 sps:$4 sm:$0xff]  }
 0x292   :  { %4889 = vmatpush1.bf16.msra.mxu0 %v15447_v6  ;;  %5053 = vmatpush1.bf16.msra.mxu1 %v15450_v7  ;;  %v15527_v6 = vld [vmem:[#allocation5 + $0x133c] ss:$52 sps:$4 sm:$0xff]   ;;  %v15530_v7 = vld [vmem:[#allocation5 + $0x1344] ss:$52 sps:$4 sm:$0xff]  }
 0x293   :  { %4890 = vmatprep.subr.bf16.mxu0 %v15455_v8  ;;  %5054 = vmatprep.subr.bf16.mxu1 %v15458_v10  ;;  %v15525_v8 = vld [vmem:[#allocation5 + $0x1338] ss:$52 sps:$4 sm:$0xff]   ;;  %v15528_v10 = vld [vmem:[#allocation5 + $0x1340] ss:$52 sps:$4 sm:$0xff]  }
 0x296   :  { %4891 = vmatpush1.bf16.msra.mxu0 %v15453_v11  ;;  %5055 = vmatpush1.bf16.msra.mxu1 %v15456_v12  ;;  %v15533_v11 = vld [vmem:[#allocation5 + $0x13ac] ss:$52 sps:$4 sm:$0xff]   ;;  %v15536_v12 = vld [vmem:[#allocation5 + $0x13a4] ss:$52 sps:$4 sm:$0xff]  }
 0x297   :  { %4892 = vmatprep.subr.bf16.mxu0 %v15461_v13  ;;  %5056 = vmatprep.subr.bf16.mxu1 %v15464_v14  ;;  %v15531_v13 = vld [vmem:[#allocation5 + $0x13a8] ss:$52 sps:$4 sm:$0xff]   ;;  %v15534_v14 = vld [vmem:[#allocation5 + $0x13a0] ss:$52 sps:$4 sm:$0xff]  }
 0x29a   :  { %4893 = vmatpush1.bf16.msra.mxu0 %v15459_v15  ;;  %5057 = vmatpush1.bf16.msra.mxu1 %v15462_v17  ;;  %v15537_v15 = vld [vmem:[#allocation5 + $0x370] ss:$52 sps:$4 sm:$0xff]  }
 0x29b   :  { %4894 = vmatprep.subr.bf16.mxu0 %v15467_v18  ;;  %5058 = vmatprep.subr.bf16.mxu1 %v15470_v19  ;;  %v15538_v17 = vld [vmem:[#allocation5 + $0x9f0] ss:$52 sps:$4 sm:$0xff]  }
 0x29c   :  { %v15539_v18 = vld [vmem:[#allocation5 + $0x30] ss:$52 sps:$4 sm:$0xff]  }
 0x29d   :  { %v15540_v19 = vld [vmem:[#allocation5 + $0x6b0] ss:$52 sps:$4 sm:$0xff]  }
 0x29e   :  { %4895 = vmatpush1.bf16.msra.mxu0 %v15465_v21  ;;  %5059 = vmatpush1.bf16.msra.mxu1 %v15468_v22  ;;  %v15541_v21 = vld [vmem:[#allocation5 + $0x3d8] ss:$52 sps:$4 sm:$0xff]  }
 0x29f   :  { %4896 = vmatprep.subr.bf16.mxu0 %v15473_v23  ;;  %5060 = vmatprep.subr.bf16.mxu1 %v15476_v25  ;;  %v15542_v22 = vld [vmem:[#allocation5 + $0xa58] ss:$52 sps:$4 sm:$0xff]  }
 0x2a0   :  { %v15543_v23 = vld [vmem:[#allocation5 + $0x98] ss:$52 sps:$4 sm:$0xff]  }
 0x2a1   :  { %v15544_v25 = vld [vmem:[#allocation5 + $0x718] ss:$52 sps:$4 sm:$0xff]  }
 0x2a2   :  { %4897 = vmatpush1.bf16.msra.mxu0 %v15471_v27  ;;  %5061 = vmatpush1.bf16.msra.mxu1 %v15474_v28  ;;  %v15545_v27 = vld [vmem:[#allocation5 + $0x440] ss:$52 sps:$4 sm:$0xff]  }
 0x2a3   :  { %4898 = vmatprep.subr.bf16.mxu0 %v15479_v9  ;;  %5062 = vmatprep.subr.bf16.mxu1 %v15482_v30  ;;  %v15546_v28 = vld [vmem:[#allocation5 + $0xac0] ss:$52 sps:$4 sm:$0xff]  }
 0x2a4   :  { %v15547_v9 = vld [vmem:[#allocation5 + $0x100] ss:$52 sps:$4 sm:$0xff]  }
 0x2a5   :  { %v15548_v30 = vld [vmem:[#allocation5 + $0x780] ss:$52 sps:$4 sm:$0xff]  }
 0x2a6   :  { %4899 = vmatpush1.bf16.msra.mxu0 %v15477_v31  ;;  %5063 = vmatpush1.bf16.msra.mxu1 %v15480_v32  ;;  %v15549_v31 = vld [vmem:[#allocation5 + $0x4a8] ss:$52 sps:$4 sm:$0xff]  }
 0x2a7   :  { %4900 = vmatprep.subr.bf16.mxu0 %v15485_v39  ;;  %5064 = vmatprep.subr.bf16.mxu1 %v15488_v40  ;;  %v15550_v32 = vld [vmem:[#allocation5 + $0xb28] ss:$52 sps:$4 sm:$0xff]  }
 0x2aa   :  { %4901 = vmatpush1.bf16.msra.mxu0 %v15483_v41  ;;  %5065 = vmatpush1.bf16.msra.mxu1 %v15486_v29  ;;  %v15551_v41 = vld [vmem:[#allocation5 + $0x168] ss:$52 sps:$4 sm:$0xff]  }
 0x2ab   :  { %4902 = vmatprep.subr.bf16.mxu0 %v15491_v45  ;;  %5066 = vmatprep.subr.bf16.mxu1 %v15494_v46  ;;  %v15552_v46 = vld [vmem:[#allocation5 + $0x7e8] ss:$52 sps:$4 sm:$0xff]  }
 0x2ae   :  { %4903 = vmatpush1.bf16.msra.mxu0 %v15489_v47  ;;  %5067 = vmatpush1.bf16.msra.mxu1 %v15492_v48 }
 0x2af   :  { %4904 = vmatprep.subr.bf16.mxu0 %v15497_v26  ;;  %5068 = vmatprep.subr.bf16.mxu1 %v15500_v50  ;;  %v15553_v26 = vld [vmem:[#allocation5 + $0x510] ss:$52 sps:$4 sm:$0xff]  }
 0x2b0   :  { %v15554_v50 = vld [vmem:[#allocation5 + $0xb90] ss:$52 sps:$4 sm:$0xff]  }
 0x2b2   :  { %4905 = vmatpush1.bf16.msra.mxu0 %v15495_v51  ;;  %5069 = vmatpush1.bf16.msra.mxu1 %v15498_v52  ;;  %v15555_v51 = vld [vmem:[#allocation5 + $0x1d0] ss:$52 sps:$4 sm:$0xff]  }
 0x2b3   :  { %4906 = vmatprep.subr.bf16.mxu0 %v15503_v53  ;;  %5070 = vmatprep.subr.bf16.mxu1 %v15506_v54  ;;  %v15556_v52 = vld [vmem:[#allocation5 + $0x850] ss:$52 sps:$4 sm:$0xff]   ;;  %v15557_v53 = vld [vmem:[#allocation5 + $0x578] ss:$52 sps:$4 sm:$0xff]  }
 0x2b4   :  { %v15558_v54 = vld [vmem:[#allocation5 + $0xbf8] ss:$52 sps:$4 sm:$0xff]  }
 0x2b6   :  { %4907 = vmatpush1.bf16.msra.mxu0 %v15501_v55  ;;  %5071 = vmatpush1.bf16.msra.mxu1 %v15504_v56  ;;  %v15559_v55 = vld [vmem:[#allocation5 + $0x238] ss:$52 sps:$4 sm:$0xff]  }
 0x2b7   :  { %4908 = vmatprep.subr.bf16.mxu0 %v15509_v57  ;;  %5072 = vmatprep.subr.bf16.mxu1 %v15512_v58  ;;  %v15560_v56 = vld [vmem:[#allocation5 + $0x8b8] ss:$52 sps:$4 sm:$0xff]   ;;  %v15561_v57 = vld [vmem:[#allocation5 + $0x5e0] ss:$52 sps:$4 sm:$0xff]  }
 0x2b8   :  { %v15562_v58 = vld [vmem:[#allocation5 + $0xc60] ss:$52 sps:$4 sm:$0xff]  }
 0x2ba   :  { %4909 = vmatpush1.bf16.msra.mxu0 %v15507_v59  ;;  %5073 = vmatpush1.bf16.msra.mxu1 %v15510_v61  ;;  %v15563_v59 = vld [vmem:[#allocation5 + $0x2a0] ss:$52 sps:$4 sm:$0xff]  }
 0x2bb   :  { %4910 = vmatprep.subr.bf16.mxu0 %v15515_v62  ;;  %5074 = vmatprep.subr.bf16.mxu1 %v15518_v63  ;;  %v15564_v61 = vld [vmem:[#allocation5 + $0x920] ss:$52 sps:$4 sm:$0xff]   ;;  %v17257_v62 = vld [vmem:[#allocation7] sm:$0xff] }
 0x2bc   :  { %v15565_v63 = vld [vmem:[#allocation5 + $0x648] ss:$52 sps:$4 sm:$0xff]  }
 0x2be   :  { %4911 = vmatpush1.bf16.msra.mxu0 %v15513_v0  ;;  %5075 = vmatpush1.bf16.msra.mxu1 %v15516_v1  ;;  %v15566_v0 = vld [vmem:[#allocation5 + $0xcc8] ss:$52 sps:$4 sm:$0xff]   ;;  %v17260_v1 = vsub.s32 1, %v17145_v43 }
 0x2bf   :  { %4912 = vmatprep.subr.bf16.mxu0 %v15521_v2  ;;  %5076 = vmatprep.subr.bf16.mxu1 %v15524_v3  ;;  %v15567_v2 = vld [vmem:[#allocation5 + $0x308] ss:$52 sps:$4 sm:$0xff]  }
 0x2c0   :  { %v15568_v3 = vld [vmem:[#allocation5 + $0x988] ss:$52 sps:$4 sm:$0xff]  }
 0x2c2   :  { %4913 = vmatpush1.bf16.msra.mxu0 %v15519_v4  ;;  %5077 = vmatpush1.bf16.msra.mxu1 %v15522_v5  ;;  %v15569_v4 = vld [vmem:[#allocation5 + $0x1070] ss:$52 sps:$4 sm:$0xff]   ;;  %v850_v5 = vrot.slane %v17257_v62, %v17260_v1 }
 0x2c3   :  { %4914 = vmatprep.subr.bf16.mxu0 %v15527_v6  ;;  %5078 = vmatprep.subr.bf16.mxu1 %v15530_v7  ;;  %v15570_v6 = vld [vmem:[#allocation5 + $0xd30] ss:$52 sps:$4 sm:$0xff]  }
 0x2c4   :  { %v15571_v7 = vld [vmem:[#allocation5 + $0x13b0] ss:$52 sps:$4 sm:$0xff]  }
 0x2c6   :  { %4915 = vmatpush1.bf16.msra.mxu0 %v15525_v8  ;;  %5079 = vmatpush1.bf16.msra.mxu1 %v15528_v10  ;;  %v17030_v8 = vmov 0.0   ;;  %v15572_v10 = vld [vmem:[#allocation5 + $0x10d8] ss:$52 sps:$4 sm:$0xff]  }
 0x2c7   :  { %5089 = vmatprep.subr.bf16.mxu1 %v15533_v11  ;;  %4925 = vmatprep.subr.bf16.mxu0 %v15536_v12  ;;  %v14463_v11 = vadd.f32 %v17227_v37, %v850_v5  ;;  %v15576_v12 = vld [vmem:[#allocation8 + $0x4] ss:$28 sps:$4 sm:$0xff]  }
 0x2c8   :  { %v15578_v37 = vld [vmem:[#allocation5 + $0xe00] ss:$52 sps:$4 sm:$0xff]  }
 0x2c9   :  { %4917 = vmatmul.mubr.bf16.vlgmr.msra.gmra.mrb[8].mxu0 %v17188_v36  ;;  %5081 = vmatmul.mubr.bf16.vlgmr.msra.gmra.mrb[8].mxu1 %v17188_v36  ;;  %v15631_v5 = vld [vmem:[#allocation8 + $0xe8] ss:$28 sps:$4 sm:$0xff]  }
 0x2ca   :  { %5090 = vmatpush1.bf16.msra.mxu1 %v15531_v13  ;;  %4926 = vmatpush1.bf16.msra.mxu0 %v15534_v14  ;;  %v15573_v13 = vld [vmem:[#allocation5 + $0xd98] ss:$52 sps:$4 sm:$0xff]   ;;  %v15577_v14 = vld [vmem:[#allocation5 + $0x1140] ss:$52 sps:$4 sm:$0xff]  }
 0x2cb   :  { %4957 = vmatprep.mubr.bf16.mxu0 %v17029_v42  ;;  %5121 = vmatprep.mubr.bf16.mxu1 %v17029_v42 }
 0x2cc   :  { %14132 = vmatprep.subr.bf16.mxu0 %v15537_v15  ;;  %14154 = vmatprep.subr.bf16.mxu1 %v15538_v17  ;;  %v5291_v15 = vmax.f32 %v14463_v11, 0.0  ;;  %v15574_v17 = vld [vmem:[#allocation8] ss:$28 sps:$4 sm:$0xff]  }
 0x2cd   :  { %v15637_v11 = vld [vmem:[#allocation8 + $0x120] ss:$28 sps:$4 sm:$0xff]  }
 0x2d5   :  { %13233 = vmatmul.mubr.msk.bf16.vlgmr.msra.gmra.mrb[8].mxu0 %vm4142_vm0, %v17197_v44  ;;  %13234 = vmatmul.mubr.msk.bf16.vlgmr.msra.gmra.mrb[8].mxu1 %vm4142_vm0, %v17197_v44 }
 0x2d6   :  { %14133 = vmatpush3.bf16.msra.mxu0 %v15539_v18  ;;  %14155 = vmatpush3.bf16.msra.mxu1 %v15540_v19  ;;  %v15579_v18 = vld [vmem:[#allocation8 + $0x38] ss:$28 sps:$4 sm:$0xff]   ;;  %v17271_v19 = vpack.c.bf16 %v5291_v15, %v5291_v15 }
 0x2d7   :  { %14134 = vmatprep.subr.bf16.mxu0 %v15541_v21  ;;  %14156 = vmatprep.subr.bf16.mxu1 %v15542_v22  ;;  %v15583_v21 = vld [vmem:[#allocation5 + $0xe68] ss:$52 sps:$4 sm:$0xff]  }
 0x2d8   :  { %5162 = vmatprep.mubr.bf16.mxu0 %v17151_v60  ;;  %5202 = vmatprep.mubr.bf16.mxu1 %v17162_v20  ;;  %v15586_v22 = vld [vmem:[#allocation8 + $0x74] ss:$28 sps:$4 sm:$0xff]  }
 0x2d9   :  { %v15643_v15 = vld [vmem:[#allocation8 + $0x158] ss:$28 sps:$4 sm:$0xff]  }
 0x2da   :  { %14135 = vmatpush3.bf16.msra.mxu0 %v15543_v23  ;;  %14157 = vmatpush3.bf16.msra.mxu1 %v15544_v25  ;;  %v15587_v23 = vld [vmem:[#allocation5 + $0x1210] ss:$52 sps:$4 sm:$0xff]  }
 0x2db   :  { %14136 = vmatprep.subr.bf16.mxu0 %v15545_v27  ;;  %14158 = vmatprep.subr.bf16.mxu1 %v15546_v28  ;;  %v15588_v25 = vld [vmem:[#allocation5 + $0xed0] ss:$52 sps:$4 sm:$0xff]   ;;  %v15592_v28 = vld [vmem:[#allocation5 + $0x1278] ss:$52 sps:$4 sm:$0xff]  }
 0x2dc   :  { %v17249_v39 = vpop.f32.mrb[4].mxu0  ;;  %v17251_v40 = vpop.f32.mrb[4].mxu1  ;;  %v15591_v27 = vld [vmem:[#allocation8 + $0xac] ss:$28 sps:$4 sm:$0xff]  }
 0x2dd   :  { %v17253_v29 = vpop.f32.mrb[5].mxu0  ;;  %v17255_v45 = vpop.f32.mrb[5].mxu1 }
 0x2de   :  { %14137 = vmatpush3.bf16.msra.mxu0 %v15547_v9  ;;  %14159 = vmatpush3.bf16.msra.mxu1 %v15548_v30  ;;  %v4635_v60 = vpop.f32.mrb[6].mxu0  ;;  %v4799_v20 = vpop.f32.mrb[6].mxu1  ;;  %v15589_v9 = vld [vmem:[#allocation8 + $0xa8] ss:$28 sps:$4 sm:$0xff]  }
 0x2df   :  { %v4636_v47 = vpop.f32.mrb[7].mxu0  ;;  %v4800_v48 = vpop.f32.mrb[7].mxu1  ;;  %14138 = vmatprep.subr.bf16.mxu0 %v15549_v31  ;;  %14160 = vmatprep.subr.bf16.mxu1 %v15550_v32  ;;  %v15593_v30 = vld [vmem:[#allocation5 + $0xf38] ss:$52 sps:$4 sm:$0xff]   ;;  %v15597_v31 = vld [vmem:[#allocation5 + $0x12e0] ss:$52 sps:$4 sm:$0xff]  }
 0x2e0   :  { %v15594_v32 = vld [vmem:[#allocation8 + $0xe0] ss:$28 sps:$4 sm:$0xff]   ;;  %v15602_v60 = vld [vmem:[#allocation5 + $0x1348] ss:$52 sps:$4 sm:$0xff]  }
 0x2e1   :  { %v15599_v20 = vld [vmem:[#allocation8 + $0x118] ss:$28 sps:$4 sm:$0xff]  }
 0x2e2   :  { %14139 = vmatpush3.bf16.msra.mxu0 %v15551_v41  ;;  %14161 = vmatpush3.bf16.msra.mxu1 %v15552_v46  ;;  %v15598_v41 = vld [vmem:[#allocation5 + $0xfa0] ss:$52 sps:$4 sm:$0xff]   ;;  %v15603_v47 = vld [vmem:[#allocation5 + $0x1008] ss:$52 sps:$4 sm:$0xff]  }
 0x2e3   :  { %14140 = vmatprep.subr.bf16.mxu0 %v15553_v26  ;;  %14162 = vmatprep.subr.bf16.mxu1 %v15554_v50  ;;  %v15601_v46 = vld [vmem:[#allocation8 + $0x11c] ss:$28 sps:$4 sm:$0xff]   ;;  %v15606_v48 = vld [vmem:[#allocation8 + $0x154] ss:$28 sps:$4 sm:$0xff]   ;;  %v15609_v26 = vld [vmem:[#allocation8 + $0xc] ss:$28 sps:$4 sm:$0xff]  }
 0x2e4   :  { %v15604_v50 = vld [vmem:[#allocation8 + $0x150] ss:$28 sps:$4 sm:$0xff]  }
 0x2e6   :  { %14141 = vmatpush3.bf16.msra.mxu0 %v15555_v51  ;;  %14163 = vmatpush3.bf16.msra.mxu1 %v15556_v52  ;;  %v15607_v51 = vld [vmem:[#allocation8 + $0x8] ss:$28 sps:$4 sm:$0xff]  }
 0x2e7   :  { %14142 = vmatprep.subr.bf16.mxu0 %v15557_v53  ;;  %14164 = vmatprep.subr.bf16.mxu1 %v15558_v54  ;;  %v15612_v52 = vld [vmem:[#allocation8 + $0x18c] ss:$28 sps:$4 sm:$0xff]   ;;  %v15615_v54 = vld [vmem:[#allocation8 + $0x44] ss:$28 sps:$4 sm:$0xff]  }
 0x2e8   :  { %v15610_v53 = vld [vmem:[#allocation8 + $0x188] ss:$28 sps:$4 sm:$0xff]  }
 0x2ea   :  { %14143 = vmatpush3.bf16.msra.mxu0 %v15559_v55  ;;  %14165 = vmatpush3.bf16.msra.mxu1 %v15560_v56  ;;  %v15613_v55 = vld [vmem:[#allocation8 + $0x40] ss:$28 sps:$4 sm:$0xff]  }
 0x2eb   :  { %14144 = vmatprep.subr.bf16.mxu0 %v15561_v57  ;;  %14166 = vmatprep.subr.bf16.mxu1 %v15562_v58  ;;  %v15618_v56 = vld [vmem:[#allocation8 + $0x1c4] ss:$28 sps:$4 sm:$0xff]   ;;  %v15621_v57 = vld [vmem:[#allocation8 + $0x7c] ss:$28 sps:$4 sm:$0xff]  }
 0x2ec   :  { %v15616_v58 = vld [vmem:[#allocation8 + $0x1c0] ss:$28 sps:$4 sm:$0xff]  }
 0x2ee   :  { %14145 = vmatpush3.bf16.msra.mxu0 %v15563_v59  ;;  %14167 = vmatpush3.bf16.msra.mxu1 %v15564_v61  ;;  %v15619_v59 = vld [vmem:[#allocation8 + $0x78] ss:$28 sps:$4 sm:$0xff]  }
 0x2ef   :  { %14146 = vmatprep.subr.bf16.mxu0 %v15565_v63  ;;  %14168 = vmatprep.subr.bf16.mxu1 %v15566_v0  ;;  %v15624_v61 = vld [vmem:[#allocation8 + $0x1fc] ss:$28 sps:$4 sm:$0xff]   ;;  %v15627_v63 = vld [vmem:[#allocation8 + $0xb4] ss:$28 sps:$4 sm:$0xff]  }
 0x2f0   :  { %v15622_v0 = vld [vmem:[#allocation8 + $0x1f8] ss:$28 sps:$4 sm:$0xff]  }
 0x2f2   :  { %14147 = vmatpush3.bf16.msra.mxu0 %v15567_v2  ;;  %14169 = vmatpush3.bf16.msra.mxu1 %v15568_v3  ;;  %v15625_v2 = vld [vmem:[#allocation8 + $0xb0] ss:$28 sps:$4 sm:$0xff]  }
 0x2f3   :  { %14176 = vmatprep.subr.bf16.mxu0 %v15569_v4  ;;  %14416 = vmatprep.subr.bf16.mxu1 %v17030_v8  ;;  %v15633_v3 = vld [vmem:[#allocation8 + $0xec] ss:$28 sps:$4 sm:$0xff]  }
 0x2f4   :  { %v15628_v4 = vld [vmem:[#allocation8 + $0x230] ss:$28 sps:$4 sm:$0xff]  }
 0x2f5   :  { %5163 = vmatmul.mubr.bf16.vlgmr.msra.gmra.mrb[12].mxu0 %v17160_v16  ;;  %5203 = vmatmul.mubr.bf16.vlgmr.msra.gmra.mrb[12].mxu1 %v17170_v24  ;;  %v15581_v16 = vld [vmem:[#allocation8 + $0x3c] ss:$28 sps:$4 sm:$0xff]   ;;  %v15582_v24 = vld [vmem:[#allocation5 + $0x11a8] ss:$52 sps:$4 sm:$0xff]  }
 0x2f6   :  { %14177 = vmatpush3.bf16.msra.mxu0 %v15570_v6  ;;  %14417 = vmatpush3.bf16.msra.mxu1 %v15571_v7  ;;  %v15636_v6 = vld [vmem:[#allocation8 + $0x26c] ss:$28 sps:$4 sm:$0xff]   ;;  %v15639_v7 = vld [vmem:[#allocation8 + $0x124] ss:$28 sps:$4 sm:$0xff]  }
 0x2f7   :  { %14178 = vmatprep.subr.bf16.mxu0 %v15572_v10  ;;  %14418 = vmatprep.mubr.msk.bf16.mxu1 %vm17031_vm1, %v17030_v8  ;;  %v15634_v10 = vld [vmem:[#allocation8 + $0x268] ss:$28 sps:$4 sm:$0xff]  }
 0x2f8   :  { %9929 = vmatprep.subr.bf16.mxu1 %v15576_v12  ;;  %5242 = vmatprep.mubr.bf16.mxu0 %v17182_v34  ;;  %v15584_v34 = vld [vmem:[#allocation8 + $0x70] ss:$28 sps:$4 sm:$0xff]   ;;  %v15642_v12 = vld [vmem:[#allocation8 + $0x2a4] ss:$28 sps:$4 sm:$0xff]  }
 0x2fa   :  { %14179 = vmatpush3.bf16.msra.mxu0 %v15573_v13  ;;  %v15645_v13 = vld [vmem:[#allocation8 + $0x15c] ss:$28 sps:$4 sm:$0xff]  }
 0x2fb   :  { %14180 = vmatprep.subr.bf16.mxu0 %v15577_v14  ;;  %v15640_v14 = vld [vmem:[#allocation8 + $0x2a0] ss:$28 sps:$4 sm:$0xff]  }
 0x2fd   :  { %14419 = vmatmul.mubr.msk.bf16.vlgmr.msra.gmra.mrb[16].mxu1 %vm4142_vm0, %v17197_v44  ;;  %v15596_v44 = vld [vmem:[#allocation8 + $0xe4] ss:$28 sps:$4 sm:$0xff]  }
 0x2fe   :  { %9930 = vmatpush1.bf16.msra.mxu1 %v15574_v17  ;;  %14181 = vmatpush3.bf16.msra.mxu0 %v15578_v37  ;;  %v15648_v17 = vld [vmem:[#allocation8 + $0x2dc] ss:$28 sps:$4 sm:$0xff]   ;;  %v17279_v37 = vsub.s32 0, %v17145_v43 }
 0x2ff   :  { %9961 = vmatprep.mubr.bf16.mxu1 %v17271_v19  ;;  %9931 = vmatprep.subr.bf16.mxu1 %v15581_v16  ;;  %v17282_v16 = vsub.s32 3, %v17145_v43 }
 0x300   :  { %14182 = vmatprep.subr.bf16.mxu0 %v15582_v24  ;;  %v15646_v24 = vld [vmem:[#allocation8 + $0x2d8] ss:$28 sps:$4 sm:$0xff]  }
 0x302   :  { %9932 = vmatpush1.bf16.msra.mxu1 %v15579_v18  ;;  %14183 = vmatpush3.bf16.msra.mxu0 %v15583_v21  ;;  %v15651_v18 = vld [vmem:[#allocation8 + $0x194] ss:$28 sps:$4 sm:$0xff]  }
 0x303   :  { %9933 = vmatprep.subr.bf16.mxu1 %v15586_v22  ;;  %14184 = vmatprep.subr.bf16.mxu0 %v15587_v23  ;;  %v15649_v21 = vld [vmem:[#allocation8 + $0x190] ss:$28 sps:$4 sm:$0xff]   ;;  %v846_v22 = vrot.slane %v17257_v62, %v17279_v37  ;;  %v858_v23 = vrot.slane %v17257_v62, %v17282_v16 }
 0x306   :  { %9934 = vmatpush1.bf16.msra.mxu1 %v15584_v34  ;;  %14185 = vmatpush3.bf16.msra.mxu0 %v15588_v25  ;;  %v15654_v34 = vld [vmem:[#allocation8 + $0x314] ss:$28 sps:$4 sm:$0xff]   ;;  %v15657_v25 = vld [vmem:[#allocation8 + $0x1cc] ss:$28 sps:$4 sm:$0xff]  }
 0x307   :  { %9935 = vmatprep.subr.bf16.mxu1 %v15591_v27  ;;  %14186 = vmatprep.subr.bf16.mxu0 %v15592_v28  ;;  %v15652_v27 = vld [vmem:[#allocation8 + $0x310] ss:$28 sps:$4 sm:$0xff]   ;;  %v15655_v28 = vld [vmem:[#allocation8 + $0x1c8] ss:$28 sps:$4 sm:$0xff]  }
 0x30a   :  { %9936 = vmatpush1.bf16.msra.mxu1 %v15589_v9  ;;  %14187 = vmatpush3.bf16.msra.mxu0 %v15593_v30  ;;  %v14462_v9 = vadd.f32 %v17223_v33, %v846_v22  ;;  %v14465_v30 = vadd.f32 %v17229_v38, %v858_v23  ;;  %v15667_v33 = vld [vmem:[#allocation8 + $0x238] ss:$28 sps:$4 sm:$0xff]  }
 0x30b   :  { %9937 = vmatprep.subr.bf16.mxu1 %v15596_v44  ;;  %14188 = vmatprep.subr.bf16.mxu0 %v15597_v31  ;;  %v15660_v44 = vld [vmem:[#allocation8 + $0x34c] ss:$28 sps:$4 sm:$0xff]   ;;  %v15663_v31 = vld [vmem:[#allocation8 + $0x204] ss:$28 sps:$4 sm:$0xff]   ;;  %v15672_v38 = vld [vmem:[#allocation8 + $0x3bc] ss:$28 sps:$4 sm:$0xff]  }
 0x30c   :  { %v5293_v62 = vmax.f32 %v14465_v30, 0.0  ;;  %v15715_v22 = vld [vmem:[#allocation8 + $0x3f8] ss:$28 sps:$4 sm:$0xff]   ;;  %v15724_v30 = vld [vmem:[#allocation8 + $0x5b0] ss:$28 sps:$4 sm:$0xff]  }
 0x30d   :  { %v15720_v23 = vld [vmem:[#allocation8 + $0x57c] ss:$28 sps:$4 sm:$0xff]  }
 0x30e   :  { %9938 = vmatpush1.bf16.msra.mxu1 %v15594_v32  ;;  %14189 = vmatpush3.bf16.msra.mxu0 %v15598_v41  ;;  %v15658_v32 = vld [vmem:[#allocation8 + $0x348] ss:$28 sps:$4 sm:$0xff]   ;;  %v15661_v41 = vld [vmem:[#allocation8 + $0x200] ss:$28 sps:$4 sm:$0xff]  }
 0x30f   :  { %9939 = vmatprep.subr.bf16.mxu1 %v15601_v46  ;;  %14190 = vmatprep.subr.bf16.mxu0 %v15602_v60  ;;  %v5290_v46 = vmax.f32 %v14462_v9, 0.0  ;;  %v15666_v60 = vld [vmem:[#allocation8 + $0x384] ss:$28 sps:$4 sm:$0xff]   ;;  %v15729_v9 = vld [vmem:[#allocation8 + $0x46c] ss:$28 sps:$4 sm:$0xff]  }
 0x312   :  { %9940 = vmatpush1.bf16.msra.mxu1 %v15599_v20  ;;  %14191 = vmatpush3.bf16.msra.mxu0 %v15603_v47  ;;  %v15669_v20 = vld [vmem:[#allocation8 + $0x23c] ss:$28 sps:$4 sm:$0xff]  }
 0x313   :  { %9941 = vmatprep.subr.bf16.mxu1 %v15606_v48  ;;  %10216 = vmatprep.subr.bf16.mxu0 %v15609_v26  ;;  %v15664_v47 = vld [vmem:[#allocation8 + $0x380] ss:$28 sps:$4 sm:$0xff]   ;;  %v17290_v48 = vpack.c.bf16 %v5290_v46, %v5290_v46  ;;  %v17292_v26 = vpack.c.bf16 %v5293_v62, %v5293_v62 }
 0x314   :  { %v15733_v46 = vld [vmem:[#allocation8 + $0x4a0] ss:$28 sps:$4 sm:$0xff]  }
 0x315   :  { %5243 = vmatmul.mubr.bf16.vlgmr.msra.gmra.mrb[16].mxu0 %v17188_v36  ;;  %v15630_v36 = vld [vmem:[#allocation8 + $0x234] ss:$28 sps:$4 sm:$0xff]   ;;  %v15738_v62 = vld [vmem:[#allocation8 + $0x624] ss:$28 sps:$4 sm:$0xff]  }
 0x316   :  { %9942 = vmatpush1.bf16.msra.mxu1 %v15604_v50  ;;  %10217 = vmatpush1.bf16.msra.mxu0 %v15607_v51  ;;  %v15675_v50 = vld [vmem:[#allocation8 + $0x274] ss:$28 sps:$4 sm:$0xff]  }
 0x317   :  { %10248 = vmatprep.mubr.bf16.mxu0 %v17271_v19  ;;  %9943 = vmatprep.subr.bf16.mxu1 %v15612_v52  ;;  %v15670_v51 = vld [vmem:[#allocation8 + $0x3b8] ss:$28 sps:$4 sm:$0xff]   ;;  %v15673_v52 = vld [vmem:[#allocation8 + $0x270] ss:$28 sps:$4 sm:$0xff]  }
 0x318   :  { %10218 = vmatprep.subr.bf16.mxu0 %v15615_v54  ;;  %v15681_v54 = vld [vmem:[#allocation8 + $0x2ac] ss:$28 sps:$4 sm:$0xff]  }
 0x31a   :  { %9944 = vmatpush1.bf16.msra.mxu1 %v15610_v53  ;;  %10219 = vmatpush1.bf16.msra.mxu0 %v15613_v55  ;;  %v15678_v53 = vld [vmem:[#allocation8 + $0x3f4] ss:$28 sps:$4 sm:$0xff]  }
 0x31b   :  { %9945 = vmatprep.subr.bf16.mxu1 %v15618_v56  ;;  %10220 = vmatprep.subr.bf16.mxu0 %v15621_v57  ;;  %v15676_v55 = vld [vmem:[#allocation8 + $0x3f0] ss:$28 sps:$4 sm:$0xff]   ;;  %v15679_v56 = vld [vmem:[#allocation8 + $0x2a8] ss:$28 sps:$4 sm:$0xff]  }
 0x31c   :  { %v15684_v57 = vld [vmem:[#allocation8 + $0x42c] ss:$28 sps:$4 sm:$0xff]  }
 0x31e   :  { %9946 = vmatpush1.bf16.msra.mxu1 %v15616_v58  ;;  %10221 = vmatpush1.bf16.msra.mxu0 %v15619_v59  ;;  %v15682_v58 = vld [vmem:[#allocation8 + $0x428] ss:$28 sps:$4 sm:$0xff]  }
 0x31f   :  { %9947 = vmatprep.subr.bf16.mxu1 %v15624_v61  ;;  %10222 = vmatprep.subr.bf16.mxu0 %v15627_v63  ;;  %v15687_v59 = vld [vmem:[#allocation8 + $0x2e4] ss:$28 sps:$4 sm:$0xff]  }
 0x320   :  { %v15685_v61 = vld [vmem:[#allocation8 + $0x2e0] ss:$28 sps:$4 sm:$0xff]  }
 0x321   :  { %v15690_v63 = vld [vmem:[#allocation8 + $0x464] ss:$28 sps:$4 sm:$0xff]  }
 0x322   :  { %9948 = vmatpush1.bf16.msra.mxu1 %v15622_v0  ;;  %10223 = vmatpush1.bf16.msra.mxu0 %v15625_v2  ;;  %v15688_v0 = vld [vmem:[#allocation8 + $0x460] ss:$28 sps:$4 sm:$0xff]  }
 0x323   :  { %9949 = vmatprep.subr.bf16.mxu1 %v15630_v36  ;;  %10224 = vmatprep.subr.bf16.mxu0 %v15633_v3  ;;  %v15693_v2 = vld [vmem:[#allocation8 + $0x31c] ss:$28 sps:$4 sm:$0xff]  }
 0x324   :  { %v15691_v36 = vld [vmem:[#allocation8 + $0x318] ss:$28 sps:$4 sm:$0xff]  }
 0x325   :  { %v15696_v3 = vld [vmem:[#allocation8 + $0x49c] ss:$28 sps:$4 sm:$0xff]  }
 0x326   :  { %9950 = vmatpush1.bf16.msra.mxu1 %v15628_v4  ;;  %10225 = vmatpush1.bf16.msra.mxu0 %v15631_v5  ;;  %v15694_v4 = vld [vmem:[#allocation8 + $0x498] ss:$28 sps:$4 sm:$0xff]  }
 0x327   :  { %9951 = vmatprep.subr.bf16.mxu1 %v15636_v6  ;;  %10226 = vmatprep.subr.bf16.mxu0 %v15639_v7  ;;  %v15699_v5 = vld [vmem:[#allocation8 + $0x354] ss:$28 sps:$4 sm:$0xff]  }
 0x328   :  { %v15697_v6 = vld [vmem:[#allocation8 + $0x350] ss:$28 sps:$4 sm:$0xff]  }
 0x329   :  { %v15702_v7 = vld [vmem:[#allocation8 + $0x4d4] ss:$28 sps:$4 sm:$0xff]  }
 0x32a   :  { %9952 = vmatpush1.bf16.msra.mxu1 %v15634_v10  ;;  %10227 = vmatpush1.bf16.msra.mxu0 %v15637_v11  ;;  %v15705_v10 = vld [vmem:[#allocation8 + $0x38c] ss:$28 sps:$4 sm:$0xff]  }
 0x32b   :  { %9953 = vmatprep.subr.bf16.mxu1 %v15642_v12  ;;  %10228 = vmatprep.subr.bf16.mxu0 %v15645_v13  ;;  %v15700_v11 = vld [vmem:[#allocation8 + $0x4d0] ss:$28 sps:$4 sm:$0xff]   ;;  %v15703_v12 = vld [vmem:[#allocation8 + $0x388] ss:$28 sps:$4 sm:$0xff]  }
 0x32c   :  { %v15708_v13 = vld [vmem:[#allocation8 + $0x50c] ss:$28 sps:$4 sm:$0xff]  }
 0x32e   :  { %9954 = vmatpush1.bf16.msra.mxu1 %v15640_v14  ;;  %10229 = vmatpush1.bf16.msra.mxu0 %v15643_v15  ;;  %v15711_v14 = vld [vmem:[#allocation8 + $0x3c4] ss:$28 sps:$4 sm:$0xff]  }
 0x32f   :  { %9955 = vmatprep.subr.bf16.mxu1 %v15648_v17  ;;  %10230 = vmatprep.subr.bf16.mxu0 %v15651_v18  ;;  %v15706_v15 = vld [vmem:[#allocation8 + $0x508] ss:$28 sps:$4 sm:$0xff]   ;;  %v15709_v17 = vld [vmem:[#allocation8 + $0x3c0] ss:$28 sps:$4 sm:$0xff]  }
 0x330   :  { %v15714_v18 = vld [vmem:[#allocation8 + $0x544] ss:$28 sps:$4 sm:$0xff]  }
 0x332   :  { %9956 = vmatpush1.bf16.msra.mxu1 %v15646_v24  ;;  %10231 = vmatpush1.bf16.msra.mxu0 %v15649_v21  ;;  %v15717_v24 = vld [vmem:[#allocation8 + $0x3fc] ss:$28 sps:$4 sm:$0xff]  }
 0x333   :  { %9957 = vmatprep.subr.bf16.mxu1 %v15654_v34  ;;  %10232 = vmatprep.subr.bf16.mxu0 %v15657_v25  ;;  %v15712_v21 = vld [vmem:[#allocation8 + $0x540] ss:$28 sps:$4 sm:$0xff]   ;;  %v15723_v34 = vld [vmem:[#allocation8 + $0x434] ss:$28 sps:$4 sm:$0xff]  }
 0x334   :  { %v15718_v25 = vld [vmem:[#allocation8 + $0x578] ss:$28 sps:$4 sm:$0xff]  }
 0x336   :  { %9958 = vmatpush1.bf16.msra.mxu1 %v15652_v27  ;;  %10233 = vmatpush1.bf16.msra.mxu0 %v15655_v28  ;;  %v15721_v27 = vld [vmem:[#allocation8 + $0x430] ss:$28 sps:$4 sm:$0xff]  }
 0x337   :  { %9959 = vmatprep.subr.bf16.mxu1 %v15660_v44  ;;  %10234 = vmatprep.subr.bf16.mxu0 %v15663_v31  ;;  %v15726_v28 = vld [vmem:[#allocation8 + $0x5b4] ss:$28 sps:$4 sm:$0xff]   ;;  %v15727_v44 = vld [vmem:[#allocation8 + $0x468] ss:$28 sps:$4 sm:$0xff]  }
 0x338   :  { %v15732_v31 = vld [vmem:[#allocation8 + $0x5ec] ss:$28 sps:$4 sm:$0xff]  }
 0x33a   :  { %9960 = vmatpush1.bf16.msra.mxu1 %v15658_v32  ;;  %10235 = vmatpush1.bf16.msra.mxu0 %v15661_v41  ;;  %v15730_v32 = vld [vmem:[#allocation8 + $0x5e8] ss:$28 sps:$4 sm:$0xff]  }
 0x33b   :  { %9970 = vmatprep.subr.bf16.mxu1 %v15666_v60  ;;  %10236 = vmatprep.subr.bf16.mxu0 %v15669_v20  ;;  %v15735_v41 = vld [vmem:[#allocation8 + $0x4a4] ss:$28 sps:$4 sm:$0xff]   ;;  %v15741_v20 = vld [vmem:[#allocation8 + $0x4dc] ss:$28 sps:$4 sm:$0xff]  }
 0x33c   :  { %v15736_v60 = vld [vmem:[#allocation8 + $0x620] ss:$28 sps:$4 sm:$0xff]  }
 0x33d   :  { %9962 = vmatmul.mubr.bf16.vlgmr.msra.gmra.mrb[20].mxu1 %v17290_v48 }
 0x33e   :  { %9971 = vmatpush1.bf16.msra.mxu1 %v15664_v47  ;;  %10002 = vmatprep.mubr.bf16.mxu1 %v17292_v26  ;;  %v15739_v47 = vld [vmem:[#allocation8 + $0x4d8] ss:$28 sps:$4 sm:$0xff]  }
 0x33f   :  { %10237 = vmatpush1.bf16.msra.mxu0 %v15667_v33  ;;  %9972 = vmatprep.subr.bf16.mxu1 %v15672_v38  ;;  %v17299_v33 = vsub.s32 2, %v17145_v43  ;;  %v15744_v38 = vld [vmem:[#allocation8 + $0x65c] ss:$28 sps:$4 sm:$0xff]  }
 0x340   :  { %10238 = vmatprep.subr.bf16.mxu0 %v15675_v50  ;;  %v865_v50 = vsub.s32 5, %v17145_v43 }
 0x342   :  { %9973 = vmatpush1.bf16.msra.mxu1 %v15670_v51  ;;  %v15742_v51 = vld [vmem:[#allocation8 + $0x658] ss:$28 sps:$4 sm:$0xff]  }
 0x343   :  { %10239 = vmatpush1.bf16.msra.mxu0 %v15673_v52  ;;  %9974 = vmatprep.subr.bf16.mxu1 %v15678_v53  ;;  %v15747_v52 = vld [vmem:[#allocation8 + $0x514] ss:$28 sps:$4 sm:$0xff]  }
 0x344   :  { %10240 = vmatprep.subr.bf16.mxu0 %v15681_v54  ;;  %v15745_v53 = vld [vmem:[#allocation8 + $0x510] ss:$28 sps:$4 sm:$0xff]  }
 0x345   :  { %v17302_v54 = vld [vmem:[#allocation7] sm:$0xff] }
 0x346   :  { %9975 = vmatpush1.bf16.msra.mxu1 %v15676_v55  ;;  %v854_v55 = vrot.slane %v17302_v54, %v17299_v33 }
 0x347   :  { %10241 = vmatpush1.bf16.msra.mxu0 %v15679_v56  ;;  %9976 = vmatprep.subr.bf16.mxu1 %v15684_v57  ;;  %v15750_v56 = vld [vmem:[#allocation8 + $0x694] ss:$28 sps:$4 sm:$0xff]   ;;  %v866_v57 = vrot.slane %v17302_v54, %v865_v50 }
 0x348   :  { %10242 = vmatprep.subr.bf16.mxu0 %v15687_v59  ;;  %v15748_v59 = vld [vmem:[#allocation8 + $0x690] ss:$28 sps:$4 sm:$0xff]  }
 0x34a   :  { %9977 = vmatpush1.bf16.msra.mxu1 %v15682_v58  ;;  %v15753_v58 = vld [vmem:[#allocation8 + $0x54c] ss:$28 sps:$4 sm:$0xff]  }
 0x34b   :  { %10243 = vmatpush1.bf16.msra.mxu0 %v15685_v61  ;;  %9978 = vmatprep.subr.bf16.mxu1 %v15690_v63  ;;  %v14464_v61 = vadd.f32 %v17225_v35, %v854_v55  ;;  %v15751_v63 = vld [vmem:[#allocation8 + $0x548] ss:$28 sps:$4 sm:$0xff]   ;;  %v15763_v35 = vld [vmem:[#allocation8 + $0x5b8] ss:$28 sps:$4 sm:$0xff]  }
 0x34c   :  { %10244 = vmatprep.subr.bf16.mxu0 %v15693_v2  ;;  %v14467_v2 = vadd.f32 %v17253_v29, %v866_v57  ;;  %v15768_v29 = vld [vmem:[#allocation8 + $0x73c] ss:$28 sps:$4 sm:$0xff]   ;;  %v15810_v55 = vld [vmem:[#allocation8 + $0x8c4] ss:$28 sps:$4 sm:$0xff]  }
 0x34d   :  { %v15808_v57 = vld [vmem:[#allocation8 + $0x8c0] ss:$28 sps:$4 sm:$0xff]  }
 0x34e   :  { %9979 = vmatpush1.bf16.msra.mxu1 %v15688_v0  ;;  %v15756_v0 = vld [vmem:[#allocation8 + $0x6cc] ss:$28 sps:$4 sm:$0xff]  }
 0x34f   :  { %10245 = vmatpush1.bf16.msra.mxu0 %v15691_v36  ;;  %9980 = vmatprep.subr.bf16.mxu1 %v15696_v3  ;;  %v15759_v36 = vld [vmem:[#allocation8 + $0x584] ss:$28 sps:$4 sm:$0xff]  }
 0x350   :  { %10246 = vmatprep.subr.bf16.mxu0 %v15699_v5  ;;  %v15754_v3 = vld [vmem:[#allocation8 + $0x6c8] ss:$28 sps:$4 sm:$0xff]   ;;  %v15757_v5 = vld [vmem:[#allocation8 + $0x580] ss:$28 sps:$4 sm:$0xff]  }
 0x352   :  { %9981 = vmatpush1.bf16.msra.mxu1 %v15694_v4  ;;  %v5292_v4 = vmax.f32 %v14464_v61, 0.0  ;;  %v15819_v61 = vld [vmem:[#allocation8 + $0x7b4] ss:$28 sps:$4 sm:$0xff]  }
 0x353   :  { %10247 = vmatpush1.bf16.msra.mxu0 %v15697_v6  ;;  %9982 = vmatprep.subr.bf16.mxu1 %v15702_v7  ;;  %v15762_v6 = vld [vmem:[#allocation8 + $0x704] ss:$28 sps:$4 sm:$0xff]   ;;  %v5295_v7 = vmax.f32 %v14467_v2, 0.0  ;;  %v15822_v2 = vld [vmem:[#allocation8 + $0x934] ss:$28 sps:$4 sm:$0xff]  }
 0x354   :  { %10257 = vmatprep.subr.bf16.mxu0 %v15705_v10  ;;  %v15760_v10 = vld [vmem:[#allocation8 + $0x700] ss:$28 sps:$4 sm:$0xff]  }
 0x356   :  { %9983 = vmatpush1.bf16.msra.mxu1 %v15700_v11  ;;  %10249 = vmatmul.mubr.bf16.vlgmr.msra.gmra.mrb[20].mxu0 %v17290_v48  ;;  %v15765_v11 = vld [vmem:[#allocation8 + $0x5bc] ss:$28 sps:$4 sm:$0xff]  }
 0x357   :  { %10258 = vmatpush1.bf16.msra.mxu0 %v15703_v12  ;;  %10289 = vmatprep.mubr.bf16.mxu0 %v17292_v26  ;;  %v17311_v12 = vpack.c.bf16 %v5292_v4, %v5292_v4  ;;  %v17319_v4 = vld [vmem:[#allocation7 + $0x8] sm:$0x1f] }
 0x358   :  { %9984 = vmatprep.subr.bf16.mxu1 %v15708_v13  ;;  %10259 = vmatprep.subr.bf16.mxu0 %v15711_v14  ;;  %v17313_v13 = vpack.c.bf16 %v5295_v7, %v5295_v7  ;;  %v15771_v14 = vld [vmem:[#allocation8 + $0x5f4] ss:$28 sps:$4 sm:$0xff]   ;;  %v15831_v7 = vld [vmem:[#allocation8 + $0x824] ss:$28 sps:$4 sm:$0xff]  }
 0x35a   :  { %9985 = vmatpush1.bf16.msra.mxu1 %v15706_v15  ;;  %v15766_v15 = vld [vmem:[#allocation8 + $0x738] ss:$28 sps:$4 sm:$0xff]  }
 0x35b   :  { %10260 = vmatpush1.bf16.msra.mxu0 %v15709_v17  ;;  %9986 = vmatprep.subr.bf16.mxu1 %v15714_v18  ;;  %v15769_v17 = vld [vmem:[#allocation8 + $0x5f0] ss:$28 sps:$4 sm:$0xff]  }
 0x35c   :  { %10261 = vmatprep.subr.bf16.mxu0 %v15717_v24  ;;  %v15774_v18 = vld [vmem:[#allocation8 + $0x774] ss:$28 sps:$4 sm:$0xff]   ;;  %v15777_v24 = vld [vmem:[#allocation8 + $0x62c] ss:$28 sps:$4 sm:$0xff]  }
 0x35e   :  { %9987 = vmatpush1.bf16.msra.mxu1 %v15712_v21  ;;  %v15772_v21 = vld [vmem:[#allocation8 + $0x770] ss:$28 sps:$4 sm:$0xff]  }
 0x35f   :  { %10262 = vmatpush1.bf16.msra.mxu0 %v15715_v22  ;;  %9988 = vmatprep.subr.bf16.mxu1 %v15720_v23  ;;  %v15775_v22 = vld [vmem:[#allocation8 + $0x628] ss:$28 sps:$4 sm:$0xff]  }
 0x360   :  { %10263 = vmatprep.subr.bf16.mxu0 %v15723_v34  ;;  %v15780_v23 = vld [vmem:[#allocation8 + $0x7ac] ss:$28 sps:$4 sm:$0xff]   ;;  %v15783_v34 = vld [vmem:[#allocation8 + $0x664] ss:$28 sps:$4 sm:$0xff]  }
 0x362   :  { %9989 = vmatpush1.bf16.msra.mxu1 %v15718_v25  ;;  %v15778_v25 = vld [vmem:[#allocation8 + $0x7a8] ss:$28 sps:$4 sm:$0xff]  }
 0x363   :  { %10264 = vmatpush1.bf16.msra.mxu0 %v15721_v27  ;;  %9990 = vmatprep.subr.bf16.mxu1 %v15726_v28  ;;  %v15781_v27 = vld [vmem:[#allocation8 + $0x660] ss:$28 sps:$4 sm:$0xff]  }
 0x364   :  { %10265 = vmatprep.subr.bf16.mxu0 %v15729_v9  ;;  %v15786_v28 = vld [vmem:[#allocation8 + $0x7e4] ss:$28 sps:$4 sm:$0xff]   ;;  %v15789_v9 = vld [vmem:[#allocation8 + $0x69c] ss:$28 sps:$4 sm:$0xff]  }
 0x366   :  { %9991 = vmatpush1.bf16.msra.mxu1 %v15724_v30  ;;  %v15784_v30 = vld [vmem:[#allocation8 + $0x7e0] ss:$28 sps:$4 sm:$0xff]  }
 0x367   :  { %10266 = vmatpush1.bf16.msra.mxu0 %v15727_v44  ;;  %9992 = vmatprep.subr.bf16.mxu1 %v15732_v31  ;;  %v15787_v44 = vld [vmem:[#allocation8 + $0x698] ss:$28 sps:$4 sm:$0xff]  }
 0x368   :  { %10267 = vmatprep.subr.bf16.mxu0 %v15735_v41  ;;  %v15792_v31 = vld [vmem:[#allocation8 + $0x81c] ss:$28 sps:$4 sm:$0xff]  }
 0x369   :  { %v15790_v41 = vld [vmem:[#allocation8 + $0x818] ss:$28 sps:$4 sm:$0xff]  }
 0x36a   :  { %9993 = vmatpush1.bf16.msra.mxu1 %v15730_v32  ;;  %v15795_v32 = vld [vmem:[#allocation8 + $0x6d4] ss:$28 sps:$4 sm:$0xff]  }
 0x36b   :  { %10268 = vmatpush1.bf16.msra.mxu0 %v15733_v46  ;;  %9994 = vmatprep.subr.bf16.mxu1 %v15738_v62  ;;  %v15793_v46 = vld [vmem:[#allocation8 + $0x6d0] ss:$28 sps:$4 sm:$0xff]  }
 0x36c   :  { %10269 = vmatprep.subr.bf16.mxu0 %v15741_v20  ;;  %v15798_v62 = vld [vmem:[#allocation8 + $0x854] ss:$28 sps:$4 sm:$0xff]  }
 0x36d   :  { %v15796_v20 = vld [vmem:[#allocation8 + $0x850] ss:$28 sps:$4 sm:$0xff]  }
 0x36e   :  { %9995 = vmatpush1.bf16.msra.mxu1 %v15736_v60  ;;  %v15801_v60 = vld [vmem:[#allocation8 + $0x70c] ss:$28 sps:$4 sm:$0xff]  }
 0x36f   :  { %10270 = vmatpush1.bf16.msra.mxu0 %v15739_v47  ;;  %9996 = vmatprep.subr.bf16.mxu1 %v15744_v38  ;;  %v15799_v47 = vld [vmem:[#allocation8 + $0x708] ss:$28 sps:$4 sm:$0xff]  }
 0x370   :  { %10271 = vmatprep.subr.bf16.mxu0 %v15747_v52  ;;  %v15804_v38 = vld [vmem:[#allocation8 + $0x88c] ss:$28 sps:$4 sm:$0xff]  }
 0x371   :  { %v15802_v52 = vld [vmem:[#allocation8 + $0x888] ss:$28 sps:$4 sm:$0xff]  }
 0x372   :  { %9997 = vmatpush1.bf16.msra.mxu1 %v15742_v51  ;;  %v15807_v51 = vld [vmem:[#allocation8 + $0x744] ss:$28 sps:$4 sm:$0xff]  }
 0x373   :  { %10272 = vmatpush1.bf16.msra.mxu0 %v15745_v53  ;;  %9998 = vmatprep.subr.bf16.mxu1 %v15750_v56  ;;  %v15805_v53 = vld [vmem:[#allocation8 + $0x740] ss:$28 sps:$4 sm:$0xff]  }
 0x374   :  { %10273 = vmatprep.subr.bf16.mxu0 %v15753_v58  ;;  %v15813_v56 = vld [vmem:[#allocation8 + $0x77c] ss:$28 sps:$4 sm:$0xff]  }
 0x375   :  { %v15811_v58 = vld [vmem:[#allocation8 + $0x778] ss:$28 sps:$4 sm:$0xff]  }
 0x376   :  { %9999 = vmatpush1.bf16.msra.mxu1 %v15748_v59  ;;  %v15816_v59 = vld [vmem:[#allocation8 + $0x8fc] ss:$28 sps:$4 sm:$0xff]  }
 0x377   :  { %10274 = vmatpush1.bf16.msra.mxu0 %v15751_v63  ;;  %10000 = vmatprep.subr.bf16.mxu1 %v15756_v0  ;;  %v15814_v63 = vld [vmem:[#allocation8 + $0x8f8] ss:$28 sps:$4 sm:$0xff]   ;;  %v15817_v0 = vld [vmem:[#allocation8 + $0x7b0] ss:$28 sps:$4 sm:$0xff]  }
 0x378   :  { %10275 = vmatprep.subr.bf16.mxu0 %v15759_v36  ;;  %v15820_v36 = vld [vmem:[#allocation8 + $0x930] ss:$28 sps:$4 sm:$0xff]  }
 0x37a   :  { %10001 = vmatpush1.bf16.msra.mxu1 %v15754_v3  ;;  %v15825_v3 = vld [vmem:[#allocation8 + $0x7ec] ss:$28 sps:$4 sm:$0xff]  }
 0x37b   :  { %10276 = vmatpush1.bf16.msra.mxu0 %v15757_v5  ;;  %10011 = vmatprep.subr.bf16.mxu1 %v15762_v6  ;;  %v15823_v5 = vld [vmem:[#allocation8 + $0x7e8] ss:$28 sps:$4 sm:$0xff]  }
 0x37c   :  { %10277 = vmatprep.subr.bf16.mxu0 %v15765_v11  ;;  %v15828_v6 = vld [vmem:[#allocation8 + $0x96c] ss:$28 sps:$4 sm:$0xff]   ;;  %v886_v11 = vrot.slane %v17319_v4, %v17299_v33 }
 0x37d   :  { %10003 = vmatmul.mubr.bf16.vlgmr.msra.gmra.mrb[20].mxu1 %v17311_v12 }
 0x37e   :  { %10012 = vmatpush1.bf16.msra.mxu1 %v15760_v10  ;;  %10043 = vmatprep.mubr.bf16.mxu1 %v17313_v13  ;;  %v15826_v10 = vld [vmem:[#allocation8 + $0x968] ss:$28 sps:$4 sm:$0xff]  }
 0x37f   :  { %10278 = vmatpush1.bf16.msra.mxu0 %v15763_v35  ;;  %10013 = vmatprep.subr.bf16.mxu1 %v15768_v29  ;;  %v890_v35 = vrot.slane %v17319_v4, %v17282_v16  ;;  %v15829_v29 = vld [vmem:[#allocation8 + $0x820] ss:$28 sps:$4 sm:$0xff]  }
 0x380   :  { %10279 = vmatprep.subr.bf16.mxu0 %v15771_v14  ;;  %v15834_v14 = vld [vmem:[#allocation8 + $0x9a4] ss:$28 sps:$4 sm:$0xff]  }
 0x382   :  { %10014 = vmatpush1.bf16.msra.mxu1 %v15766_v15 }
 0x383   :  { %10280 = vmatpush1.bf16.msra.mxu0 %v15769_v17  ;;  %10015 = vmatprep.subr.bf16.mxu1 %v15774_v18  ;;  %v15837_v18 = vld [vmem:[#allocation8 + $0x85c] ss:$28 sps:$4 sm:$0xff]  }
 0x384   :  { %10281 = vmatprep.subr.bf16.mxu0 %v15777_v24 }
 0x386   :  { %10016 = vmatpush1.bf16.msra.mxu1 %v15772_v21 }
 0x387   :  { %10282 = vmatpush1.bf16.msra.mxu0 %v15775_v22  ;;  %10017 = vmatprep.subr.bf16.mxu1 %v15780_v23  ;;  %v15832_v23 = vld [vmem:[#allocation8 + $0x9a0] ss:$28 sps:$4 sm:$0xff]  }
 0x388   :  { %10283 = vmatprep.subr.bf16.mxu0 %v15783_v34  ;;  %v17332_v34 = vsub.s32 4, %v17145_v43 }
 0x38a   :  { %10018 = vmatpush1.bf16.msra.mxu1 %v15778_v25 }
 0x38b   :  { %10284 = vmatpush1.bf16.msra.mxu0 %v15781_v27  ;;  %10019 = vmatprep.subr.bf16.mxu1 %v15786_v28 }
 0x38c   :  { %10285 = vmatprep.subr.bf16.mxu0 %v15789_v9 }
 0x38e   :  { %10020 = vmatpush1.bf16.msra.mxu1 %v15784_v30 }
 0x38f   :  { %10286 = vmatpush1.bf16.msra.mxu0 %v15787_v44  ;;  %10021 = vmatprep.subr.bf16.mxu1 %v15792_v31  ;;  %v15835_v44 = vld [vmem:[#allocation8 + $0x858] ss:$28 sps:$4 sm:$0xff]  }
 0x390   :  { %10287 = vmatprep.subr.bf16.mxu0 %v15795_v32  ;;  %v15840_v31 = vld [vmem:[#allocation8 + $0x9dc] ss:$28 sps:$4 sm:$0xff]   ;;  %v873_v32 = vsub.s32 7, %v17145_v43 }
 0x392   :  { %10022 = vmatpush1.bf16.msra.mxu1 %v15790_v41  ;;  %v15843_v41 = vld [vmem:[#allocation8 + $0x894] ss:$28 sps:$4 sm:$0xff]  }
 0x393   :  { %10288 = vmatpush1.bf16.msra.mxu0 %v15793_v46  ;;  %10023 = vmatprep.subr.bf16.mxu1 %v15798_v62  ;;  %v15838_v46 = vld [vmem:[#allocation8 + $0x9d8] ss:$28 sps:$4 sm:$0xff]   ;;  %v862_v62 = vrot.slane %v17302_v54, %v17332_v34 }
 0x394   :  { %10298 = vmatprep.subr.bf16.mxu0 %v15801_v60  ;;  %v15841_v60 = vld [vmem:[#allocation8 + $0x890] ss:$28 sps:$4 sm:$0xff]  }
 0x396   :  { %10024 = vmatpush1.bf16.msra.mxu1 %v15796_v20  ;;  %10290 = vmatmul.mubr.bf16.vlgmr.msra.gmra.mrb[20].mxu0 %v17311_v12  ;;  %v15846_v20 = vld [vmem:[#allocation8 + $0xa14] ss:$28 sps:$4 sm:$0xff]  }
 0x397   :  { %10299 = vmatpush1.bf16.msra.mxu0 %v15799_v47  ;;  %10330 = vmatprep.mubr.bf16.mxu0 %v17313_v13  ;;  %v874_v47 = vrot.slane %v17302_v54, %v873_v32  ;;  %v15853_v54 = vld [vmem:[#allocation8 + $0x900] ss:$28 sps:$4 sm:$0xff]  }
 0x398   :  { %10025 = vmatprep.subr.bf16.mxu1 %v15804_v38  ;;  %10300 = vmatprep.subr.bf16.mxu0 %v15807_v51  ;;  %v15849_v38 = vld [vmem:[#allocation8 + $0x8cc] ss:$28 sps:$4 sm:$0xff]  }
 0x399   :  { %v15844_v51 = vld [vmem:[#allocation8 + $0xa10] ss:$28 sps:$4 sm:$0xff]  }
 0x39a   :  { %10026 = vmatpush1.bf16.msra.mxu1 %v15802_v52  ;;  %v14466_v52 = vadd.f32 %v17249_v39, %v862_v62  ;;  %v15859_v39 = vld [vmem:[#allocation8 + $0x938] ss:$28 sps:$4 sm:$0xff]  }
 0x39b   :  { %10301 = vmatpush1.bf16.msra.mxu0 %v15805_v53  ;;  %10027 = vmatprep.subr.bf16.mxu1 %v15810_v55  ;;  %v15847_v53 = vld [vmem:[#allocation8 + $0x8c8] ss:$28 sps:$4 sm:$0xff]  }
 0x39c   :  { %10302 = vmatprep.subr.bf16.mxu0 %v15813_v56  ;;  %v15852_v55 = vld [vmem:[#allocation8 + $0xa4c] ss:$28 sps:$4 sm:$0xff]   ;;  %v14469_v56 = vadd.f32 %v17255_v45, %v874_v47  ;;  %v15864_v45 = vld [vmem:[#allocation8 + $0xabc] ss:$28 sps:$4 sm:$0xff]  }
 0x39e   :  { %10028 = vmatpush1.bf16.msra.mxu1 %v15808_v57  ;;  %v15855_v57 = vld [vmem:[#allocation8 + $0x904] ss:$28 sps:$4 sm:$0xff]  }
 0x39f   :  { %10303 = vmatpush1.bf16.msra.mxu0 %v15811_v58  ;;  %10029 = vmatprep.subr.bf16.mxu1 %v15816_v59  ;;  %v15850_v58 = vld [vmem:[#allocation8 + $0xa48] ss:$28 sps:$4 sm:$0xff]   ;;  %v5294_v59 = vmax.f32 %v14466_v52, 0.0 }
 0x3a0   :  { %10304 = vmatprep.subr.bf16.mxu0 %v15819_v61  ;;  %v15858_v61 = vld [vmem:[#allocation8 + $0xa84] ss:$28 sps:$4 sm:$0xff]  }
 0x3a2   :  { %10030 = vmatpush1.bf16.msra.mxu1 %v15814_v63  ;;  %v5297_v63 = vmax.f32 %v14469_v56, 0.0  ;;  %v15886_v56 = vld [vmem:[#allocation8 + $0xb98] ss:$28 sps:$4 sm:$0xff]  }
 0x3a3   :  { %10305 = vmatpush1.bf16.msra.mxu0 %v15817_v0  ;;  %10031 = vmatprep.subr.bf16.mxu1 %v15822_v2  ;;  %v15856_v0 = vld [vmem:[#allocation8 + $0xa80] ss:$28 sps:$4 sm:$0xff]  }
 0x3a4   :  { %10306 = vmatprep.subr.bf16.mxu0 %v15825_v3  ;;  %v15861_v2 = vld [vmem:[#allocation8 + $0x93c] ss:$28 sps:$4 sm:$0xff]   ;;  %v17344_v3 = vpack.c.bf16 %v5297_v63, %v5297_v63 }
 0x3a6   :  { %10032 = vmatpush1.bf16.msra.mxu1 %v15820_v36  ;;  %v17342_v36 = vpack.c.bf16 %v5294_v59, %v5294_v59  ;;  %v15894_v59 = vld [vmem:[#allocation8 + $0xbd4] ss:$28 sps:$4 sm:$0xff]  }
 0x3a7   :  { %10307 = vmatpush1.bf16.msra.mxu0 %v15823_v5  ;;  %10033 = vmatprep.subr.bf16.mxu1 %v15828_v6  ;;  %v15867_v5 = vld [vmem:[#allocation8 + $0x974] ss:$28 sps:$4 sm:$0xff]  }
 0x3a8   :  { %v17325_v15 = vpop.f32.mrb[8].mxu0  ;;  %v5123_v17 = vpop.f32.mrb[8].mxu1  ;;  %10308 = vmatprep.subr.bf16.mxu0 %v15831_v7  ;;  %v15862_v6 = vld [vmem:[#allocation8 + $0xab8] ss:$28 sps:$4 sm:$0xff]   ;;  %v869_v7 = vsub.s32 6, %v17145_v43 }
 0x3a9   :  { %v17327_v24 = vadd.f32 %v5123_v17, %v886_v11  ;;  %v17329_v21 = vpop.f32.mrb[9].mxu0  ;;  %v5125_v22 = vpop.f32.mrb[9].mxu1  ;;  %v15870_v11 = vld [vmem:[#allocation8 + $0xaf4] ss:$28 sps:$4 sm:$0xff]   ;;  %v15876_v17 = vld [vmem:[#allocation8 + $0xb2c] ss:$28 sps:$4 sm:$0xff]  }
 0x3aa   :  { %10034 = vmatpush1.bf16.msra.mxu1 %v15826_v10  ;;  %v17334_v25 = vadd.f32 %v5125_v22, %v890_v35  ;;  %v4963_v27 = vpop.f32.mrb[10].mxu0  ;;  %v5127_v28 = vpop.f32.mrb[10].mxu1  ;;  %v15865_v10 = vld [vmem:[#allocation8 + $0x970] ss:$28 sps:$4 sm:$0xff]   ;;  %v15874_v22 = vld [vmem:[#allocation8 + $0xb28] ss:$28 sps:$4 sm:$0xff]  }
 0x3ab   :  { %10309 = vmatpush1.bf16.msra.mxu0 %v15829_v29  ;;  %v4964_v9 = vpop.f32.mrb[11].mxu0  ;;  %v5128_v30 = vpop.f32.mrb[11].mxu1  ;;  %10035 = vmatprep.subr.bf16.mxu1 %v15834_v14  ;;  %v15873_v35 = vld [vmem:[#allocation8 + $0x9ac] ss:$28 sps:$4 sm:$0xff]   ;;  %v15882_v27 = vld [vmem:[#allocation8 + $0xb64] ss:$28 sps:$4 sm:$0xff]  }
 0x3ac   :  { %10310 = vmatprep.subr.bf16.mxu0 %v15837_v18  ;;  %v15868_v29 = vld [vmem:[#allocation8 + $0xaf0] ss:$28 sps:$4 sm:$0xff]   ;;  %v15871_v14 = vld [vmem:[#allocation8 + $0x9a8] ss:$28 sps:$4 sm:$0xff]   ;;  %v894_v30 = vrot.slane %v17319_v4, %v17332_v34 }
 0x3ad   :  { %v15879_v18 = vld [vmem:[#allocation8 + $0x9e4] ss:$28 sps:$4 sm:$0xff]  }
 0x3ae   :  { %10036 = vmatpush1.bf16.msra.mxu1 %v15832_v23  ;;  %v15877_v23 = vld [vmem:[#allocation8 + $0x9e0] ss:$28 sps:$4 sm:$0xff]   ;;  %v16815_v43 = vld [vmem:[%s18032_s5 + $0x49c] ss:$12 sps:$4 sm:$0xff]  }
 0x3af   :  { %10311 = vmatpush1.bf16.msra.mxu0 %v15835_v44  ;;  %10037 = vmatprep.subr.bf16.mxu1 %v15840_v31  ;;  %v15885_v44 = vld [vmem:[#allocation8 + $0xa1c] ss:$28 sps:$4 sm:$0xff]  }
 0x3b0   :  { %10312 = vmatprep.subr.bf16.mxu0 %v15843_v41  ;;  %v15880_v41 = vld [vmem:[#allocation8 + $0xb60] ss:$28 sps:$4 sm:$0xff]  }
 0x3b2   :  { %10038 = vmatpush1.bf16.msra.mxu1 %v15838_v46 }
 0x3b3   :  { %10313 = vmatpush1.bf16.msra.mxu0 %v15841_v60  ;;  %10039 = vmatprep.subr.bf16.mxu1 %v15846_v20 }
 0x3b4   :  { %10314 = vmatprep.subr.bf16.mxu0 %v15849_v38  ;;  %v15883_v38 = vld [vmem:[#allocation8 + $0xa18] ss:$28 sps:$4 sm:$0xff]  }
 0x3b6   :  { %10040 = vmatpush1.bf16.msra.mxu1 %v15844_v51  ;;  %v15888_v51 = vld [vmem:[#allocation8 + $0xb9c] ss:$28 sps:$4 sm:$0xff]  }
 0x3b7   :  { %10315 = vmatpush1.bf16.msra.mxu0 %v15847_v53  ;;  %10041 = vmatprep.subr.bf16.mxu1 %v15852_v55  ;;  %v15891_v55 = vld [vmem:[#allocation8 + $0xa54] ss:$28 sps:$4 sm:$0xff]  }
 0x3b8   :  { %10316 = vmatprep.subr.bf16.mxu0 %v15855_v57 }
 0x3ba   :  { %10042 = vmatpush1.bf16.msra.mxu1 %v15850_v58  ;;  %v15889_v58 = vld [vmem:[#allocation8 + $0xa50] ss:$28 sps:$4 sm:$0xff]  }
 0x3bb   :  { %10317 = vmatpush1.bf16.msra.mxu0 %v15853_v54  ;;  %10052 = vmatprep.subr.bf16.mxu1 %v15858_v61  ;;  %v15897_v61 = vld [vmem:[#allocation8 + $0xa8c] ss:$28 sps:$4 sm:$0xff]  }
 0x3bc   :  { %10318 = vmatprep.subr.bf16.mxu0 %v15861_v2 }
 0x3bd   :  { %10044 = vmatmul.mubr.bf16.vlgmr.msra.gmra.mrb[20].mxu1 %v17342_v36 }
 0x3be   :  { %10053 = vmatpush1.bf16.msra.mxu1 %v15856_v0  ;;  %10084 = vmatprep.mubr.bf16.mxu1 %v17344_v3  ;;  %v15892_v0 = vld [vmem:[#allocation8 + $0xbd0] ss:$28 sps:$4 sm:$0xff]  }
 0x3bf   :  { %10319 = vmatpush1.bf16.msra.mxu0 %v15859_v39  ;;  %10054 = vmatprep.subr.bf16.mxu1 %v15864_v45  ;;  %v15895_v45 = vld [vmem:[#allocation8 + $0xa88] ss:$28 sps:$4 sm:$0xff]  }
 0x3c0   :  { %10320 = vmatprep.subr.bf16.mxu0 %v15867_v5  ;;  %v15900_v5 = vld [vmem:[#allocation8 + $0xc0c] ss:$28 sps:$4 sm:$0xff]  }
 0x3c2   :  { %10055 = vmatpush1.bf16.msra.mxu1 %v15862_v6  ;;  %v15903_v6 = vld [vmem:[#allocation8 + $0xac4] ss:$28 sps:$4 sm:$0xff]  }
 0x3c3   :  { %10321 = vmatpush1.bf16.msra.mxu0 %v15865_v10  ;;  %10056 = vmatprep.subr.bf16.mxu1 %v15870_v11  ;;  %v15898_v10 = vld [vmem:[#allocation8 + $0xc08] ss:$28 sps:$4 sm:$0xff]   ;;  %v15901_v11 = vld [vmem:[#allocation8 + $0xac0] ss:$28 sps:$4 sm:$0xff]  }
 0x3c4   :  { %10322 = vmatprep.subr.bf16.mxu0 %v15873_v35  ;;  %v15906_v35 = vld [vmem:[#allocation8 + $0xc44] ss:$28 sps:$4 sm:$0xff]  }
 0x3c6   :  { %10057 = vmatpush1.bf16.msra.mxu1 %v15868_v29  ;;  %v15909_v29 = vld [vmem:[#allocation8 + $0xafc] ss:$28 sps:$4 sm:$0xff]  }
 0x3c7   :  { %10323 = vmatpush1.bf16.msra.mxu0 %v15871_v14  ;;  %10058 = vmatprep.subr.bf16.mxu1 %v15876_v17  ;;  %v15904_v14 = vld [vmem:[#allocation8 + $0xc40] ss:$28 sps:$4 sm:$0xff]   ;;  %v15907_v17 = vld [vmem:[#allocation8 + $0xaf8] ss:$28 sps:$4 sm:$0xff]  }
 0x3c8   :  { %v14148_v28 = vpop.f32.mrb[12].mxu0  ;;  %v14170_v9 = vpop.f32.mrb[12].mxu1  ;;  %10324 = vmatprep.subr.bf16.mxu0 %v15879_v18  ;;  %v15912_v18 = vld [vmem:[#allocation8 + $0xc7c] ss:$28 sps:$4 sm:$0xff]  }
 0x3c9   :  { %v14149_v31 = vpop.f32.mrb[13].mxu0  ;;  %v14171_v32 = vpop.f32.mrb[13].mxu1 }
 0x3ca   :  { %v14150_v46 = vadd.f32 %v14149_v31, %v14148_v28  ;;  %v14172_v62 = vadd.f32 %v14171_v32, %v14170_v9  ;;  %10059 = vmatpush1.bf16.msra.mxu1 %v15874_v22  ;;  %v14173_v60 = vpop.f32.mrb[14].mxu1  ;;  %v14151_v20 = vpop.f32.mrb[14].mxu0  ;;  %v15915_v22 = vld [vmem:[#allocation8 + $0xb34] ss:$28 sps:$4 sm:$0xff]   ;;  %v15921_v9 = vld [vmem:[#allocation8 + $0xb6c] ss:$28 sps:$4 sm:$0xff]  }
 0x3cb   :  { %10325 = vmatpush1.bf16.msra.mxu0 %v15877_v23  ;;  %v14174_v47 = vpop.f32.mrb[15].mxu1  ;;  %10060 = vmatprep.subr.bf16.mxu1 %v15882_v27  ;;  %v14152_v52 = vpop.f32.mrb[15].mxu0  ;;  %v15910_v23 = vld [vmem:[#allocation8 + $0xc78] ss:$28 sps:$4 sm:$0xff]   ;;  %v15913_v27 = vld [vmem:[#allocation8 + $0xb30] ss:$28 sps:$4 sm:$0xff]  }
 0x3cc   :  { %v5165_v53 = vadd.f32 %v14150_v46, %v894_v30  ;;  %10326 = vmatprep.subr.bf16.mxu0 %v15885_v44  ;;  %v15918_v28 = vld [vmem:[#allocation8 + $0xcb4] ss:$28 sps:$4 sm:$0xff]   ;;  %v15919_v44 = vld [vmem:[#allocation8 + $0xb68] ss:$28 sps:$4 sm:$0xff]   ;;  %v15925_v46 = vld [vmem:[#allocation8 + $0xba0] ss:$28 sps:$4 sm:$0xff]  }
 0x3cd   :  { %v15916_v30 = vld [vmem:[#allocation8 + $0xcb0] ss:$28 sps:$4 sm:$0xff]   ;;  %v15927_v32 = vld [vmem:[#allocation8 + $0xba4] ss:$28 sps:$4 sm:$0xff]   ;;  %v15933_v20 = vld [vmem:[#allocation8 + $0xbdc] ss:$28 sps:$4 sm:$0xff]  }
 0x3ce   :  { %v17351_v57 = vadd.f32 %v14172_v62, %v5165_v53  ;;  %10061 = vmatpush1.bf16.msra.mxu1 %v15880_v41  ;;  %v15924_v31 = vld [vmem:[#allocation8 + $0xcec] ss:$28 sps:$4 sm:$0xff]   ;;  %v15930_v62 = vld [vmem:[#allocation8 + $0xd24] ss:$28 sps:$4 sm:$0xff]   ;;  %v15931_v53 = vld [vmem:[#allocation8 + $0xbd8] ss:$28 sps:$4 sm:$0xff]  }
 0x3cf   :  { %10327 = vmatpush1.bf16.msra.mxu0 %v15883_v38  ;;  %10062 = vmatprep.subr.bf16.mxu1 %v15888_v51  ;;  %v15922_v41 = vld [vmem:[#allocation8 + $0xce8] ss:$28 sps:$4 sm:$0xff]   ;;  %v15928_v38 = vld [vmem:[#allocation8 + $0xd20] ss:$28 sps:$4 sm:$0xff]  }
 0x3d0   :  { %v17353_v54 = vpop.f32.mrb[16].mxu1  ;;  %10328 = vmatprep.subr.bf16.mxu0 %v15891_v55  ;;  %v15936_v55 = vld [vmem:[#allocation8 + $0xd5c] ss:$28 sps:$4 sm:$0xff]  }
 0x3d1   :  { %v14420_v63 = vpop.f32.mrb[17].mxu1 }
 0x3d2   :  { %10063 = vmatpush1.bf16.msra.mxu1 %v15886_v56  ;;  %v5287_v2 = vpop.f32.mrb[18].mxu1 }
 0x3d3   :  { %10329 = vmatpush1.bf16.msra.mxu0 %v15889_v58  ;;  %v14421_v39 = vpop.f32.mrb[19].mxu1  ;;  %10064 = vmatprep.subr.bf16.mxu1 %v15894_v59  ;;  %v15939_v59 = vld [vmem:[#allocation8 + $0xc14] ss:$28 sps:$4 sm:$0xff]  }
 0x3d4   :  { %10339 = vmatprep.subr.bf16.mxu0 %v15897_v61  ;;  %v15934_v61 = vld [vmem:[#allocation8 + $0xd58] ss:$28 sps:$4 sm:$0xff]   ;;  %v15937_v39 = vld [vmem:[#allocation8 + $0xc10] ss:$28 sps:$4 sm:$0xff]  }
 0x3d6   :  { %10065 = vmatpush1.bf16.msra.mxu1 %v15892_v0  ;;  %10331 = vmatmul.mubr.bf16.vlgmr.msra.gmra.mrb[20].mxu0 %v17342_v36  ;;  %v16851_v0 = vld [vmem:[#allocation7] sm:$0xff] }
 0x3d7   :  { %10340 = vmatpush1.bf16.msra.mxu0 %v15895_v45  ;;  %10371 = vmatprep.mubr.bf16.mxu0 %v17344_v3  ;;  %v870_v2 = vrot.slane %v16851_v0, %v869_v7  ;;  %v15942_v45 = vld [vmem:[#allocation8 + $0xd94] ss:$28 sps:$4 sm:$0xff]  }
 0x3d8   :  { %10066 = vmatprep.subr.bf16.mxu1 %v15900_v5  ;;  %10341 = vmatprep.subr.bf16.mxu0 %v15903_v6  ;;  %v882_v5 = vrot.slane %v17319_v4, %v17260_v1  ;;  %v15940_v6 = vld [vmem:[#allocation8 + $0xd90] ss:$28 sps:$4 sm:$0xff]   ;;  %v15949_v4 = vld [vmem:[#allocation8 + $0xc80] ss:$28 sps:$4 sm:$0xff]  }
 0x3d9   :  { %v15990_v0 = vld [vmem:[#allocation8 + $0xf54] ss:$28 sps:$4 sm:$0xff]  }
 0x3da   :  { %10067 = vmatpush1.bf16.msra.mxu1 %v15898_v10  ;;  %v14468_v10 = vadd.f32 %v17251_v40, %v870_v2  ;;  %v15955_v40 = vld [vmem:[#allocation8 + $0xcb8] ss:$28 sps:$4 sm:$0xff]   ;;  %v15993_v2 = vld [vmem:[#allocation8 + $0xe0c] ss:$28 sps:$4 sm:$0xff]  }
 0x3db   :  { %10342 = vmatpush1.bf16.msra.mxu0 %v15901_v11  ;;  %10068 = vmatprep.subr.bf16.mxu1 %v15906_v35  ;;  %v15948_v11 = vld [vmem:[#allocation8 + $0xdcc] ss:$28 sps:$4 sm:$0xff]   ;;  %v14471_v35 = vadd.f32 %v17329_v21, %v882_v5  ;;  %v15960_v21 = vld [vmem:[#allocation8 + $0xe3c] ss:$28 sps:$4 sm:$0xff]  }
 0x3dc   :  { %10343 = vmatprep.subr.bf16.mxu0 %v15909_v29  ;;  %v15951_v29 = vld [vmem:[#allocation8 + $0xc84] ss:$28 sps:$4 sm:$0xff]   ;;  %v15996_v5 = vld [vmem:[#allocation8 + $0xf8c] ss:$28 sps:$4 sm:$0xff]  }
 0x3de   :  { %10069 = vmatpush1.bf16.msra.mxu1 %v15904_v14  ;;  %v15946_v14 = vld [vmem:[#allocation8 + $0xdc8] ss:$28 sps:$4 sm:$0xff]  }
 0x3df   :  { %10344 = vmatpush1.bf16.msra.mxu0 %v15907_v17  ;;  %10070 = vmatprep.subr.bf16.mxu1 %v15912_v18  ;;  %v5296_v17 = vmax.f32 %v14468_v10, 0.0  ;;  %v15954_v18 = vld [vmem:[#allocation8 + $0xe04] ss:$28 sps:$4 sm:$0xff]  }
 0x3e0   :  { %10345 = vmatprep.subr.bf16.mxu0 %v15915_v22  ;;  %v5299_v22 = vmax.f32 %v14471_v35, 0.0  ;;  %v15997_v10 = vld [vmem:[#allocation8 + $0xe40] ss:$28 sps:$4 sm:$0xff]  }
 0x3e1   :  { %v16000_v35 = vld [vmem:[#allocation8 + $0xfc0] ss:$28 sps:$4 sm:$0xff]  }
 0x3e2   :  { %10071 = vmatpush1.bf16.msra.mxu1 %v15910_v23  ;;  %v15952_v23 = vld [vmem:[#allocation8 + $0xe00] ss:$28 sps:$4 sm:$0xff]  }
 0x3e3   :  { %10346 = vmatpush1.bf16.msra.mxu0 %v15913_v27  ;;  %10072 = vmatprep.subr.bf16.mxu1 %v15918_v28  ;;  %v15957_v27 = vld [vmem:[#allocation8 + $0xcbc] ss:$28 sps:$4 sm:$0xff]   ;;  %v17367_v28 = vpack.c.bf16 %v5296_v17, %v5296_v17  ;;  %v16011_v17 = vld [vmem:[#allocation8 + $0xeb4] ss:$28 sps:$4 sm:$0xff]  }
 0x3e4   :  { %10347 = vmatprep.subr.bf16.mxu0 %v15921_v9  ;;  %v17369_v9 = vpack.c.bf16 %v5299_v22, %v5299_v22  ;;  %v16014_v22 = vld [vmem:[#allocation8 + $0x1034] ss:$28 sps:$4 sm:$0xff]  }
 0x3e6   :  { %10073 = vmatpush1.bf16.msra.mxu1 %v15916_v30  ;;  %v15963_v30 = vld [vmem:[#allocation8 + $0xcf4] ss:$28 sps:$4 sm:$0xff]  }
 0x3e7   :  { %10348 = vmatpush1.bf16.msra.mxu0 %v15919_v44  ;;  %10074 = vmatprep.subr.bf16.mxu1 %v15924_v31  ;;  %v15958_v44 = vld [vmem:[#allocation8 + $0xe38] ss:$28 sps:$4 sm:$0xff]   ;;  %v15961_v31 = vld [vmem:[#allocation8 + $0xcf0] ss:$28 sps:$4 sm:$0xff]  }
 0x3e8   :  { %v14192_v60 = vpop.f32.mrb[16].mxu0  ;;  %10349 = vmatprep.subr.bf16.mxu0 %v15927_v32  ;;  %v15966_v32 = vld [vmem:[#allocation8 + $0xe74] ss:$28 sps:$4 sm:$0xff]  }
 0x3e9   :  { %v14193_v47 = vpop.f32.mrb[17].mxu0 }
 0x3ea   :  { %v14194_v51 = vadd.f32 %v14193_v47, %v14192_v60  ;;  %10075 = vmatpush1.bf16.msra.mxu1 %v15922_v41  ;;  %v14195_v52 = vpop.f32.mrb[18].mxu0  ;;  %v15969_v41 = vld [vmem:[#allocation8 + $0xd2c] ss:$28 sps:$4 sm:$0xff]  }
 0x3eb   :  { %10350 = vmatpush1.bf16.msra.mxu0 %v15925_v46  ;;  %10076 = vmatprep.subr.bf16.mxu1 %v15930_v62  ;;  %v14196_v56 = vpop.f32.mrb[19].mxu0  ;;  %v15964_v46 = vld [vmem:[#allocation8 + $0xe70] ss:$28 sps:$4 sm:$0xff]   ;;  %v15967_v62 = vld [vmem:[#allocation8 + $0xd28] ss:$28 sps:$4 sm:$0xff]  }
 0x3ec   :  { %v5245_v58 = vadd.f32 %v14194_v51, %v17351_v57  ;;  %10351 = vmatprep.subr.bf16.mxu0 %v15933_v20  ;;  %v15945_v57 = vld [vmem:[#allocation8 + $0xc4c] ss:$28 sps:$4 sm:$0xff]   ;;  %v15975_v20 = vld [vmem:[#allocation8 + $0xd64] ss:$28 sps:$4 sm:$0xff]   ;;  %v15981_v52 = vld [vmem:[#allocation8 + $0xd9c] ss:$28 sps:$4 sm:$0xff]  }
 0x3ed   :  { %v15972_v60 = vld [vmem:[#allocation8 + $0xeac] ss:$28 sps:$4 sm:$0xff]   ;;  %v15978_v51 = vld [vmem:[#allocation8 + $0xee4] ss:$28 sps:$4 sm:$0xff]   ;;  %v15984_v56 = vld [vmem:[#allocation8 + $0xf1c] ss:$28 sps:$4 sm:$0xff]  }
 0x3ee   :  { %v17359_v63 = vadd.f32 %v17353_v54, %v5245_v58  ;;  %10077 = vmatpush1.bf16.msra.mxu1 %v15928_v38  ;;  %v15943_v54 = vld [vmem:[#allocation8 + $0xc48] ss:$28 sps:$4 sm:$0xff]   ;;  %v15973_v38 = vld [vmem:[#allocation8 + $0xd60] ss:$28 sps:$4 sm:$0xff]   ;;  %v15987_v58 = vld [vmem:[#allocation8 + $0xdd4] ss:$28 sps:$4 sm:$0xff]  }
 0x3ef   :  { %10352 = vmatpush1.bf16.msra.mxu0 %v15931_v53  ;;  %10078 = vmatprep.subr.bf16.mxu1 %v15936_v55  ;;  %v15970_v47 = vld [vmem:[#allocation8 + $0xea8] ss:$28 sps:$4 sm:$0xff]   ;;  %v15976_v53 = vld [vmem:[#allocation8 + $0xee0] ss:$28 sps:$4 sm:$0xff]   ;;  %v15979_v55 = vld [vmem:[#allocation8 + $0xd98] ss:$28 sps:$4 sm:$0xff]  }
 0x3f0   :  { %10353 = vmatprep.subr.bf16.mxu0 %v15939_v59  ;;  %v15982_v59 = vld [vmem:[#allocation8 + $0xf18] ss:$28 sps:$4 sm:$0xff]  }
 0x3f2   :  { %10079 = vmatpush1.bf16.msra.mxu1 %v15934_v61  ;;  %v15985_v61 = vld [vmem:[#allocation8 + $0xdd0] ss:$28 sps:$4 sm:$0xff]  }
 0x3f3   :  { %10354 = vmatpush1.bf16.msra.mxu0 %v15937_v39  ;;  %10080 = vmatprep.subr.bf16.mxu1 %v15942_v45  ;;  %v15988_v39 = vld [vmem:[#allocation8 + $0xf50] ss:$28 sps:$4 sm:$0xff]   ;;  %v15991_v45 = vld [vmem:[#allocation8 + $0xe08] ss:$28 sps:$4 sm:$0xff]  }
 0x3f4   :  { %10355 = vmatprep.subr.bf16.mxu0 %v15945_v57  ;;  %v15999_v57 = vld [vmem:[#allocation8 + $0xe44] ss:$28 sps:$4 sm:$0xff]  }
 0x3f6   :  { %10081 = vmatpush1.bf16.msra.mxu1 %v15940_v6  ;;  %v15994_v6 = vld [vmem:[#allocation8 + $0xf88] ss:$28 sps:$4 sm:$0xff]  }
 0x3f7   :  { %10356 = vmatpush1.bf16.msra.mxu0 %v15943_v54  ;;  %10082 = vmatprep.subr.bf16.mxu1 %v15948_v11  ;;  %v16002_v54 = vld [vmem:[#allocation8 + $0xfc4] ss:$28 sps:$4 sm:$0xff]   ;;  %v16005_v11 = vld [vmem:[#allocation8 + $0xe7c] ss:$28 sps:$4 sm:$0xff]  }
 0x3f8   :  { %10357 = vmatprep.subr.bf16.mxu0 %v15951_v29  ;;  %v16003_v29 = vld [vmem:[#allocation8 + $0xe78] ss:$28 sps:$4 sm:$0xff]  }
 0x3fa   :  { %10083 = vmatpush1.bf16.msra.mxu1 %v15946_v14  ;;  %v16008_v14 = vld [vmem:[#allocation8 + $0xffc] ss:$28 sps:$4 sm:$0xff]  }
 0x3fb   :  { %10358 = vmatpush1.bf16.msra.mxu0 %v15949_v4  ;;  %10093 = vmatprep.subr.bf16.mxu1 %v15954_v18  ;;  %v16006_v4 = vld [vmem:[#allocation8 + $0xff8] ss:$28 sps:$4 sm:$0xff]   ;;  %v16009_v18 = vld [vmem:[#allocation8 + $0xeb0] ss:$28 sps:$4 sm:$0xff]  }
 0x3fc   :  { %10359 = vmatprep.subr.bf16.mxu0 %v15957_v27  ;;  %v16012_v27 = vld [vmem:[#allocation8 + $0x1030] ss:$28 sps:$4 sm:$0xff]  }
 0x3fd   :  { %10085 = vmatmul.mubr.bf16.vlgmr.msra.gmra.mrb[20].mxu1 %v17367_v28 }
 0x3fe   :  { %10094 = vmatpush1.bf16.msra.mxu1 %v15952_v23  ;;  %10125 = vmatprep.mubr.bf16.mxu1 %v17369_v9  ;;  %v16017_v23 = vld [vmem:[#allocation8 + $0xeec] ss:$28 sps:$4 sm:$0xff]  }
 0x3ff   :  { %10360 = vmatpush1.bf16.msra.mxu0 %v15955_v40  ;;  %10095 = vmatprep.subr.bf16.mxu1 %v15960_v21  ;;  %v16015_v40 = vld [vmem:[#allocation8 + $0xee8] ss:$28 sps:$4 sm:$0xff]  }
 0x400   :  { %10361 = vmatprep.subr.bf16.mxu0 %v15963_v30  ;;  %v16020_v21 = vld [vmem:[#allocation8 + $0x106c] ss:$28 sps:$4 sm:$0xff]   ;;  %v16023_v30 = vld [vmem:[#allocation8 + $0xf24] ss:$28 sps:$4 sm:$0xff]  }
 0x402   :  { %10096 = vmatpush1.bf16.msra.mxu1 %v15958_v44  ;;  %v16018_v44 = vld [vmem:[#allocation8 + $0x1068] ss:$28 sps:$4 sm:$0xff]  }
 0x403   :  { %10362 = vmatpush1.bf16.msra.mxu0 %v15961_v31  ;;  %10097 = vmatprep.subr.bf16.mxu1 %v15966_v32  ;;  %v16021_v31 = vld [vmem:[#allocation8 + $0xf20] ss:$28 sps:$4 sm:$0xff]  }
 0x404   :  { %10363 = vmatprep.subr.bf16.mxu0 %v15969_v41  ;;  %v16026_v32 = vld [vmem:[#allocation8 + $0x10a4] ss:$28 sps:$4 sm:$0xff]   ;;  %v16029_v41 = vld [vmem:[#allocation8 + $0xf5c] ss:$28 sps:$4 sm:$0xff]  }
 0x406   :  { %10098 = vmatpush1.bf16.msra.mxu1 %v15964_v46  ;;  %v16024_v46 = vld [vmem:[#allocation8 + $0x10a0] ss:$28 sps:$4 sm:$0xff]  }
 0x407   :  { %10364 = vmatpush1.bf16.msra.mxu0 %v15967_v62  ;;  %10099 = vmatprep.subr.bf16.mxu1 %v15972_v60  ;;  %v16027_v62 = vld [vmem:[#allocation8 + $0xf58] ss:$28 sps:$4 sm:$0xff]  }
 0x408   :  { %10365 = vmatprep.subr.bf16.mxu0 %v15975_v20  ;;  %v16032_v60 = vld [vmem:[#allocation8 + $0x10dc] ss:$28 sps:$4 sm:$0xff]   ;;  %v16035_v20 = vld [vmem:[#allocation8 + $0xf94] ss:$28 sps:$4 sm:$0xff]  }
 0x40a   :  { %10100 = vmatpush1.bf16.msra.mxu1 %v15970_v47  ;;  %v16030_v47 = vld [vmem:[#allocation8 + $0x10d8] ss:$28 sps:$4 sm:$0xff]  }
 0x40b   :  { %10366 = vmatpush1.bf16.msra.mxu0 %v15973_v38  ;;  %10101 = vmatprep.subr.bf16.mxu1 %v15978_v51  ;;  %v16852_v38 = vld [vmem:[#allocation7 + $0x8] sm:$0x1f] }
 0x40c   :  { %10367 = vmatprep.subr.bf16.mxu0 %v15981_v52  ;;  %v878_v51 = vrot.slane %v16852_v38, %v17279_v37  ;;  %v16033_v52 = vld [vmem:[#allocation8 + $0xf90] ss:$28 sps:$4 sm:$0xff]  }
 0x40d   :  { %v16084_v38 = vld [vmem:[#allocation8 + $0x12d0] ss:$28 sps:$4 sm:$0xff]  }
 0x40e   :  { %10102 = vmatpush1.bf16.msra.mxu1 %v15976_v53  ;;  %v16038_v53 = vld [vmem:[#allocation8 + $0x1114] ss:$28 sps:$4 sm:$0xff]  }
 0x40f   :  { %10368 = vmatpush1.bf16.msra.mxu0 %v15979_v55  ;;  %10103 = vmatprep.subr.bf16.mxu1 %v15984_v56  ;;  %v16041_v55 = vld [vmem:[#allocation8 + $0xfcc] ss:$28 sps:$4 sm:$0xff]  }
 0x410   :  { %10369 = vmatprep.subr.bf16.mxu0 %v15987_v58  ;;  %v16036_v56 = vld [vmem:[#allocation8 + $0x1110] ss:$28 sps:$4 sm:$0xff]   ;;  %v14470_v58 = vadd.f32 %v17325_v15, %v878_v51  ;;  %v16087_v51 = vld [vmem:[#allocation8 + $0x1188] ss:$28 sps:$4 sm:$0xff]  }
 0x412   :  { %10104 = vmatpush1.bf16.msra.mxu1 %v15982_v59  ;;  %v16039_v59 = vld [vmem:[#allocation8 + $0xfc8] ss:$28 sps:$4 sm:$0xff]  }
 0x413   :  { %10370 = vmatpush1.bf16.msra.mxu0 %v15985_v61  ;;  %10105 = vmatprep.subr.bf16.mxu1 %v15990_v0  ;;  %v16044_v61 = vld [vmem:[#allocation8 + $0x114c] ss:$28 sps:$4 sm:$0xff]   ;;  %v16047_v0 = vld [vmem:[#allocation8 + $0x1004] ss:$28 sps:$4 sm:$0xff]  }
 0x414   :  { %10380 = vmatprep.subr.bf16.mxu0 %v15993_v2  ;;  %v16042_v2 = vld [vmem:[#allocation8 + $0x1148] ss:$28 sps:$4 sm:$0xff]  }
 0x416   :  { %10106 = vmatpush1.bf16.msra.mxu1 %v15988_v39  ;;  %10372 = vmatmul.mubr.bf16.vlgmr.msra.gmra.mrb[20].mxu0 %v17367_v28  ;;  %v5298_v39 = vmax.f32 %v14470_v58, 0.0  ;;  %v16098_v58 = vld [vmem:[#allocation8 + $0x1344] ss:$28 sps:$4 sm:$0xff]  }
 0x417   :  { %10381 = vmatpush1.bf16.msra.mxu0 %v15991_v45  ;;  %10412 = vmatprep.mubr.bf16.mxu0 %v17369_v9  ;;  %v16045_v45 = vld [vmem:[#allocation8 + $0x1000] ss:$28 sps:$4 sm:$0xff]  }
 0x418   :  { %10107 = vmatprep.subr.bf16.mxu1 %v15996_v5  ;;  %10382 = vmatprep.subr.bf16.mxu0 %v15999_v57  ;;  %v16050_v5 = vld [vmem:[#allocation8 + $0x1184] ss:$28 sps:$4 sm:$0xff]   ;;  %v5301_v57 = vmax.f32 %v17334_v25, 0.0  ;;  %v17378_v15 = vpack.c.bf16 %v5298_v39, %v5298_v39  ;;  %v16054_v25 = vld [vmem:[#allocation8 + $0x11b8] ss:$28 sps:$4 sm:$0xff]  }
 0x419   :  { %v16107_v39 = vld [vmem:[#allocation8 + $0x1234] ss:$28 sps:$4 sm:$0xff]  }
 0x41a   :  { %10108 = vmatpush1.bf16.msra.mxu1 %v15994_v6  ;;  %v16053_v6 = vld [vmem:[#allocation8 + $0x103c] ss:$28 sps:$4 sm:$0xff]  }
 0x41b   :  { %10383 = vmatpush1.bf16.msra.mxu0 %v15997_v10  ;;  %10109 = vmatprep.subr.bf16.mxu1 %v16002_v54  ;;  %v16048_v10 = vld [vmem:[#allocation8 + $0x1180] ss:$28 sps:$4 sm:$0xff]   ;;  %v16051_v54 = vld [vmem:[#allocation8 + $0x1038] ss:$28 sps:$4 sm:$0xff]  }
 0x41c   :  { %10384 = vmatprep.subr.bf16.mxu0 %v16005_v11  ;;  %v16056_v11 = vld [vmem:[#allocation8 + $0x11bc] ss:$28 sps:$4 sm:$0xff]  }
 0x41e   :  { %10110 = vmatpush1.bf16.msra.mxu1 %v16000_v35  ;;  %v17380_v35 = vpack.c.bf16 %v5301_v57, %v5301_v57  ;;  %v16110_v57 = vld [vmem:[#allocation8 + $0x13b4] ss:$28 sps:$4 sm:$0xff]  }
 0x41f   :  { %10385 = vmatpush1.bf16.msra.mxu0 %v16003_v29  ;;  %10111 = vmatprep.subr.bf16.mxu1 %v16008_v14  ;;  %v16059_v29 = vld [vmem:[#allocation8 + $0x1074] ss:$28 sps:$4 sm:$0xff]  }
 0x420   :  { %10386 = vmatprep.subr.bf16.mxu0 %v16011_v17  ;;  %v16057_v14 = vld [vmem:[#allocation8 + $0x1070] ss:$28 sps:$4 sm:$0xff]  }
 0x421   :  { %v16062_v17 = vld [vmem:[#allocation8 + $0x11f4] ss:$28 sps:$4 sm:$0xff]  }
 0x422   :  { %10112 = vmatpush1.bf16.msra.mxu1 %v16006_v4  ;;  %v16065_v4 = vld [vmem:[#allocation8 + $0x10ac] ss:$28 sps:$4 sm:$0xff]  }
 0x423   :  { %10387 = vmatpush1.bf16.msra.mxu0 %v16009_v18  ;;  %10113 = vmatprep.subr.bf16.mxu1 %v16014_v22  ;;  %v16060_v18 = vld [vmem:[#allocation8 + $0x11f0] ss:$28 sps:$4 sm:$0xff]   ;;  %v16063_v22 = vld [vmem:[#allocation8 + $0x10a8] ss:$28 sps:$4 sm:$0xff]  }
 0x424   :  { %10388 = vmatprep.subr.bf16.mxu0 %v16017_v23  ;;  %v16068_v23 = vld [vmem:[#allocation8 + $0x122c] ss:$28 sps:$4 sm:$0xff]  }
 0x426   :  { %10114 = vmatpush1.bf16.msra.mxu1 %v16012_v27  ;;  %v16071_v27 = vld [vmem:[#allocation8 + $0x10e4] ss:$28 sps:$4 sm:$0xff]  }
 0x427   :  { %10389 = vmatpush1.bf16.msra.mxu0 %v16015_v40  ;;  %10115 = vmatprep.subr.bf16.mxu1 %v16020_v21  ;;  %v16066_v40 = vld [vmem:[#allocation8 + $0x1228] ss:$28 sps:$4 sm:$0xff]   ;;  %v16069_v21 = vld [vmem:[#allocation8 + $0x10e0] ss:$28 sps:$4 sm:$0xff]  }
 0x428   :  { %10390 = vmatprep.subr.bf16.mxu0 %v16023_v30  ;;  %v16074_v30 = vld [vmem:[#allocation8 + $0x1264] ss:$28 sps:$4 sm:$0xff]  }
 0x42a   :  { %10116 = vmatpush1.bf16.msra.mxu1 %v16018_v44  ;;  %v16077_v44 = vld [vmem:[#allocation8 + $0x111c] ss:$28 sps:$4 sm:$0xff]  }
 0x42b   :  { %10391 = vmatpush1.bf16.msra.mxu0 %v16021_v31  ;;  %10117 = vmatprep.subr.bf16.mxu1 %v16026_v32  ;;  %v16072_v31 = vld [vmem:[#allocation8 + $0x1260] ss:$28 sps:$4 sm:$0xff]   ;;  %v16075_v32 = vld [vmem:[#allocation8 + $0x1118] ss:$28 sps:$4 sm:$0xff]  }
 0x42c   :  { %10392 = vmatprep.subr.bf16.mxu0 %v16029_v41  ;;  %v16080_v41 = vld [vmem:[#allocation8 + $0x129c] ss:$28 sps:$4 sm:$0xff]  }
 0x42e   :  { %10118 = vmatpush1.bf16.msra.mxu1 %v16024_v46  ;;  %v16083_v46 = vld [vmem:[#allocation8 + $0x1154] ss:$28 sps:$4 sm:$0xff]  }
 0x42f   :  { %10393 = vmatpush1.bf16.msra.mxu0 %v16027_v62  ;;  %10119 = vmatprep.subr.bf16.mxu1 %v16032_v60  ;;  %v16078_v62 = vld [vmem:[#allocation8 + $0x1298] ss:$28 sps:$4 sm:$0xff]   ;;  %v16081_v60 = vld [vmem:[#allocation8 + $0x1150] ss:$28 sps:$4 sm:$0xff]  }
 0x430   :  { %10394 = vmatprep.subr.bf16.mxu0 %v16035_v20  ;;  %v16086_v20 = vld [vmem:[#allocation8 + $0x12d4] ss:$28 sps:$4 sm:$0xff]  }
 0x432   :  { %10120 = vmatpush1.bf16.msra.mxu1 %v16030_v47  ;;  %v16089_v47 = vld [vmem:[#allocation8 + $0x118c] ss:$28 sps:$4 sm:$0xff]  }
 0x433   :  { %10395 = vmatpush1.bf16.msra.mxu0 %v16033_v52  ;;  %10121 = vmatprep.subr.bf16.mxu1 %v16038_v53  ;;  %v16092_v52 = vld [vmem:[#allocation8 + $0x130c] ss:$28 sps:$4 sm:$0xff]   ;;  %v16095_v53 = vld [vmem:[#allocation8 + $0x11c4] ss:$28 sps:$4 sm:$0xff]  }
 0x434   :  { %10396 = vmatprep.subr.bf16.mxu0 %v16041_v55  ;;  %v16090_v55 = vld [vmem:[#allocation8 + $0x1308] ss:$28 sps:$4 sm:$0xff]  }
 0x436   :  { %10122 = vmatpush1.bf16.msra.mxu1 %v16036_v56  ;;  %v16093_v56 = vld [vmem:[#allocation8 + $0x11c0] ss:$28 sps:$4 sm:$0xff]  }
 0x437   :  { %10397 = vmatpush1.bf16.msra.mxu0 %v16039_v59  ;;  %10123 = vmatprep.subr.bf16.mxu1 %v16044_v61  ;;  %v16101_v59 = vld [vmem:[#allocation8 + $0x11fc] ss:$28 sps:$4 sm:$0xff]  }
 0x438   :  { %10398 = vmatprep.subr.bf16.mxu0 %v16047_v0  ;;  %v16096_v61 = vld [vmem:[#allocation8 + $0x1340] ss:$28 sps:$4 sm:$0xff]   ;;  %v16099_v0 = vld [vmem:[#allocation8 + $0x11f8] ss:$28 sps:$4 sm:$0xff]  }
 0x43a   :  { %10124 = vmatpush1.bf16.msra.mxu1 %v16042_v2  ;;  %v16104_v2 = vld [vmem:[#allocation8 + $0x137c] ss:$28 sps:$4 sm:$0xff]  }
 0x43b   :  { %10399 = vmatpush1.bf16.msra.mxu0 %v16045_v45  ;;  %10134 = vmatprep.subr.bf16.mxu1 %v16050_v5  ;;  %v16102_v45 = vld [vmem:[#allocation8 + $0x1378] ss:$28 sps:$4 sm:$0xff]   ;;  %v16105_v5 = vld [vmem:[#allocation8 + $0x1230] ss:$28 sps:$4 sm:$0xff]  }
 0x43c   :  { %10400 = vmatprep.subr.bf16.mxu0 %v16053_v6  ;;  %v16113_v6 = vld [vmem:[#allocation8 + $0x126c] ss:$28 sps:$4 sm:$0xff]  }
 0x43d   :  { %10126 = vmatmul.mubr.bf16.vlgmr.msra.gmra.mrb[20].mxu1 %v17378_v15 }
 0x43e   :  { %10135 = vmatpush1.bf16.msra.mxu1 %v16048_v10  ;;  %10166 = vmatprep.mubr.bf16.mxu1 %v17380_v35  ;;  %v16108_v10 = vld [vmem:[#allocation8 + $0x13b0] ss:$28 sps:$4 sm:$0xff]  }
 0x43f   :  { %10401 = vmatpush1.bf16.msra.mxu0 %v16051_v54  ;;  %10136 = vmatprep.subr.bf16.mxu1 %v16056_v11  ;;  %v16111_v54 = vld [vmem:[#allocation8 + $0x1268] ss:$28 sps:$4 sm:$0xff]  }
 0x440   :  { %10402 = vmatprep.subr.bf16.mxu0 %v16059_v29  ;;  %v16116_v11 = vld [vmem:[#allocation8 + $0x13ec] ss:$28 sps:$4 sm:$0xff]   ;;  %v16119_v29 = vld [vmem:[#allocation8 + $0x12a4] ss:$28 sps:$4 sm:$0xff]  }
 0x442   :  { %10137 = vmatpush1.bf16.msra.mxu1 %v16054_v25  ;;  %v16114_v25 = vld [vmem:[#allocation8 + $0x13e8] ss:$28 sps:$4 sm:$0xff]  }
 0x443   :  { %10403 = vmatpush1.bf16.msra.mxu0 %v16057_v14  ;;  %10138 = vmatprep.subr.bf16.mxu1 %v16062_v17  ;;  %v16117_v14 = vld [vmem:[#allocation8 + $0x12a0] ss:$28 sps:$4 sm:$0xff]  }
 0x444   :  { %10404 = vmatprep.subr.bf16.mxu0 %v16065_v4  ;;  %v16122_v17 = vld [vmem:[#allocation8 + $0x1424] ss:$28 sps:$4 sm:$0xff]   ;;  %v16125_v4 = vld [vmem:[#allocation8 + $0x12dc] ss:$28 sps:$4 sm:$0xff]  }
 0x446   :  { %10139 = vmatpush1.bf16.msra.mxu1 %v16060_v18  ;;  %v16120_v18 = vld [vmem:[#allocation8 + $0x1420] ss:$28 sps:$4 sm:$0xff]  }
 0x447   :  { %10405 = vmatpush1.bf16.msra.mxu0 %v16063_v22  ;;  %10140 = vmatprep.subr.bf16.mxu1 %v16068_v23  ;;  %v16123_v22 = vld [vmem:[#allocation8 + $0x12d8] ss:$28 sps:$4 sm:$0xff]  }
 0x448   :  { %10406 = vmatprep.subr.bf16.mxu0 %v16071_v27  ;;  %v16128_v23 = vld [vmem:[#allocation8 + $0x145c] ss:$28 sps:$4 sm:$0xff]   ;;  %v16131_v27 = vld [vmem:[#allocation8 + $0x1314] ss:$28 sps:$4 sm:$0xff]  }
 0x44a   :  { %10141 = vmatpush1.bf16.msra.mxu1 %v16066_v40  ;;  %v16126_v40 = vld [vmem:[#allocation8 + $0x1458] ss:$28 sps:$4 sm:$0xff]  }
 0x44b   :  { %10407 = vmatpush1.bf16.msra.mxu0 %v16069_v21  ;;  %10142 = vmatprep.subr.bf16.mxu1 %v16074_v30  ;;  %v16129_v21 = vld [vmem:[#allocation8 + $0x1310] ss:$28 sps:$4 sm:$0xff]  }
 0x44c   :  { %10408 = vmatprep.subr.bf16.mxu0 %v16077_v44  ;;  %v16134_v30 = vld [vmem:[#allocation8 + $0x1494] ss:$28 sps:$4 sm:$0xff]   ;;  %v16137_v44 = vld [vmem:[#allocation8 + $0x134c] ss:$28 sps:$4 sm:$0xff]  }
 0x44e   :  { %10143 = vmatpush1.bf16.msra.mxu1 %v16072_v31  ;;  %v16132_v31 = vld [vmem:[#allocation8 + $0x1490] ss:$28 sps:$4 sm:$0xff]  }
 0x44f   :  { %10409 = vmatpush1.bf16.msra.mxu0 %v16075_v32  ;;  %10144 = vmatprep.subr.bf16.mxu1 %v16080_v41  ;;  %v16135_v32 = vld [vmem:[#allocation8 + $0x1348] ss:$28 sps:$4 sm:$0xff]  }
 0x450   :  { %10410 = vmatprep.subr.bf16.mxu0 %v16083_v46  ;;  %v16140_v41 = vld [vmem:[#allocation8 + $0x14cc] ss:$28 sps:$4 sm:$0xff]   ;;  %v16143_v46 = vld [vmem:[#allocation8 + $0x1384] ss:$28 sps:$4 sm:$0xff]  }
 0x452   :  { %10145 = vmatpush1.bf16.msra.mxu1 %v16078_v62  ;;  %v16138_v62 = vld [vmem:[#allocation8 + $0x14c8] ss:$28 sps:$4 sm:$0xff]  }
 0x453   :  { %10411 = vmatpush1.bf16.msra.mxu0 %v16081_v60  ;;  %10146 = vmatprep.subr.bf16.mxu1 %v16086_v20  ;;  %v5300_v60 = vmax.f32 %v17327_v24, 0.0  ;;  %v16141_v20 = vld [vmem:[#allocation8 + $0x1380] ss:$28 sps:$4 sm:$0xff]   ;;  %v16150_v24 = vld [vmem:[#allocation8 + $0x1538] ss:$28 sps:$4 sm:$0xff]  }
 0x454   :  { %10421 = vmatprep.subr.bf16.mxu0 %v16089_v47  ;;  %v16146_v47 = vld [vmem:[#allocation8 + $0x1504] ss:$28 sps:$4 sm:$0xff]  }
 0x456   :  { %10147 = vmatpush1.bf16.msra.mxu1 %v16084_v38  ;;  %10413 = vmatmul.mubr.bf16.vlgmr.msra.gmra.mrb[20].mxu0 %v17378_v15  ;;  %v16149_v38 = vld [vmem:[#allocation8 + $0x13bc] ss:$28 sps:$4 sm:$0xff]  }
 0x457   :  { %10422 = vmatpush1.bf16.msra.mxu0 %v16087_v51  ;;  %10453 = vmatprep.mubr.bf16.mxu0 %v17380_v35  ;;  %v16144_v51 = vld [vmem:[#allocation8 + $0x1500] ss:$28 sps:$4 sm:$0xff]  }
 0x458   :  { %10148 = vmatprep.subr.bf16.mxu1 %v16092_v52  ;;  %10423 = vmatprep.subr.bf16.mxu0 %v16095_v53  ;;  %v17387_v52 = vpack.c.bf16 %v5300_v60, %v5300_v60  ;;  %v16147_v53 = vld [vmem:[#allocation8 + $0x13b8] ss:$28 sps:$4 sm:$0xff]   ;;  %v16200_v60 = vld [vmem:[#allocation8 + $0x4c] ss:$28 sps:$4 sm:$0xff]  }
 0x45a   :  { %10149 = vmatpush1.bf16.msra.mxu1 %v16090_v55  ;;  %v16152_v55 = vld [vmem:[#allocation8 + $0x153c] ss:$28 sps:$4 sm:$0xff]  }
 0x45b   :  { %10424 = vmatpush1.bf16.msra.mxu0 %v16093_v56  ;;  %10150 = vmatprep.subr.bf16.mxu1 %v16098_v58  ;;  %v16155_v56 = vld [vmem:[#allocation8 + $0x13f4] ss:$28 sps:$4 sm:$0xff]  }
 0x45c   :  { %10425 = vmatprep.subr.bf16.mxu0 %v16101_v59  ;;  %v16153_v58 = vld [vmem:[#allocation8 + $0x13f0] ss:$28 sps:$4 sm:$0xff]  }
 0x45d   :  { %v16158_v59 = vld [vmem:[#allocation8 + $0x1574] ss:$28 sps:$4 sm:$0xff]  }
 0x45e   :  { %10151 = vmatpush1.bf16.msra.mxu1 %v16096_v61  ;;  %v16161_v61 = vld [vmem:[#allocation8 + $0x142c] ss:$28 sps:$4 sm:$0xff]  }
 0x45f   :  { %10426 = vmatpush1.bf16.msra.mxu0 %v16099_v0  ;;  %10152 = vmatprep.subr.bf16.mxu1 %v16104_v2  ;;  %v16156_v0 = vld [vmem:[#allocation8 + $0x1570] ss:$28 sps:$4 sm:$0xff]   ;;  %v16159_v2 = vld [vmem:[#allocation8 + $0x1428] ss:$28 sps:$4 sm:$0xff]  }
 0x460   :  { %10427 = vmatprep.subr.bf16.mxu0 %v16107_v39  ;;  %v16164_v39 = vld [vmem:[#allocation8 + $0x15ac] ss:$28 sps:$4 sm:$0xff]  }
 0x462   :  { %10153 = vmatpush1.bf16.msra.mxu1 %v16102_v45  ;;  %v16167_v45 = vld [vmem:[#allocation8 + $0x1464] ss:$28 sps:$4 sm:$0xff]  }
 0x463   :  { %10428 = vmatpush1.bf16.msra.mxu0 %v16105_v5  ;;  %10154 = vmatprep.subr.bf16.mxu1 %v16110_v57  ;;  %v16162_v5 = vld [vmem:[#allocation8 + $0x15a8] ss:$28 sps:$4 sm:$0xff]   ;;  %v16165_v57 = vld [vmem:[#allocation8 + $0x1460] ss:$28 sps:$4 sm:$0xff]  }
 0x464   :  { %10429 = vmatprep.subr.bf16.mxu0 %v16113_v6  ;;  %v16170_v6 = vld [vmem:[#allocation8 + $0x15e4] ss:$28 sps:$4 sm:$0xff]  }
 0x466   :  { %10155 = vmatpush1.bf16.msra.mxu1 %v16108_v10  ;;  %v16173_v10 = vld [vmem:[#allocation8 + $0x149c] ss:$28 sps:$4 sm:$0xff]  }
 0x467   :  { %10430 = vmatpush1.bf16.msra.mxu0 %v16111_v54  ;;  %10156 = vmatprep.subr.bf16.mxu1 %v16116_v11  ;;  %v16168_v54 = vld [vmem:[#allocation8 + $0x15e0] ss:$28 sps:$4 sm:$0xff]   ;;  %v16171_v11 = vld [vmem:[#allocation8 + $0x1498] ss:$28 sps:$4 sm:$0xff]  }
 0x468   :  { %10431 = vmatprep.subr.bf16.mxu0 %v16119_v29  ;;  %v16176_v29 = vld [vmem:[#allocation8 + $0x161c] ss:$28 sps:$4 sm:$0xff]  }
 0x46a   :  { %10157 = vmatpush1.bf16.msra.mxu1 %v16114_v25  ;;  %v16179_v25 = vld [vmem:[#allocation8 + $0x14d4] ss:$28 sps:$4 sm:$0xff]  }
 0x46b   :  { %10432 = vmatpush1.bf16.msra.mxu0 %v16117_v14  ;;  %10158 = vmatprep.subr.bf16.mxu1 %v16122_v17  ;;  %v16174_v14 = vld [vmem:[#allocation8 + $0x1618] ss:$28 sps:$4 sm:$0xff]   ;;  %v16177_v17 = vld [vmem:[#allocation8 + $0x14d0] ss:$28 sps:$4 sm:$0xff]  }
 0x46c   :  { %10433 = vmatprep.subr.bf16.mxu0 %v16125_v4  ;;  %v16182_v4 = vld [vmem:[#allocation8 + $0x1654] ss:$28 sps:$4 sm:$0xff]  }
 0x46e   :  { %10159 = vmatpush1.bf16.msra.mxu1 %v16120_v18  ;;  %v16185_v18 = vld [vmem:[#allocation8 + $0x150c] ss:$28 sps:$4 sm:$0xff]  }
 0x46f   :  { %10434 = vmatpush1.bf16.msra.mxu0 %v16123_v22  ;;  %10160 = vmatprep.subr.bf16.mxu1 %v16128_v23  ;;  %v16180_v22 = vld [vmem:[#allocation8 + $0x1650] ss:$28 sps:$4 sm:$0xff]   ;;  %v16183_v23 = vld [vmem:[#allocation8 + $0x1508] ss:$28 sps:$4 sm:$0xff]  }
 0x470   :  { %10435 = vmatprep.subr.bf16.mxu0 %v16131_v27  ;;  %v16188_v27 = vld [vmem:[#allocation8 + $0x168c] ss:$28 sps:$4 sm:$0xff]  }
 0x472   :  { %10161 = vmatpush1.bf16.msra.mxu1 %v16126_v40  ;;  %v16191_v40 = vld [vmem:[#allocation8 + $0x1544] ss:$28 sps:$4 sm:$0xff]  }
 0x473   :  { %10436 = vmatpush1.bf16.msra.mxu0 %v16129_v21  ;;  %10162 = vmatprep.subr.bf16.mxu1 %v16134_v30  ;;  %v16186_v21 = vld [vmem:[#allocation8 + $0x1688] ss:$28 sps:$4 sm:$0xff]   ;;  %v5302_v30 = vmax.f32 %v17359_v63, 0.0 }
 0x474   :  { %10437 = vmatprep.subr.bf16.mxu0 %v16137_v44  ;;  %v16189_v44 = vld [vmem:[#allocation8 + $0x1540] ss:$28 sps:$4 sm:$0xff]   ;;  %v16198_v63 = vld [vmem:[#allocation8 + $0x48] ss:$28 sps:$4 sm:$0xff]  }
 0x476   :  { %10163 = vmatpush1.bf16.msra.mxu1 %v16132_v31  ;;  %v16194_v31 = vld [vmem:[#allocation8 + $0x14] ss:$28 sps:$4 sm:$0xff]  }
 0x477   :  { %10438 = vmatpush1.bf16.msra.mxu0 %v16135_v32  ;;  %10164 = vmatprep.subr.bf16.mxu1 %v16140_v41  ;;  %v16197_v32 = vld [vmem:[#allocation8 + $0x157c] ss:$28 sps:$4 sm:$0xff]   ;;  %v16192_v41 = vld [vmem:[#allocation8 + $0x10] ss:$28 sps:$4 sm:$0xff]  }
 0x478   :  { %10439 = vmatprep.subr.bf16.mxu0 %v16143_v46  ;;  %v17394_v46 = vpack.c.bf16 %v5302_v30, %v5302_v30  ;;  %v16243_v30 = vld [vmem:[#allocation8 + $0x208] ss:$28 sps:$4 sm:$0xff]  }
 0x47a   :  { %10165 = vmatpush1.bf16.msra.mxu1 %v16138_v62  ;;  %v16195_v62 = vld [vmem:[#allocation8 + $0x1578] ss:$28 sps:$4 sm:$0xff]  }
 0x47b   :  { %10440 = vmatpush1.bf16.msra.mxu0 %v16141_v20  ;;  %10175 = vmatprep.subr.bf16.mxu1 %v16146_v47  ;;  %v16203_v20 = vld [vmem:[#allocation8 + $0x15b4] ss:$28 sps:$4 sm:$0xff]  }
 0x47c   :  { %10441 = vmatprep.subr.bf16.mxu0 %v16149_v38  ;;  %v16201_v47 = vld [vmem:[#allocation8 + $0x15b0] ss:$28 sps:$4 sm:$0xff]   ;;  %v16206_v38 = vld [vmem:[#allocation8 + $0x84] ss:$28 sps:$4 sm:$0xff]  }
 0x47d   :  { %10167 = vmatmul.mubr.bf16.vlgmr.msra.gmra.mrb[20].mxu1 %v17387_v52 }
 0x47e   :  { %10176 = vmatpush1.bf16.msra.mxu1 %v16144_v51  ;;  %10207 = vmatprep.mubr.bf16.mxu1 %v17029_v42  ;;  %v16209_v51 = vld [vmem:[#allocation8 + $0x15ec] ss:$28 sps:$4 sm:$0xff]  }
 0x47f   :  { %10442 = vmatpush1.bf16.msra.mxu0 %v16147_v53  ;;  %10177 = vmatprep.subr.bf16.mxu1 %v16152_v55  ;;  %v16204_v53 = vld [vmem:[#allocation8 + $0x80] ss:$28 sps:$4 sm:$0xff]   ;;  %v16207_v55 = vld [vmem:[#allocation8 + $0x15e8] ss:$28 sps:$4 sm:$0xff]  }
 0x480   :  { %10443 = vmatprep.subr.bf16.mxu0 %v16155_v56  ;;  %v16212_v56 = vld [vmem:[#allocation8 + $0xbc] ss:$28 sps:$4 sm:$0xff]  }
 0x482   :  { %10178 = vmatpush1.bf16.msra.mxu1 %v16150_v24  ;;  %v16215_v24 = vld [vmem:[#allocation8 + $0x1624] ss:$28 sps:$4 sm:$0xff]  }
 0x483   :  { %10444 = vmatpush1.bf16.msra.mxu0 %v16153_v58  ;;  %10179 = vmatprep.subr.bf16.mxu1 %v16158_v59  ;;  %v16210_v58 = vld [vmem:[#allocation8 + $0xb8] ss:$28 sps:$4 sm:$0xff]   ;;  %v16213_v59 = vld [vmem:[#allocation8 + $0x1620] ss:$28 sps:$4 sm:$0xff]  }
 0x484   :  { %10445 = vmatprep.subr.bf16.mxu0 %v16161_v61  ;;  %v16218_v61 = vld [vmem:[#allocation8 + $0xf4] ss:$28 sps:$4 sm:$0xff]  }
 0x486   :  { %10180 = vmatpush1.bf16.msra.mxu1 %v16156_v0  ;;  %v16221_v0 = vld [vmem:[#allocation8 + $0x165c] ss:$28 sps:$4 sm:$0xff]  }
 0x487   :  { %10446 = vmatpush1.bf16.msra.mxu0 %v16159_v2  ;;  %10181 = vmatprep.subr.bf16.mxu1 %v16164_v39  ;;  %v16216_v2 = vld [vmem:[#allocation8 + $0xf0] ss:$28 sps:$4 sm:$0xff]   ;;  %v16219_v39 = vld [vmem:[#allocation8 + $0x1658] ss:$28 sps:$4 sm:$0xff]  }
 0x488   :  { %10447 = vmatprep.subr.bf16.mxu0 %v16167_v45  ;;  %v16224_v45 = vld [vmem:[#allocation8 + $0x12c] ss:$28 sps:$4 sm:$0xff]  }
 0x48a   :  { %10182 = vmatpush1.bf16.msra.mxu1 %v16162_v5  ;;  %v16227_v5 = vld [vmem:[#allocation8 + $0x1694] ss:$28 sps:$4 sm:$0xff]  }
 0x48b   :  { %10448 = vmatpush1.bf16.msra.mxu0 %v16165_v57  ;;  %10183 = vmatprep.subr.bf16.mxu1 %v16170_v6  ;;  %v16222_v57 = vld [vmem:[#allocation8 + $0x128] ss:$28 sps:$4 sm:$0xff]   ;;  %v16225_v6 = vld [vmem:[#allocation8 + $0x1690] ss:$28 sps:$4 sm:$0xff]  }
 0x48c   :  { %10449 = vmatprep.subr.bf16.mxu0 %v16173_v10  ;;  %v16230_v10 = vld [vmem:[#allocation8 + $0x164] ss:$28 sps:$4 sm:$0xff]  }
 0x48e   :  { %10184 = vmatpush1.bf16.msra.mxu1 %v16168_v54  ;;  %v16231_v54 = vld [vmem:[#allocation8 + $0x1d8] ss:$28 sps:$4 sm:$0xff]  }
 0x48f   :  { %10450 = vmatpush1.bf16.msra.mxu0 %v16171_v11  ;;  %10185 = vmatprep.subr.bf16.mxu1 %v16176_v29  ;;  %v16228_v11 = vld [vmem:[#allocation8 + $0x160] ss:$28 sps:$4 sm:$0xff]   ;;  %v16232_v29 = vld [vmem:[#allocation8 + $0x18] ss:$28 sps:$4 sm:$0xff]  }
 0x490   :  { %10451 = vmatprep.subr.bf16.mxu0 %v16179_v25  ;;  %v16235_v25 = vld [vmem:[#allocation8 + $0x19c] ss:$28 sps:$4 sm:$0xff]  }
 0x492   :  { %10186 = vmatpush1.bf16.msra.mxu1 %v16174_v14  ;;  %v16236_v14 = vld [vmem:[#allocation8 + $0x210] ss:$28 sps:$4 sm:$0xff]  }
 0x493   :  { %10452 = vmatpush1.bf16.msra.mxu0 %v16177_v17  ;;  %10187 = vmatprep.subr.bf16.mxu1 %v16182_v4  ;;  %v16233_v17 = vld [vmem:[#allocation8 + $0x198] ss:$28 sps:$4 sm:$0xff]   ;;  %v16237_v4 = vld [vmem:[#allocation8 + $0x50] ss:$28 sps:$4 sm:$0xff]  }
 0x494   :  { %10462 = vmatprep.subr.bf16.mxu0 %v16185_v18  ;;  %v16240_v18 = vld [vmem:[#allocation8 + $0x1d4] ss:$28 sps:$4 sm:$0xff]  }
 0x496   :  { %10188 = vmatpush1.bf16.msra.mxu1 %v16180_v22  ;;  %10454 = vmatmul.mubr.bf16.vlgmr.msra.gmra.mrb[20].mxu0 %v17387_v52  ;;  %v16241_v22 = vld [vmem:[#allocation8 + $0x248] ss:$28 sps:$4 sm:$0xff]  }
 0x497   :  { %10463 = vmatpush1.bf16.msra.mxu0 %v16183_v23  ;;  %10189 = vmatprep.subr.bf16.mxu1 %v16188_v27  ;;  %v16238_v23 = vld [vmem:[#allocation8 + $0x1d0] ss:$28 sps:$4 sm:$0xff]   ;;  %v16242_v27 = vld [vmem:[#allocation8 + $0x88] ss:$28 sps:$4 sm:$0xff]  }
 0x498   :  { %10464 = vmatprep.subr.bf16.mxu0 %v16191_v40  ;;  %10494 = vmatprep.mubr.bf16.mxu0 %v17029_v42  ;;  %v16245_v40 = vld [vmem:[#allocation8 + $0x20c] ss:$28 sps:$4 sm:$0xff]  }
 0x49a   :  { %10190 = vmatpush1.bf16.msra.mxu1 %v16186_v21  ;;  %v16246_v21 = vld [vmem:[#allocation8 + $0x280] ss:$28 sps:$4 sm:$0xff]  }
 0x49b   :  { %10465 = vmatpush1.bf16.msra.mxu0 %v16189_v44  ;;  %10503 = vmatprep.subr.bf16.mxu1 %v16194_v31  ;;  %v16247_v44 = vld [vmem:[#allocation8 + $0xc0] ss:$28 sps:$4 sm:$0xff]  }
 0x49c   :  { %10466 = vmatprep.subr.bf16.mxu0 %v16197_v32  ;;  %v16250_v31 = vld [vmem:[#allocation8 + $0x244] ss:$28 sps:$4 sm:$0xff]  }
 0x49d   :  { %10208 = vmatmul.mubr.bf16.vlgmr.msra.gmra.mrb[20].mxu1 %v17394_v46  ;;  %v16248_v32 = vld [vmem:[#allocation8 + $0x240] ss:$28 sps:$4 sm:$0xff]  }
 0x49e   :  { %10504 = vmatpush1.bf16.msra.mxu1 %v16192_v41  ;;  %10535 = vmatprep.mubr.bf16.mxu1 %v17271_v19  ;;  %v16252_v41 = vld [vmem:[#allocation8 + $0xf8] ss:$28 sps:$4 sm:$0xff]  }
 0x49f   :  { %10467 = vmatpush1.bf16.msra.mxu0 %v16195_v62  ;;  %10505 = vmatprep.subr.bf16.mxu1 %v16200_v60  ;;  %v16255_v62 = vld [vmem:[#allocation8 + $0x27c] ss:$28 sps:$4 sm:$0xff]   ;;  %v16256_v60 = vld [vmem:[#allocation8 + $0x2f0] ss:$28 sps:$4 sm:$0xff]  }
 0x4a0   :  { %10468 = vmatprep.subr.bf16.mxu0 %v16203_v20  ;;  %v16253_v20 = vld [vmem:[#allocation8 + $0x278] ss:$28 sps:$4 sm:$0xff]  }
 0x4a2   :  { %10506 = vmatpush1.bf16.msra.mxu1 %v16198_v63  ;;  %v16257_v63 = vld [vmem:[#allocation8 + $0x130] ss:$28 sps:$4 sm:$0xff]  }
 0x4a3   :  { %10469 = vmatpush1.bf16.msra.mxu0 %v16201_v47  ;;  %10507 = vmatprep.subr.bf16.mxu1 %v16206_v38  ;;  %v16260_v47 = vld [vmem:[#allocation8 + $0x2b4] ss:$28 sps:$4 sm:$0xff]   ;;  %v16261_v38 = vld [vmem:[#allocation8 + $0x328] ss:$28 sps:$4 sm:$0xff]  }
 0x4a4   :  { %10470 = vmatprep.subr.bf16.mxu0 %v16209_v51  ;;  %v16258_v51 = vld [vmem:[#allocation8 + $0x2b0] ss:$28 sps:$4 sm:$0xff]  }
 0x4a6   :  { %10508 = vmatpush1.bf16.msra.mxu1 %v16204_v53  ;;  %v16262_v53 = vld [vmem:[#allocation8 + $0x168] ss:$28 sps:$4 sm:$0xff]  }
 0x4a7   :  { %10471 = vmatpush1.bf16.msra.mxu0 %v16207_v55  ;;  %10509 = vmatprep.subr.bf16.mxu1 %v16212_v56  ;;  %v16265_v55 = vld [vmem:[#allocation8 + $0x2ec] ss:$28 sps:$4 sm:$0xff]   ;;  %v16266_v56 = vld [vmem:[#allocation8 + $0x360] ss:$28 sps:$4 sm:$0xff]  }
 0x4a8   :  { %10472 = vmatprep.subr.bf16.mxu0 %v16215_v24  ;;  %v16263_v24 = vld [vmem:[#allocation8 + $0x2e8] ss:$28 sps:$4 sm:$0xff]  }
 0x4aa   :  { %10510 = vmatpush1.bf16.msra.mxu1 %v16210_v58  ;;  %v16267_v58 = vld [vmem:[#allocation8 + $0x1a0] ss:$28 sps:$4 sm:$0xff]  }
 0x4ab   :  { %10473 = vmatpush1.bf16.msra.mxu0 %v16213_v59  ;;  %10511 = vmatprep.subr.bf16.mxu1 %v16218_v61  ;;  %v16270_v59 = vld [vmem:[#allocation8 + $0x324] ss:$28 sps:$4 sm:$0xff]   ;;  %v16271_v61 = vld [vmem:[#allocation8 + $0x558] ss:$28 sps:$4 sm:$0xff]  }
 0x4ac   :  { %10474 = vmatprep.subr.bf16.mxu0 %v16221_v0  ;;  %v16268_v0 = vld [vmem:[#allocation8 + $0x320] ss:$28 sps:$4 sm:$0xff]  }
 0x4ae   :  { %10512 = vmatpush1.bf16.msra.mxu1 %v16216_v2  ;;  %v16272_v2 = vld [vmem:[#allocation8 + $0x398] ss:$28 sps:$4 sm:$0xff]  }
 0x4af   :  { %10475 = vmatpush1.bf16.msra.mxu0 %v16219_v39  ;;  %10513 = vmatprep.subr.bf16.mxu1 %v16224_v45  ;;  %v16275_v39 = vld [vmem:[#allocation8 + $0x35c] ss:$28 sps:$4 sm:$0xff]   ;;  %v16276_v45 = vld [vmem:[#allocation8 + $0x590] ss:$28 sps:$4 sm:$0xff]  }
 0x4b0   :  { %10476 = vmatprep.subr.bf16.mxu0 %v16227_v5  ;;  %v16273_v5 = vld [vmem:[#allocation8 + $0x358] ss:$28 sps:$4 sm:$0xff]  }
 0x4b2   :  { %10514 = vmatpush1.bf16.msra.mxu1 %v16222_v57  ;;  %v16277_v57 = vld [vmem:[#allocation8 + $0x3d0] ss:$28 sps:$4 sm:$0xff]  }
 0x4b3   :  { %10477 = vmatpush1.bf16.msra.mxu0 %v16225_v6  ;;  %10515 = vmatprep.subr.bf16.mxu1 %v16230_v10  ;;  %v16280_v6 = vld [vmem:[#allocation8 + $0x394] ss:$28 sps:$4 sm:$0xff]   ;;  %v16281_v10 = vld [vmem:[#allocation8 + $0x5c8] ss:$28 sps:$4 sm:$0xff]  }
 0x4b4   :  { %14200 = vmatprep.subr.bf16.mxu0 %v16231_v54  ;;  %v16278_v54 = vld [vmem:[#allocation8 + $0x390] ss:$28 sps:$4 sm:$0xff]  }
 0x4b6   :  { %10495 = vmatmul.mubr.bf16.vlgmr.msra.gmra.mrb[20].mxu0 %v17394_v46  ;;  %10516 = vmatpush1.bf16.msra.mxu1 %v16228_v11  ;;  %v16282_v11 = vld [vmem:[#allocation8 + $0x408] ss:$28 sps:$4 sm:$0xff]  }
 0x4b7   :  { %14201 = vmatpush3.bf16.msra.mxu0 %v16232_v29  ;;  %10822 = vmatprep.mubr.bf16.mxu0 %v17271_v19  ;;  %v16251_v19 = vld [vmem:[#allocation8 + $0x2b8] ss:$28 sps:$4 sm:$0xff]   ;;  %v16285_v29 = vld [vmem:[#allocation8 + $0x3cc] ss:$28 sps:$4 sm:$0xff]  }
 0x4b8   :  { %10517 = vmatprep.subr.bf16.mxu1 %v16235_v25  ;;  %14202 = vmatprep.subr.bf16.mxu0 %v16236_v14  ;;  %v16286_v25 = vld [vmem:[#allocation8 + $0x600] ss:$28 sps:$4 sm:$0xff]   ;;  %v16283_v14 = vld [vmem:[#allocation8 + $0x3c8] ss:$28 sps:$4 sm:$0xff]  }
 0x4ba   :  { %10518 = vmatpush1.bf16.msra.mxu1 %v16233_v17  ;;  %v16287_v17 = vld [vmem:[#allocation8 + $0x440] ss:$28 sps:$4 sm:$0xff]  }
 0x4bb   :  { %14203 = vmatpush3.bf16.msra.mxu0 %v16237_v4  ;;  %10519 = vmatprep.subr.bf16.mxu1 %v16240_v18  ;;  %v16290_v4 = vld [vmem:[#allocation8 + $0x404] ss:$28 sps:$4 sm:$0xff]   ;;  %v16291_v18 = vld [vmem:[#allocation8 + $0x638] ss:$28 sps:$4 sm:$0xff]  }
 0x4bc   :  { %14204 = vmatprep.subr.bf16.mxu0 %v16241_v22  ;;  %v16288_v22 = vld [vmem:[#allocation8 + $0x400] ss:$28 sps:$4 sm:$0xff]  }
 0x4be   :  { %10520 = vmatpush1.bf16.msra.mxu1 %v16238_v23  ;;  %v16292_v23 = vld [vmem:[#allocation8 + $0x478] ss:$28 sps:$4 sm:$0xff]  }
 0x4bf   :  { %14205 = vmatpush3.bf16.msra.mxu0 %v16242_v27  ;;  %10521 = vmatprep.subr.bf16.mxu1 %v16245_v40  ;;  %v16295_v27 = vld [vmem:[#allocation8 + $0x43c] ss:$28 sps:$4 sm:$0xff]   ;;  %v16296_v40 = vld [vmem:[#allocation8 + $0x670] ss:$28 sps:$4 sm:$0xff]  }
 0x4c0   :  { %14206 = vmatprep.subr.bf16.mxu0 %v16246_v21  ;;  %v16300_v21 = vld [vmem:[#allocation8 + $0x474] ss:$28 sps:$4 sm:$0xff]  }
 0x4c2   :  { %10522 = vmatpush1.bf16.msra.mxu1 %v16243_v30  ;;  %v16301_v30 = vld [vmem:[#allocation8 + $0x6a8] ss:$28 sps:$4 sm:$0xff]  }
 0x4c3   :  { %14207 = vmatpush3.bf16.msra.mxu0 %v16247_v44  ;;  %10523 = vmatprep.subr.bf16.mxu1 %v16250_v31  ;;  %v16298_v44 = vld [vmem:[#allocation8 + $0x470] ss:$28 sps:$4 sm:$0xff]   ;;  %v16302_v31 = vld [vmem:[#allocation8 + $0x4e8] ss:$28 sps:$4 sm:$0xff]  }
 0x4c4   :  { %14208 = vmatprep.subr.bf16.mxu0 %v16251_v19  ;;  %v16305_v19 = vld [vmem:[#allocation8 + $0x4ac] ss:$28 sps:$4 sm:$0xff]  }
 0x4c6   :  { %10524 = vmatpush1.bf16.msra.mxu1 %v16248_v32  ;;  %v16306_v32 = vld [vmem:[#allocation8 + $0x6e0] ss:$28 sps:$4 sm:$0xff]  }
 0x4c7   :  { %14209 = vmatpush3.bf16.msra.mxu0 %v16252_v41  ;;  %10525 = vmatprep.subr.bf16.mxu1 %v16255_v62  ;;  %v16303_v41 = vld [vmem:[#allocation8 + $0x4a8] ss:$28 sps:$4 sm:$0xff]   ;;  %v16307_v62 = vld [vmem:[#allocation8 + $0x520] ss:$28 sps:$4 sm:$0xff]  }
 0x4c8   :  { %14210 = vmatprep.subr.bf16.mxu0 %v16256_v60  ;;  %v16310_v60 = vld [vmem:[#allocation8 + $0x4e4] ss:$28 sps:$4 sm:$0xff]  }
 0x4ca   :  { %10526 = vmatpush1.bf16.msra.mxu1 %v16253_v20  ;;  %v16311_v20 = vld [vmem:[#allocation8 + $0x8d8] ss:$28 sps:$4 sm:$0xff]  }
 0x4cb   :  { %14211 = vmatpush3.bf16.msra.mxu0 %v16257_v63  ;;  %10527 = vmatprep.subr.bf16.mxu1 %v16260_v47  ;;  %v16308_v63 = vld [vmem:[#allocation8 + $0x4e0] ss:$28 sps:$4 sm:$0xff]   ;;  %v16312_v47 = vld [vmem:[#allocation8 + $0x718] ss:$28 sps:$4 sm:$0xff]  }
 0x4cc   :  { %14212 = vmatprep.subr.bf16.mxu0 %v16261_v38  ;;  %v16315_v38 = vld [vmem:[#allocation8 + $0x51c] ss:$28 sps:$4 sm:$0xff]  }
 0x4ce   :  { %10528 = vmatpush1.bf16.msra.mxu1 %v16258_v51  ;;  %v16316_v51 = vld [vmem:[#allocation8 + $0x910] ss:$28 sps:$4 sm:$0xff]  }
 0x4cf   :  { %14213 = vmatpush3.bf16.msra.mxu0 %v16262_v53  ;;  %10529 = vmatprep.subr.bf16.mxu1 %v16265_v55  ;;  %v16313_v53 = vld [vmem:[#allocation8 + $0x518] ss:$28 sps:$4 sm:$0xff]   ;;  %v16317_v55 = vld [vmem:[#allocation8 + $0x750] ss:$28 sps:$4 sm:$0xff]  }
 0x4d0   :  { %14214 = vmatprep.subr.bf16.mxu0 %v16266_v56  ;;  %v16320_v56 = vld [vmem:[#allocation8 + $0x554] ss:$28 sps:$4 sm:$0xff]  }
 0x4d2   :  { %10530 = vmatpush1.bf16.msra.mxu1 %v16263_v24  ;;  %v16321_v24 = vld [vmem:[#allocation8 + $0x948] ss:$28 sps:$4 sm:$0xff]  }
 0x4d3   :  { %14215 = vmatpush3.bf16.msra.mxu0 %v16267_v58  ;;  %10531 = vmatprep.subr.bf16.mxu1 %v16270_v59  ;;  %v16318_v58 = vld [vmem:[#allocation8 + $0x550] ss:$28 sps:$4 sm:$0xff]   ;;  %v16322_v59 = vld [vmem:[#allocation8 + $0x788] ss:$28 sps:$4 sm:$0xff]  }
 0x4d4   :  { %14222 = vmatprep.subr.bf16.mxu0 %v16271_v61  ;;  %v16325_v61 = vld [vmem:[#allocation8 + $0x58c] ss:$28 sps:$4 sm:$0xff]  }
 0x4d6   :  { %10532 = vmatpush1.bf16.msra.mxu1 %v16268_v0  ;;  %10823 = vmatmul.mubr.bf16.vlgmr.msra.gmra.mrb[24].mxu0 %v17290_v48  ;;  %v16326_v0 = vld [vmem:[#allocation8 + $0x980] ss:$28 sps:$4 sm:$0xff]  }
 0x4d7   :  { %14223 = vmatpush3.bf16.msra.mxu0 %v16272_v2  ;;  %10862 = vmatprep.mubr.bf16.mxu0 %v17292_v26  ;;  %v16323_v2 = vld [vmem:[#allocation8 + $0x588] ss:$28 sps:$4 sm:$0xff]  }
 0x4d8   :  { %10533 = vmatprep.subr.bf16.mxu1 %v16275_v39  ;;  %14224 = vmatprep.subr.bf16.mxu0 %v16276_v45  ;;  %v16327_v39 = vld [vmem:[#allocation8 + $0x7c0] ss:$28 sps:$4 sm:$0xff]  }
 0x4d9   :  { %v16330_v45 = vld [vmem:[#allocation8 + $0x5c4] ss:$28 sps:$4 sm:$0xff]  }
 0x4da   :  { %10534 = vmatpush1.bf16.msra.mxu1 %v16273_v5  ;;  %v16331_v5 = vld [vmem:[#allocation8 + $0x9b8] ss:$28 sps:$4 sm:$0xff]  }
 0x4db   :  { %14225 = vmatpush3.bf16.msra.mxu0 %v16277_v57  ;;  %10544 = vmatprep.subr.bf16.mxu1 %v16280_v6  ;;  %v16328_v57 = vld [vmem:[#allocation8 + $0x5c0] ss:$28 sps:$4 sm:$0xff]   ;;  %v16332_v6 = vld [vmem:[#allocation8 + $0x7f8] ss:$28 sps:$4 sm:$0xff]  }
 0x4dc   :  { %14226 = vmatprep.subr.bf16.mxu0 %v16281_v10  ;;  %v16335_v10 = vld [vmem:[#allocation8 + $0x5fc] ss:$28 sps:$4 sm:$0xff]  }
 0x4dd   :  { %10536 = vmatmul.mubr.bf16.vlgmr.msra.gmra.mrb[24].mxu1 %v17290_v48  ;;  %v16293_v48 = vld [vmem:[#allocation8 + $0x438] ss:$28 sps:$4 sm:$0xff]  }
 0x4de   :  { %10545 = vmatpush1.bf16.msra.mxu1 %v16278_v54  ;;  %10576 = vmatprep.mubr.bf16.mxu1 %v17292_v26  ;;  %v16297_v26 = vld [vmem:[#allocation8 + $0x4b0] ss:$28 sps:$4 sm:$0xff]  }
 0x4df   :  { %14227 = vmatpush3.bf16.msra.mxu0 %v16282_v11  ;;  %10546 = vmatprep.subr.bf16.mxu1 %v16285_v29  ;;  %v16336_v54 = vld [vmem:[#allocation8 + $0x9f0] ss:$28 sps:$4 sm:$0xff]   ;;  %v16333_v11 = vld [vmem:[#allocation8 + $0x5f8] ss:$28 sps:$4 sm:$0xff]  }
 0x4e0   :  { %14228 = vmatprep.subr.bf16.mxu0 %v16286_v25  ;;  %v16337_v29 = vld [vmem:[#allocation8 + $0x830] ss:$28 sps:$4 sm:$0xff]  }
 0x4e1   :  { %v16340_v25 = vld [vmem:[#allocation8 + $0x634] ss:$28 sps:$4 sm:$0xff]  }
 0x4e2   :  { %10547 = vmatpush1.bf16.msra.mxu1 %v16283_v14  ;;  %v16341_v14 = vld [vmem:[#allocation8 + $0xa28] ss:$28 sps:$4 sm:$0xff]  }
 0x4e3   :  { %14229 = vmatpush3.bf16.msra.mxu0 %v16287_v17  ;;  %10548 = vmatprep.subr.bf16.mxu1 %v16290_v4  ;;  %v16338_v17 = vld [vmem:[#allocation8 + $0x630] ss:$28 sps:$4 sm:$0xff]   ;;  %v16342_v4 = vld [vmem:[#allocation8 + $0x868] ss:$28 sps:$4 sm:$0xff]  }
 0x4e4   :  { %14230 = vmatprep.subr.bf16.mxu0 %v16291_v18  ;;  %v16345_v18 = vld [vmem:[#allocation8 + $0x66c] ss:$28 sps:$4 sm:$0xff]  }
 0x4e6   :  { %10549 = vmatpush1.bf16.msra.mxu1 %v16288_v22  ;;  %v16346_v22 = vld [vmem:[#allocation8 + $0xa60] ss:$28 sps:$4 sm:$0xff]  }
 0x4e7   :  { %14231 = vmatpush3.bf16.msra.mxu0 %v16292_v23  ;;  %10550 = vmatprep.subr.bf16.mxu1 %v16295_v27  ;;  %v16343_v23 = vld [vmem:[#allocation8 + $0x668] ss:$28 sps:$4 sm:$0xff]   ;;  %v16347_v27 = vld [vmem:[#allocation8 + $0x8a0] ss:$28 sps:$4 sm:$0xff]  }
 0x4e8   :  { %14232 = vmatprep.subr.bf16.mxu0 %v16296_v40  ;;  %v16350_v40 = vld [vmem:[#allocation8 + $0x6a4] ss:$28 sps:$4 sm:$0xff]  }
 0x4ea   :  { %10551 = vmatpush1.bf16.msra.mxu1 %v16293_v48  ;;  %v16351_v48 = vld [vmem:[#allocation8 + $0xc58] ss:$28 sps:$4 sm:$0xff]  }
 0x4eb   :  { %14233 = vmatpush3.bf16.msra.mxu0 %v16297_v26  ;;  %10552 = vmatprep.subr.bf16.mxu1 %v16300_v21  ;;  %v16348_v26 = vld [vmem:[#allocation8 + $0x6a0] ss:$28 sps:$4 sm:$0xff]   ;;  %v16352_v21 = vld [vmem:[#allocation8 + $0xa98] ss:$28 sps:$4 sm:$0xff]  }
 0x4ec   :  { %14234 = vmatprep.subr.bf16.mxu0 %v16301_v30  ;;  %v16355_v30 = vld [vmem:[#allocation8 + $0x6dc] ss:$28 sps:$4 sm:$0xff]  }
 0x4ee   :  { %10553 = vmatpush1.bf16.msra.mxu1 %v16298_v44  ;;  %v16356_v44 = vld [vmem:[#allocation8 + $0xc90] ss:$28 sps:$4 sm:$0xff]  }
 0x4ef   :  { %14235 = vmatpush3.bf16.msra.mxu0 %v16302_v31  ;;  %10554 = vmatprep.subr.bf16.mxu1 %v16305_v19  ;;  %v16353_v31 = vld [vmem:[#allocation8 + $0x6d8] ss:$28 sps:$4 sm:$0xff]   ;;  %v16357_v19 = vld [vmem:[#allocation8 + $0xad0] ss:$28 sps:$4 sm:$0xff]  }
 0x4f0   :  { %14236 = vmatprep.subr.bf16.mxu0 %v16306_v32  ;;  %v16360_v32 = vld [vmem:[#allocation8 + $0x714] ss:$28 sps:$4 sm:$0xff]  }
 0x4f2   :  { %10555 = vmatpush1.bf16.msra.mxu1 %v16303_v41  ;;  %v16361_v41 = vld [vmem:[#allocation8 + $0xcc8] ss:$28 sps:$4 sm:$0xff]  }
 0x4f3   :  { %14237 = vmatpush3.bf16.msra.mxu0 %v16307_v62  ;;  %10556 = vmatprep.subr.bf16.mxu1 %v16310_v60  ;;  %v16358_v62 = vld [vmem:[#allocation8 + $0x710] ss:$28 sps:$4 sm:$0xff]   ;;  %v16362_v60 = vld [vmem:[#allocation8 + $0xb08] ss:$28 sps:$4 sm:$0xff]  }
 0x4f4   :  { %14244 = vmatprep.subr.bf16.mxu0 %v16311_v20  ;;  %v16365_v20 = vld [vmem:[#allocation8 + $0x74c] ss:$28 sps:$4 sm:$0xff]  }
 0x4f6   :  { %10557 = vmatpush1.bf16.msra.mxu1 %v16308_v63  ;;  %10863 = vmatmul.mubr.bf16.vlgmr.msra.gmra.mrb[28].mxu0 %v17311_v12  ;;  %v16366_v63 = vld [vmem:[#allocation8 + $0xd00] ss:$28 sps:$4 sm:$0xff]  }
 0x4f7   :  { %14245 = vmatpush3.bf16.msra.mxu0 %v16312_v47  ;;  %10902 = vmatprep.mubr.bf16.mxu0 %v17313_v13  ;;  %v16363_v47 = vld [vmem:[#allocation8 + $0x748] ss:$28 sps:$4 sm:$0xff]  }
 0x4f8   :  { %10558 = vmatprep.subr.bf16.mxu1 %v16315_v38  ;;  %14246 = vmatprep.subr.bf16.mxu0 %v16316_v51  ;;  %v16367_v38 = vld [vmem:[#allocation8 + $0xb40] ss:$28 sps:$4 sm:$0xff]  }
 0x4f9   :  { %v16370_v51 = vld [vmem:[#allocation8 + $0x784] ss:$28 sps:$4 sm:$0xff]  }
 0x4fa   :  { %10559 = vmatpush1.bf16.msra.mxu1 %v16313_v53  ;;  %v16371_v53 = vld [vmem:[#allocation8 + $0xd38] ss:$28 sps:$4 sm:$0xff]  }
 0x4fb   :  { %14247 = vmatpush3.bf16.msra.mxu0 %v16317_v55  ;;  %10560 = vmatprep.subr.bf16.mxu1 %v16320_v56  ;;  %v16368_v55 = vld [vmem:[#allocation8 + $0x780] ss:$28 sps:$4 sm:$0xff]   ;;  %v16372_v56 = vld [vmem:[#allocation8 + $0xb78] ss:$28 sps:$4 sm:$0xff]  }
 0x4fc   :  { %14248 = vmatprep.subr.bf16.mxu0 %v16321_v24  ;;  %v16375_v24 = vld [vmem:[#allocation8 + $0x7bc] ss:$28 sps:$4 sm:$0xff]  }
 0x4fe   :  { %10561 = vmatpush1.bf16.msra.mxu1 %v16318_v58  ;;  %v16376_v58 = vld [vmem:[#allocation8 + $0xd70] ss:$28 sps:$4 sm:$0xff]  }
 0x4ff   :  { %14249 = vmatpush3.bf16.msra.mxu0 %v16322_v59  ;;  %10562 = vmatprep.subr.bf16.mxu1 %v16325_v61  ;;  %v16380_v59 = vld [vmem:[#allocation8 + $0x7f4] ss:$28 sps:$4 sm:$0xff]   ;;  %v16381_v61 = vld [vmem:[#allocation8 + $0xda8] ss:$28 sps:$4 sm:$0xff]  }
 0x500   :  { %14250 = vmatprep.subr.bf16.mxu0 %v16326_v0  ;;  %v16378_v0 = vld [vmem:[#allocation8 + $0x7f0] ss:$28 sps:$4 sm:$0xff]  }
 0x502   :  { %10563 = vmatpush1.bf16.msra.mxu1 %v16323_v2  ;;  %v16382_v2 = vld [vmem:[#allocation8 + $0xbe8] ss:$28 sps:$4 sm:$0xff]  }
 0x503   :  { %14251 = vmatpush3.bf16.msra.mxu0 %v16327_v39  ;;  %10564 = vmatprep.subr.bf16.mxu1 %v16330_v45  ;;  %v16385_v39 = vld [vmem:[#allocation8 + $0x82c] ss:$28 sps:$4 sm:$0xff]   ;;  %v16386_v45 = vld [vmem:[#allocation8 + $0xde0] ss:$28 sps:$4 sm:$0xff]  }
 0x504   :  { %14252 = vmatprep.subr.bf16.mxu0 %v16331_v5  ;;  %v16383_v5 = vld [vmem:[#allocation8 + $0x828] ss:$28 sps:$4 sm:$0xff]  }
 0x506   :  { %10565 = vmatpush1.bf16.msra.mxu1 %v16328_v57  ;;  %v16387_v57 = vld [vmem:[#allocation8 + $0xc20] ss:$28 sps:$4 sm:$0xff]  }
 0x507   :  { %14253 = vmatpush3.bf16.msra.mxu0 %v16332_v6  ;;  %10566 = vmatprep.subr.bf16.mxu1 %v16335_v10  ;;  %v16390_v6 = vld [vmem:[#allocation8 + $0x864] ss:$28 sps:$4 sm:$0xff]   ;;  %v16391_v10 = vld [vmem:[#allocation8 + $0xfd8] ss:$28 sps:$4 sm:$0xff]  }
 0x508   :  { %14254 = vmatprep.subr.bf16.mxu0 %v16336_v54  ;;  %v16388_v54 = vld [vmem:[#allocation8 + $0x860] ss:$28 sps:$4 sm:$0xff]  }
 0x50a   :  { %10567 = vmatpush1.bf16.msra.mxu1 %v16333_v11  ;;  %v16392_v11 = vld [vmem:[#allocation8 + $0xe18] ss:$28 sps:$4 sm:$0xff]  }
 0x50b   :  { %14255 = vmatpush3.bf16.msra.mxu0 %v16337_v29  ;;  %10568 = vmatprep.subr.bf16.mxu1 %v16340_v25  ;;  %v16395_v29 = vld [vmem:[#allocation8 + $0x89c] ss:$28 sps:$4 sm:$0xff]   ;;  %v16396_v25 = vld [vmem:[#allocation8 + $0x1010] ss:$28 sps:$4 sm:$0xff]  }
 0x50c   :  { %14256 = vmatprep.subr.bf16.mxu0 %v16341_v14  ;;  %v16393_v14 = vld [vmem:[#allocation8 + $0x898] ss:$28 sps:$4 sm:$0xff]  }
 0x50e   :  { %10569 = vmatpush1.bf16.msra.mxu1 %v16338_v17  ;;  %v16397_v17 = vld [vmem:[#allocation8 + $0xe50] ss:$28 sps:$4 sm:$0xff]  }
 0x50f   :  { %14257 = vmatpush3.bf16.msra.mxu0 %v16342_v4  ;;  %10570 = vmatprep.subr.bf16.mxu1 %v16345_v18  ;;  %v16400_v4 = vld [vmem:[#allocation8 + $0x8d4] ss:$28 sps:$4 sm:$0xff]   ;;  %v16401_v18 = vld [vmem:[#allocation8 + $0x1048] ss:$28 sps:$4 sm:$0xff]  }
 0x510   :  { %14258 = vmatprep.subr.bf16.mxu0 %v16346_v22  ;;  %v16398_v22 = vld [vmem:[#allocation8 + $0x8d0] ss:$28 sps:$4 sm:$0xff]  }
 0x512   :  { %10571 = vmatpush1.bf16.msra.mxu1 %v16343_v23  ;;  %v16402_v23 = vld [vmem:[#allocation8 + $0xe88] ss:$28 sps:$4 sm:$0xff]  }
 0x513   :  { %14259 = vmatpush3.bf16.msra.mxu0 %v16347_v27  ;;  %10572 = vmatprep.subr.bf16.mxu1 %v16350_v40  ;;  %v16405_v27 = vld [vmem:[#allocation8 + $0x90c] ss:$28 sps:$4 sm:$0xff]   ;;  %v16406_v40 = vld [vmem:[#allocation8 + $0x1080] ss:$28 sps:$4 sm:$0xff]  }
 0x514   :  { %14266 = vmatprep.subr.bf16.mxu0 %v16351_v48  ;;  %v16403_v48 = vld [vmem:[#allocation8 + $0x908] ss:$28 sps:$4 sm:$0xff]  }
 0x516   :  { %10573 = vmatpush1.bf16.msra.mxu1 %v16348_v26  ;;  %10903 = vmatmul.mubr.bf16.vlgmr.msra.gmra.mrb[32].mxu0 %v17342_v36  ;;  %v16407_v26 = vld [vmem:[#allocation8 + $0xec0] ss:$28 sps:$4 sm:$0xff]  }
 0x517   :  { %14267 = vmatpush3.bf16.msra.mxu0 %v16352_v21  ;;  %10942 = vmatprep.mubr.bf16.mxu0 %v17344_v3  ;;  %v16410_v21 = vld [vmem:[#allocation8 + $0x944] ss:$28 sps:$4 sm:$0xff]  }
 0x518   :  { %10574 = vmatprep.subr.bf16.mxu1 %v16355_v30  ;;  %14268 = vmatprep.subr.bf16.mxu0 %v16356_v44  ;;  %v16411_v30 = vld [vmem:[#allocation8 + $0x10b8] ss:$28 sps:$4 sm:$0xff]   ;;  %v16408_v44 = vld [vmem:[#allocation8 + $0x940] ss:$28 sps:$4 sm:$0xff]  }
 0x51a   :  { %10575 = vmatpush1.bf16.msra.mxu1 %v16353_v31  ;;  %v16412_v31 = vld [vmem:[#allocation8 + $0xef8] ss:$28 sps:$4 sm:$0xff]  }
 0x51b   :  { %14269 = vmatpush3.bf16.msra.mxu0 %v16357_v19  ;;  %10585 = vmatprep.subr.bf16.mxu1 %v16360_v32  ;;  %v16415_v19 = vld [vmem:[#allocation8 + $0x97c] ss:$28 sps:$4 sm:$0xff]   ;;  %v16416_v32 = vld [vmem:[#allocation8 + $0x10f0] ss:$28 sps:$4 sm:$0xff]  }
 0x51c   :  { %14270 = vmatprep.subr.bf16.mxu0 %v16361_v41  ;;  %v16413_v41 = vld [vmem:[#allocation8 + $0x978] ss:$28 sps:$4 sm:$0xff]  }
 0x51d   :  { %10577 = vmatmul.mubr.bf16.vlgmr.msra.gmra.mrb[24].mxu1 %v17311_v12  ;;  %v16373_v12 = vld [vmem:[#allocation8 + $0x7b8] ss:$28 sps:$4 sm:$0xff]  }
 0x51e   :  { %10586 = vmatpush1.bf16.msra.mxu1 %v16358_v62  ;;  %10617 = vmatprep.mubr.bf16.mxu1 %v17313_v13  ;;  %v16377_v13 = vld [vmem:[#allocation8 + $0xbb0] ss:$28 sps:$4 sm:$0xff]  }
 0x51f   :  { %14271 = vmatpush3.bf16.msra.mxu0 %v16362_v60  ;;  %10587 = vmatprep.subr.bf16.mxu1 %v16365_v20  ;;  %v16417_v62 = vld [vmem:[#allocation8 + $0xf30] ss:$28 sps:$4 sm:$0xff]   ;;  %v16421_v20 = vld [vmem:[#allocation8 + $0x1128] ss:$28 sps:$4 sm:$0xff]  }
 0x520   :  { %14272 = vmatprep.subr.bf16.mxu0 %v16366_v63  ;;  %v16420_v60 = vld [vmem:[#allocation8 + $0x9b4] ss:$28 sps:$4 sm:$0xff]  }
 0x521   :  { %v16418_v63 = vld [vmem:[#allocation8 + $0x9b0] ss:$28 sps:$4 sm:$0xff]  }
 0x522   :  { %10588 = vmatpush1.bf16.msra.mxu1 %v16363_v47  ;;  %v16422_v47 = vld [vmem:[#allocation8 + $0xf68] ss:$28 sps:$4 sm:$0xff]  }
 0x523   :  { %14273 = vmatpush3.bf16.msra.mxu0 %v16367_v38  ;;  %10589 = vmatprep.subr.bf16.mxu1 %v16370_v51  ;;  %v16425_v38 = vld [vmem:[#allocation8 + $0x9ec] ss:$28 sps:$4 sm:$0xff]   ;;  %v16426_v51 = vld [vmem:[#allocation8 + $0x1160] ss:$28 sps:$4 sm:$0xff]  }
 0x524   :  { %14274 = vmatprep.subr.bf16.mxu0 %v16371_v53  ;;  %v16423_v53 = vld [vmem:[#allocation8 + $0x9e8] ss:$28 sps:$4 sm:$0xff]  }
 0x526   :  { %10590 = vmatpush1.bf16.msra.mxu1 %v16368_v55  ;;  %v16427_v55 = vld [vmem:[#allocation8 + $0xfa0] ss:$28 sps:$4 sm:$0xff]  }
 0x527   :  { %14275 = vmatpush3.bf16.msra.mxu0 %v16372_v56  ;;  %10591 = vmatprep.subr.bf16.mxu1 %v16375_v24  ;;  %v16430_v56 = vld [vmem:[#allocation8 + $0xa24] ss:$28 sps:$4 sm:$0xff]   ;;  %v16431_v24 = vld [vmem:[#allocation8 + $0x1358] ss:$28 sps:$4 sm:$0xff]  }
 0x528   :  { %14276 = vmatprep.subr.bf16.mxu0 %v16376_v58  ;;  %v16428_v58 = vld [vmem:[#allocation8 + $0xa20] ss:$28 sps:$4 sm:$0xff]  }
 0x52a   :  { %10592 = vmatpush1.bf16.msra.mxu1 %v16373_v12  ;;  %v16432_v12 = vld [vmem:[#allocation8 + $0x1198] ss:$28 sps:$4 sm:$0xff]  }
 0x52b   :  { %14277 = vmatpush3.bf16.msra.mxu0 %v16377_v13  ;;  %10593 = vmatprep.subr.bf16.mxu1 %v16380_v59  ;;  %v16435_v13 = vld [vmem:[#allocation8 + $0xa5c] ss:$28 sps:$4 sm:$0xff]   ;;  %v16436_v59 = vld [vmem:[#allocation8 + $0x1390] ss:$28 sps:$4 sm:$0xff]  }
 0x52c   :  { %14278 = vmatprep.subr.bf16.mxu0 %v16381_v61  ;;  %v16433_v61 = vld [vmem:[#allocation8 + $0xa58] ss:$28 sps:$4 sm:$0xff]  }
 0x52e   :  { %10594 = vmatpush1.bf16.msra.mxu1 %v16378_v0  ;;  %v16437_v0 = vld [vmem:[#allocation8 + $0x11d0] ss:$28 sps:$4 sm:$0xff]  }
 0x52f   :  { %14279 = vmatpush3.bf16.msra.mxu0 %v16382_v2  ;;  %10595 = vmatprep.subr.bf16.mxu1 %v16385_v39  ;;  %v16440_v2 = vld [vmem:[#allocation8 + $0xa94] ss:$28 sps:$4 sm:$0xff]   ;;  %v16441_v39 = vld [vmem:[#allocation8 + $0x13c8] ss:$28 sps:$4 sm:$0xff]  }
 0x530   :  { %14280 = vmatprep.subr.bf16.mxu0 %v16386_v45  ;;  %v16438_v45 = vld [vmem:[#allocation8 + $0xa90] ss:$28 sps:$4 sm:$0xff]  }
 0x532   :  { %10596 = vmatpush1.bf16.msra.mxu1 %v16383_v5  ;;  %v16442_v5 = vld [vmem:[#allocation8 + $0x1208] ss:$28 sps:$4 sm:$0xff]  }
 0x533   :  { %14281 = vmatpush3.bf16.msra.mxu0 %v16387_v57  ;;  %10597 = vmatprep.subr.bf16.mxu1 %v16390_v6  ;;  %v16445_v57 = vld [vmem:[#allocation8 + $0xacc] ss:$28 sps:$4 sm:$0xff]   ;;  %v16446_v6 = vld [vmem:[#allocation8 + $0x1400] ss:$28 sps:$4 sm:$0xff]  }
 0x534   :  { %14288 = vmatprep.subr.bf16.mxu0 %v16391_v10  ;;  %v16443_v10 = vld [vmem:[#allocation8 + $0xac8] ss:$28 sps:$4 sm:$0xff]  }
 0x536   :  { %10598 = vmatpush1.bf16.msra.mxu1 %v16388_v54  ;;  %10943 = vmatmul.mubr.bf16.vlgmr.msra.gmra.mrb[36].mxu0 %v17367_v28  ;;  %v16447_v54 = vld [vmem:[#allocation8 + $0x1240] ss:$28 sps:$4 sm:$0xff]  }
 0x537   :  { %14289 = vmatpush3.bf16.msra.mxu0 %v16392_v11  ;;  %10982 = vmatprep.mubr.bf16.mxu0 %v17369_v9  ;;  %v16450_v11 = vld [vmem:[#allocation8 + $0xb04] ss:$28 sps:$4 sm:$0xff]  }
 0x538   :  { %10599 = vmatprep.subr.bf16.mxu1 %v16395_v29  ;;  %14290 = vmatprep.subr.bf16.mxu0 %v16396_v25  ;;  %v16451_v29 = vld [vmem:[#allocation8 + $0x1438] ss:$28 sps:$4 sm:$0xff]   ;;  %v16448_v25 = vld [vmem:[#allocation8 + $0xb00] ss:$28 sps:$4 sm:$0xff]  }
 0x53a   :  { %10600 = vmatpush1.bf16.msra.mxu1 %v16393_v14  ;;  %v16452_v14 = vld [vmem:[#allocation8 + $0x1278] ss:$28 sps:$4 sm:$0xff]  }
 0x53b   :  { %14291 = vmatpush3.bf16.msra.mxu0 %v16397_v17  ;;  %10601 = vmatprep.subr.bf16.mxu1 %v16400_v4  ;;  %v16455_v17 = vld [vmem:[#allocation8 + $0xb3c] ss:$28 sps:$4 sm:$0xff]   ;;  %v16456_v4 = vld [vmem:[#allocation8 + $0x1470] ss:$28 sps:$4 sm:$0xff]  }
 0x53c   :  { %14292 = vmatprep.subr.bf16.mxu0 %v16401_v18  ;;  %v16460_v18 = vld [vmem:[#allocation8 + $0xb74] ss:$28 sps:$4 sm:$0xff]  }
 0x53e   :  { %10602 = vmatpush1.bf16.msra.mxu1 %v16398_v22  ;;  %v16461_v22 = vld [vmem:[#allocation8 + $0x14a8] ss:$28 sps:$4 sm:$0xff]  }
 0x53f   :  { %14293 = vmatpush3.bf16.msra.mxu0 %v16402_v23  ;;  %10603 = vmatprep.subr.bf16.mxu1 %v16405_v27  ;;  %v16458_v23 = vld [vmem:[#allocation8 + $0xb70] ss:$28 sps:$4 sm:$0xff]   ;;  %v16462_v27 = vld [vmem:[#allocation8 + $0x12e8] ss:$28 sps:$4 sm:$0xff]  }
 0x540   :  { %14294 = vmatprep.subr.bf16.mxu0 %v16406_v40  ;;  %v16465_v40 = vld [vmem:[#allocation8 + $0xbac] ss:$28 sps:$4 sm:$0xff]  }
 0x542   :  { %10604 = vmatpush1.bf16.msra.mxu1 %v16403_v48  ;;  %v16466_v48 = vld [vmem:[#allocation8 + $0x14e0] ss:$28 sps:$4 sm:$0xff]  }
 0x543   :  { %14295 = vmatpush3.bf16.msra.mxu0 %v16407_v26  ;;  %10605 = vmatprep.subr.bf16.mxu1 %v16410_v21  ;;  %v16463_v26 = vld [vmem:[#allocation8 + $0xba8] ss:$28 sps:$4 sm:$0xff]   ;;  %v16467_v21 = vld [vmem:[#allocation8 + $0x1320] ss:$28 sps:$4 sm:$0xff]  }
 0x544   :  { %14296 = vmatprep.subr.bf16.mxu0 %v16411_v30  ;;  %v16470_v30 = vld [vmem:[#allocation8 + $0xbe4] ss:$28 sps:$4 sm:$0xff]  }
 0x546   :  { %10606 = vmatpush1.bf16.msra.mxu1 %v16408_v44 }
 0x547   :  { %14297 = vmatpush3.bf16.msra.mxu0 %v16412_v31  ;;  %10607 = vmatprep.subr.bf16.mxu1 %v16415_v19 }
 0x548   :  { %14298 = vmatprep.subr.bf16.mxu0 %v16416_v32  ;;  %v16468_v32 = vld [vmem:[#allocation8 + $0xbe0] ss:$28 sps:$4 sm:$0xff]  }
 0x54a   :  { %10608 = vmatpush1.bf16.msra.mxu1 %v16413_v41 }
 0x54b   :  { %14299 = vmatpush3.bf16.msra.mxu0 %v16417_v62  ;;  %10609 = vmatprep.subr.bf16.mxu1 %v16420_v60  ;;  %v16471_v62 = vld [vmem:[#allocation8 + $0x1518] ss:$28 sps:$4 sm:$0xff]  }
 0x54c   :  { %14300 = vmatprep.subr.bf16.mxu0 %v16421_v20  ;;  %v16474_v60 = vld [vmem:[#allocation8 + $0xc1c] ss:$28 sps:$4 sm:$0xff]  }
 0x54d   :  { %v16472_v20 = vld [vmem:[#allocation8 + $0xc18] ss:$28 sps:$4 sm:$0xff]  }
 0x54e   :  { %10610 = vmatpush1.bf16.msra.mxu1 %v16418_v63  ;;  %v16475_v63 = vld [vmem:[#allocation8 + $0x1550] ss:$28 sps:$4 sm:$0xff]  }
 0x54f   :  { %14301 = vmatpush3.bf16.msra.mxu0 %v16422_v47  ;;  %10611 = vmatprep.subr.bf16.mxu1 %v16425_v38  ;;  %v16478_v47 = vld [vmem:[#allocation8 + $0xc54] ss:$28 sps:$4 sm:$0xff]  }
 0x550   :  { %14302 = vmatprep.subr.bf16.mxu0 %v16426_v51  ;;  %v16476_v38 = vld [vmem:[#allocation8 + $0xc50] ss:$28 sps:$4 sm:$0xff]   ;;  %v16479_v51 = vld [vmem:[#allocation8 + $0x1588] ss:$28 sps:$4 sm:$0xff]  }
 0x552   :  { %10612 = vmatpush1.bf16.msra.mxu1 %v16423_v53  ;;  %v16482_v53 = vld [vmem:[#allocation8 + $0xc8c] ss:$28 sps:$4 sm:$0xff]  }
 0x553   :  { %14303 = vmatpush3.bf16.msra.mxu0 %v16427_v55  ;;  %10613 = vmatprep.subr.bf16.mxu1 %v16430_v56  ;;  %v16480_v55 = vld [vmem:[#allocation8 + $0xc88] ss:$28 sps:$4 sm:$0xff]   ;;  %v16483_v56 = vld [vmem:[#allocation8 + $0x15c0] ss:$28 sps:$4 sm:$0xff]  }
 0x554   :  { %14310 = vmatprep.subr.bf16.mxu0 %v16431_v24  ;;  %v16486_v24 = vld [vmem:[#allocation8 + $0xcc4] ss:$28 sps:$4 sm:$0xff]  }
 0x556   :  { %10614 = vmatpush1.bf16.msra.mxu1 %v16428_v58  ;;  %10983 = vmatmul.mubr.bf16.vlgmr.msra.gmra.mrb[40].mxu0 %v17378_v15  ;;  %v16484_v58 = vld [vmem:[#allocation8 + $0xcc0] ss:$28 sps:$4 sm:$0xff]  }
 0x557   :  { %14311 = vmatpush3.bf16.msra.mxu0 %v16432_v12  ;;  %11022 = vmatprep.mubr.bf16.mxu0 %v17380_v35  ;;  %v16487_v12 = vld [vmem:[#allocation8 + $0x15f8] ss:$28 sps:$4 sm:$0xff]  }
 0x558   :  { %10615 = vmatprep.subr.bf16.mxu1 %v16435_v13  ;;  %14312 = vmatprep.subr.bf16.mxu0 %v16436_v59  ;;  %v16490_v13 = vld [vmem:[#allocation8 + $0xcfc] ss:$28 sps:$4 sm:$0xff]   ;;  %v17426_v59 = vld [vmem:[#allocation10] sm:$0xff] }
 0x55a   :  { %10616 = vmatpush1.bf16.msra.mxu1 %v16433_v61  ;;  %v16488_v61 = vld [vmem:[#allocation8 + $0xcf8] ss:$28 sps:$4 sm:$0xff]  }
 0x55b   :  { %14313 = vmatpush3.bf16.msra.mxu0 %v16437_v0  ;;  %10626 = vmatprep.subr.bf16.mxu1 %v16440_v2  ;;  %v16491_v0 = vld [vmem:[#allocation8 + $0x1630] ss:$28 sps:$4 sm:$0xff]  }
 0x55c   :  { %14314 = vmatprep.subr.bf16.mxu0 %v16441_v39  ;;  %v16494_v2 = vld [vmem:[#allocation8 + $0xd34] ss:$28 sps:$4 sm:$0xff]   ;;  %v6157_v39 = vrot.slane %v17426_v59, %v17260_v1 }
 0x55d   :  { %10618 = vmatmul.mubr.bf16.vlgmr.msra.gmra.mrb[24].mxu1 %v17342_v36  ;;  %v16453_v36 = vld [vmem:[#allocation8 + $0xb38] ss:$28 sps:$4 sm:$0xff]  }
 0x55e   :  { %10627 = vmatpush1.bf16.msra.mxu1 %v16438_v45  ;;  %10658 = vmatprep.mubr.bf16.mxu1 %v17344_v3  ;;  %v16457_v3 = vld [vmem:[#allocation8 + $0x12b0] ss:$28 sps:$4 sm:$0xff]  }
 0x55f   :  { %14315 = vmatpush3.bf16.msra.mxu0 %v16442_v5  ;;  %10628 = vmatprep.subr.bf16.mxu1 %v16445_v57  ;;  %v16492_v57 = vld [vmem:[#allocation8 + $0xd30] ss:$28 sps:$4 sm:$0xff]  }
 0x560   :  { %14316 = vmatprep.subr.bf16.mxu0 %v16446_v6 }
 0x562   :  { %10629 = vmatpush1.bf16.msra.mxu1 %v16443_v10  ;;  %v16495_v10 = vld [vmem:[#allocation8 + $0x1668] ss:$28 sps:$4 sm:$0xff]  }
 0x563   :  { %14317 = vmatpush3.bf16.msra.mxu0 %v16447_v54  ;;  %10630 = vmatprep.subr.bf16.mxu1 %v16450_v11  ;;  %v16498_v54 = vld [vmem:[#allocation8 + $0xd6c] ss:$28 sps:$4 sm:$0xff]  }
 0x564   :  { %14318 = vmatprep.subr.bf16.mxu0 %v16451_v29 }
 0x566   :  { %10631 = vmatpush1.bf16.msra.mxu1 %v16448_v25  ;;  %v16496_v25 = vld [vmem:[#allocation8 + $0xd68] ss:$28 sps:$4 sm:$0xff]  }
 0x567   :  { %14319 = vmatpush3.bf16.msra.mxu0 %v16452_v14  ;;  %10632 = vmatprep.subr.bf16.mxu1 %v16455_v17  ;;  %v16499_v14 = vld [vmem:[#allocation8 + $0x16a0] ss:$28 sps:$4 sm:$0xff]  }
 0x568   :  { %14320 = vmatprep.subr.bf16.mxu0 %v16456_v4  ;;  %v16502_v17 = vld [vmem:[#allocation8 + $0xda4] ss:$28 sps:$4 sm:$0xff]  }
 0x569   :  { %v16505_v4 = vld [vmem:[%s18032_s5 + $0x4] ss:$12 sps:$4 sm:$0xff]  }
 0x56a   :  { %10633 = vmatpush1.bf16.msra.mxu1 %v16453_v36 }
 0x56b   :  { %14321 = vmatpush3.bf16.msra.mxu0 %v16457_v3  ;;  %10634 = vmatprep.subr.bf16.mxu1 %v16460_v18  ;;  %v16500_v3 = vld [vmem:[#allocation8 + $0xda0] ss:$28 sps:$4 sm:$0xff]  }
 0x56c   :  { %14322 = vmatprep.subr.bf16.mxu0 %v16461_v22  ;;  %v16503_v18 = vld [vmem:[%s18032_s5] ss:$12 sps:$4 sm:$0xff]  }
 0x56d   :  { %v16508_v22 = vld [vmem:[#allocation8 + $0xddc] ss:$28 sps:$4 sm:$0xff]  }
 0x56e   :  { %10635 = vmatpush1.bf16.msra.mxu1 %v16458_v23  ;;  %v16511_v23 = vld [vmem:[%s18032_s5 + $0x1c] ss:$12 sps:$4 sm:$0xff]  }
 0x56f   :  { %14323 = vmatpush3.bf16.msra.mxu0 %v16462_v27  ;;  %10636 = vmatprep.subr.bf16.mxu1 %v16465_v40  ;;  %v16506_v40 = vld [vmem:[#allocation8 + $0xdd8] ss:$28 sps:$4 sm:$0xff]  }
 0x570   :  { %v17416_v44 = vpop.f32.mrb[20].mxu1  ;;  %14324 = vmatprep.subr.bf16.mxu0 %v16466_v48  ;;  %v16509_v48 = vld [vmem:[%s18032_s5 + $0x18] ss:$12 sps:$4 sm:$0xff]  }
 0x571   :  { %v10211_v31 = vpop.f32.mrb[21].mxu1 }
 0x572   :  { %v10213_v19 = vpop.f32.mrb[22].mxu1  ;;  %10637 = vmatpush1.bf16.msra.mxu1 %v16463_v26  ;;  %v14475_v29 = vadd.f32 %v10211_v31, %v6157_v39  ;;  %v16514_v26 = vld [vmem:[#allocation8 + $0xe14] ss:$28 sps:$4 sm:$0xff]   ;;  %v16515_v31 = vld [vmem:[%s18032_s5 + $0x30] ss:$12 sps:$4 sm:$0xff]  }
 0x573   :  { %v10214_v41 = vpop.f32.mrb[23].mxu1  ;;  %14325 = vmatpush3.bf16.msra.mxu0 %v16467_v21  ;;  %10638 = vmatprep.subr.bf16.mxu1 %v16470_v30  ;;  %v16517_v21 = vld [vmem:[%s18032_s5 + $0x34] ss:$12 sps:$4 sm:$0xff]   ;;  %v16520_v19 = vld [vmem:[#allocation8 + $0xe4c] ss:$28 sps:$4 sm:$0xff]  }
 0x574   :  { %14422 = vmatprep.subr.bf16.mxu0 %v17030_v8  ;;  %v11071_v36 = vmax.f32 %v14475_v29, 0.0  ;;  %v16512_v30 = vld [vmem:[#allocation8 + $0xe10] ss:$28 sps:$4 sm:$0xff]   ;;  %v16518_v41 = vld [vmem:[#allocation8 + $0xe48] ss:$28 sps:$4 sm:$0xff]  }
 0x575   :  { %v16547_v39 = vld [vmem:[%s18032_s5 + $0xac] ss:$12 sps:$4 sm:$0xff]  }
 0x576   :  { %10639 = vmatpush1.bf16.msra.mxu1 %v16468_v32  ;;  %11023 = vmatmul.mubr.bf16.vlgmr.msra.gmra.mrb[44].mxu0 %v17387_v52  ;;  %v17446_v27 = vpack.c.bf16 %v11071_v36, %v11071_v36  ;;  %v16523_v32 = vld [vmem:[%s18032_s5 + $0x4c] ss:$12 sps:$4 sm:$0xff]  }
 0x577   :  { %14423 = vmatpush3.bf16.msra.mxu0 %v16471_v62  ;;  %10640 = vmatprep.subr.bf16.mxu1 %v16474_v60  ;;  %v16521_v62 = vld [vmem:[%s18032_s5 + $0x48] ss:$12 sps:$4 sm:$0xff]   ;;  %v16551_v29 = vld [vmem:[%s18032_s5 + $0xc0] ss:$12 sps:$4 sm:$0xff]  }
 0x578   :  { %14424 = vmatprep.subr.bf16.mxu0 %v17030_v8  ;;  %14438 = vmatprep.mubr.msk.bf16.mxu0 %vm17031_vm1, %v17030_v8  ;;  %v16526_v60 = vld [vmem:[#allocation8 + $0xe84] ss:$28 sps:$4 sm:$0xff]   ;;  %v16562_v36 = vld [vmem:[#allocation8 + $0xfd4] ss:$28 sps:$4 sm:$0xff]  }
 0x57a   :  { %10641 = vmatpush1.bf16.msra.mxu1 %v16472_v20  ;;  %v16529_v20 = vld [vmem:[%s18032_s5 + $0x64] ss:$12 sps:$4 sm:$0xff]  }
 0x57b   :  { %14425 = vmatpush3.bf16.msra.mxu0 %v16475_v63  ;;  %10642 = vmatprep.subr.bf16.mxu1 %v16478_v47  ;;  %v16524_v63 = vld [vmem:[#allocation8 + $0xe80] ss:$28 sps:$4 sm:$0xff]   ;;  %v16535_v47 = vld [vmem:[%s18032_s5 + $0x7c] ss:$12 sps:$4 sm:$0xff]  }
 0x57c   :  { %14426 = vmatprep.subr.bf16.mxu0 %v17030_v8 }
 0x57e   :  { %10643 = vmatpush1.bf16.msra.mxu1 %v16476_v38  ;;  %v16530_v38 = vld [vmem:[#allocation8 + $0xeb8] ss:$28 sps:$4 sm:$0xff]  }
 0x57f   :  { %14427 = vmatpush3.bf16.msra.mxu0 %v16479_v51  ;;  %10644 = vmatprep.subr.bf16.mxu1 %v16482_v53  ;;  %v16533_v51 = vld [vmem:[%s18032_s5 + $0x78] ss:$12 sps:$4 sm:$0xff]  }
 0x580   :  { %14428 = vmatprep.subr.bf16.mxu0 %v17030_v8  ;;  %v16538_v53 = vld [vmem:[#allocation8 + $0xef4] ss:$28 sps:$4 sm:$0xff]  }
 0x582   :  { %10645 = vmatpush1.bf16.msra.mxu1 %v16480_v55  ;;  %v16541_v55 = vld [vmem:[%s18032_s5 + $0x94] ss:$12 sps:$4 sm:$0xff]  }
 0x583   :  { %14429 = vmatpush3.bf16.msra.mxu0 %v16483_v56  ;;  %10646 = vmatprep.subr.bf16.mxu1 %v16486_v24 }
 0x584   :  { %14430 = vmatprep.subr.bf16.mxu0 %v17030_v8 }
 0x586   :  { %10647 = vmatpush1.bf16.msra.mxu1 %v16484_v58  ;;  %v16536_v58 = vld [vmem:[#allocation8 + $0xef0] ss:$28 sps:$4 sm:$0xff]  }
 0x587   :  { %14431 = vmatpush3.bf16.msra.mxu0 %v16487_v12  ;;  %10648 = vmatprep.subr.bf16.mxu1 %v16490_v13 }
 0x588   :  { %14432 = vmatprep.subr.bf16.mxu0 %v17030_v8 }
 0x589   :  { %v17431_v45 = vpop.f32.mrb[20].mxu0 }
 0x58a   :  { %v17433_v5 = vpop.f32.mrb[21].mxu0  ;;  %10649 = vmatpush1.bf16.msra.mxu1 %v16488_v61  ;;  %v16539_v61 = vld [vmem:[%s18032_s5 + $0x90] ss:$12 sps:$4 sm:$0xff]  }
 0x58b   :  { %v10500_v6 = vpop.f32.mrb[22].mxu0  ;;  %14433 = vmatpush3.bf16.msra.mxu0 %v16491_v0  ;;  %10650 = vmatprep.subr.bf16.mxu1 %v16494_v2  ;;  %v16544_v0 = vld [vmem:[#allocation8 + $0xf2c] ss:$28 sps:$4 sm:$0xff]  }
 0x58c   :  { %v10501_v11 = vpop.f32.mrb[23].mxu0  ;;  %14434 = vmatprep.subr.bf16.mxu0 %v17030_v8  ;;  %v16545_v6 = vld [vmem:[%s18032_s5 + $0xa8] ss:$12 sps:$4 sm:$0xff]  }
 0x58d   :  { %v16548_v11 = vld [vmem:[#allocation8 + $0xf60] ss:$28 sps:$4 sm:$0xff]  }
 0x58e   :  { %10651 = vmatpush1.bf16.msra.mxu1 %v16492_v57  ;;  %v16542_v57 = vld [vmem:[#allocation8 + $0xf28] ss:$28 sps:$4 sm:$0xff]  }
 0x58f   :  { %14435 = vmatpush3.bf16.msra.mxu0 %v16495_v10  ;;  %10652 = vmatprep.subr.bf16.mxu1 %v16498_v54  ;;  %v16550_v10 = vld [vmem:[#allocation8 + $0xf64] ss:$28 sps:$4 sm:$0xff]  }
 0x590   :  { %14436 = vmatprep.subr.bf16.mxu0 %v17030_v8  ;;  %v16553_v54 = vld [vmem:[%s18032_s5 + $0xc4] ss:$12 sps:$4 sm:$0xff]  }
 0x592   :  { %10653 = vmatpush1.bf16.msra.mxu1 %v16496_v25  ;;  %v16556_v25 = vld [vmem:[#allocation8 + $0xf9c] ss:$28 sps:$4 sm:$0xff]  }
 0x593   :  { %14437 = vmatpush3.bf16.msra.mxu0 %v16499_v14  ;;  %10654 = vmatprep.subr.bf16.mxu1 %v16502_v17  ;;  %v16559_v14 = vld [vmem:[%s18032_s5 + $0xdc] ss:$12 sps:$4 sm:$0xff]  }
 0x594   :  { %12221 = vmatprep.subr.bf16.mxu0 %v16505_v4  ;;  %v16554_v17 = vld [vmem:[#allocation8 + $0xf98] ss:$28 sps:$4 sm:$0xff]  }
 0x595   :  { %v16557_v4 = vld [vmem:[%s18032_s5 + $0xd8] ss:$12 sps:$4 sm:$0xff]  }
 0x596   :  { %10655 = vmatpush1.bf16.msra.mxu1 %v16500_v3  ;;  %14439 = vmatmul.mubr.bf16.vlgmr.msra.gmra.mrb[48].mxu0 %v17394_v46  ;;  %v16565_v3 = vld [vmem:[%s18032_s5 + $0xf4] ss:$12 sps:$4 sm:$0xff]  }
 0x597   :  { %12222 = vmatpush1.bf16.msra.mxu0 %v16503_v18  ;;  %12253 = vmatprep.mubr.bf16.mxu0 %v17446_v27  ;;  %v16560_v18 = vld [vmem:[#allocation8 + $0xfd0] ss:$28 sps:$4 sm:$0xff]  }
 0x598   :  { %10656 = vmatprep.subr.bf16.mxu1 %v16508_v22  ;;  %12223 = vmatprep.subr.bf16.mxu0 %v16511_v23  ;;  %v16563_v22 = vld [vmem:[%s18032_s5 + $0xf0] ss:$12 sps:$4 sm:$0xff]  }
 0x599   :  { %v16568_v23 = vld [vmem:[#allocation8 + $0x100c] ss:$28 sps:$4 sm:$0xff]  }
 0x59a   :  { %10657 = vmatpush1.bf16.msra.mxu1 %v16506_v40  ;;  %v16571_v40 = vld [vmem:[%s18032_s5 + $0x10c] ss:$12 sps:$4 sm:$0xff]  }
 0x59b   :  { %12224 = vmatpush1.bf16.msra.mxu0 %v16509_v48  ;;  %10667 = vmatprep.subr.bf16.mxu1 %v16514_v26  ;;  %v16566_v48 = vld [vmem:[#allocation8 + $0x1008] ss:$28 sps:$4 sm:$0xff]  }
 0x59c   :  { %12225 = vmatprep.subr.bf16.mxu0 %v16517_v21  ;;  %v16569_v26 = vld [vmem:[%s18032_s5 + $0x108] ss:$12 sps:$4 sm:$0xff]  }
 0x59d   :  { %10659 = vmatmul.mubr.bf16.vlgmr.msra.gmra.mrb[24].mxu1 %v17367_v28  ;;  %v16527_v28 = vld [vmem:[%s18032_s5 + $0x60] ss:$12 sps:$4 sm:$0xff]   ;;  %v16574_v21 = vld [vmem:[#allocation8 + $0x1044] ss:$28 sps:$4 sm:$0xff]  }
 0x59e   :  { %10668 = vmatpush1.bf16.msra.mxu1 %v16512_v30  ;;  %10699 = vmatprep.mubr.bf16.mxu1 %v17369_v9  ;;  %v16532_v9 = vld [vmem:[#allocation8 + $0xebc] ss:$28 sps:$4 sm:$0xff]   ;;  %v16577_v30 = vld [vmem:[%s18032_s5 + $0x124] ss:$12 sps:$4 sm:$0xff]  }
 0x59f   :  { %12226 = vmatpush1.bf16.msra.mxu0 %v16515_v31  ;;  %10669 = vmatprep.subr.bf16.mxu1 %v16520_v19  ;;  %v16572_v31 = vld [vmem:[#allocation8 + $0x1040] ss:$28 sps:$4 sm:$0xff]  }
 0x5a0   :  { %12227 = vmatprep.subr.bf16.mxu0 %v16523_v32  ;;  %v16575_v19 = vld [vmem:[%s18032_s5 + $0x120] ss:$12 sps:$4 sm:$0xff]  }
 0x5a1   :  { %v16580_v32 = vld [vmem:[#allocation8 + $0x107c] ss:$28 sps:$4 sm:$0xff]  }
 0x5a2   :  { %10670 = vmatpush1.bf16.msra.mxu1 %v16518_v41  ;;  %v16583_v41 = vld [vmem:[%s18032_s5 + $0x13c] ss:$12 sps:$4 sm:$0xff]  }
 0x5a3   :  { %12228 = vmatpush1.bf16.msra.mxu0 %v16521_v62  ;;  %10671 = vmatprep.subr.bf16.mxu1 %v16526_v60  ;;  %v16578_v62 = vld [vmem:[#allocation8 + $0x1078] ss:$28 sps:$4 sm:$0xff]   ;;  %v6177_v60 = vrot.slane %v17426_v59, %v869_v7 }
 0x5a4   :  { %12229 = vmatprep.subr.bf16.mxu0 %v16529_v20  ;;  %v16581_v20 = vld [vmem:[%s18032_s5 + $0x138] ss:$12 sps:$4 sm:$0xff]  }
 0x5a6   :  { %10672 = vmatpush1.bf16.msra.mxu1 %v16524_v63  ;;  %v16586_v63 = vld [vmem:[#allocation8 + $0x10b4] ss:$28 sps:$4 sm:$0xff]  }
 0x5a7   :  { %12230 = vmatpush1.bf16.msra.mxu0 %v16527_v28  ;;  %10673 = vmatprep.subr.bf16.mxu1 %v16532_v9  ;;  %v6153_v28 = vrot.slane %v17426_v59, %v17279_v37  ;;  %v16589_v9 = vld [vmem:[%s18032_s5 + $0x154] ss:$12 sps:$4 sm:$0xff]  }
 0x5a8   :  { %12231 = vmatprep.subr.bf16.mxu0 %v16535_v47  ;;  %v6165_v47 = vrot.slane %v17426_v59, %v17282_v16  ;;  %v16595_v16 = vld [vmem:[%s18032_s5 + $0x16c] ss:$12 sps:$4 sm:$0xff]  }
 0x5a9   :  { %v14216_v56 = vpop.f32.mrb[24].mxu0 }
 0x5aa   :  { %10674 = vmatpush1.bf16.msra.mxu1 %v16530_v38  ;;  %v14217_v24 = vpop.f32.mrb[25].mxu0 }
 0x5ab   :  { %v17482_v12 = vadd.f32 %v14217_v24, %v14216_v56  ;;  %v14219_v13 = vpop.f32.mrb[26].mxu0  ;;  %12232 = vmatpush1.bf16.msra.mxu0 %v16533_v51  ;;  %10675 = vmatprep.subr.bf16.mxu1 %v16538_v53  ;;  %v16584_v51 = vld [vmem:[#allocation8 + $0x10b0] ss:$28 sps:$4 sm:$0xff]  }
 0x5ac   :  { %v14220_v2 = vpop.f32.mrb[27].mxu0  ;;  %12233 = vmatprep.subr.bf16.mxu0 %v16541_v55  ;;  %v16587_v24 = vld [vmem:[%s18032_s5 + $0x150] ss:$12 sps:$4 sm:$0xff]   ;;  %v14474_v13 = vadd.f32 %v17416_v44, %v6153_v28 }
 0x5ad   :  { %v10825_v53 = vadd.f32 %v17482_v12, %v6177_v60  ;;  %v16590_v2 = vld [vmem:[#allocation8 + $0x10e8] ss:$28 sps:$4 sm:$0xff]   ;;  %v16637_v60 = vld [vmem:[%s18032_s5 + $0x214] ss:$12 sps:$4 sm:$0xff]  }
 0x5ae   :  { %10676 = vmatpush1.bf16.msra.mxu1 %v16536_v58  ;;  %v16592_v58 = vld [vmem:[#allocation8 + $0x10ec] ss:$28 sps:$4 sm:$0xff]   ;;  %v11070_v44 = vmax.f32 %v14474_v13, 0.0 }
 0x5af   :  { %12234 = vmatpush1.bf16.msra.mxu0 %v16539_v61  ;;  %10677 = vmatprep.subr.bf16.mxu1 %v16544_v0  ;;  %v14477_v0 = vadd.f32 %v17433_v5, %v6165_v47  ;;  %v16596_v5 = vld [vmem:[#allocation8 + $0x1120] ss:$28 sps:$4 sm:$0xff]   ;;  %v16632_v28 = vld [vmem:[#allocation8 + $0x1270] ss:$28 sps:$4 sm:$0xff]  }
 0x5b0   :  { %12235 = vmatprep.subr.bf16.mxu0 %v16547_v39  ;;  %v16593_v39 = vld [vmem:[%s18032_s5 + $0x168] ss:$12 sps:$4 sm:$0xff]   ;;  %v16649_v13 = vld [vmem:[%s18032_s5 + $0x244] ss:$12 sps:$4 sm:$0xff]  }
 0x5b2   :  { %10678 = vmatpush1.bf16.msra.mxu1 %v16542_v57  ;;  %v16598_v57 = vld [vmem:[#allocation8 + $0x1124] ss:$28 sps:$4 sm:$0xff]  }
 0x5b3   :  { %12236 = vmatpush1.bf16.msra.mxu0 %v16545_v6  ;;  %10679 = vmatprep.subr.bf16.mxu1 %v16550_v10  ;;  %v16601_v6 = vld [vmem:[%s18032_s5 + $0x184] ss:$12 sps:$4 sm:$0xff]   ;;  %v11073_v10 = vmax.f32 %v14477_v0, 0.0  ;;  %v16652_v0 = vld [vmem:[#allocation8 + $0x131c] ss:$28 sps:$4 sm:$0xff]  }
 0x5b4   :  { %12237 = vmatprep.subr.bf16.mxu0 %v16553_v54  ;;  %v16599_v54 = vld [vmem:[%s18032_s5 + $0x180] ss:$12 sps:$4 sm:$0xff]  }
 0x5b6   :  { %10680 = vmatpush1.bf16.msra.mxu1 %v16548_v11  ;;  %v17559_v11 = vpack.c.bf16 %v11070_v44, %v11070_v44  ;;  %v16661_v44 = vld [vmem:[%s18032_s5 + $0x274] ss:$12 sps:$4 sm:$0xff]  }
 0x5b7   :  { %12238 = vmatpush1.bf16.msra.mxu0 %v16551_v29  ;;  %10681 = vmatprep.subr.bf16.mxu1 %v16556_v25  ;;  %v16604_v29 = vld [vmem:[#allocation8 + $0x115c] ss:$28 sps:$4 sm:$0xff]  }
 0x5b8   :  { %12239 = vmatprep.subr.bf16.mxu0 %v16559_v14  ;;  %v16607_v25 = vld [vmem:[%s18032_s5 + $0x19c] ss:$12 sps:$4 sm:$0xff]   ;;  %v17564_v14 = vpack.c.bf16 %v11073_v10, %v11073_v10 }
 0x5b9   :  { %v16659_v10 = vld [vmem:[%s18032_s5 + $0x270] ss:$12 sps:$4 sm:$0xff]  }
 0x5ba   :  { %10682 = vmatpush1.bf16.msra.mxu1 %v16554_v17  ;;  %v16602_v17 = vld [vmem:[#allocation8 + $0x1158] ss:$28 sps:$4 sm:$0xff]  }
 0x5bb   :  { %12240 = vmatpush1.bf16.msra.mxu0 %v16557_v4  ;;  %10683 = vmatprep.subr.bf16.mxu1 %v16562_v36  ;;  %v16605_v4 = vld [vmem:[%s18032_s5 + $0x198] ss:$12 sps:$4 sm:$0xff]  }
 0x5bc   :  { %12241 = vmatprep.subr.bf16.mxu0 %v16565_v3  ;;  %v16610_v36 = vld [vmem:[#allocation8 + $0x1194] ss:$28 sps:$4 sm:$0xff]  }
 0x5bd   :  { %v16613_v3 = vld [vmem:[%s18032_s5 + $0x1b4] ss:$12 sps:$4 sm:$0xff]  }
 0x5be   :  { %10684 = vmatpush1.bf16.msra.mxu1 %v16560_v18  ;;  %v16608_v18 = vld [vmem:[#allocation8 + $0x1190] ss:$28 sps:$4 sm:$0xff]  }
 0x5bf   :  { %12242 = vmatpush1.bf16.msra.mxu0 %v16563_v22  ;;  %10685 = vmatprep.subr.bf16.mxu1 %v16568_v23  ;;  %v16611_v22 = vld [vmem:[%s18032_s5 + $0x1b0] ss:$12 sps:$4 sm:$0xff]  }
 0x5c0   :  { %12243 = vmatprep.subr.bf16.mxu0 %v16571_v40  ;;  %v16616_v23 = vld [vmem:[#allocation8 + $0x11cc] ss:$28 sps:$4 sm:$0xff]  }
 0x5c1   :  { %v16619_v40 = vld [vmem:[%s18032_s5 + $0x1cc] ss:$12 sps:$4 sm:$0xff]  }
 0x5c2   :  { %10686 = vmatpush1.bf16.msra.mxu1 %v16566_v48  ;;  %v16614_v48 = vld [vmem:[#allocation8 + $0x11c8] ss:$28 sps:$4 sm:$0xff]  }
 0x5c3   :  { %12244 = vmatpush1.bf16.msra.mxu0 %v16569_v26  ;;  %10687 = vmatprep.subr.bf16.mxu1 %v16574_v21  ;;  %v16617_v26 = vld [vmem:[%s18032_s5 + $0x1c8] ss:$12 sps:$4 sm:$0xff]  }
 0x5c4   :  { %12245 = vmatprep.subr.bf16.mxu0 %v16577_v30  ;;  %v16622_v21 = vld [vmem:[#allocation8 + $0x1204] ss:$28 sps:$4 sm:$0xff]  }
 0x5c5   :  { %v16625_v30 = vld [vmem:[%s18032_s5 + $0x1e4] ss:$12 sps:$4 sm:$0xff]  }
 0x5c6   :  { %10688 = vmatpush1.bf16.msra.mxu1 %v16572_v31  ;;  %v16620_v31 = vld [vmem:[#allocation8 + $0x1200] ss:$28 sps:$4 sm:$0xff]  }
 0x5c7   :  { %12246 = vmatpush1.bf16.msra.mxu0 %v16575_v19  ;;  %10689 = vmatprep.subr.bf16.mxu1 %v16580_v32  ;;  %v16631_v19 = vld [vmem:[%s18032_s5 + $0x1fc] ss:$12 sps:$4 sm:$0xff]  }
 0x5c8   :  { %12247 = vmatprep.subr.bf16.mxu0 %v16583_v41  ;;  %v16626_v32 = vld [vmem:[#allocation8 + $0x1238] ss:$28 sps:$4 sm:$0xff]  }
 0x5c9   :  { %v14238_v38 = vpop.f32.mrb[28].mxu0  ;;  %v16629_v41 = vld [vmem:[%s18032_s5 + $0x1f8] ss:$12 sps:$4 sm:$0xff]  }
 0x5ca   :  { %10690 = vmatpush1.bf16.msra.mxu1 %v16578_v62  ;;  %v14239_v7 = vpop.f32.mrb[29].mxu0  ;;  %v16634_v62 = vld [vmem:[#allocation8 + $0x1274] ss:$28 sps:$4 sm:$0xff]  }
 0x5cb   :  { %v14240_v55 = vadd.f32 %v14239_v7, %v14238_v38  ;;  %v14241_v56 = vpop.f32.mrb[30].mxu0  ;;  %12248 = vmatpush1.bf16.msra.mxu0 %v16581_v20  ;;  %10691 = vmatprep.subr.bf16.mxu1 %v16586_v63  ;;  %v16635_v38 = vld [vmem:[%s18032_s5 + $0x210] ss:$12 sps:$4 sm:$0xff]  }
 0x5cc   :  { %v14242_v61 = vpop.f32.mrb[31].mxu0  ;;  %12249 = vmatprep.subr.bf16.mxu0 %v16589_v9  ;;  %v16640_v7 = vld [vmem:[#allocation8 + $0x12ac] ss:$28 sps:$4 sm:$0xff]  }
 0x5cd   :  { %v17548_v12 = vadd.f32 %v14240_v55, %v10825_v53  ;;  %v16643_v53 = vld [vmem:[%s18032_s5 + $0x22c] ss:$12 sps:$4 sm:$0xff]   ;;  %v16644_v61 = vld [vmem:[#allocation8 + $0x12e0] ss:$28 sps:$4 sm:$0xff]  }
 0x5ce   :  { %10692 = vmatpush1.bf16.msra.mxu1 %v16584_v51  ;;  %v16638_v56 = vld [vmem:[#allocation8 + $0x12a8] ss:$28 sps:$4 sm:$0xff]  }
 0x5cf   :  { %12250 = vmatpush1.bf16.msra.mxu0 %v16587_v24  ;;  %10693 = vmatprep.subr.bf16.mxu1 %v16592_v58  ;;  %v16641_v24 = vld [vmem:[%s18032_s5 + $0x228] ss:$12 sps:$4 sm:$0xff]  }
 0x5d0   :  { %12251 = vmatprep.subr.bf16.mxu0 %v16595_v16  ;;  %v16646_v58 = vld [vmem:[#allocation8 + $0x12e4] ss:$28 sps:$4 sm:$0xff]   ;;  %v16647_v16 = vld [vmem:[%s18032_s5 + $0x240] ss:$12 sps:$4 sm:$0xff]  }
 0x5d2   :  { %10694 = vmatpush1.bf16.msra.mxu1 %v16590_v2  ;;  %v16650_v2 = vld [vmem:[#allocation8 + $0x1318] ss:$28 sps:$4 sm:$0xff]  }
 0x5d3   :  { %12252 = vmatpush1.bf16.msra.mxu0 %v16593_v39  ;;  %10695 = vmatprep.subr.bf16.mxu1 %v16598_v57  ;;  %v16653_v39 = vld [vmem:[%s18032_s5 + $0x258] ss:$12 sps:$4 sm:$0xff]  }
 0x5d4   :  { %12262 = vmatprep.subr.bf16.mxu0 %v16601_v6  ;;  %v16658_v57 = vld [vmem:[#allocation8 + $0x1354] ss:$28 sps:$4 sm:$0xff]  }
 0x5d5   :  { %v16656_v6 = vld [vmem:[#allocation8 + $0x1350] ss:$28 sps:$4 sm:$0xff]  }
 0x5d6   :  { %10696 = vmatpush1.bf16.msra.mxu1 %v16596_v5  ;;  %12254 = vmatmul.mubr.bf16.vlgmr.msra.gmra.mrb[52].mxu0 %v17559_v11  ;;  %v16664_v5 = vld [vmem:[#allocation8 + $0x138c] ss:$28 sps:$4 sm:$0xff]  }
 0x5d7   :  { %12263 = vmatpush1.bf16.msra.mxu0 %v16599_v54  ;;  %12294 = vmatprep.mubr.bf16.mxu0 %v17564_v14  ;;  %v16667_v54 = vld [vmem:[%s18032_s5 + $0x28c] ss:$12 sps:$4 sm:$0xff]  }
 0x5d8   :  { %10697 = vmatprep.subr.bf16.mxu1 %v16604_v29  ;;  %12264 = vmatprep.subr.bf16.mxu0 %v16607_v25  ;;  %v16662_v29 = vld [vmem:[#allocation8 + $0x1388] ss:$28 sps:$4 sm:$0xff]  }
 0x5d9   :  { %v16665_v25 = vld [vmem:[%s18032_s5 + $0x288] ss:$12 sps:$4 sm:$0xff]  }
 0x5da   :  { %10698 = vmatpush1.bf16.msra.mxu1 %v16602_v17  ;;  %v16670_v17 = vld [vmem:[#allocation8 + $0x13c4] ss:$28 sps:$4 sm:$0xff]  }
 0x5db   :  { %12265 = vmatpush1.bf16.msra.mxu0 %v16605_v4  ;;  %10708 = vmatprep.subr.bf16.mxu1 %v16610_v36  ;;  %v16673_v4 = vld [vmem:[%s18032_s5 + $0x2a4] ss:$12 sps:$4 sm:$0xff]  }
 0x5dc   :  { %12266 = vmatprep.subr.bf16.mxu0 %v16613_v3  ;;  %v16668_v36 = vld [vmem:[#allocation8 + $0x13c0] ss:$28 sps:$4 sm:$0xff]  }
 0x5dd   :  { %10700 = vmatmul.mubr.bf16.vlgmr.msra.gmra.mrb[24].mxu1 %v17378_v15  ;;  %v16623_v15 = vld [vmem:[%s18032_s5 + $0x1e0] ss:$12 sps:$4 sm:$0xff]  }
 0x5de   :  { %10709 = vmatpush1.bf16.msra.mxu1 %v16608_v18  ;;  %10740 = vmatprep.mubr.bf16.mxu1 %v17380_v35  ;;  %v16628_v35 = vld [vmem:[#allocation8 + $0x123c] ss:$28 sps:$4 sm:$0xff]  }
 0x5df   :  { %12267 = vmatpush1.bf16.msra.mxu0 %v16611_v22  ;;  %10710 = vmatprep.subr.bf16.mxu1 %v16616_v23  ;;  %v16671_v3 = vld [vmem:[%s18032_s5 + $0x2a0] ss:$12 sps:$4 sm:$0xff]   ;;  %v16679_v22 = vld [vmem:[%s18032_s5 + $0x2bc] ss:$12 sps:$4 sm:$0xff]  }
 0x5e0   :  { %12268 = vmatprep.subr.bf16.mxu0 %v16619_v40  ;;  %v16676_v18 = vld [vmem:[#allocation8 + $0x13fc] ss:$28 sps:$4 sm:$0xff]   ;;  %v16677_v40 = vld [vmem:[%s18032_s5 + $0x2b8] ss:$12 sps:$4 sm:$0xff]  }
 0x5e1   :  { %v16674_v23 = vld [vmem:[#allocation8 + $0x13f8] ss:$28 sps:$4 sm:$0xff]  }
 0x5e2   :  { %10711 = vmatpush1.bf16.msra.mxu1 %v16614_v48  ;;  %v16682_v48 = vld [vmem:[#allocation8 + $0x1434] ss:$28 sps:$4 sm:$0xff]  }
 0x5e3   :  { %12269 = vmatpush1.bf16.msra.mxu0 %v16617_v26  ;;  %10712 = vmatprep.subr.bf16.mxu1 %v16622_v21  ;;  %v6161_v26 = vrot.slane %v17426_v59, %v17299_v33  ;;  %v16685_v21 = vld [vmem:[%s18032_s5 + $0x2d4] ss:$12 sps:$4 sm:$0xff]  }
 0x5e4   :  { %12270 = vmatprep.subr.bf16.mxu0 %v16625_v30 }
 0x5e5   :  { %v14476_v59 = vadd.f32 %v17431_v45, %v6161_v26  ;;  %v16692_v45 = vld [vmem:[#allocation8 + $0x14a0] ss:$28 sps:$4 sm:$0xff]  }
 0x5e6   :  { %10713 = vmatpush1.bf16.msra.mxu1 %v16620_v31  ;;  %v16777_v26 = vld [vmem:[%s18032_s5 + $0x378] ss:$12 sps:$4 sm:$0xff]  }
 0x5e7   :  { %12271 = vmatpush1.bf16.msra.mxu0 %v16623_v15  ;;  %10714 = vmatprep.subr.bf16.mxu1 %v16628_v35  ;;  %v16680_v15 = vld [vmem:[#allocation8 + $0x1430] ss:$28 sps:$4 sm:$0xff]  }
 0x5e8   :  { %12272 = vmatprep.subr.bf16.mxu0 %v16631_v19 }
 0x5e9   :  { %v14260_v20 = vpop.f32.mrb[32].mxu0 }
 0x5ea   :  { %10715 = vmatpush1.bf16.msra.mxu1 %v16626_v32  ;;  %v14261_v63 = vpop.f32.mrb[33].mxu0  ;;  %v16683_v32 = vld [vmem:[%s18032_s5 + $0x2d0] ss:$12 sps:$4 sm:$0xff]  }
 0x5eb   :  { %v14262_v9 = vadd.f32 %v14261_v63, %v14260_v20  ;;  %v14263_v47 = vpop.f32.mrb[34].mxu0  ;;  %12273 = vmatpush1.bf16.msra.mxu0 %v16629_v41  ;;  %10716 = vmatprep.subr.bf16.mxu1 %v16634_v62  ;;  %v16688_v41 = vld [vmem:[#allocation8 + $0x146c] ss:$28 sps:$4 sm:$0xff]  }
 0x5ec   :  { %v14264_v51 = vpop.f32.mrb[35].mxu0  ;;  %12274 = vmatprep.subr.bf16.mxu0 %v16637_v60  ;;  %v16691_v60 = vld [vmem:[%s18032_s5 + $0x2ec] ss:$12 sps:$4 sm:$0xff]   ;;  %v11072_v47 = vmax.f32 %v14476_v59, 0.0  ;;  %v16788_v59 = vld [vmem:[%s18032_s5 + $0x3c4] ss:$12 sps:$4 sm:$0xff]  }
 0x5ed   :  { %v17607_v55 = vadd.f32 %v14262_v9, %v17548_v12  ;;  %v16655_v12 = vld [vmem:[%s18032_s5 + $0x25c] ss:$12 sps:$4 sm:$0xff]  }
 0x5ee   :  { %10717 = vmatpush1.bf16.msra.mxu1 %v16632_v28  ;;  %v16686_v63 = vld [vmem:[#allocation8 + $0x1468] ss:$28 sps:$4 sm:$0xff]   ;;  %v16695_v51 = vld [vmem:[#allocation8 + $0x14d8] ss:$28 sps:$4 sm:$0xff]  }
 0x5ef   :  { %12275 = vmatpush1.bf16.msra.mxu0 %v16635_v38  ;;  %10718 = vmatprep.subr.bf16.mxu1 %v16640_v7  ;;  %v16689_v28 = vld [vmem:[%s18032_s5 + $0x2e8] ss:$12 sps:$4 sm:$0xff]   ;;  %v16697_v38 = vld [vmem:[#allocation8 + $0x14dc] ss:$28 sps:$4 sm:$0xff]   ;;  %v17666_v7 = vpack.c.bf16 %v11072_v47, %v11072_v47 }
 0x5f0   :  { %12276 = vmatprep.subr.bf16.mxu0 %v16643_v53  ;;  %v16694_v9 = vld [vmem:[#allocation8 + $0x14a4] ss:$28 sps:$4 sm:$0xff]   ;;  %v16700_v53 = vld [vmem:[#allocation8 + $0x1514] ss:$28 sps:$4 sm:$0xff]  }
 0x5f1   :  { %v16794_v47 = vld [vmem:[%s18032_s5 + $0x3f4] ss:$12 sps:$4 sm:$0xff]  }
 0x5f2   :  { %10719 = vmatpush1.bf16.msra.mxu1 %v16638_v56  ;;  %v16703_v56 = vld [vmem:[#allocation8 + $0x154c] ss:$28 sps:$4 sm:$0xff]  }
 0x5f3   :  { %12277 = vmatpush1.bf16.msra.mxu0 %v16641_v24  ;;  %10720 = vmatprep.subr.bf16.mxu1 %v16646_v58  ;;  %v16762_v24 = vld [vmem:[%s18032_s5 + $0x300] ss:$12 sps:$4 sm:$0xff]   ;;  %v16764_v58 = vld [vmem:[%s18032_s5 + $0x304] ss:$12 sps:$4 sm:$0xff]  }
 0x5f4   :  { %12278 = vmatprep.subr.bf16.mxu0 %v16649_v13  ;;  %v16701_v13 = vld [vmem:[#allocation8 + $0x1548] ss:$28 sps:$4 sm:$0xff]  }
 0x5f6   :  { %10721 = vmatpush1.bf16.msra.mxu1 %v16644_v61  ;;  %v16767_v61 = vld [vmem:[%s18032_s5 + $0x31c] ss:$12 sps:$4 sm:$0xff]  }
 0x5f7   :  { %12279 = vmatpush1.bf16.msra.mxu0 %v16647_v16  ;;  %10722 = vmatprep.subr.bf16.mxu1 %v16652_v0  ;;  %v16706_v16 = vld [vmem:[#allocation8 + $0x1584] ss:$28 sps:$4 sm:$0xff]   ;;  %v16770_v0 = vld [vmem:[%s18032_s5 + $0x334] ss:$12 sps:$4 sm:$0xff]  }
 0x5f8   :  { %12280 = vmatprep.subr.bf16.mxu0 %v16655_v12  ;;  %v16704_v12 = vld [vmem:[#allocation8 + $0x1580] ss:$28 sps:$4 sm:$0xff]  }
 0x5fa   :  { %10723 = vmatpush1.bf16.msra.mxu1 %v16650_v2  ;;  %v16709_v2 = vld [vmem:[#allocation8 + $0x15bc] ss:$28 sps:$4 sm:$0xff]  }
 0x5fb   :  { %12281 = vmatpush1.bf16.msra.mxu0 %v16653_v39  ;;  %10724 = vmatprep.subr.bf16.mxu1 %v16658_v57  ;;  %v16768_v39 = vld [vmem:[%s18032_s5 + $0x330] ss:$12 sps:$4 sm:$0xff]   ;;  %v16773_v57 = vld [vmem:[%s18032_s5 + $0x34c] ss:$12 sps:$4 sm:$0xff]  }
 0x5fc   :  { %12282 = vmatprep.subr.bf16.mxu0 %v16661_v44  ;;  %v16707_v44 = vld [vmem:[#allocation8 + $0x15b8] ss:$28 sps:$4 sm:$0xff]  }
 0x5fe   :  { %10725 = vmatpush1.bf16.msra.mxu1 %v16656_v6  ;;  %v16712_v6 = vld [vmem:[#allocation8 + $0x15f4] ss:$28 sps:$4 sm:$0xff]  }
 0x5ff   :  { %12283 = vmatpush1.bf16.msra.mxu0 %v16659_v10  ;;  %10726 = vmatprep.subr.bf16.mxu1 %v16664_v5  ;;  %v16771_v10 = vld [vmem:[%s18032_s5 + $0x348] ss:$12 sps:$4 sm:$0xff]  }
 0x600   :  { %12284 = vmatprep.subr.bf16.mxu0 %v16667_v54  ;;  %v16776_v54 = vld [vmem:[%s18032_s5 + $0x364] ss:$12 sps:$4 sm:$0xff]  }
 0x602   :  { %10727 = vmatpush1.bf16.msra.mxu1 %v16662_v29 }
 0x603   :  { %12285 = vmatpush1.bf16.msra.mxu0 %v16665_v25  ;;  %10728 = vmatprep.subr.bf16.mxu1 %v16670_v17  ;;  %v16710_v25 = vld [vmem:[#allocation8 + $0x15f0] ss:$28 sps:$4 sm:$0xff]  }
 0x604   :  { %12286 = vmatprep.subr.bf16.mxu0 %v16673_v4 }
 0x606   :  { %10729 = vmatpush1.bf16.msra.mxu1 %v16668_v36  ;;  %v16715_v36 = vld [vmem:[#allocation8 + $0x162c] ss:$28 sps:$4 sm:$0xff]  }
 0x607   :  { %12287 = vmatpush1.bf16.msra.mxu0 %v16671_v3  ;;  %10730 = vmatprep.subr.bf16.mxu1 %v16676_v18  ;;  %v16774_v18 = vld [vmem:[%s18032_s5 + $0x360] ss:$12 sps:$4 sm:$0xff]  }
 0x608   :  { %12288 = vmatprep.subr.bf16.mxu0 %v16679_v22 }
 0x609   :  { %v14282_v30 = vpop.f32.mrb[36].mxu0 }
 0x60a   :  { %10731 = vmatpush1.bf16.msra.mxu1 %v16674_v23  ;;  %v14283_v31 = vpop.f32.mrb[37].mxu0  ;;  %v16779_v23 = vld [vmem:[%s18032_s5 + $0x37c] ss:$12 sps:$4 sm:$0xff]  }
 0x60b   :  { %v14284_v35 = vadd.f32 %v14283_v31, %v14282_v30  ;;  %v14285_v19 = vpop.f32.mrb[38].mxu0  ;;  %12289 = vmatpush1.bf16.msra.mxu0 %v16677_v40  ;;  %10732 = vmatprep.subr.bf16.mxu1 %v16682_v48  ;;  %v16713_v40 = vld [vmem:[#allocation8 + $0x1628] ss:$28 sps:$4 sm:$0xff]   ;;  %v16716_v30 = vld [vmem:[#allocation8 + $0x1660] ss:$28 sps:$4 sm:$0xff]  }
 0x60c   :  { %v14286_v62 = vpop.f32.mrb[39].mxu0  ;;  %12290 = vmatprep.subr.bf16.mxu0 %v16685_v21  ;;  %v16718_v48 = vld [vmem:[#allocation8 + $0x1664] ss:$28 sps:$4 sm:$0xff]   ;;  %v16782_v21 = vld [vmem:[%s18032_s5 + $0x394] ss:$12 sps:$4 sm:$0xff]  }
 0x60d   :  { %v17661_v20 = vadd.f32 %v14284_v35, %v17607_v55  ;;  %v16698_v55 = vld [vmem:[#allocation8 + $0x1510] ss:$28 sps:$4 sm:$0xff]   ;;  %v16721_v31 = vld [vmem:[#allocation8 + $0x169c] ss:$28 sps:$4 sm:$0xff]   ;;  %v16785_v35 = vld [vmem:[%s18032_s5 + $0x3ac] ss:$12 sps:$4 sm:$0xff]  }
 0x60e   :  { %10733 = vmatpush1.bf16.msra.mxu1 %v16680_v15  ;;  %v16780_v15 = vld [vmem:[%s18032_s5 + $0x390] ss:$12 sps:$4 sm:$0xff]   ;;  %v16723_v62 = vld [vmem:[%s18032_s5 + $0x8] ss:$12 sps:$4 sm:$0xff]  }
 0x60f   :  { %12291 = vmatpush1.bf16.msra.mxu0 %v16683_v32  ;;  %10734 = vmatprep.subr.bf16.mxu1 %v16688_v41  ;;  %v16719_v19 = vld [vmem:[#allocation8 + $0x1698] ss:$28 sps:$4 sm:$0xff]   ;;  %v16722_v32 = vld [vmem:[%s18032_s5 + $0xc8] ss:$12 sps:$4 sm:$0xff]  }
 0x610   :  { %12292 = vmatprep.subr.bf16.mxu0 %v16691_v60  ;;  %v16783_v41 = vld [vmem:[%s18032_s5 + $0x3a8] ss:$12 sps:$4 sm:$0xff]   ;;  %v16724_v60 = vld [vmem:[%s18032_s5 + $0xe0] ss:$12 sps:$4 sm:$0xff]  }
 0x612   :  { %10735 = vmatpush1.bf16.msra.mxu1 %v16686_v63  ;;  %v16791_v63 = vld [vmem:[%s18032_s5 + $0x3dc] ss:$12 sps:$4 sm:$0xff]  }
 0x613   :  { %12293 = vmatpush1.bf16.msra.mxu0 %v16689_v28  ;;  %10736 = vmatprep.subr.bf16.mxu1 %v16694_v9  ;;  %v16725_v28 = vld [vmem:[%s18032_s5 + $0x20] ss:$12 sps:$4 sm:$0xff]   ;;  %v16726_v9 = vld [vmem:[%s18032_s5 + $0xf8] ss:$12 sps:$4 sm:$0xff]  }
 0x614   :  { %12303 = vmatprep.subr.bf16.mxu0 %v16764_v58  ;;  %v16800_v58 = vld [vmem:[%s18032_s5 + $0x424] ss:$12 sps:$4 sm:$0xff]  }
 0x616   :  { %10737 = vmatpush1.bf16.msra.mxu1 %v16692_v45  ;;  %12295 = vmatmul.mubr.bf16.vlgmr.msra.gmra.mrb[52].mxu0 %v17666_v7  ;;  %v16728_v45 = vld [vmem:[%s18032_s5 + $0x110] ss:$12 sps:$4 sm:$0xff]  }
 0x617   :  { %10738 = vmatprep.subr.bf16.mxu1 %v16697_v38  ;;  %12304 = vmatpush1.bf16.msra.mxu0 %v16762_v24  ;;  %v16792_v38 = vld [vmem:[%s18032_s5 + $0x3f0] ss:$12 sps:$4 sm:$0xff]  }
 0x618   :  { %12305 = vmatprep.subr.bf16.mxu0 %v16767_v61  ;;  %v16731_v61 = vld [vmem:[%s18032_s5 + $0x68] ss:$12 sps:$4 sm:$0xff]  }
 0x61a   :  { %10739 = vmatpush1.bf16.msra.mxu1 %v16695_v51  ;;  %v16797_v51 = vld [vmem:[%s18032_s5 + $0x40c] ss:$12 sps:$4 sm:$0xff]  }
 0x61b   :  { %10749 = vmatprep.subr.bf16.mxu1 %v16700_v53  ;;  %v16729_v53 = vld [vmem:[%s18032_s5 + $0x50] ss:$12 sps:$4 sm:$0xff]  }
 0x61d   :  { %10741 = vmatmul.mubr.bf16.vlgmr.msra.gmra.mrb[24].mxu1 %v17387_v52  ;;  %v16765_v52 = vld [vmem:[%s18032_s5 + $0x318] ss:$12 sps:$4 sm:$0xff]  }
 0x61e   :  { %10750 = vmatpush1.bf16.msra.mxu1 %v16698_v55  ;;  %10781 = vmatprep.mubr.bf16.mxu1 %v17029_v42  ;;  %v16730_v55 = vld [vmem:[%s18032_s5 + $0x128] ss:$12 sps:$4 sm:$0xff]  }
 0x61f   :  { %10751 = vmatprep.subr.bf16.mxu1 %v16703_v56  ;;  %12306 = vmatpush1.bf16.msra.mxu0 %v16765_v52  ;;  %v16795_v56 = vld [vmem:[%s18032_s5 + $0x408] ss:$12 sps:$4 sm:$0xff]  }
 0x620   :  { %12307 = vmatprep.subr.bf16.mxu0 %v16770_v0  ;;  %v16732_v0 = vld [vmem:[%s18032_s5 + $0x140] ss:$12 sps:$4 sm:$0xff]  }
 0x622   :  { %10752 = vmatpush1.bf16.msra.mxu1 %v16701_v13 }
 0x623   :  { %10753 = vmatprep.subr.bf16.mxu1 %v16706_v16  ;;  %12308 = vmatpush1.bf16.msra.mxu0 %v16768_v39 }
 0x624   :  { %12309 = vmatprep.subr.bf16.mxu0 %v16773_v57  ;;  %v16803_v57 = vld [vmem:[%s18032_s5 + $0x43c] ss:$12 sps:$4 sm:$0xff]  }
 0x626   :  { %10754 = vmatpush1.bf16.msra.mxu1 %v16704_v12 }
 0x627   :  { %10755 = vmatprep.subr.bf16.mxu1 %v16709_v2  ;;  %12310 = vmatpush1.bf16.msra.mxu0 %v16771_v10  ;;  %v16798_v2 = vld [vmem:[%s18032_s5 + $0x420] ss:$12 sps:$4 sm:$0xff]   ;;  %v16801_v10 = vld [vmem:[%s18032_s5 + $0x438] ss:$12 sps:$4 sm:$0xff]  }
 0x628   :  { %12311 = vmatprep.subr.bf16.mxu0 %v16776_v54  ;;  %v16736_v54 = vld [vmem:[%s18032_s5 + $0x170] ss:$12 sps:$4 sm:$0xff]  }
 0x629   :  { %v14304_v5 = vpop.f32.mrb[40].mxu0 }
 0x62a   :  { %10756 = vmatpush1.bf16.msra.mxu1 %v16707_v44  ;;  %v14305_v29 = vpop.f32.mrb[41].mxu0  ;;  %v16733_v44 = vld [vmem:[%s18032_s5 + $0x80] ss:$12 sps:$4 sm:$0xff]  }
 0x62b   :  { %v14306_v17 = vadd.f32 %v14305_v29, %v14304_v5  ;;  %v14307_v4 = vpop.f32.mrb[42].mxu0  ;;  %10757 = vmatprep.subr.bf16.mxu1 %v16712_v6  ;;  %12312 = vmatpush1.bf16.msra.mxu0 %v16774_v18  ;;  %v16734_v6 = vld [vmem:[%s18032_s5 + $0x158] ss:$12 sps:$4 sm:$0xff]   ;;  %v16737_v29 = vld [vmem:[%s18032_s5 + $0xb0] ss:$12 sps:$4 sm:$0xff]  }
 0x62c   :  { %v14308_v3 = vpop.f32.mrb[43].mxu0  ;;  %12313 = vmatprep.subr.bf16.mxu0 %v16779_v23  ;;  %v16735_v5 = vld [vmem:[%s18032_s5 + $0x98] ss:$12 sps:$4 sm:$0xff]   ;;  %v16740_v4 = vld [vmem:[%s18032_s5 + $0x260] ss:$12 sps:$4 sm:$0xff]  }
 0x62d   :  { %v17702_v22 = vadd.f32 %v14306_v17, %v17661_v20  ;;  %v16786_v20 = vld [vmem:[%s18032_s5 + $0x3c0] ss:$12 sps:$4 sm:$0xff]   ;;  %v16739_v17 = vld [vmem:[%s18032_s5 + $0x188] ss:$12 sps:$4 sm:$0xff]   ;;  %v16742_v3 = vld [vmem:[%s18032_s5 + $0x278] ss:$12 sps:$4 sm:$0xff]  }
 0x62e   :  { %10758 = vmatpush1.bf16.msra.mxu1 %v16710_v25  ;;  %v16738_v25 = vld [vmem:[%s18032_s5 + $0x248] ss:$12 sps:$4 sm:$0xff]   ;;  %v16743_v18 = vld [vmem:[%s18032_s5 + $0x1b8] ss:$12 sps:$4 sm:$0xff]  }
 0x62f   :  { %10759 = vmatprep.subr.bf16.mxu1 %v16715_v36  ;;  %12314 = vmatpush1.bf16.msra.mxu0 %v16777_v26  ;;  %v16741_v36 = vld [vmem:[%s18032_s5 + $0x1a0] ss:$12 sps:$4 sm:$0xff]   ;;  %v16747_v26 = vld [vmem:[%s18032_s5 + $0x1e8] ss:$12 sps:$4 sm:$0xff]  }
 0x630   :  { %12315 = vmatprep.subr.bf16.mxu0 %v16782_v21 }
 0x632   :  { %10760 = vmatpush1.bf16.msra.mxu1 %v16713_v40 }
 0x633   :  { %10761 = vmatprep.subr.bf16.mxu1 %v16718_v48  ;;  %12316 = vmatpush1.bf16.msra.mxu0 %v16780_v15  ;;  %v16749_v15 = vld [vmem:[%s18032_s5 + $0x200] ss:$12 sps:$4 sm:$0xff]  }
 0x634   :  { %12317 = vmatprep.subr.bf16.mxu0 %v16785_v35  ;;  %v16750_v35 = vld [vmem:[%s18032_s5 + $0x2d8] ss:$12 sps:$4 sm:$0xff]  }
 0x636   :  { %10762 = vmatpush1.bf16.msra.mxu1 %v16716_v30  ;;  %v16748_v30 = vld [vmem:[%s18032_s5 + $0x2c0] ss:$12 sps:$4 sm:$0xff]  }
 0x637   :  { %10763 = vmatprep.subr.bf16.mxu1 %v16721_v31  ;;  %12318 = vmatpush1.bf16.msra.mxu0 %v16783_v41  ;;  %v16753_v41 = vld [vmem:[%s18032_s5 + $0x230] ss:$12 sps:$4 sm:$0xff]  }
 0x638   :  { %12319 = vmatprep.subr.bf16.mxu0 %v16788_v59  ;;  %v16754_v59 = vld [vmem:[%s18032_s5 + $0x488] ss:$12 sps:$4 sm:$0xff]  }
 0x63a   :  { %10764 = vmatpush1.bf16.msra.mxu1 %v16719_v19  ;;  %v16751_v19 = vld [vmem:[%s18032_s5 + $0x218] ss:$12 sps:$4 sm:$0xff]  }
 0x63b   :  { %14341 = vmatprep.subr.bf16.mxu1 %v16722_v32  ;;  %12320 = vmatpush1.bf16.msra.mxu0 %v16786_v20  ;;  %v16752_v32 = vld [vmem:[%s18032_s5 + $0x2f0] ss:$12 sps:$4 sm:$0xff]   ;;  %v16758_v20 = vld [vmem:[%s18032_s5 + $0x4e8] ss:$12 sps:$4 sm:$0xff]  }
 0x63c   :  { %12321 = vmatprep.subr.bf16.mxu0 %v16791_v63  ;;  %v16759_v63 = vld [vmem:[%s18032_s5 + $0x500] ss:$12 sps:$4 sm:$0xff]  }
 0x63d   :  { %10782 = vmatmul.mubr.bf16.vlgmr.msra.gmra.mrb[24].mxu1 %v17394_v46  ;;  %v16789_v46 = vld [vmem:[%s18032_s5 + $0x3d8] ss:$12 sps:$4 sm:$0xff]  }
 0x63e   :  { %14342 = vmatpush3.bf16.msra.mxu1 %v16723_v62  ;;  %12417 = vmatprep.mubr.bf16.mxu1 %v17446_v27  ;;  %v16727_v27 = vld [vmem:[%s18032_s5 + $0x38] ss:$12 sps:$4 sm:$0xff]   ;;  %v16755_v62 = vld [vmem:[%s18032_s5 + $0x4a0] ss:$12 sps:$4 sm:$0xff]  }
 0x63f   :  { %14343 = vmatprep.subr.bf16.mxu1 %v16724_v60  ;;  %12322 = vmatpush1.bf16.msra.mxu0 %v16789_v46  ;;  %v16756_v60 = vld [vmem:[%s18032_s5 + $0x4b8] ss:$12 sps:$4 sm:$0xff]  }
 0x640   :  { %12323 = vmatprep.subr.bf16.mxu0 %v16794_v47  ;;  %v16760_v46 = vld [vmem:[%s18032_s5 + $0x518] ss:$12 sps:$4 sm:$0xff]  }
 0x641   :  { %v16809_v47 = vld [vmem:[%s18032_s5 + $0x46c] ss:$12 sps:$4 sm:$0xff]  }
 0x642   :  { %14344 = vmatpush3.bf16.msra.mxu1 %v16725_v28  ;;  %v16806_v28 = vld [vmem:[%s18032_s5 + $0x454] ss:$12 sps:$4 sm:$0xff]  }
 0x643   :  { %14345 = vmatprep.subr.bf16.mxu1 %v16726_v9  ;;  %12324 = vmatpush1.bf16.msra.mxu0 %v16792_v38  ;;  %v16804_v9 = vld [vmem:[%s18032_s5 + $0x450] ss:$12 sps:$4 sm:$0xff]  }
 0x644   :  { %12325 = vmatprep.subr.bf16.mxu0 %v16797_v51  ;;  %v16812_v38 = vld [vmem:[%s18032_s5 + $0x484] ss:$12 sps:$4 sm:$0xff]  }
 0x646   :  { %14346 = vmatpush3.bf16.msra.mxu1 %v16727_v27  ;;  %v16807_v27 = vld [vmem:[%s18032_s5 + $0x468] ss:$12 sps:$4 sm:$0xff]  }
 0x647   :  { %14347 = vmatprep.subr.bf16.mxu1 %v16728_v45  ;;  %12326 = vmatpush1.bf16.msra.mxu0 %v16795_v56  ;;  %v16761_v45 = vld [vmem:[%s18032_s5 + $0x530] ss:$12 sps:$4 sm:$0xff]  }
 0x648   :  { %12327 = vmatprep.subr.bf16.mxu0 %v16800_v58 }
 0x649   :  { %v14326_v24 = vpop.f32.mrb[44].mxu0 }
 0x64a   :  { %v14327_v13 = vpop.f32.mrb[45].mxu0  ;;  %14348 = vmatpush3.bf16.msra.mxu1 %v16729_v53 }
 0x64b   :  { %v14328_v16 = vadd.f32 %v14327_v13, %v14326_v24  ;;  %v14329_v52 = vpop.f32.mrb[46].mxu0  ;;  %14349 = vmatprep.subr.bf16.mxu1 %v16730_v55  ;;  %12328 = vmatpush1.bf16.msra.mxu0 %v16798_v2  ;;  %v16853_v55 = vld [vmem:[#allocation10] sm:$0xff] }
 0x64c   :  { %v14330_v12 = vpop.f32.mrb[47].mxu0  ;;  %12329 = vmatprep.subr.bf16.mxu0 %v16803_v57  ;;  %v6169_v56 = vrot.slane %v16853_v55, %v17332_v34  ;;  %v6173_v24 = vrot.slane %v16853_v55, %v865_v50  ;;  %v16813_v50 = vld [vmem:[%s18032_s5 + $0x498] ss:$12 sps:$4 sm:$0xff]   ;;  %v16818_v34 = vld [vmem:[%s18032_s5 + $0x4b4] ss:$12 sps:$4 sm:$0xff]  }
 0x64d   :  { %v11025_v39 = vadd.f32 %v14328_v16, %v17702_v22  ;;  %v16746_v22 = vld [vmem:[%s18032_s5 + $0x2a8] ss:$12 sps:$4 sm:$0xff]  }
 0x64e   :  { %14350 = vmatpush3.bf16.msra.mxu1 %v16731_v61 }
 0x64f   :  { %14351 = vmatprep.subr.bf16.mxu1 %v16732_v0  ;;  %12330 = vmatpush1.bf16.msra.mxu0 %v16801_v10  ;;  %v16824_v10 = vld [vmem:[%s18032_s5 + $0x4e4] ss:$12 sps:$4 sm:$0xff]  }
 0x650   :  { %12331 = vmatprep.subr.bf16.mxu0 %v16806_v28 }
 0x652   :  { %14352 = vmatpush3.bf16.msra.mxu1 %v16733_v44  ;;  %v16816_v44 = vld [vmem:[%s18032_s5 + $0x4b0] ss:$12 sps:$4 sm:$0xff]  }
 0x653   :  { %14353 = vmatprep.subr.bf16.mxu1 %v16734_v6  ;;  %12332 = vmatpush1.bf16.msra.mxu0 %v16804_v9  ;;  %v16821_v6 = vld [vmem:[%s18032_s5 + $0x4cc] ss:$12 sps:$4 sm:$0xff]  }
 0x654   :  { %12333 = vmatprep.subr.bf16.mxu0 %v16809_v47 }
 0x656   :  { %14354 = vmatpush3.bf16.msra.mxu1 %v16735_v5  ;;  %v16822_v5 = vld [vmem:[%s18032_s5 + $0x4e0] ss:$12 sps:$4 sm:$0xff]  }
 0x657   :  { %14355 = vmatprep.subr.bf16.mxu1 %v16736_v54  ;;  %12334 = vmatpush1.bf16.msra.mxu0 %v16807_v27  ;;  %v16827_v54 = vld [vmem:[%s18032_s5 + $0x4fc] ss:$12 sps:$4 sm:$0xff]  }
 0x658   :  { %12344 = vmatprep.subr.bf16.mxu0 %v16812_v38 }
 0x65a   :  { %14356 = vmatpush3.bf16.msra.mxu1 %v16737_v29  ;;  %v16825_v29 = vld [vmem:[%s18032_s5 + $0x4f8] ss:$12 sps:$4 sm:$0xff]  }
 0x65b   :  { %14363 = vmatprep.subr.bf16.mxu1 %v16738_v25  ;;  %v16830_v25 = vld [vmem:[%s18032_s5 + $0x514] ss:$12 sps:$4 sm:$0xff]  }
 0x65d   :  { %12418 = vmatmul.mubr.bf16.vlgmr.msra.gmra.mrb[28].mxu1 %v17559_v11  ;;  %v16744_v11 = vld [vmem:[%s18032_s5 + $0x290] ss:$12 sps:$4 sm:$0xff]  }
 0x65e   :  { %14364 = vmatpush3.bf16.msra.mxu1 %v16739_v17  ;;  %12457 = vmatprep.mubr.bf16.mxu1 %v17564_v14  ;;  %v16745_v14 = vld [vmem:[%s18032_s5 + $0x1d0] ss:$12 sps:$4 sm:$0xff]  }
 0x65f   :  { %14365 = vmatprep.subr.bf16.mxu1 %v16740_v4  ;;  %v16828_v17 = vld [vmem:[%s18032_s5 + $0x510] ss:$12 sps:$4 sm:$0xff]   ;;  %v16833_v4 = vld [vmem:[%s18032_s5 + $0x52c] ss:$12 sps:$4 sm:$0xff]  }
 0x662   :  { %14366 = vmatpush3.bf16.msra.mxu1 %v16741_v36 }
 0x663   :  { %14367 = vmatprep.subr.bf16.mxu1 %v16742_v3 }
 0x666   :  { %14368 = vmatpush3.bf16.msra.mxu1 %v16743_v18 }
 0x667   :  { %14369 = vmatprep.subr.bf16.mxu1 %v16744_v11 }
 0x669   :  { %v11064_v23 = vpop.f32.mrb[48].mxu0 }
 0x66a   :  { %v11065_v40 = vadd.f32 %v11064_v23, %v11025_v39  ;;  %v14440_v48 = vpop.f32.mrb[49].mxu0  ;;  %14370 = vmatpush3.bf16.msra.mxu1 %v16745_v14  ;;  %v16831_v14 = vld [vmem:[%s18032_s5 + $0x528] ss:$12 sps:$4 sm:$0xff]  }
 0x66b   :  { %v11067_v21 = vpop.f32.mrb[50].mxu0  ;;  %14371 = vmatprep.subr.bf16.mxu1 %v16746_v22  ;;  %v16834_v23 = vld [vmem:[%s18032_s5 + $0x3c8] ss:$12 sps:$4 sm:$0xff]   ;;  %v16836_v48 = vld [vmem:[%s18032_s5 + $0x3e0] ss:$12 sps:$4 sm:$0xff]  }
 0x66c   :  { %v14441_v31 = vpop.f32.mrb[51].mxu0  ;;  %v11076_v51 = vmax.f32 %v11065_v40, 0.0  ;;  %v16835_v40 = vld [vmem:[%s18032_s5 + $0x308] ss:$12 sps:$4 sm:$0xff]   ;;  %v16838_v21 = vld [vmem:[%s18032_s5 + $0x3f8] ss:$12 sps:$4 sm:$0xff]  }
 0x66d   :  { %v16840_v31 = vld [vmem:[%s18032_s5 + $0x410] ss:$12 sps:$4 sm:$0xff]  }
 0x66e   :  { %14372 = vmatpush3.bf16.msra.mxu1 %v16747_v26  ;;  %v11083_v53 = vpack.c.bf16 %v11076_v51, %v11076_v51  ;;  %v16837_v26 = vld [vmem:[%s18032_s5 + $0x320] ss:$12 sps:$4 sm:$0xff]  }
 0x66f   :  { %14373 = vmatprep.subr.bf16.mxu1 %v16748_v30  ;;  %v16839_v30 = vld [vmem:[%s18032_s5 + $0x338] ss:$12 sps:$4 sm:$0xff]  }
 0x672   :  { %14374 = vmatpush3.bf16.msra.mxu1 %v16749_v15  ;;  %v16841_v15 = vld [vmem:[%s18032_s5 + $0x350] ss:$12 sps:$4 sm:$0xff]  }
 0x673   :  { %14375 = vmatprep.subr.bf16.mxu1 %v16750_v35  ;;  %v16842_v35 = vld [vmem:[%s18032_s5 + $0x428] ss:$12 sps:$4 sm:$0xff]  }
 0x676   :  { %14376 = vmatpush3.bf16.msra.mxu1 %v16751_v19  ;;  %v16843_v19 = vld [vmem:[%s18032_s5 + $0x368] ss:$12 sps:$4 sm:$0xff]  }
 0x677   :  { %14377 = vmatprep.subr.bf16.mxu1 %v16752_v32  ;;  %v16844_v32 = vld [vmem:[%s18032_s5 + $0x440] ss:$12 sps:$4 sm:$0xff]  }
 0x67a   :  { %14378 = vmatpush3.bf16.msra.mxu1 %v16753_v41  ;;  %v16845_v41 = vld [vmem:[%s18032_s5 + $0x380] ss:$12 sps:$4 sm:$0xff]  }
 0x67b   :  { %14442 = vmatprep.subr.bf16.mxu1 %v17030_v8 }
 0x67d   :  { %12458 = vmatmul.mubr.bf16.vlgmr.msra.gmra.mrb[32].mxu1 %v17666_v7  ;;  %v16757_v7 = vld [vmem:[%s18032_s5 + $0x4d0] ss:$12 sps:$4 sm:$0xff]  }
 0x67e   :  { %14443 = vmatpush3.bf16.msra.mxu1 %v16754_v59  ;;  %14458 = vmatprep.mubr.msk.bf16.mxu1 %vm17031_vm1, %v17030_v8  ;;  %v11308_v59 = vld [vmem:[#allocation11] sm:$0x7] }
 0x67f   :  { %14444 = vmatprep.subr.bf16.mxu1 %v17030_v8 }
 0x682   :  { %14445 = vmatpush3.bf16.msra.mxu1 %v16755_v62  ;;  %v16846_v62 = vld [vmem:[%s18032_s5 + $0x458] ss:$12 sps:$4 sm:$0xff]  }
 0x683   :  { %14446 = vmatprep.subr.bf16.mxu1 %v17030_v8 }
 0x686   :  { %14447 = vmatpush3.bf16.msra.mxu1 %v16756_v60  ;;  %v11321_v60 = vrot.slane %v11308_v59, %v17299_v33  ;;  %v16849_v33 = vld [vmem:[%s18032_s5 + $0x3b0] ss:$12 sps:$4 sm:$0xff]  }
 0x687   :  { %14448 = vmatprep.subr.bf16.mxu1 %v17030_v8 }
 0x68a   :  { %14449 = vmatpush3.bf16.msra.mxu1 %v16757_v7  ;;  %v16847_v7 = vld [vmem:[%s18032_s5 + $0x398] ss:$12 sps:$4 sm:$0xff]  }
 0x68b   :  { %14450 = vmatprep.subr.bf16.mxu1 %v17030_v8 }
 0x68e   :  { %14451 = vmatpush3.bf16.msra.mxu1 %v16758_v20  ;;  %v16848_v20 = vld [vmem:[%s18032_s5 + $0x470] ss:$12 sps:$4 sm:$0xff]  }
 0x68f   :  { %14452 = vmatprep.subr.bf16.mxu1 %v17030_v8 }
 0x692   :  { %14453 = vmatpush3.bf16.msra.mxu1 %v16759_v63 }
 0x693   :  { %14454 = vmatprep.subr.bf16.mxu1 %v17030_v8 }
 0x696   :  { %14455 = vmatpush3.bf16.msra.mxu1 %v16760_v46 }
 0x697   :  { %14456 = vmatprep.subr.bf16.mxu1 %v17030_v8  ;;  %v16810_v8 = vld [vmem:[%s18032_s5 + $0x480] ss:$12 sps:$4 sm:$0xff]  }
 0x69a   :  { %14457 = vmatpush3.bf16.msra.mxu1 %v16761_v45 }
 0x69d   :  { %14459 = vmatmul.mubr.bf16.vlgmr.msra.gmra.mrb[36].mxu1 %v11083_v53 }
 0x710   :  { %v10783_v58 = vpop.f32.mrb[24].mxu1 }
 0x711   :  { %v14478_v13 = vadd.f32 %v10783_v58, %v6169_v56  ;;  %v10785_v61 = vpop.f32.mrb[25].mxu1  ;;  %v11313_v56 = vrot.slane %v11308_v59, %v17279_v37 }
 0x712   :  { %v14479_v16 = vadd.f32 %v10785_v61, %v6173_v24  ;;  %v10787_v52 = vpop.f32.mrb[26].mxu1  ;;  %v11317_v24 = vrot.slane %v11308_v59, %v17260_v1 }
 0x713   :  { %v11074_v0 = vmax.f32 %v14478_v13, 0.0  ;;  %v10788_v12 = vpop.f32.mrb[27].mxu1 }
 0x714   :  { %v11075_v2 = vmax.f32 %v14479_v16, 0.0 }
 0x715   :  { %v17915_v57 = vpack.c.bf16 %v11074_v0, %v11074_v0 }
 0x716   :  { %v11082_v39 = vpack.c.bf16 %v11075_v2, %v11075_v2 }
 0x718   :  { %12335 = vmatprep.mubr.bf16.mxu0 %v11082_v39 }
 0x719   :  { %12336 = vmatmul.mubr.bf16.vlgmr.msra.gmra.mrb[52].mxu0 %v17915_v57 }
 0x71a   :  { %12345 = vmatpush1.bf16.msra.mxu0 %v16810_v8  ;;  %12376 = vmatprep.mubr.bf16.mxu0 %v17029_v42  ;;  %v16819_v42 = vld [vmem:[%s18032_s5 + $0x4c8] ss:$12 sps:$4 sm:$0xff]   ;;  %s17032_s5 = smov [#allocation13]  }
 0x71b   :  { %12346 = vmatprep.subr.bf16.mxu0 %v16815_v43  ;;  %s12580_s16 = sshll.u32 %s17032_s5, 4  ;;  %s12581_s16 = int_to_ptr.vmem [resolvable:$true] %s12580_s16 }
 0x71c   :  { %s16986_s17 = scalar_lea.vmem %s12581_s16, 96  ;;  %p16991_p7 = scmp.lt.s32.totalorder %s12581_s16, %s12581_s16 }
 0x71d   :  { %p16987_p6 = scmp.ne.s32.totalorder %s12581_s16, %s16986_s17  ;;  %p16992_p8 = scmp.lt.s32.totalorder %s16986_s17, %s16986_s17 }
 0x71e   :  { %12347 = vmatpush1.bf16.msra.mxu0 %v16813_v50 }
 0x71f   :  { %12348 = vmatprep.subr.bf16.mxu0 %v16818_v34  ;;  %p16993_p9 = por %p16992_p8, %p16991_p7 }
 0x721   :  { %p16994_p10 = pnand %p16993_p9, %p16987_p6 }
 0x722   :  { %12349 = vmatpush1.bf16.msra.mxu0 %v16816_v44 }
 0x723   :  { %12350 = vmatprep.subr.bf16.mxu0 %v16821_v6 }
 0x726   :  { %12351 = vmatpush1.bf16.msra.mxu0 %v16819_v42 }
 0x727   :  { %12352 = vmatprep.subr.bf16.mxu0 %v16824_v10 }
 0x72a   :  { %12353 = vmatpush1.bf16.msra.mxu0 %v16822_v5 }
 0x72b   :  { %12354 = vmatprep.subr.bf16.mxu0 %v16827_v54 }
 0x72e   :  { %12355 = vmatpush1.bf16.msra.mxu0 %v16825_v29 }
 0x72f   :  { %12356 = vmatprep.subr.bf16.mxu0 %v16830_v25 }
 0x730   :  { %v14357_v36 = vpop.f32.mrb[28].mxu1 }
 0x731   :  { %v14358_v3 = vpop.f32.mrb[29].mxu1 }
 0x732   :  { %12357 = vmatpush1.bf16.msra.mxu0 %v16828_v17  ;;  %v14359_v18 = vadd.f32 %v14358_v3, %v14357_v36  ;;  %v14360_v11 = vpop.f32.mrb[30].mxu1 }
 0x733   :  { %v14361_v22 = vpop.f32.mrb[31].mxu1  ;;  %12358 = vmatprep.subr.bf16.mxu0 %v16833_v4 }
 0x734   :  { %v12420_v9 = vadd.f32 %v14359_v18, %v11321_v60 }
 0x736   :  { %12359 = vmatpush1.bf16.msra.mxu0 %v16831_v14 }
 0x737   :  { %14385 = vmatprep.subr.bf16.mxu0 %v16834_v23 }
 0x739   :  { %12377 = vmatmul.mubr.bf16.vlgmr.msra.gmra.mrb[52].mxu0 %v11083_v53 }
 0x73a   :  { %14386 = vmatpush3.bf16.msra.mxu0 %v16835_v40  ;;  %12497 = vmatprep.mubr.bf16.mxu0 %v11082_v39 }
 0x73b   :  { %14387 = vmatprep.subr.bf16.mxu0 %v16836_v48 }
 0x73e   :  { %14388 = vmatpush3.bf16.msra.mxu0 %v16837_v26 }
 0x73f   :  { %14389 = vmatprep.subr.bf16.mxu0 %v16838_v21 }
 0x742   :  { %14390 = vmatpush3.bf16.msra.mxu0 %v16839_v30 }
 0x743   :  { %14391 = vmatprep.subr.bf16.mxu0 %v16840_v31 }
 0x746   :  { %14392 = vmatpush3.bf16.msra.mxu0 %v16841_v15 }
 0x747   :  { %14393 = vmatprep.subr.bf16.mxu0 %v16842_v35 }
 0x74a   :  { %14394 = vmatpush3.bf16.msra.mxu0 %v16843_v19 }
 0x74b   :  { %14395 = vmatprep.subr.bf16.mxu0 %v16844_v32 }
 0x74e   :  { %14396 = vmatpush3.bf16.msra.mxu0 %v16845_v41 }
 0x74f   :  { %14397 = vmatprep.subr.bf16.mxu0 %v16846_v62 }
 0x750   :  { %v14379_v63 = vpop.f32.mrb[32].mxu1 }
 0x751   :  { %v14380_v28 = vpop.f32.mrb[33].mxu1 }
 0x752   :  { %v14381_v46 = vadd.f32 %v14380_v28, %v14379_v63  ;;  %14398 = vmatpush3.bf16.msra.mxu0 %v16847_v7  ;;  %v14382_v47 = vpop.f32.mrb[34].mxu1 }
 0x753   :  { %v14383_v27 = vpop.f32.mrb[35].mxu1  ;;  %14399 = vmatprep.subr.bf16.mxu0 %v16848_v20 }
 0x754   :  { %v12460_v45 = vadd.f32 %v14381_v46, %v12420_v9 }
 0x756   :  { %14400 = vmatpush3.bf16.msra.mxu0 %v16849_v33 }
 0x759   :  { %12498 = vmatmul.mubr.bf16.vlgmr.msra.gmra.mrb[56].mxu0 %v17915_v57 }
 0x770   :  { %v12539_v38 = vpop.f32.mrb[36].mxu1 }
 0x771   :  { %v14460_v51 = vpop.f32.mrb[37].mxu1 }
 0x772   :  { %v12542_v53 = vpop.f32.mrb[38].mxu1 }
 0x773   :  { %v14461_v55 = vpop.f32.mrb[39].mxu1 }
 0x80c   :  { %v12378_v58 = vpop.f32.mrb[52].mxu0 }
 0x80d   :  { %v14480_v13 = vadd.f32 %v12378_v58, %v11313_v56  ;;  %v12380_v61 = vpop.f32.mrb[53].mxu0 }
 0x80e   :  { %v14481_v16 = vadd.f32 %v12380_v61, %v11317_v24  ;;  %v12382_v52 = vpop.f32.mrb[54].mxu0 }
 0x80f   :  { %v12545_v0 = vmax.f32 %v14480_v13, 0.0  ;;  %v12383_v12 = vpop.f32.mrb[55].mxu0 }
 0x810   :  { %v12546_v2 = vmax.f32 %v14481_v16, 0.0 }
 0x812   :  { %v12551_v39 = vcombine.low %v12545_v0, %v12546_v2 }
 0x814   :  { %v12558_v1 = vrot.slane %v12551_v39, %v17148_v49 }
 0x82c   :  { %v14401_v8 = vpop.f32.mrb[56].mxu0 }
 0x82d   :  { %v14402_v43 = vpop.f32.mrb[57].mxu0 }
 0x82e   :  { %v14403_v57 = vadd.f32 %v14402_v43, %v14401_v8  ;;  %v14404_v50 = vpop.f32.mrb[58].mxu0 }
 0x82f   :  { %v14405_v34 = vpop.f32.mrb[59].mxu0 }
 0x830   :  { %v12500_v44 = vadd.f32 %v14403_v57, %v12460_v45 }
 0x832   :  { %v12540_v37 = vadd.f32 %v12539_v38, %v12500_v44 }
 0x834   :  { %v12547_v6 = vmax.f32 %v12540_v37, 0.0 }
 0x836   :  { %v12565_v42 = vrot.slane %v12547_v6, %v17148_v49 }
 0x838   :  { %v12566_v10 = vcombine.low %v12558_v1, %v12565_v42 }
 0x83a   :  { %12573 = vst.msk [vmem:[#allocation13] sm:$0x3f] %vm12572_vm6, %v12566_v10 }
 0x83b   :  { %16997 = shalt.err (!%p16994_p10)
}
 0x83c   :  { %s16998_s20 = scalar_lea.hbm %s18034_s7, 96 }
 0x83d   :  { %p16999_p11 = scmp.ne.s32.totalorder %s18034_s7, %s16998_s20  ;;  %p17002_p12 = scmp.lt.u32.totalorder %s16998_s20, %s18034_s7 }
 0x83f   :  { %p17004_p13 = pnand %p17002_p12, %p16999_p11 }
 0x841   :  { %17007 = shalt.err (!%p17004_p13)
}
 0x842   :  { %12583 = dma.vmem_to_hbm [thread:$0]  %s12581_s16, 96, %s18034_s7, [#allocation4]  }
 0x843   :  { %17016 = dma.done.wait [#allocation4], 96  }
 0x844   :  { %17017 = vsyncadd [#allocation4], 4294967200 }
 0x845   :  { %12587 = vsyncpa [#allocation3], 1 }
 0x846   :  { %12588 = vsyncpa [#allocation6], 1 }
 0x847   :  { %12589 = vsyncpa [#allocation9], 1 }
 0x848   :  { %12590 = vsyncpa [#allocation12], 1 }
 0x849   :  { %12591 = vsyncpa [#allocation4], 1 }

</bundles_post_ra>
